<compile_context>
chip_gen: v7x
topology: tpu7x:2x2x1
jax: 0.10.0
libtpu: 0.0.40
codegen_flags: <defaults>
</compile_context>

<pallas_src>
import math

import jax
import jax.numpy as jnp
from jax import lax
from jax.experimental import pallas as pl
from jax.experimental.pallas import tpu as pltpu

# ------------------------------ configuration -------------------------------
BATCH            = 2
STATE_DIM        = 16          # config.state_dim
N_EMBD           = 32          # configT.n_embd ("C")
N_EMBDS          = 32          # configS.n_embd
N_HEAD           = 4
HEAD_DIM         = N_EMBD // N_HEAD
BLOCK_SIZE       = 16          # T_k
BLOCK_SIZE_STATE = 8           # T_q
N_LAYER          = 1           # attlayer
INIT_GRU_BIAS    = 2.0
LN_EPS           = 1e-5
NEG_INF          = -1e30       # batch-isolation value folded into the biases

assert N_EMBD == N_EMBDS, "spatial attn-bias broadcast requires n_embdS == n_embd"
assert N_EMBD % N_HEAD == 0

TA = (((0,), (0,)), ((), ()))  # contract dim0 x dim0   (A^T @ B)
TB = (((1,), (1,)), ((), ()))  # contract dim1 x dim1   (A @ B^T)


# --------------------------- weight-slab layout ------------------------------
def _branch32(pre, d):
    return [(pre + 'wq', d), (pre + 'wp', d), (pre + 'g1_uh', d), (pre + 'g2_uh', d),
            (pre + 'mlp_w2', 2 * d),
            (pre + 'ln1_g', 1), (pre + 'ln1_b', 1), (pre + 'ln2_g', 1), (pre + 'ln2_b', 1),
            (pre + 'bq', 1), (pre + 'bp', 1), (pre + 'mlp_b2', 1),
            (pre + 'g1_bz', 1), (pre + 'g2_bz', 1)]


def _branch64(pre, d):
    return [(pre + 'wkv', d), (pre + 'g1_urz', d), (pre + 'g2_urz', d), (pre + 'mlp_w1', d),
            (pre + 'bkv', 1), (pre + 'mlp_b1', 1)]


def _branch96(pre, d):
    return [(pre + 'g1_wrzh', d), (pre + 'g2_wrzh', d)]


_W32_ENTRIES = ([('tok_w', STATE_DIM),
                 ('pos_q2', BATCH * BLOCK_SIZE_STATE), ('pos_k2', BATCH * BLOCK_SIZE),
                 ('t2s_w', BLOCK_SIZE), ('t2sq_w', BLOCK_SIZE_STATE), ('s2t_wT', BLOCK_SIZE_STATE),
                 ('net1_w', N_EMBD),
                 ('tok_b', 1), ('lnf_g', 1), ('lnf_b', 1), ('net1_b', 1),
                 ('net2_wrow', 1), ('net2_b', 1), ('t2s_b', 1), ('t2sq_b', 1)]
                + _branch32('T_', N_EMBD) + _branch32('S_', N_EMBDS))
_W64_ENTRIES = _branch64('T_', N_EMBD) + _branch64('S_', N_EMBDS)
_W96_ENTRIES = _branch96('T_', N_EMBD) + _branch96('S_', N_EMBDS)


def _slab_layout(entries):
    off, rows = {}, 0
    for name, n in entries:
        off[name] = (rows, n)
        rows += -(-n // 8) * 8          # keep every entry 8-sublane aligned
    return off, rows


_W32_OFF, _W32_ROWS = _slab_layout(_W32_ENTRIES)
_W64_OFF, _W64_ROWS = _slab_layout(_W64_ENTRIES)
_W96_OFF, _W96_ROWS = _slab_layout(_W96_ENTRIES)


def _pack_slab(raw, entries, off, rows, width):
    slab = jnp.zeros((rows, width), jnp.float32)
    for name, n in entries:
        a = raw[name]
        r0, _ = off[name]
        slab = slab.at[r0:r0 + n, :a.shape[1]].set(a)
    return slab


def _take(ref, off, name):
    r0, n = off[name]
    return ref[r0:r0 + n, :]


# --------------------------- in-kernel math helpers --------------------------
def _dot(a, b):
    return jnp.dot(a, b, preferred_element_type=jnp.float32)


_GELU_C = math.sqrt(2.0 / math.pi)


def _gelu(x):
    # tanh-approximate GELU (EUP tanh; replaces the long erf-polynomial chain)
    return 0.5 * x * (1.0 + jnp.tanh(_GELU_C * (x + 0.044715 * x * x * x)))


def _layernorm(x, g, b):
    mu = jnp.mean(x, axis=-1, keepdims=True)
    xc = x - mu
    var = jnp.mean(xc * xc, axis=-1, keepdims=True)
    return xc * lax.rsqrt(var + LN_EPS) * g + b


def _mlp(x, w1, b1, w2, b2):
    return _dot(_gelu(_dot(x, w1) + b1), w2) + b2


def _gru_gate(h, x, w_rzh, u_rz, u_h, bz):
    d = h.shape[-1]
    xw = _dot(x, w_rzh)                       # (R, 3d): [r | z | h] pre-acts
    hu = _dot(h, u_rz)                        # (R, 2d): [r | z]
    r = jax.nn.sigmoid(xw[:, :d] + hu[:, :d])
    z = jax.nn.sigmoid(xw[:, d:2 * d] + hu[:, d:2 * d] - bz)
    h_new = jnp.tanh(xw[:, 2 * d:] + _dot(h * r, u_h))
    return (1.0 - z) * h + z * h_new


def _gtrxl_block(g32, g64, g96, pre, q, kv, bias_full, masks):
    """BlockGTrXL: ln1 -> attention -> GRU gate1 -> ln2 -> MLP -> GRU gate2.
    `bias_full` already contains the block-diagonal batch-isolation mask."""
    d = N_EMBD
    ln1_g, ln1_b = g32(pre + 'ln1_g'), g32(pre + 'ln1_b')
    qn = _layernorm(q, ln1_g, ln1_b)
    kn = _layernorm(kv, ln1_g, ln1_b)          # v == k in STT

    # attention: fused K|V projection, all heads via channel masks (lane-dense)
    qp = _dot(qn, g32(pre + 'wq')) + g32(pre + 'bq')            # (Rq, d)
    kvp = _dot(kn, g64(pre + 'wkv')) + g64(pre + 'bkv')         # (Rk, 2d)
    kp, vp = kvp[:, :d], kvp[:, d:]
    scale = 1.0 / math.sqrt(d // N_HEAD)
    ctx = jnp.zeros(qp.shape, jnp.float32)
    for m in masks:                            # static unroll over heads
        s = lax.dot_general(qp * m, kp, TB,
                            preferred_element_type=jnp.float32) * scale + bias_full
        e = jnp.exp(s - jnp.max(s, axis=-1, keepdims=True))
        p = e * pl.reciprocal(jnp.sum(e, axis=-1, keepdims=True), approx=True)
        ctx = ctx + _dot(p, vp * m)            # lands in this head's channels
    att = _dot(ctx, g32(pre + 'wp')) + g32(pre + 'bp')

    x = _gru_gate(q, att, g96(pre + 'g1_wrzh'), g64(pre + 'g1_urz'),
                  g32(pre + 'g1_uh'), g32(pre + 'g1_bz'))
    h = _mlp(_layernorm(x, g32(pre + 'ln2_g'), g32(pre + 'ln2_b')),
             g64(pre + 'mlp_w1'), g64(pre + 'mlp_b1'),
             g32(pre + 'mlp_w2'), g32(pre + 'mlp_b2'))
    return _gru_gate(x, h, g96(pre + 'g2_wrzh'), g64(pre + 'g2_urz'),
                     g32(pre + 'g2_uh'), g32(pre + 'g2_bz'))


# ------------------------------ fused kernel ---------------------------------
def _critic_kernel(state_ref, past_ref, w32_ref, w64_ref, w96_ref,
                   bias_t_ref, bias_s_ref, out_ref):
    g32 = lambda n: _take(w32_ref, _W32_OFF, n)
    g64 = lambda n: _take(w64_ref, _W64_OFF, n)
    g96 = lambda n: _take(w96_ref, _W96_OFF, n)
    C, TQ, TK = N_EMBD, BLOCK_SIZE_STATE, BLOCK_SIZE

    tok_w, tok_b = g32('tok_w'), g32('tok_b')
    # ---- token + positional embedding; both batch elements stacked on sublanes
    q0 = _dot(state_ref[...], tok_w) + tok_b + g32('pos_q2')       # (B*Tq, C)
    kv0 = _dot(past_ref[...], tok_w) + tok_b + g32('pos_k2')       # (B*Tk, C)

    # ---- per-head channel masks (heads batched into C-wide MXU matmuls) ------
    lane = lax.broadcasted_iota(jnp.int32, (1, C), 1)
    masks = [jnp.where((lane >= h * HEAD_DIM) & (lane < (h + 1) * HEAD_DIM), 1.0, 0.0)
             for h in range(N_HEAD)]

    # ---- temporal GTrXL branch (block-diag bias keeps the batches separate) --
    q2 = _gtrxl_block(g32, g64, g96, 'T_', q0, kv0, bias_t_ref[...], masks)

    # ---- temporal -> spatial: reference .transpose(1,2) folded into dot dims -
    t2sq_w, t2sq_b = g32('t2sq_w'), g32('t2sq_b')
    t2s_w, t2s_b = g32('t2s_w'), g32('t2s_b')
    qs_parts, ks_parts = [], []
    for b in range(BATCH):                     # static unroll, aligned slices
        q2_b = q2[b * TQ:(b + 1) * TQ, :]
        kv_b = kv0[b * TK:(b + 1) * TK, :]
        qs_parts.append(lax.dot_general(q2_b, t2sq_w, TA,
                                        preferred_element_type=jnp.float32) + t2sq_b)
        ks_parts.append(lax.dot_general(kv_b, t2s_w, TA,
                                        preferred_element_type=jnp.float32) + t2s_b)
    qS = jnp.concatenate(qs_parts, axis=0)     # (B*C, CS)
    kS = jnp.concatenate(ks_parts, axis=0)     # (B*C, CS)

    # ---- spatial GTrXL branch ------------------------------------------------
    q4 = _gtrxl_block(g32, g64, g96, 'S_', qS, kS, bias_s_ref[...], masks)

    # ---- spatial -> temporal, ln_f + time-mean, critic MLP head --------------
    s2t_wT = g32('s2t_wT')
    lnf_g, lnf_b = g32('lnf_g'), g32('lnf_b')
    net1_w, net1_b = g32('net1_w'), g32('net1_b')
    net2_wrow = g32('net2_wrow')
    net2_b = g32('net2_b')[:, 0:1]
    for b in range(BATCH):
        q4_b = q4[b * C:(b + 1) * C, :]
        qT_b = lax.dot_general(s2t_wT, q4_b, TB,
                               preferred_element_type=jnp.float32)   # (Tq, C)
        # transformS2T's per-time-row bias is omitted: it adds a constant across
        # the channel axis which the immediately following ln_f removes exactly.
        xm = jnp.mean(_layernorm(qT_b, lnf_g, lnf_b), axis=0, keepdims=True)  # (1, C)
        h1 = _gelu(_dot(xm, net1_w) + net1_b)                                 # (1, C)
        out_ref[b:b + 1, :] = jnp.sum(h1 * net2_wrow, axis=-1, keepdims=True) + net2_b


# ------------------------------ forward wrapper ------------------------------
def criticadv_forward(params, state, past_state, att_bias):
    """CriticAdvAtt.forward: value = net(STT(state, past_state, att_bias))."""
    enc, host, slabs = params['enc'], params['host'], params['slabs']
    TQ, TK, C = BLOCK_SIZE_STATE, BLOCK_SIZE, N_EMBD
    assert state.shape == (BATCH, TQ, STATE_DIM)
    assert past_state.shape == (BATCH, TK, STATE_DIM)

    # batch/head-invariant attention-bias math hoisted out of the kernel
    bias_s = jnp.einsum('qkc,c->qk', att_bias, enc['abS_w']) + enc['abS_b']       # (Tq, Tk)
    bias_t = jnp.einsum('qkc,k->qc', att_bias, enc['abT_w']) + enc['abT_b']       # (Tq, SD)
    bias_t = bias_t @ host['tok_w'] + host['tok_b']                                # (Tq, C)
    bias_sp = (jnp.einsum('ts,tc->sc', host['t2sq_w'], bias_t)
               + host['t2sq_b'].reshape(-1, 1))                                    # (CS, C)

    # fold the stacked-batch isolation mask into the pre-tiled biases
    bT = jnp.full((BATCH * TQ, BATCH * TK), NEG_INF, jnp.float32)
    bS = jnp.full((BATCH * C, BATCH * C), NEG_INF, jnp.float32)
    for b in range(BATCH):
        bT = bT.at[b * TQ:(b + 1) * TQ, b * TK:(b + 1) * TK].set(bias_s)
        bS = bS.at[b * C:(b + 1) * C, b * C:(b + 1) * C].set(bias_sp)

    state_stack = state.reshape(BATCH * TQ, STATE_DIM)
    past_stack = past_state.reshape(BATCH * TK, STATE_DIM)

    args = (state_stack, past_stack, slabs['w32'], slabs['w64'], slabs['w96'], bT, bS)
    full = lambda a: pl.BlockSpec(a.shape, lambda i: (0, 0))
    out = pl.pallas_call(
        _critic_kernel,
        out_shape=jax.ShapeDtypeStruct((BATCH, 1), jnp.float32),
        grid=(1,),                               # whole forward fused in one step
        in_specs=[full(a) for a in args],
        out_specs=pl.BlockSpec((BATCH, 1), lambda i: (0, 0)),
        compiler_params=pltpu.CompilerParams(dimension_semantics=("arbitrary",)),
    )(*args)
    return out


# ------------------------------ parameter init -------------------------------
def make_params(key):
    C, CS, TQ, TK, SD = N_EMBD, N_EMBDS, BLOCK_SIZE_STATE, BLOCK_SIZE, STATE_DIM
    keys = iter(jax.random.split(key, 128))

    def nrm(shape, scale):
        return scale * jax.random.normal(next(keys), shape, jnp.float32)

    def lin(din, dout):                      # nn.Linear stored in (in, out) layout
        return nrm((din, dout), 1.0 / math.sqrt(din)), nrm((1, dout), 0.02)

    def xavier(d1, d2):
        return nrm((d1, d2), math.sqrt(2.0 / (d1 + d2)))

    raw = {}
    raw['tok_w'], raw['tok_b'] = lin(SD, C)
    pos = nrm((TK, C), 0.02)                               # pos_emb[:, :block_size, :]
    raw['pos_q2'] = jnp.tile(pos[:TQ], (BATCH, 1))         # pre-tiled for stacked batch
    raw['pos_k2'] = jnp.tile(pos, (BATCH, 1))
    raw['lnf_g'] = jnp.ones((1, C), jnp.float32)
    raw['lnf_b'] = jnp.zeros((1, C), jnp.float32)
    raw['net1_w'], raw['net1_b'] = lin(C, C)               # CriticAdvAtt.net[0]
    w2, b2 = lin(C, 1)                                     # CriticAdvAtt.net[2]
    raw['net2_wrow'] = w2.reshape(1, C)
    raw['net2_b'] = b2                                     # (1, 1)
    raw['t2s_w'], raw['t2s_b'] = lin(TK, CS)               # transformT2S
    raw['t2sq_w'], raw['t2sq_b'] = lin(TQ, CS)             # transformT2S_q
    raw['s2t_wT'] = nrm((TQ, CS), 1.0 / math.sqrt(CS))     # transformS2T weight (out,in)
    # transformS2T bias omitted: exact no-op under the immediately following ln_f

    for pre, D in (('T_', C), ('S_', CS)):
        raw[pre + 'ln1_g'] = jnp.ones((1, D), jnp.float32)
        raw[pre + 'ln1_b'] = jnp.zeros((1, D), jnp.float32)
        raw[pre + 'ln2_g'] = jnp.ones((1, D), jnp.float32)
        raw[pre + 'ln2_b'] = jnp.zeros((1, D), jnp.float32)
        raw[pre + 'wq'], raw[pre + 'bq'] = lin(D, D)
        raw[pre + 'wkv'], raw[pre + 'bkv'] = lin(D, 2 * D)     # fused key|value
        raw[pre + 'wp'], raw[pre + 'bp'] = lin(D, D)
        raw[pre + 'mlp_w1'], raw[pre + 'mlp_b1'] = lin(D, 2 * D)
        raw[pre + 'mlp_w2'], raw[pre + 'mlp_b2'] = lin(2 * D, D)
        for g in ('g1_', 'g2_'):
            raw[pre + g + 'wrzh'] = xavier(D, 3 * D)           # fused w_r|w_z|w_h
            raw[pre + g + 'urz'] = xavier(D, 2 * D)            # fused u_r|u_z
            raw[pre + g + 'uh'] = xavier(D, D)
            raw[pre + g + 'bz'] = jnp.full((1, D), INIT_GRU_BIAS, jnp.float32)

    enc = dict(abS_w=nrm((SD,), 1.0 / math.sqrt(SD)), abS_b=nrm((), 0.02),
               abT_w=nrm((TK,), 1.0 / math.sqrt(TK)), abT_b=nrm((), 0.02))
    slabs = dict(w32=_pack_slab(raw, _W32_ENTRIES, _W32_OFF, _W32_ROWS, 32),
                 w64=_pack_slab(raw, _W64_ENTRIES, _W64_OFF, _W64_ROWS, 64),
                 w96=_pack_slab(raw, _W96_ENTRIES, _W96_OFF, _W96_ROWS, 96))
    host = dict(tok_w=raw['tok_w'], tok_b=raw['tok_b'],
                t2sq_w=raw['t2sq_w'], t2sq_b=raw['t2sq_b'])
    return dict(enc=enc, host=host, slabs=slabs)


# ------------------------------------ main ------------------------------------
if __name__ == "__main__":
    key = jax.random.PRNGKey(0)
    kp, ks, kpast, kb = jax.random.split(key, 4)
    params = make_params(kp)

    state = jax.random.normal(ks, (BATCH, BLOCK_SIZE_STATE, STATE_DIM), jnp.float32)
    past_state = jax.random.normal(kpast, (BATCH, BLOCK_SIZE, STATE_DIM), jnp.float32)
    att_bias = 0.1 * jax.random.normal(
        kb, (BLOCK_SIZE_STATE, BLOCK_SIZE, STATE_DIM), jnp.float32)

    fwd = jax.jit(criticadv_forward)
    value = fwd(params, state, past_state, att_bias)
    jax.block_until_ready(value)

    assert value.shape == (BATCH, 1)
    print("KERNEL_OK")
</pallas_src>

<mosaic_0001>
module attributes {stable_mosaic.version = 11 : i64} {
  func.func @_critic_kernel(%arg0: i32, %arg1: memref<16x16xf32, #tpu.memory_space<vmem>>, %arg2: memref<32x16xf32, #tpu.memory_space<vmem>>, %arg3: memref<720x32xf32, #tpu.memory_space<vmem>>, %arg4: memref<288x64xf32, #tpu.memory_space<vmem>>, %arg5: memref<128x96xf32, #tpu.memory_space<vmem>>, %arg6: memref<16x32xf32, #tpu.memory_space<vmem>>, %arg7: memref<64x64xf32, #tpu.memory_space<vmem>>, %arg8: memref<2x1xf32, #tpu.memory_space<vmem>>) attributes {dimension_semantics = [#tpu.dimension_semantics<arbitrary>], iteration_bounds = array<i64: 1>, scalar_prefetch = 0 : i64, scratch_operands = 0 : i64, tpu.core_type = #tpu.core_type<tc>, window_params = [{pipeline_mode = #tpu.pipeline_mode<synchronous>, transform_indices = @transform_0, window_bounds = array<i64: 16, 16>}, {pipeline_mode = #tpu.pipeline_mode<synchronous>, transform_indices = @transform_1, window_bounds = array<i64: 32, 16>}, {pipeline_mode = #tpu.pipeline_mode<synchronous>, transform_indices = @transform_2, window_bounds = array<i64: 720, 32>}, {pipeline_mode = #tpu.pipeline_mode<synchronous>, transform_indices = @transform_3, window_bounds = array<i64: 288, 64>}, {pipeline_mode = #tpu.pipeline_mode<synchronous>, transform_indices = @transform_4, window_bounds = array<i64: 128, 96>}, {pipeline_mode = #tpu.pipeline_mode<synchronous>, transform_indices = @transform_5, window_bounds = array<i64: 16, 32>}, {pipeline_mode = #tpu.pipeline_mode<synchronous>, transform_indices = @transform_6, window_bounds = array<i64: 64, 64>}, {pipeline_mode = #tpu.pipeline_mode<synchronous>, transform_indices = @transform_7, window_bounds = array<i64: 2, 1>}]} {
    %c0 = arith.constant 0 : index
    %c0_0 = arith.constant 0 : index
    %0 = vector.load %arg3[%c0, %c0_0] : memref<720x32xf32, #tpu.memory_space<vmem>>, vector<16x32xf32>
    %c128 = arith.constant 128 : index
    %c0_1 = arith.constant 0 : index
    %1 = vector.load %arg3[%c128, %c0_1] : memref<720x32xf32, #tpu.memory_space<vmem>>, vector<1x32xf32>
    %c0_2 = arith.constant 0 : index
    %c0_3 = arith.constant 0 : index
    %2 = vector.load %arg1[%c0_2, %c0_3] : memref<16x16xf32, #tpu.memory_space<vmem>>, vector<16x16xf32>
    %cst = arith.constant dense<0.000000e+00> : vector<16x32xf32>
    %3 = tpu.matmul %2, %0, %cst {dimension_numbers = #tpu.dot_dimension_numbers<[1], [0], [0], [1], [0, 0, 1, 1], [], []>} : vector<16x16xf32>, vector<16x32xf32>, vector<16x32xf32> -> vector<16x32xf32>
    %4 = vector.broadcast %1 : vector<1x32xf32> to vector<16x32xf32>
    %5 = arith.addf %3, %4 : vector<16x32xf32>
    %c16 = arith.constant 16 : index
    %c0_4 = arith.constant 0 : index
    %6 = vector.load %arg3[%c16, %c0_4] : memref<720x32xf32, #tpu.memory_space<vmem>>, vector<16x32xf32>
    %7 = arith.addf %5, %6 : vector<16x32xf32>
    %c0_5 = arith.constant 0 : index
    %c0_6 = arith.constant 0 : index
    %8 = vector.load %arg2[%c0_5, %c0_6] : memref<32x16xf32, #tpu.memory_space<vmem>>, vector<32x16xf32>
    %cst_7 = arith.constant dense<0.000000e+00> : vector<32x32xf32>
    %9 = tpu.matmul %8, %0, %cst_7 {dimension_numbers = #tpu.dot_dimension_numbers<[1], [0], [0], [1], [0, 0, 1, 1], [], []>} : vector<32x16xf32>, vector<16x32xf32>, vector<32x32xf32> -> vector<32x32xf32>
    %10 = vector.broadcast %1 : vector<1x32xf32> to vector<32x32xf32>
    %11 = arith.addf %9, %10 : vector<32x32xf32>
    %c32 = arith.constant 32 : index
    %c0_8 = arith.constant 0 : index
    %12 = vector.load %arg3[%c32, %c0_8] : memref<720x32xf32, #tpu.memory_space<vmem>>, vector<32x32xf32>
    %13 = arith.addf %11, %12 : vector<32x32xf32>
    %14 = tpu.iota {dimensions = array<i32: 1>} : vector<1x32xi32>
    %c0_i32 = arith.constant 0 : i32
    %15 = vector.broadcast %c0_i32 : i32 to vector<1x32xi32>
    %16 = arith.cmpi sge, %14, %15 : vector<1x32xi32>
    %c8_i32 = arith.constant 8 : i32
    %17 = vector.broadcast %c8_i32 : i32 to vector<1x32xi32>
    %18 = arith.cmpi slt, %14, %17 : vector<1x32xi32>
    %19 = arith.andi %16, %18 : vector<1x32xi1>
    %cst_9 = arith.constant 1.000000e+00 : f32
    %cst_10 = arith.constant 0.000000e+00 : f32
    %20 = vector.broadcast %cst_9 : f32 to vector<1x32xf32>
    %21 = vector.broadcast %cst_10 : f32 to vector<1x32xf32>
    %22 = arith.select %19, %20, %21 : vector<1x32xi1>, vector<1x32xf32>
    %c8_i32_11 = arith.constant 8 : i32
    %23 = vector.broadcast %c8_i32_11 : i32 to vector<1x32xi32>
    %24 = arith.cmpi sge, %14, %23 : vector<1x32xi32>
    %c16_i32 = arith.constant 16 : i32
    %25 = vector.broadcast %c16_i32 : i32 to vector<1x32xi32>
    %26 = arith.cmpi slt, %14, %25 : vector<1x32xi32>
    %27 = arith.andi %24, %26 : vector<1x32xi1>
    %cst_12 = arith.constant 1.000000e+00 : f32
    %cst_13 = arith.constant 0.000000e+00 : f32
    %28 = vector.broadcast %cst_12 : f32 to vector<1x32xf32>
    %29 = vector.broadcast %cst_13 : f32 to vector<1x32xf32>
    %30 = arith.select %27, %28, %29 : vector<1x32xi1>, vector<1x32xf32>
    %c16_i32_14 = arith.constant 16 : i32
    %31 = vector.broadcast %c16_i32_14 : i32 to vector<1x32xi32>
    %32 = arith.cmpi sge, %14, %31 : vector<1x32xi32>
    %c24_i32 = arith.constant 24 : i32
    %33 = vector.broadcast %c24_i32 : i32 to vector<1x32xi32>
    %34 = arith.cmpi slt, %14, %33 : vector<1x32xi32>
    %35 = arith.andi %32, %34 : vector<1x32xi1>
    %cst_15 = arith.constant 1.000000e+00 : f32
    %cst_16 = arith.constant 0.000000e+00 : f32
    %36 = vector.broadcast %cst_15 : f32 to vector<1x32xf32>
    %37 = vector.broadcast %cst_16 : f32 to vector<1x32xf32>
    %38 = arith.select %35, %36, %37 : vector<1x32xi1>, vector<1x32xf32>
    %c24_i32_17 = arith.constant 24 : i32
    %39 = vector.broadcast %c24_i32_17 : i32 to vector<1x32xi32>
    %40 = arith.cmpi sge, %14, %39 : vector<1x32xi32>
    %c32_i32 = arith.constant 32 : i32
    %41 = vector.broadcast %c32_i32 : i32 to vector<1x32xi32>
    %42 = arith.cmpi slt, %14, %41 : vector<1x32xi32>
    %43 = arith.andi %40, %42 : vector<1x32xi1>
    %cst_18 = arith.constant 1.000000e+00 : f32
    %cst_19 = arith.constant 0.000000e+00 : f32
    %44 = vector.broadcast %cst_18 : f32 to vector<1x32xf32>
    %45 = vector.broadcast %cst_19 : f32 to vector<1x32xf32>
    %46 = arith.select %43, %44, %45 : vector<1x32xi1>, vector<1x32xf32>
    %c0_20 = arith.constant 0 : index
    %c0_21 = arith.constant 0 : index
    %47 = vector.load %arg6[%c0_20, %c0_21] : memref<16x32xf32, #tpu.memory_space<vmem>>, vector<16x32xf32>
    %c384 = arith.constant 384 : index
    %c0_22 = arith.constant 0 : index
    %48 = vector.load %arg3[%c384, %c0_22] : memref<720x32xf32, #tpu.memory_space<vmem>>, vector<1x32xf32>
    %c392 = arith.constant 392 : index
    %c0_23 = arith.constant 0 : index
    %49 = vector.load %arg3[%c392, %c0_23] : memref<720x32xf32, #tpu.memory_space<vmem>>, vector<1x32xf32>
    %cst_24 = arith.constant dense<0.000000e+00> : vector<16xf32>
    %50 = vector.multi_reduction <add>, %7, %cst_24 [1] : vector<16x32xf32> to vector<16xf32>
    %51 = vector.shape_cast %50 : vector<16xf32> to vector<16x1xf32>
    %cst_25 = arith.constant 3.200000e+01 : f32
    %52 = vector.broadcast %cst_25 : f32 to vector<16x1xf32>
    %53 = arith.divf %51, %52 : vector<16x1xf32>
    %54 = vector.broadcast %53 : vector<16x1xf32> to vector<16x32xf32>
    %55 = arith.subf %7, %54 : vector<16x32xf32>
    %56 = arith.mulf %55, %55 : vector<16x32xf32>
    %cst_26 = arith.constant dense<0.000000e+00> : vector<16xf32>
    %57 = vector.multi_reduction <add>, %56, %cst_26 [1] : vector<16x32xf32> to vector<16xf32>
    %58 = vector.shape_cast %57 : vector<16xf32> to vector<16x1xf32>
    %cst_27 = arith.constant 3.200000e+01 : f32
    %59 = vector.broadcast %cst_27 : f32 to vector<16x1xf32>
    %60 = arith.divf %58, %59 : vector<16x1xf32>
    %cst_28 = arith.constant 9.99999974E-6 : f32
    %61 = vector.broadcast %cst_28 : f32 to vector<16x1xf32>
    %62 = arith.addf %60, %61 : vector<16x1xf32>
    %63 = math.rsqrt %62 : vector<16x1xf32>
    %64 = vector.broadcast %63 : vector<16x1xf32> to vector<16x32xf32>
    %65 = arith.mulf %55, %64 : vector<16x32xf32>
    %66 = vector.broadcast %48 : vector<1x32xf32> to vector<16x32xf32>
    %67 = arith.mulf %65, %66 : vector<16x32xf32>
    %68 = vector.broadcast %49 : vector<1x32xf32> to vector<16x32xf32>
    %69 = arith.addf %67, %68 : vector<16x32xf32>
    %cst_29 = arith.constant dense<0.000000e+00> : vector<32xf32>
    %70 = vector.multi_reduction <add>, %13, %cst_29 [1] : vector<32x32xf32> to vector<32xf32>
    %71 = vector.shape_cast %70 : vector<32xf32> to vector<32x1xf32>
    %cst_30 = arith.constant 3.200000e+01 : f32
    %72 = vector.broadcast %cst_30 : f32 to vector<32x1xf32>
    %73 = arith.divf %71, %72 : vector<32x1xf32>
    %74 = vector.broadcast %73 : vector<32x1xf32> to vector<32x32xf32>
    %75 = arith.subf %13, %74 : vector<32x32xf32>
    %76 = arith.mulf %75, %75 : vector<32x32xf32>
    %cst_31 = arith.constant dense<0.000000e+00> : vector<32xf32>
    %77 = vector.multi_reduction <add>, %76, %cst_31 [1] : vector<32x32xf32> to vector<32xf32>
    %78 = vector.shape_cast %77 : vector<32xf32> to vector<32x1xf32>
    %cst_32 = arith.constant 3.200000e+01 : f32
    %79 = vector.broadcast %cst_32 : f32 to vector<32x1xf32>
    %80 = arith.divf %78, %79 : vector<32x1xf32>
    %cst_33 = arith.constant 9.99999974E-6 : f32
    %81 = vector.broadcast %cst_33 : f32 to vector<32x1xf32>
    %82 = arith.addf %80, %81 : vector<32x1xf32>
    %83 = math.rsqrt %82 : vector<32x1xf32>
    %84 = vector.broadcast %83 : vector<32x1xf32> to vector<32x32xf32>
    %85 = arith.mulf %75, %84 : vector<32x32xf32>
    %86 = vector.broadcast %48 : vector<1x32xf32> to vector<32x32xf32>
    %87 = arith.mulf %85, %86 : vector<32x32xf32>
    %88 = vector.broadcast %49 : vector<1x32xf32> to vector<32x32xf32>
    %89 = arith.addf %87, %88 : vector<32x32xf32>
    %c192 = arith.constant 192 : index
    %c0_34 = arith.constant 0 : index
    %90 = vector.load %arg3[%c192, %c0_34] : memref<720x32xf32, #tpu.memory_space<vmem>>, vector<32x32xf32>
    %cst_35 = arith.constant dense<0.000000e+00> : vector<16x32xf32>
    %91 = tpu.matmul %69, %90, %cst_35 {dimension_numbers = #tpu.dot_dimension_numbers<[1], [0], [0], [1], [0, 0, 1, 1], [], []>} : vector<16x32xf32>, vector<32x32xf32>, vector<16x32xf32> -> vector<16x32xf32>
    %c416 = arith.constant 416 : index
    %c0_36 = arith.constant 0 : index
    %92 = vector.load %arg3[%c416, %c0_36] : memref<720x32xf32, #tpu.memory_space<vmem>>, vector<1x32xf32>
    %93 = vector.broadcast %92 : vector<1x32xf32> to vector<16x32xf32>
    %94 = arith.addf %91, %93 : vector<16x32xf32>
    %c0_37 = arith.constant 0 : index
    %c0_38 = arith.constant 0 : index
    %95 = vector.load %arg4[%c0_37, %c0_38] : memref<288x64xf32, #tpu.memory_space<vmem>>, vector<32x64xf32>
    %cst_39 = arith.constant dense<0.000000e+00> : vector<32x64xf32>
    %96 = tpu.matmul %89, %95, %cst_39 {dimension_numbers = #tpu.dot_dimension_numbers<[1], [0], [0], [1], [0, 0, 1, 1], [], []>} : vector<32x32xf32>, vector<32x64xf32>, vector<32x64xf32> -> vector<32x64xf32>
    %c128_40 = arith.constant 128 : index
    %c0_41 = arith.constant 0 : index
    %97 = vector.load %arg4[%c128_40, %c0_41] : memref<288x64xf32, #tpu.memory_space<vmem>>, vector<1x64xf32>
    %98 = vector.broadcast %97 : vector<1x64xf32> to vector<32x64xf32>
    %99 = arith.addf %96, %98 : vector<32x64xf32>
    %100 = vector.extract_strided_slice %99 {offsets = [0, 0], sizes = [32, 32], strides = [1, 1]} : vector<32x64xf32> to vector<32x32xf32>
    %101 = vector.extract_strided_slice %99 {offsets = [0, 32], sizes = [32, 32], strides = [1, 1]} : vector<32x64xf32> to vector<32x32xf32>
    %cst_42 = arith.constant 0.000000e+00 : f32
    %102 = vector.broadcast %cst_42 : f32 to vector<16x32xf32>
    %103 = vector.broadcast %22 : vector<1x32xf32> to vector<16x32xf32>
    %104 = arith.mulf %94, %103 : vector<16x32xf32>
    %cst_43 = arith.constant dense<0.000000e+00> : vector<16x32xf32>
    %105 = tpu.matmul %104, %100, %cst_43 {dimension_numbers = #tpu.dot_dimension_numbers<[1], [1], [0], [0], [0, 0, 1, 0], [], []>} : vector<16x32xf32>, vector<32x32xf32>, vector<16x32xf32> -> vector<16x32xf32>
    %cst_44 = arith.constant 0.353553385 : f32
    %106 = vector.broadcast %cst_44 : f32 to vector<16x32xf32>
    %107 = arith.mulf %105, %106 : vector<16x32xf32>
    %108 = arith.addf %107, %47 : vector<16x32xf32>
    %cst_45 = arith.constant dense<0xFF800000> : vector<16xf32>
    %109 = vector.multi_reduction <maximumf>, %108, %cst_45 [1] : vector<16x32xf32> to vector<16xf32>
    %110 = vector.shape_cast %109 : vector<16xf32> to vector<16x1xf32>
    %111 = vector.broadcast %110 : vector<16x1xf32> to vector<16x32xf32>
    %112 = arith.subf %108, %111 : vector<16x32xf32>
    %113 = math.exp %112 : vector<16x32xf32>
    %cst_46 = arith.constant dense<0.000000e+00> : vector<16xf32>
    %114 = vector.multi_reduction <add>, %113, %cst_46 [1] : vector<16x32xf32> to vector<16xf32>
    %115 = vector.shape_cast %114 : vector<16xf32> to vector<16x1xf32>
    %116 = tpu.reciprocal %115 {approx = true} : vector<16x1xf32> -> vector<16x1xf32>
    %117 = vector.broadcast %116 : vector<16x1xf32> to vector<16x32xf32>
    %118 = arith.mulf %113, %117 : vector<16x32xf32>
    %119 = vector.broadcast %22 : vector<1x32xf32> to vector<32x32xf32>
    %120 = arith.mulf %101, %119 : vector<32x32xf32>
    %cst_47 = arith.constant dense<0.000000e+00> : vector<16x32xf32>
    %121 = tpu.matmul %118, %120, %cst_47 {dimension_numbers = #tpu.dot_dimension_numbers<[1], [0], [0], [1], [0, 0, 1, 1], [], []>} : vector<16x32xf32>, vector<32x32xf32>, vector<16x32xf32> -> vector<16x32xf32>
    %122 = arith.addf %102, %121 : vector<16x32xf32>
    %123 = vector.broadcast %30 : vector<1x32xf32> to vector<16x32xf32>
    %124 = arith.mulf %94, %123 : vector<16x32xf32>
    %cst_48 = arith.constant dense<0.000000e+00> : vector<16x32xf32>
    %125 = tpu.matmul %124, %100, %cst_48 {dimension_numbers = #tpu.dot_dimension_numbers<[1], [1], [0], [0], [0, 0, 1, 0], [], []>} : vector<16x32xf32>, vector<32x32xf32>, vector<16x32xf32> -> vector<16x32xf32>
    %cst_49 = arith.constant 0.353553385 : f32
    %126 = vector.broadcast %cst_49 : f32 to vector<16x32xf32>
    %127 = arith.mulf %125, %126 : vector<16x32xf32>
    %128 = arith.addf %127, %47 : vector<16x32xf32>
    %cst_50 = arith.constant dense<0xFF800000> : vector<16xf32>
    %129 = vector.multi_reduction <maximumf>, %128, %cst_50 [1] : vector<16x32xf32> to vector<16xf32>
    %130 = vector.shape_cast %129 : vector<16xf32> to vector<16x1xf32>
    %131 = vector.broadcast %130 : vector<16x1xf32> to vector<16x32xf32>
    %132 = arith.subf %128, %131 : vector<16x32xf32>
    %133 = math.exp %132 : vector<16x32xf32>
    %cst_51 = arith.constant dense<0.000000e+00> : vector<16xf32>
    %134 = vector.multi_reduction <add>, %133, %cst_51 [1] : vector<16x32xf32> to vector<16xf32>
    %135 = vector.shape_cast %134 : vector<16xf32> to vector<16x1xf32>
    %136 = tpu.reciprocal %135 {approx = true} : vector<16x1xf32> -> vector<16x1xf32>
    %137 = vector.broadcast %136 : vector<16x1xf32> to vector<16x32xf32>
    %138 = arith.mulf %133, %137 : vector<16x32xf32>
    %139 = vector.broadcast %30 : vector<1x32xf32> to vector<32x32xf32>
    %140 = arith.mulf %101, %139 : vector<32x32xf32>
    %cst_52 = arith.constant dense<0.000000e+00> : vector<16x32xf32>
    %141 = tpu.matmul %138, %140, %cst_52 {dimension_numbers = #tpu.dot_dimension_numbers<[1], [0], [0], [1], [0, 0, 1, 1], [], []>} : vector<16x32xf32>, vector<32x32xf32>, vector<16x32xf32> -> vector<16x32xf32>
    %142 = arith.addf %122, %141 : vector<16x32xf32>
    %143 = vector.broadcast %38 : vector<1x32xf32> to vector<16x32xf32>
    %144 = arith.mulf %94, %143 : vector<16x32xf32>
    %cst_53 = arith.constant dense<0.000000e+00> : vector<16x32xf32>
    %145 = tpu.matmul %144, %100, %cst_53 {dimension_numbers = #tpu.dot_dimension_numbers<[1], [1], [0], [0], [0, 0, 1, 0], [], []>} : vector<16x32xf32>, vector<32x32xf32>, vector<16x32xf32> -> vector<16x32xf32>
    %cst_54 = arith.constant 0.353553385 : f32
    %146 = vector.broadcast %cst_54 : f32 to vector<16x32xf32>
    %147 = arith.mulf %145, %146 : vector<16x32xf32>
    %148 = arith.addf %147, %47 : vector<16x32xf32>
    %cst_55 = arith.constant dense<0xFF800000> : vector<16xf32>
    %149 = vector.multi_reduction <maximumf>, %148, %cst_55 [1] : vector<16x32xf32> to vector<16xf32>
    %150 = vector.shape_cast %149 : vector<16xf32> to vector<16x1xf32>
    %151 = vector.broadcast %150 : vector<16x1xf32> to vector<16x32xf32>
    %152 = arith.subf %148, %151 : vector<16x32xf32>
    %153 = math.exp %152 : vector<16x32xf32>
    %cst_56 = arith.constant dense<0.000000e+00> : vector<16xf32>
    %154 = vector.multi_reduction <add>, %153, %cst_56 [1] : vector<16x32xf32> to vector<16xf32>
    %155 = vector.shape_cast %154 : vector<16xf32> to vector<16x1xf32>
    %156 = tpu.reciprocal %155 {approx = true} : vector<16x1xf32> -> vector<16x1xf32>
    %157 = vector.broadcast %156 : vector<16x1xf32> to vector<16x32xf32>
    %158 = arith.mulf %153, %157 : vector<16x32xf32>
    %159 = vector.broadcast %38 : vector<1x32xf32> to vector<32x32xf32>
    %160 = arith.mulf %101, %159 : vector<32x32xf32>
    %cst_57 = arith.constant dense<0.000000e+00> : vector<16x32xf32>
    %161 = tpu.matmul %158, %160, %cst_57 {dimension_numbers = #tpu.dot_dimension_numbers<[1], [0], [0], [1], [0, 0, 1, 1], [], []>} : vector<16x32xf32>, vector<32x32xf32>, vector<16x32xf32> -> vector<16x32xf32>
    %162 = arith.addf %142, %161 : vector<16x32xf32>
    %163 = vector.broadcast %46 : vector<1x32xf32> to vector<16x32xf32>
    %164 = arith.mulf %94, %163 : vector<16x32xf32>
    %cst_58 = arith.constant dense<0.000000e+00> : vector<16x32xf32>
    %165 = tpu.matmul %164, %100, %cst_58 {dimension_numbers = #tpu.dot_dimension_numbers<[1], [1], [0], [0], [0, 0, 1, 0], [], []>} : vector<16x32xf32>, vector<32x32xf32>, vector<16x32xf32> -> vector<16x32xf32>
    %cst_59 = arith.constant 0.353553385 : f32
    %166 = vector.broadcast %cst_59 : f32 to vector<16x32xf32>
    %167 = arith.mulf %165, %166 : vector<16x32xf32>
    %168 = arith.addf %167, %47 : vector<16x32xf32>
    %cst_60 = arith.constant dense<0xFF800000> : vector<16xf32>
    %169 = vector.multi_reduction <maximumf>, %168, %cst_60 [1] : vector<16x32xf32> to vector<16xf32>
    %170 = vector.shape_cast %169 : vector<16xf32> to vector<16x1xf32>
    %171 = vector.broadcast %170 : vector<16x1xf32> to vector<16x32xf32>
    %172 = arith.subf %168, %171 : vector<16x32xf32>
    %173 = math.exp %172 : vector<16x32xf32>
    %cst_61 = arith.constant dense<0.000000e+00> : vector<16xf32>
    %174 = vector.multi_reduction <add>, %173, %cst_61 [1] : vector<16x32xf32> to vector<16xf32>
    %175 = vector.shape_cast %174 : vector<16xf32> to vector<16x1xf32>
    %176 = tpu.reciprocal %175 {approx = true} : vector<16x1xf32> -> vector<16x1xf32>
    %177 = vector.broadcast %176 : vector<16x1xf32> to vector<16x32xf32>
    %178 = arith.mulf %173, %177 : vector<16x32xf32>
    %179 = vector.broadcast %46 : vector<1x32xf32> to vector<32x32xf32>
    %180 = arith.mulf %101, %179 : vector<32x32xf32>
    %cst_62 = arith.constant dense<0.000000e+00> : vector<16x32xf32>
    %181 = tpu.matmul %178, %180, %cst_62 {dimension_numbers = #tpu.dot_dimension_numbers<[1], [0], [0], [1], [0, 0, 1, 1], [], []>} : vector<16x32xf32>, vector<32x32xf32>, vector<16x32xf32> -> vector<16x32xf32>
    %182 = arith.addf %162, %181 : vector<16x32xf32>
    %c224 = arith.constant 224 : index
    %c0_63 = arith.constant 0 : index
    %183 = vector.load %arg3[%c224, %c0_63] : memref<720x32xf32, #tpu.memory_space<vmem>>, vector<32x32xf32>
    %cst_64 = arith.constant dense<0.000000e+00> : vector<16x32xf32>
    %184 = tpu.matmul %182, %183, %cst_64 {dimension_numbers = #tpu.dot_dimension_numbers<[1], [0], [0], [1], [0, 0, 1, 1], [], []>} : vector<16x32xf32>, vector<32x32xf32>, vector<16x32xf32> -> vector<16x32xf32>
    %c424 = arith.constant 424 : index
    %c0_65 = arith.constant 0 : index
    %185 = vector.load %arg3[%c424, %c0_65] : memref<720x32xf32, #tpu.memory_space<vmem>>, vector<1x32xf32>
    %186 = vector.broadcast %185 : vector<1x32xf32> to vector<16x32xf32>
    %187 = arith.addf %184, %186 : vector<16x32xf32>
    %c0_66 = arith.constant 0 : index
    %c0_67 = arith.constant 0 : index
    %188 = vector.load %arg5[%c0_66, %c0_67] : memref<128x96xf32, #tpu.memory_space<vmem>>, vector<32x96xf32>
    %c32_68 = arith.constant 32 : index
    %c0_69 = arith.constant 0 : index
    %189 = vector.load %arg4[%c32_68, %c0_69] : memref<288x64xf32, #tpu.memory_space<vmem>>, vector<32x64xf32>
    %c256 = arith.constant 256 : index
    %c0_70 = arith.constant 0 : index
    %190 = vector.load %arg3[%c256, %c0_70] : memref<720x32xf32, #tpu.memory_space<vmem>>, vector<32x32xf32>
    %c440 = arith.constant 440 : index
    %c0_71 = arith.constant 0 : index
    %191 = vector.load %arg3[%c440, %c0_71] : memref<720x32xf32, #tpu.memory_space<vmem>>, vector<1x32xf32>
    %cst_72 = arith.constant dense<0.000000e+00> : vector<16x96xf32>
    %192 = tpu.matmul %187, %188, %cst_72 {dimension_numbers = #tpu.dot_dimension_numbers<[1], [0], [0], [1], [0, 0, 1, 1], [], []>} : vector<16x32xf32>, vector<32x96xf32>, vector<16x96xf32> -> vector<16x96xf32>
    %cst_73 = arith.constant dense<0.000000e+00> : vector<16x64xf32>
    %193 = tpu.matmul %7, %189, %cst_73 {dimension_numbers = #tpu.dot_dimension_numbers<[1], [0], [0], [1], [0, 0, 1, 1], [], []>} : vector<16x32xf32>, vector<32x64xf32>, vector<16x64xf32> -> vector<16x64xf32>
    %194 = vector.extract_strided_slice %192 {offsets = [0, 0], sizes = [16, 32], strides = [1, 1]} : vector<16x96xf32> to vector<16x32xf32>
    %195 = vector.extract_strided_slice %193 {offsets = [0, 0], sizes = [16, 32], strides = [1, 1]} : vector<16x64xf32> to vector<16x32xf32>
    %196 = arith.addf %194, %195 : vector<16x32xf32>
    %197 = arith.negf %196 : vector<16x32xf32>
    %198 = math.exp %197 : vector<16x32xf32>
    %cst_74 = arith.constant 1.000000e+00 : f32
    %199 = vector.broadcast %cst_74 : f32 to vector<16x32xf32>
    %200 = arith.addf %199, %198 : vector<16x32xf32>
    %201 = arith.divf %199, %200 : vector<16x32xf32>
    %202 = vector.extract_strided_slice %192 {offsets = [0, 32], sizes = [16, 32], strides = [1, 1]} : vector<16x96xf32> to vector<16x32xf32>
    %203 = vector.extract_strided_slice %193 {offsets = [0, 32], sizes = [16, 32], strides = [1, 1]} : vector<16x64xf32> to vector<16x32xf32>
    %204 = arith.addf %202, %203 : vector<16x32xf32>
    %205 = vector.broadcast %191 : vector<1x32xf32> to vector<16x32xf32>
    %206 = arith.subf %204, %205 : vector<16x32xf32>
    %207 = arith.negf %206 : vector<16x32xf32>
    %208 = math.exp %207 : vector<16x32xf32>
    %cst_75 = arith.constant 1.000000e+00 : f32
    %209 = vector.broadcast %cst_75 : f32 to vector<16x32xf32>
    %210 = arith.addf %209, %208 : vector<16x32xf32>
    %211 = arith.divf %209, %210 : vector<16x32xf32>
    %212 = vector.extract_strided_slice %192 {offsets = [0, 64], sizes = [16, 32], strides = [1, 1]} : vector<16x96xf32> to vector<16x32xf32>
    %213 = arith.mulf %7, %201 : vector<16x32xf32>
    %cst_76 = arith.constant dense<0.000000e+00> : vector<16x32xf32>
    %214 = tpu.matmul %213, %190, %cst_76 {dimension_numbers = #tpu.dot_dimension_numbers<[1], [0], [0], [1], [0, 0, 1, 1], [], []>} : vector<16x32xf32>, vector<32x32xf32>, vector<16x32xf32> -> vector<16x32xf32>
    %215 = arith.addf %212, %214 : vector<16x32xf32>
    %216 = math.tanh %215 : vector<16x32xf32>
    %cst_77 = arith.constant 1.000000e+00 : f32
    %217 = vector.broadcast %cst_77 : f32 to vector<16x32xf32>
    %218 = arith.subf %217, %211 : vector<16x32xf32>
    %219 = arith.mulf %218, %7 : vector<16x32xf32>
    %220 = arith.mulf %211, %216 : vector<16x32xf32>
    %221 = arith.addf %219, %220 : vector<16x32xf32>
    %c400 = arith.constant 400 : index
    %c0_78 = arith.constant 0 : index
    %222 = vector.load %arg3[%c400, %c0_78] : memref<720x32xf32, #tpu.memory_space<vmem>>, vector<1x32xf32>
    %c408 = arith.constant 408 : index
    %c0_79 = arith.constant 0 : index
    %223 = vector.load %arg3[%c408, %c0_79] : memref<720x32xf32, #tpu.memory_space<vmem>>, vector<1x32xf32>
    %cst_80 = arith.constant dense<0.000000e+00> : vector<16xf32>
    %224 = vector.multi_reduction <add>, %221, %cst_80 [1] : vector<16x32xf32> to vector<16xf32>
    %225 = vector.shape_cast %224 : vector<16xf32> to vector<16x1xf32>
    %cst_81 = arith.constant 3.200000e+01 : f32
    %226 = vector.broadcast %cst_81 : f32 to vector<16x1xf32>
    %227 = arith.divf %225, %226 : vector<16x1xf32>
    %228 = vector.broadcast %227 : vector<16x1xf32> to vector<16x32xf32>
    %229 = arith.subf %221, %228 : vector<16x32xf32>
    %230 = arith.mulf %229, %229 : vector<16x32xf32>
    %cst_82 = arith.constant dense<0.000000e+00> : vector<16xf32>
    %231 = vector.multi_reduction <add>, %230, %cst_82 [1] : vector<16x32xf32> to vector<16xf32>
    %232 = vector.shape_cast %231 : vector<16xf32> to vector<16x1xf32>
    %cst_83 = arith.constant 3.200000e+01 : f32
    %233 = vector.broadcast %cst_83 : f32 to vector<16x1xf32>
    %234 = arith.divf %232, %233 : vector<16x1xf32>
    %cst_84 = arith.constant 9.99999974E-6 : f32
    %235 = vector.broadcast %cst_84 : f32 to vector<16x1xf32>
    %236 = arith.addf %234, %235 : vector<16x1xf32>
    %237 = math.rsqrt %236 : vector<16x1xf32>
    %238 = vector.broadcast %237 : vector<16x1xf32> to vector<16x32xf32>
    %239 = arith.mulf %229, %238 : vector<16x32xf32>
    %240 = vector.broadcast %222 : vector<1x32xf32> to vector<16x32xf32>
    %241 = arith.mulf %239, %240 : vector<16x32xf32>
    %242 = vector.broadcast %223 : vector<1x32xf32> to vector<16x32xf32>
    %243 = arith.addf %241, %242 : vector<16x32xf32>
    %c96 = arith.constant 96 : index
    %c0_85 = arith.constant 0 : index
    %244 = vector.load %arg4[%c96, %c0_85] : memref<288x64xf32, #tpu.memory_space<vmem>>, vector<32x64xf32>
    %c136 = arith.constant 136 : index
    %c0_86 = arith.constant 0 : index
    %245 = vector.load %arg4[%c136, %c0_86] : memref<288x64xf32, #tpu.memory_space<vmem>>, vector<1x64xf32>
    %c320 = arith.constant 320 : index
    %c0_87 = arith.constant 0 : index
    %246 = vector.load %arg3[%c320, %c0_87] : memref<720x32xf32, #tpu.memory_space<vmem>>, vector<64x32xf32>
    %c432 = arith.constant 432 : index
    %c0_88 = arith.constant 0 : index
    %247 = vector.load %arg3[%c432, %c0_88] : memref<720x32xf32, #tpu.memory_space<vmem>>, vector<1x32xf32>
    %cst_89 = arith.constant dense<0.000000e+00> : vector<16x64xf32>
    %248 = tpu.matmul %243, %244, %cst_89 {dimension_numbers = #tpu.dot_dimension_numbers<[1], [0], [0], [1], [0, 0, 1, 1], [], []>} : vector<16x32xf32>, vector<32x64xf32>, vector<16x64xf32> -> vector<16x64xf32>
    %249 = vector.broadcast %245 : vector<1x64xf32> to vector<16x64xf32>
    %250 = arith.addf %248, %249 : vector<16x64xf32>
    %cst_90 = arith.constant 5.000000e-01 : f32
    %251 = vector.broadcast %cst_90 : f32 to vector<16x64xf32>
    %252 = arith.mulf %251, %250 : vector<16x64xf32>
    %cst_91 = arith.constant 4.471500e-02 : f32
    %253 = vector.broadcast %cst_91 : f32 to vector<16x64xf32>
    %254 = arith.mulf %253, %250 : vector<16x64xf32>
    %255 = arith.mulf %254, %250 : vector<16x64xf32>
    %256 = arith.mulf %255, %250 : vector<16x64xf32>
    %257 = arith.addf %250, %256 : vector<16x64xf32>
    %cst_92 = arith.constant 0.797884583 : f32
    %258 = vector.broadcast %cst_92 : f32 to vector<16x64xf32>
    %259 = arith.mulf %258, %257 : vector<16x64xf32>
    %260 = math.tanh %259 : vector<16x64xf32>
    %cst_93 = arith.constant 1.000000e+00 : f32
    %261 = vector.broadcast %cst_93 : f32 to vector<16x64xf32>
    %262 = arith.addf %261, %260 : vector<16x64xf32>
    %263 = arith.mulf %252, %262 : vector<16x64xf32>
    %cst_94 = arith.constant dense<0.000000e+00> : vector<16x32xf32>
    %264 = tpu.matmul %263, %246, %cst_94 {dimension_numbers = #tpu.dot_dimension_numbers<[1], [0], [0], [1], [0, 0, 1, 1], [], []>} : vector<16x64xf32>, vector<64x32xf32>, vector<16x32xf32> -> vector<16x32xf32>
    %265 = vector.broadcast %247 : vector<1x32xf32> to vector<16x32xf32>
    %266 = arith.addf %264, %265 : vector<16x32xf32>
    %c32_95 = arith.constant 32 : index
    %c0_96 = arith.constant 0 : index
    %267 = vector.load %arg5[%c32_95, %c0_96] : memref<128x96xf32, #tpu.memory_space<vmem>>, vector<32x96xf32>
    %c64 = arith.constant 64 : index
    %c0_97 = arith.constant 0 : index
    %268 = vector.load %arg4[%c64, %c0_97] : memref<288x64xf32, #tpu.memory_space<vmem>>, vector<32x64xf32>
    %c288 = arith.constant 288 : index
    %c0_98 = arith.constant 0 : index
    %269 = vector.load %arg3[%c288, %c0_98] : memref<720x32xf32, #tpu.memory_space<vmem>>, vector<32x32xf32>
    %c448 = arith.constant 448 : index
    %c0_99 = arith.constant 0 : index
    %270 = vector.load %arg3[%c448, %c0_99] : memref<720x32xf32, #tpu.memory_space<vmem>>, vector<1x32xf32>
    %cst_100 = arith.constant dense<0.000000e+00> : vector<16x96xf32>
    %271 = tpu.matmul %266, %267, %cst_100 {dimension_numbers = #tpu.dot_dimension_numbers<[1], [0], [0], [1], [0, 0, 1, 1], [], []>} : vector<16x32xf32>, vector<32x96xf32>, vector<16x96xf32> -> vector<16x96xf32>
    %cst_101 = arith.constant dense<0.000000e+00> : vector<16x64xf32>
    %272 = tpu.matmul %221, %268, %cst_101 {dimension_numbers = #tpu.dot_dimension_numbers<[1], [0], [0], [1], [0, 0, 1, 1], [], []>} : vector<16x32xf32>, vector<32x64xf32>, vector<16x64xf32> -> vector<16x64xf32>
    %273 = vector.extract_strided_slice %271 {offsets = [0, 0], sizes = [16, 32], strides = [1, 1]} : vector<16x96xf32> to vector<16x32xf32>
    %274 = vector.extract_strided_slice %272 {offsets = [0, 0], sizes = [16, 32], strides = [1, 1]} : vector<16x64xf32> to vector<16x32xf32>
    %275 = arith.addf %273, %274 : vector<16x32xf32>
    %276 = arith.negf %275 : vector<16x32xf32>
    %277 = math.exp %276 : vector<16x32xf32>
    %cst_102 = arith.constant 1.000000e+00 : f32
    %278 = vector.broadcast %cst_102 : f32 to vector<16x32xf32>
    %279 = arith.addf %278, %277 : vector<16x32xf32>
    %280 = arith.divf %278, %279 : vector<16x32xf32>
    %281 = vector.extract_strided_slice %271 {offsets = [0, 32], sizes = [16, 32], strides = [1, 1]} : vector<16x96xf32> to vector<16x32xf32>
    %282 = vector.extract_strided_slice %272 {offsets = [0, 32], sizes = [16, 32], strides = [1, 1]} : vector<16x64xf32> to vector<16x32xf32>
    %283 = arith.addf %281, %282 : vector<16x32xf32>
    %284 = vector.broadcast %270 : vector<1x32xf32> to vector<16x32xf32>
    %285 = arith.subf %283, %284 : vector<16x32xf32>
    %286 = arith.negf %285 : vector<16x32xf32>
    %287 = math.exp %286 : vector<16x32xf32>
    %cst_103 = arith.constant 1.000000e+00 : f32
    %288 = vector.broadcast %cst_103 : f32 to vector<16x32xf32>
    %289 = arith.addf %288, %287 : vector<16x32xf32>
    %290 = arith.divf %288, %289 : vector<16x32xf32>
    %291 = vector.extract_strided_slice %271 {offsets = [0, 64], sizes = [16, 32], strides = [1, 1]} : vector<16x96xf32> to vector<16x32xf32>
    %292 = arith.mulf %221, %280 : vector<16x32xf32>
    %cst_104 = arith.constant dense<0.000000e+00> : vector<16x32xf32>
    %293 = tpu.matmul %292, %269, %cst_104 {dimension_numbers = #tpu.dot_dimension_numbers<[1], [0], [0], [1], [0, 0, 1, 1], [], []>} : vector<16x32xf32>, vector<32x32xf32>, vector<16x32xf32> -> vector<16x32xf32>
    %294 = arith.addf %291, %293 : vector<16x32xf32>
    %295 = math.tanh %294 : vector<16x32xf32>
    %cst_105 = arith.constant 1.000000e+00 : f32
    %296 = vector.broadcast %cst_105 : f32 to vector<16x32xf32>
    %297 = arith.subf %296, %290 : vector<16x32xf32>
    %298 = arith.mulf %297, %221 : vector<16x32xf32>
    %299 = arith.mulf %290, %295 : vector<16x32xf32>
    %300 = arith.addf %298, %299 : vector<16x32xf32>
    %c80 = arith.constant 80 : index
    %c0_106 = arith.constant 0 : index
    %301 = vector.load %arg3[%c80, %c0_106] : memref<720x32xf32, #tpu.memory_space<vmem>>, vector<8x32xf32>
    %c184 = arith.constant 184 : index
    %c0_107 = arith.constant 0 : index
    %302 = vector.load %arg3[%c184, %c0_107] : memref<720x32xf32, #tpu.memory_space<vmem>>, vector<1x32xf32>
    %c64_108 = arith.constant 64 : index
    %c0_109 = arith.constant 0 : index
    %303 = vector.load %arg3[%c64_108, %c0_109] : memref<720x32xf32, #tpu.memory_space<vmem>>, vector<16x32xf32>
    %c176 = arith.constant 176 : index
    %c0_110 = arith.constant 0 : index
    %304 = vector.load %arg3[%c176, %c0_110] : memref<720x32xf32, #tpu.memory_space<vmem>>, vector<1x32xf32>
    %305 = vector.extract_strided_slice %300 {offsets = [0, 0], sizes = [8, 32], strides = [1, 1]} : vector<16x32xf32> to vector<8x32xf32>
    %306 = vector.extract_strided_slice %13 {offsets = [0, 0], sizes = [16, 32], strides = [1, 1]} : vector<32x32xf32> to vector<16x32xf32>
    %cst_111 = arith.constant dense<0.000000e+00> : vector<32x32xf32>
    %307 = tpu.matmul %305, %301, %cst_111 {dimension_numbers = #tpu.dot_dimension_numbers<[0], [0], [1], [1], [0, 1, 1, 1], [], []>} : vector<8x32xf32>, vector<8x32xf32>, vector<32x32xf32> -> vector<32x32xf32>
    %308 = vector.broadcast %302 : vector<1x32xf32> to vector<32x32xf32>
    %309 = arith.addf %307, %308 : vector<32x32xf32>
    %cst_112 = arith.constant dense<0.000000e+00> : vector<32x32xf32>
    %310 = tpu.matmul %306, %303, %cst_112 {dimension_numbers = #tpu.dot_dimension_numbers<[0], [0], [1], [1], [0, 1, 1, 1], [], []>} : vector<16x32xf32>, vector<16x32xf32>, vector<32x32xf32> -> vector<32x32xf32>
    %311 = vector.broadcast %304 : vector<1x32xf32> to vector<32x32xf32>
    %312 = arith.addf %310, %311 : vector<32x32xf32>
    %313 = vector.extract_strided_slice %300 {offsets = [8, 0], sizes = [8, 32], strides = [1, 1]} : vector<16x32xf32> to vector<8x32xf32>
    %314 = vector.extract_strided_slice %13 {offsets = [16, 0], sizes = [16, 32], strides = [1, 1]} : vector<32x32xf32> to vector<16x32xf32>
    %cst_113 = arith.constant dense<0.000000e+00> : vector<32x32xf32>
    %315 = tpu.matmul %313, %301, %cst_113 {dimension_numbers = #tpu.dot_dimension_numbers<[0], [0], [1], [1], [0, 1, 1, 1], [], []>} : vector<8x32xf32>, vector<8x32xf32>, vector<32x32xf32> -> vector<32x32xf32>
    %316 = vector.broadcast %302 : vector<1x32xf32> to vector<32x32xf32>
    %317 = arith.addf %315, %316 : vector<32x32xf32>
    %cst_114 = arith.constant dense<0.000000e+00> : vector<32x32xf32>
    %318 = tpu.matmul %314, %303, %cst_114 {dimension_numbers = #tpu.dot_dimension_numbers<[0], [0], [1], [1], [0, 1, 1, 1], [], []>} : vector<16x32xf32>, vector<16x32xf32>, vector<32x32xf32> -> vector<32x32xf32>
    %319 = vector.broadcast %304 : vector<1x32xf32> to vector<32x32xf32>
    %320 = arith.addf %318, %319 : vector<32x32xf32>
    %321 = tpu.concatenate %309, %317 in 0 : vector<32x32xf32>, vector<32x32xf32> -> vector<64x32xf32>
    %322 = tpu.concatenate %312, %320 in 0 : vector<32x32xf32>, vector<32x32xf32> -> vector<64x32xf32>
    %c0_115 = arith.constant 0 : index
    %c0_116 = arith.constant 0 : index
    %323 = vector.load %arg7[%c0_115, %c0_116] : memref<64x64xf32, #tpu.memory_space<vmem>>, vector<64x64xf32>
    %c648 = arith.constant 648 : index
    %c0_117 = arith.constant 0 : index
    %324 = vector.load %arg3[%c648, %c0_117] : memref<720x32xf32, #tpu.memory_space<vmem>>, vector<1x32xf32>
    %c656 = arith.constant 656 : index
    %c0_118 = arith.constant 0 : index
    %325 = vector.load %arg3[%c656, %c0_118] : memref<720x32xf32, #tpu.memory_space<vmem>>, vector<1x32xf32>
    %cst_119 = arith.constant dense<0.000000e+00> : vector<64xf32>
    %326 = vector.multi_reduction <add>, %321, %cst_119 [1] : vector<64x32xf32> to vector<64xf32>
    %327 = vector.shape_cast %326 : vector<64xf32> to vector<64x1xf32>
    %cst_120 = arith.constant 3.200000e+01 : f32
    %328 = vector.broadcast %cst_120 : f32 to vector<64x1xf32>
    %329 = arith.divf %327, %328 : vector<64x1xf32>
    %330 = vector.broadcast %329 : vector<64x1xf32> to vector<64x32xf32>
    %331 = arith.subf %321, %330 : vector<64x32xf32>
    %332 = arith.mulf %331, %331 : vector<64x32xf32>
    %cst_121 = arith.constant dense<0.000000e+00> : vector<64xf32>
    %333 = vector.multi_reduction <add>, %332, %cst_121 [1] : vector<64x32xf32> to vector<64xf32>
    %334 = vector.shape_cast %333 : vector<64xf32> to vector<64x1xf32>
    %cst_122 = arith.constant 3.200000e+01 : f32
    %335 = vector.broadcast %cst_122 : f32 to vector<64x1xf32>
    %336 = arith.divf %334, %335 : vector<64x1xf32>
    %cst_123 = arith.constant 9.99999974E-6 : f32
    %337 = vector.broadcast %cst_123 : f32 to vector<64x1xf32>
    %338 = arith.addf %336, %337 : vector<64x1xf32>
    %339 = math.rsqrt %338 : vector<64x1xf32>
    %340 = vector.broadcast %339 : vector<64x1xf32> to vector<64x32xf32>
    %341 = arith.mulf %331, %340 : vector<64x32xf32>
    %342 = vector.broadcast %324 : vector<1x32xf32> to vector<64x32xf32>
    %343 = arith.mulf %341, %342 : vector<64x32xf32>
    %344 = vector.broadcast %325 : vector<1x32xf32> to vector<64x32xf32>
    %345 = arith.addf %343, %344 : vector<64x32xf32>
    %cst_124 = arith.constant dense<0.000000e+00> : vector<64xf32>
    %346 = vector.multi_reduction <add>, %322, %cst_124 [1] : vector<64x32xf32> to vector<64xf32>
    %347 = vector.shape_cast %346 : vector<64xf32> to vector<64x1xf32>
    %cst_125 = arith.constant 3.200000e+01 : f32
    %348 = vector.broadcast %cst_125 : f32 to vector<64x1xf32>
    %349 = arith.divf %347, %348 : vector<64x1xf32>
    %350 = vector.broadcast %349 : vector<64x1xf32> to vector<64x32xf32>
    %351 = arith.subf %322, %350 : vector<64x32xf32>
    %352 = arith.mulf %351, %351 : vector<64x32xf32>
    %cst_126 = arith.constant dense<0.000000e+00> : vector<64xf32>
    %353 = vector.multi_reduction <add>, %352, %cst_126 [1] : vector<64x32xf32> to vector<64xf32>
    %354 = vector.shape_cast %353 : vector<64xf32> to vector<64x1xf32>
    %cst_127 = arith.constant 3.200000e+01 : f32
    %355 = vector.broadcast %cst_127 : f32 to vector<64x1xf32>
    %356 = arith.divf %354, %355 : vector<64x1xf32>
    %cst_128 = arith.constant 9.99999974E-6 : f32
    %357 = vector.broadcast %cst_128 : f32 to vector<64x1xf32>
    %358 = arith.addf %356, %357 : vector<64x1xf32>
    %359 = math.rsqrt %358 : vector<64x1xf32>
    %360 = vector.broadcast %359 : vector<64x1xf32> to vector<64x32xf32>
    %361 = arith.mulf %351, %360 : vector<64x32xf32>
    %362 = vector.broadcast %324 : vector<1x32xf32> to vector<64x32xf32>
    %363 = arith.mulf %361, %362 : vector<64x32xf32>
    %364 = vector.broadcast %325 : vector<1x32xf32> to vector<64x32xf32>
    %365 = arith.addf %363, %364 : vector<64x32xf32>
    %c456 = arith.constant 456 : index
    %c0_129 = arith.constant 0 : index
    %366 = vector.load %arg3[%c456, %c0_129] : memref<720x32xf32, #tpu.memory_space<vmem>>, vector<32x32xf32>
    %cst_130 = arith.constant dense<0.000000e+00> : vector<64x32xf32>
    %367 = tpu.matmul %345, %366, %cst_130 {dimension_numbers = #tpu.dot_dimension_numbers<[1], [0], [0], [1], [0, 0, 1, 1], [], []>} : vector<64x32xf32>, vector<32x32xf32>, vector<64x32xf32> -> vector<64x32xf32>
    %c680 = arith.constant 680 : index
    %c0_131 = arith.constant 0 : index
    %368 = vector.load %arg3[%c680, %c0_131] : memref<720x32xf32, #tpu.memory_space<vmem>>, vector<1x32xf32>
    %369 = vector.broadcast %368 : vector<1x32xf32> to vector<64x32xf32>
    %370 = arith.addf %367, %369 : vector<64x32xf32>
    %c144 = arith.constant 144 : index
    %c0_132 = arith.constant 0 : index
    %371 = vector.load %arg4[%c144, %c0_132] : memref<288x64xf32, #tpu.memory_space<vmem>>, vector<32x64xf32>
    %cst_133 = arith.constant dense<0.000000e+00> : vector<64x64xf32>
    %372 = tpu.matmul %365, %371, %cst_133 {dimension_numbers = #tpu.dot_dimension_numbers<[1], [0], [0], [1], [0, 0, 1, 1], [], []>} : vector<64x32xf32>, vector<32x64xf32>, vector<64x64xf32> -> vector<64x64xf32>
    %c272 = arith.constant 272 : index
    %c0_134 = arith.constant 0 : index
    %373 = vector.load %arg4[%c272, %c0_134] : memref<288x64xf32, #tpu.memory_space<vmem>>, vector<1x64xf32>
    %374 = vector.broadcast %373 : vector<1x64xf32> to vector<64x64xf32>
    %375 = arith.addf %372, %374 : vector<64x64xf32>
    %376 = vector.extract_strided_slice %375 {offsets = [0, 0], sizes = [64, 32], strides = [1, 1]} : vector<64x64xf32> to vector<64x32xf32>
    %377 = vector.extract_strided_slice %375 {offsets = [0, 32], sizes = [64, 32], strides = [1, 1]} : vector<64x64xf32> to vector<64x32xf32>
    %cst_135 = arith.constant 0.000000e+00 : f32
    %378 = vector.broadcast %cst_135 : f32 to vector<64x32xf32>
    %379 = vector.broadcast %22 : vector<1x32xf32> to vector<64x32xf32>
    %380 = arith.mulf %370, %379 : vector<64x32xf32>
    %cst_136 = arith.constant dense<0.000000e+00> : vector<64x64xf32>
    %381 = tpu.matmul %380, %376, %cst_136 {dimension_numbers = #tpu.dot_dimension_numbers<[1], [1], [0], [0], [0, 0, 1, 0], [], []>} : vector<64x32xf32>, vector<64x32xf32>, vector<64x64xf32> -> vector<64x64xf32>
    %cst_137 = arith.constant 0.353553385 : f32
    %382 = vector.broadcast %cst_137 : f32 to vector<64x64xf32>
    %383 = arith.mulf %381, %382 : vector<64x64xf32>
    %384 = arith.addf %383, %323 : vector<64x64xf32>
    %cst_138 = arith.constant dense<0xFF800000> : vector<64xf32>
    %385 = vector.multi_reduction <maximumf>, %384, %cst_138 [1] : vector<64x64xf32> to vector<64xf32>
    %386 = vector.shape_cast %385 : vector<64xf32> to vector<64x1xf32>
    %387 = vector.broadcast %386 : vector<64x1xf32> to vector<64x64xf32>
    %388 = arith.subf %384, %387 : vector<64x64xf32>
    %389 = math.exp %388 : vector<64x64xf32>
    %cst_139 = arith.constant dense<0.000000e+00> : vector<64xf32>
    %390 = vector.multi_reduction <add>, %389, %cst_139 [1] : vector<64x64xf32> to vector<64xf32>
    %391 = vector.shape_cast %390 : vector<64xf32> to vector<64x1xf32>
    %392 = tpu.reciprocal %391 {approx = true} : vector<64x1xf32> -> vector<64x1xf32>
    %393 = vector.broadcast %392 : vector<64x1xf32> to vector<64x64xf32>
    %394 = arith.mulf %389, %393 : vector<64x64xf32>
    %395 = vector.broadcast %22 : vector<1x32xf32> to vector<64x32xf32>
    %396 = arith.mulf %377, %395 : vector<64x32xf32>
    %cst_140 = arith.constant dense<0.000000e+00> : vector<64x32xf32>
    %397 = tpu.matmul %394, %396, %cst_140 {dimension_numbers = #tpu.dot_dimension_numbers<[1], [0], [0], [1], [0, 0, 1, 1], [], []>} : vector<64x64xf32>, vector<64x32xf32>, vector<64x32xf32> -> vector<64x32xf32>
    %398 = arith.addf %378, %397 : vector<64x32xf32>
    %399 = vector.broadcast %30 : vector<1x32xf32> to vector<64x32xf32>
    %400 = arith.mulf %370, %399 : vector<64x32xf32>
    %cst_141 = arith.constant dense<0.000000e+00> : vector<64x64xf32>
    %401 = tpu.matmul %400, %376, %cst_141 {dimension_numbers = #tpu.dot_dimension_numbers<[1], [1], [0], [0], [0, 0, 1, 0], [], []>} : vector<64x32xf32>, vector<64x32xf32>, vector<64x64xf32> -> vector<64x64xf32>
    %cst_142 = arith.constant 0.353553385 : f32
    %402 = vector.broadcast %cst_142 : f32 to vector<64x64xf32>
    %403 = arith.mulf %401, %402 : vector<64x64xf32>
    %404 = arith.addf %403, %323 : vector<64x64xf32>
    %cst_143 = arith.constant dense<0xFF800000> : vector<64xf32>
    %405 = vector.multi_reduction <maximumf>, %404, %cst_143 [1] : vector<64x64xf32> to vector<64xf32>
    %406 = vector.shape_cast %405 : vector<64xf32> to vector<64x1xf32>
    %407 = vector.broadcast %406 : vector<64x1xf32> to vector<64x64xf32>
    %408 = arith.subf %404, %407 : vector<64x64xf32>
    %409 = math.exp %408 : vector<64x64xf32>
    %cst_144 = arith.constant dense<0.000000e+00> : vector<64xf32>
    %410 = vector.multi_reduction <add>, %409, %cst_144 [1] : vector<64x64xf32> to vector<64xf32>
    %411 = vector.shape_cast %410 : vector<64xf32> to vector<64x1xf32>
    %412 = tpu.reciprocal %411 {approx = true} : vector<64x1xf32> -> vector<64x1xf32>
    %413 = vector.broadcast %412 : vector<64x1xf32> to vector<64x64xf32>
    %414 = arith.mulf %409, %413 : vector<64x64xf32>
    %415 = vector.broadcast %30 : vector<1x32xf32> to vector<64x32xf32>
    %416 = arith.mulf %377, %415 : vector<64x32xf32>
    %cst_145 = arith.constant dense<0.000000e+00> : vector<64x32xf32>
    %417 = tpu.matmul %414, %416, %cst_145 {dimension_numbers = #tpu.dot_dimension_numbers<[1], [0], [0], [1], [0, 0, 1, 1], [], []>} : vector<64x64xf32>, vector<64x32xf32>, vector<64x32xf32> -> vector<64x32xf32>
    %418 = arith.addf %398, %417 : vector<64x32xf32>
    %419 = vector.broadcast %38 : vector<1x32xf32> to vector<64x32xf32>
    %420 = arith.mulf %370, %419 : vector<64x32xf32>
    %cst_146 = arith.constant dense<0.000000e+00> : vector<64x64xf32>
    %421 = tpu.matmul %420, %376, %cst_146 {dimension_numbers = #tpu.dot_dimension_numbers<[1], [1], [0], [0], [0, 0, 1, 0], [], []>} : vector<64x32xf32>, vector<64x32xf32>, vector<64x64xf32> -> vector<64x64xf32>
    %cst_147 = arith.constant 0.353553385 : f32
    %422 = vector.broadcast %cst_147 : f32 to vector<64x64xf32>
    %423 = arith.mulf %421, %422 : vector<64x64xf32>
    %424 = arith.addf %423, %323 : vector<64x64xf32>
    %cst_148 = arith.constant dense<0xFF800000> : vector<64xf32>
    %425 = vector.multi_reduction <maximumf>, %424, %cst_148 [1] : vector<64x64xf32> to vector<64xf32>
    %426 = vector.shape_cast %425 : vector<64xf32> to vector<64x1xf32>
    %427 = vector.broadcast %426 : vector<64x1xf32> to vector<64x64xf32>
    %428 = arith.subf %424, %427 : vector<64x64xf32>
    %429 = math.exp %428 : vector<64x64xf32>
    %cst_149 = arith.constant dense<0.000000e+00> : vector<64xf32>
    %430 = vector.multi_reduction <add>, %429, %cst_149 [1] : vector<64x64xf32> to vector<64xf32>
    %431 = vector.shape_cast %430 : vector<64xf32> to vector<64x1xf32>
    %432 = tpu.reciprocal %431 {approx = true} : vector<64x1xf32> -> vector<64x1xf32>
    %433 = vector.broadcast %432 : vector<64x1xf32> to vector<64x64xf32>
    %434 = arith.mulf %429, %433 : vector<64x64xf32>
    %435 = vector.broadcast %38 : vector<1x32xf32> to vector<64x32xf32>
    %436 = arith.mulf %377, %435 : vector<64x32xf32>
    %cst_150 = arith.constant dense<0.000000e+00> : vector<64x32xf32>
    %437 = tpu.matmul %434, %436, %cst_150 {dimension_numbers = #tpu.dot_dimension_numbers<[1], [0], [0], [1], [0, 0, 1, 1], [], []>} : vector<64x64xf32>, vector<64x32xf32>, vector<64x32xf32> -> vector<64x32xf32>
    %438 = arith.addf %418, %437 : vector<64x32xf32>
    %439 = vector.broadcast %46 : vector<1x32xf32> to vector<64x32xf32>
    %440 = arith.mulf %370, %439 : vector<64x32xf32>
    %cst_151 = arith.constant dense<0.000000e+00> : vector<64x64xf32>
    %441 = tpu.matmul %440, %376, %cst_151 {dimension_numbers = #tpu.dot_dimension_numbers<[1], [1], [0], [0], [0, 0, 1, 0], [], []>} : vector<64x32xf32>, vector<64x32xf32>, vector<64x64xf32> -> vector<64x64xf32>
    %cst_152 = arith.constant 0.353553385 : f32
    %442 = vector.broadcast %cst_152 : f32 to vector<64x64xf32>
    %443 = arith.mulf %441, %442 : vector<64x64xf32>
    %444 = arith.addf %443, %323 : vector<64x64xf32>
    %cst_153 = arith.constant dense<0xFF800000> : vector<64xf32>
    %445 = vector.multi_reduction <maximumf>, %444, %cst_153 [1] : vector<64x64xf32> to vector<64xf32>
    %446 = vector.shape_cast %445 : vector<64xf32> to vector<64x1xf32>
    %447 = vector.broadcast %446 : vector<64x1xf32> to vector<64x64xf32>
    %448 = arith.subf %444, %447 : vector<64x64xf32>
    %449 = math.exp %448 : vector<64x64xf32>
    %cst_154 = arith.constant dense<0.000000e+00> : vector<64xf32>
    %450 = vector.multi_reduction <add>, %449, %cst_154 [1] : vector<64x64xf32> to vector<64xf32>
    %451 = vector.shape_cast %450 : vector<64xf32> to vector<64x1xf32>
    %452 = tpu.reciprocal %451 {approx = true} : vector<64x1xf32> -> vector<64x1xf32>
    %453 = vector.broadcast %452 : vector<64x1xf32> to vector<64x64xf32>
    %454 = arith.mulf %449, %453 : vector<64x64xf32>
    %455 = vector.broadcast %46 : vector<1x32xf32> to vector<64x32xf32>
    %456 = arith.mulf %377, %455 : vector<64x32xf32>
    %cst_155 = arith.constant dense<0.000000e+00> : vector<64x32xf32>
    %457 = tpu.matmul %454, %456, %cst_155 {dimension_numbers = #tpu.dot_dimension_numbers<[1], [0], [0], [1], [0, 0, 1, 1], [], []>} : vector<64x64xf32>, vector<64x32xf32>, vector<64x32xf32> -> vector<64x32xf32>
    %458 = arith.addf %438, %457 : vector<64x32xf32>
    %c488 = arith.constant 488 : index
    %c0_156 = arith.constant 0 : index
    %459 = vector.load %arg3[%c488, %c0_156] : memref<720x32xf32, #tpu.memory_space<vmem>>, vector<32x32xf32>
    %cst_157 = arith.constant dense<0.000000e+00> : vector<64x32xf32>
    %460 = tpu.matmul %458, %459, %cst_157 {dimension_numbers = #tpu.dot_dimension_numbers<[1], [0], [0], [1], [0, 0, 1, 1], [], []>} : vector<64x32xf32>, vector<32x32xf32>, vector<64x32xf32> -> vector<64x32xf32>
    %c688 = arith.constant 688 : index
    %c0_158 = arith.constant 0 : index
    %461 = vector.load %arg3[%c688, %c0_158] : memref<720x32xf32, #tpu.memory_space<vmem>>, vector<1x32xf32>
    %462 = vector.broadcast %461 : vector<1x32xf32> to vector<64x32xf32>
    %463 = arith.addf %460, %462 : vector<64x32xf32>
    %c64_159 = arith.constant 64 : index
    %c0_160 = arith.constant 0 : index
    %464 = vector.load %arg5[%c64_159, %c0_160] : memref<128x96xf32, #tpu.memory_space<vmem>>, vector<32x96xf32>
    %c176_161 = arith.constant 176 : index
    %c0_162 = arith.constant 0 : index
    %465 = vector.load %arg4[%c176_161, %c0_162] : memref<288x64xf32, #tpu.memory_space<vmem>>, vector<32x64xf32>
    %c520 = arith.constant 520 : index
    %c0_163 = arith.constant 0 : index
    %466 = vector.load %arg3[%c520, %c0_163] : memref<720x32xf32, #tpu.memory_space<vmem>>, vector<32x32xf32>
    %c704 = arith.constant 704 : index
    %c0_164 = arith.constant 0 : index
    %467 = vector.load %arg3[%c704, %c0_164] : memref<720x32xf32, #tpu.memory_space<vmem>>, vector<1x32xf32>
    %cst_165 = arith.constant dense<0.000000e+00> : vector<64x96xf32>
    %468 = tpu.matmul %463, %464, %cst_165 {dimension_numbers = #tpu.dot_dimension_numbers<[1], [0], [0], [1], [0, 0, 1, 1], [], []>} : vector<64x32xf32>, vector<32x96xf32>, vector<64x96xf32> -> vector<64x96xf32>
    %cst_166 = arith.constant dense<0.000000e+00> : vector<64x64xf32>
    %469 = tpu.matmul %321, %465, %cst_166 {dimension_numbers = #tpu.dot_dimension_numbers<[1], [0], [0], [1], [0, 0, 1, 1], [], []>} : vector<64x32xf32>, vector<32x64xf32>, vector<64x64xf32> -> vector<64x64xf32>
    %470 = vector.extract_strided_slice %468 {offsets = [0, 0], sizes = [64, 32], strides = [1, 1]} : vector<64x96xf32> to vector<64x32xf32>
    %471 = vector.extract_strided_slice %469 {offsets = [0, 0], sizes = [64, 32], strides = [1, 1]} : vector<64x64xf32> to vector<64x32xf32>
    %472 = arith.addf %470, %471 : vector<64x32xf32>
    %473 = arith.negf %472 : vector<64x32xf32>
    %474 = math.exp %473 : vector<64x32xf32>
    %cst_167 = arith.constant 1.000000e+00 : f32
    %475 = vector.broadcast %cst_167 : f32 to vector<64x32xf32>
    %476 = arith.addf %475, %474 : vector<64x32xf32>
    %477 = arith.divf %475, %476 : vector<64x32xf32>
    %478 = vector.extract_strided_slice %468 {offsets = [0, 32], sizes = [64, 32], strides = [1, 1]} : vector<64x96xf32> to vector<64x32xf32>
    %479 = vector.extract_strided_slice %469 {offsets = [0, 32], sizes = [64, 32], strides = [1, 1]} : vector<64x64xf32> to vector<64x32xf32>
    %480 = arith.addf %478, %479 : vector<64x32xf32>
    %481 = vector.broadcast %467 : vector<1x32xf32> to vector<64x32xf32>
    %482 = arith.subf %480, %481 : vector<64x32xf32>
    %483 = arith.negf %482 : vector<64x32xf32>
    %484 = math.exp %483 : vector<64x32xf32>
    %cst_168 = arith.constant 1.000000e+00 : f32
    %485 = vector.broadcast %cst_168 : f32 to vector<64x32xf32>
    %486 = arith.addf %485, %484 : vector<64x32xf32>
    %487 = arith.divf %485, %486 : vector<64x32xf32>
    %488 = vector.extract_strided_slice %468 {offsets = [0, 64], sizes = [64, 32], strides = [1, 1]} : vector<64x96xf32> to vector<64x32xf32>
    %489 = arith.mulf %321, %477 : vector<64x32xf32>
    %cst_169 = arith.constant dense<0.000000e+00> : vector<64x32xf32>
    %490 = tpu.matmul %489, %466, %cst_169 {dimension_numbers = #tpu.dot_dimension_numbers<[1], [0], [0], [1], [0, 0, 1, 1], [], []>} : vector<64x32xf32>, vector<32x32xf32>, vector<64x32xf32> -> vector<64x32xf32>
    %491 = arith.addf %488, %490 : vector<64x32xf32>
    %492 = math.tanh %491 : vector<64x32xf32>
    %cst_170 = arith.constant 1.000000e+00 : f32
    %493 = vector.broadcast %cst_170 : f32 to vector<64x32xf32>
    %494 = arith.subf %493, %487 : vector<64x32xf32>
    %495 = arith.mulf %494, %321 : vector<64x32xf32>
    %496 = arith.mulf %487, %492 : vector<64x32xf32>
    %497 = arith.addf %495, %496 : vector<64x32xf32>
    %c664 = arith.constant 664 : index
    %c0_171 = arith.constant 0 : index
    %498 = vector.load %arg3[%c664, %c0_171] : memref<720x32xf32, #tpu.memory_space<vmem>>, vector<1x32xf32>
    %c672 = arith.constant 672 : index
    %c0_172 = arith.constant 0 : index
    %499 = vector.load %arg3[%c672, %c0_172] : memref<720x32xf32, #tpu.memory_space<vmem>>, vector<1x32xf32>
    %cst_173 = arith.constant dense<0.000000e+00> : vector<64xf32>
    %500 = vector.multi_reduction <add>, %497, %cst_173 [1] : vector<64x32xf32> to vector<64xf32>
    %501 = vector.shape_cast %500 : vector<64xf32> to vector<64x1xf32>
    %cst_174 = arith.constant 3.200000e+01 : f32
    %502 = vector.broadcast %cst_174 : f32 to vector<64x1xf32>
    %503 = arith.divf %501, %502 : vector<64x1xf32>
    %504 = vector.broadcast %503 : vector<64x1xf32> to vector<64x32xf32>
    %505 = arith.subf %497, %504 : vector<64x32xf32>
    %506 = arith.mulf %505, %505 : vector<64x32xf32>
    %cst_175 = arith.constant dense<0.000000e+00> : vector<64xf32>
    %507 = vector.multi_reduction <add>, %506, %cst_175 [1] : vector<64x32xf32> to vector<64xf32>
    %508 = vector.shape_cast %507 : vector<64xf32> to vector<64x1xf32>
    %cst_176 = arith.constant 3.200000e+01 : f32
    %509 = vector.broadcast %cst_176 : f32 to vector<64x1xf32>
    %510 = arith.divf %508, %509 : vector<64x1xf32>
    %cst_177 = arith.constant 9.99999974E-6 : f32
    %511 = vector.broadcast %cst_177 : f32 to vector<64x1xf32>
    %512 = arith.addf %510, %511 : vector<64x1xf32>
    %513 = math.rsqrt %512 : vector<64x1xf32>
    %514 = vector.broadcast %513 : vector<64x1xf32> to vector<64x32xf32>
    %515 = arith.mulf %505, %514 : vector<64x32xf32>
    %516 = vector.broadcast %498 : vector<1x32xf32> to vector<64x32xf32>
    %517 = arith.mulf %515, %516 : vector<64x32xf32>
    %518 = vector.broadcast %499 : vector<1x32xf32> to vector<64x32xf32>
    %519 = arith.addf %517, %518 : vector<64x32xf32>
    %c240 = arith.constant 240 : index
    %c0_178 = arith.constant 0 : index
    %520 = vector.load %arg4[%c240, %c0_178] : memref<288x64xf32, #tpu.memory_space<vmem>>, vector<32x64xf32>
    %c280 = arith.constant 280 : index
    %c0_179 = arith.constant 0 : index
    %521 = vector.load %arg4[%c280, %c0_179] : memref<288x64xf32, #tpu.memory_space<vmem>>, vector<1x64xf32>
    %c584 = arith.constant 584 : index
    %c0_180 = arith.constant 0 : index
    %522 = vector.load %arg3[%c584, %c0_180] : memref<720x32xf32, #tpu.memory_space<vmem>>, vector<64x32xf32>
    %c696 = arith.constant 696 : index
    %c0_181 = arith.constant 0 : index
    %523 = vector.load %arg3[%c696, %c0_181] : memref<720x32xf32, #tpu.memory_space<vmem>>, vector<1x32xf32>
    %cst_182 = arith.constant dense<0.000000e+00> : vector<64x64xf32>
    %524 = tpu.matmul %519, %520, %cst_182 {dimension_numbers = #tpu.dot_dimension_numbers<[1], [0], [0], [1], [0, 0, 1, 1], [], []>} : vector<64x32xf32>, vector<32x64xf32>, vector<64x64xf32> -> vector<64x64xf32>
    %525 = vector.broadcast %521 : vector<1x64xf32> to vector<64x64xf32>
    %526 = arith.addf %524, %525 : vector<64x64xf32>
    %cst_183 = arith.constant 5.000000e-01 : f32
    %527 = vector.broadcast %cst_183 : f32 to vector<64x64xf32>
    %528 = arith.mulf %527, %526 : vector<64x64xf32>
    %cst_184 = arith.constant 4.471500e-02 : f32
    %529 = vector.broadcast %cst_184 : f32 to vector<64x64xf32>
    %530 = arith.mulf %529, %526 : vector<64x64xf32>
    %531 = arith.mulf %530, %526 : vector<64x64xf32>
    %532 = arith.mulf %531, %526 : vector<64x64xf32>
    %533 = arith.addf %526, %532 : vector<64x64xf32>
    %cst_185 = arith.constant 0.797884583 : f32
    %534 = vector.broadcast %cst_185 : f32 to vector<64x64xf32>
    %535 = arith.mulf %534, %533 : vector<64x64xf32>
    %536 = math.tanh %535 : vector<64x64xf32>
    %cst_186 = arith.constant 1.000000e+00 : f32
    %537 = vector.broadcast %cst_186 : f32 to vector<64x64xf32>
    %538 = arith.addf %537, %536 : vector<64x64xf32>
    %539 = arith.mulf %528, %538 : vector<64x64xf32>
    %cst_187 = arith.constant dense<0.000000e+00> : vector<64x32xf32>
    %540 = tpu.matmul %539, %522, %cst_187 {dimension_numbers = #tpu.dot_dimension_numbers<[1], [0], [0], [1], [0, 0, 1, 1], [], []>} : vector<64x64xf32>, vector<64x32xf32>, vector<64x32xf32> -> vector<64x32xf32>
    %541 = vector.broadcast %523 : vector<1x32xf32> to vector<64x32xf32>
    %542 = arith.addf %540, %541 : vector<64x32xf32>
    %c96_188 = arith.constant 96 : index
    %c0_189 = arith.constant 0 : index
    %543 = vector.load %arg5[%c96_188, %c0_189] : memref<128x96xf32, #tpu.memory_space<vmem>>, vector<32x96xf32>
    %c208 = arith.constant 208 : index
    %c0_190 = arith.constant 0 : index
    %544 = vector.load %arg4[%c208, %c0_190] : memref<288x64xf32, #tpu.memory_space<vmem>>, vector<32x64xf32>
    %c552 = arith.constant 552 : index
    %c0_191 = arith.constant 0 : index
    %545 = vector.load %arg3[%c552, %c0_191] : memref<720x32xf32, #tpu.memory_space<vmem>>, vector<32x32xf32>
    %c712 = arith.constant 712 : index
    %c0_192 = arith.constant 0 : index
    %546 = vector.load %arg3[%c712, %c0_192] : memref<720x32xf32, #tpu.memory_space<vmem>>, vector<1x32xf32>
    %cst_193 = arith.constant dense<0.000000e+00> : vector<64x96xf32>
    %547 = tpu.matmul %542, %543, %cst_193 {dimension_numbers = #tpu.dot_dimension_numbers<[1], [0], [0], [1], [0, 0, 1, 1], [], []>} : vector<64x32xf32>, vector<32x96xf32>, vector<64x96xf32> -> vector<64x96xf32>
    %cst_194 = arith.constant dense<0.000000e+00> : vector<64x64xf32>
    %548 = tpu.matmul %497, %544, %cst_194 {dimension_numbers = #tpu.dot_dimension_numbers<[1], [0], [0], [1], [0, 0, 1, 1], [], []>} : vector<64x32xf32>, vector<32x64xf32>, vector<64x64xf32> -> vector<64x64xf32>
    %549 = vector.extract_strided_slice %547 {offsets = [0, 0], sizes = [64, 32], strides = [1, 1]} : vector<64x96xf32> to vector<64x32xf32>
    %550 = vector.extract_strided_slice %548 {offsets = [0, 0], sizes = [64, 32], strides = [1, 1]} : vector<64x64xf32> to vector<64x32xf32>
    %551 = arith.addf %549, %550 : vector<64x32xf32>
    %552 = arith.negf %551 : vector<64x32xf32>
    %553 = math.exp %552 : vector<64x32xf32>
    %cst_195 = arith.constant 1.000000e+00 : f32
    %554 = vector.broadcast %cst_195 : f32 to vector<64x32xf32>
    %555 = arith.addf %554, %553 : vector<64x32xf32>
    %556 = arith.divf %554, %555 : vector<64x32xf32>
    %557 = vector.extract_strided_slice %547 {offsets = [0, 32], sizes = [64, 32], strides = [1, 1]} : vector<64x96xf32> to vector<64x32xf32>
    %558 = vector.extract_strided_slice %548 {offsets = [0, 32], sizes = [64, 32], strides = [1, 1]} : vector<64x64xf32> to vector<64x32xf32>
    %559 = arith.addf %557, %558 : vector<64x32xf32>
    %560 = vector.broadcast %546 : vector<1x32xf32> to vector<64x32xf32>
    %561 = arith.subf %559, %560 : vector<64x32xf32>
    %562 = arith.negf %561 : vector<64x32xf32>
    %563 = math.exp %562 : vector<64x32xf32>
    %cst_196 = arith.constant 1.000000e+00 : f32
    %564 = vector.broadcast %cst_196 : f32 to vector<64x32xf32>
    %565 = arith.addf %564, %563 : vector<64x32xf32>
    %566 = arith.divf %564, %565 : vector<64x32xf32>
    %567 = vector.extract_strided_slice %547 {offsets = [0, 64], sizes = [64, 32], strides = [1, 1]} : vector<64x96xf32> to vector<64x32xf32>
    %568 = arith.mulf %497, %556 : vector<64x32xf32>
    %cst_197 = arith.constant dense<0.000000e+00> : vector<64x32xf32>
    %569 = tpu.matmul %568, %545, %cst_197 {dimension_numbers = #tpu.dot_dimension_numbers<[1], [0], [0], [1], [0, 0, 1, 1], [], []>} : vector<64x32xf32>, vector<32x32xf32>, vector<64x32xf32> -> vector<64x32xf32>
    %570 = arith.addf %567, %569 : vector<64x32xf32>
    %571 = math.tanh %570 : vector<64x32xf32>
    %cst_198 = arith.constant 1.000000e+00 : f32
    %572 = vector.broadcast %cst_198 : f32 to vector<64x32xf32>
    %573 = arith.subf %572, %566 : vector<64x32xf32>
    %574 = arith.mulf %573, %497 : vector<64x32xf32>
    %575 = arith.mulf %566, %571 : vector<64x32xf32>
    %576 = arith.addf %574, %575 : vector<64x32xf32>
    %c88 = arith.constant 88 : index
    %c0_199 = arith.constant 0 : index
    %577 = vector.load %arg3[%c88, %c0_199] : memref<720x32xf32, #tpu.memory_space<vmem>>, vector<8x32xf32>
    %c136_200 = arith.constant 136 : index
    %c0_201 = arith.constant 0 : index
    %578 = vector.load %arg3[%c136_200, %c0_201] : memref<720x32xf32, #tpu.memory_space<vmem>>, vector<1x32xf32>
    %c144_202 = arith.constant 144 : index
    %c0_203 = arith.constant 0 : index
    %579 = vector.load %arg3[%c144_202, %c0_203] : memref<720x32xf32, #tpu.memory_space<vmem>>, vector<1x32xf32>
    %c96_204 = arith.constant 96 : index
    %c0_205 = arith.constant 0 : index
    %580 = vector.load %arg3[%c96_204, %c0_205] : memref<720x32xf32, #tpu.memory_space<vmem>>, vector<32x32xf32>
    %c152 = arith.constant 152 : index
    %c0_206 = arith.constant 0 : index
    %581 = vector.load %arg3[%c152, %c0_206] : memref<720x32xf32, #tpu.memory_space<vmem>>, vector<1x32xf32>
    %c160 = arith.constant 160 : index
    %c0_207 = arith.constant 0 : index
    %582 = vector.load %arg3[%c160, %c0_207] : memref<720x32xf32, #tpu.memory_space<vmem>>, vector<1x32xf32>
    %c168 = arith.constant 168 : index
    %c0_208 = arith.constant 0 : index
    %583 = vector.load %arg3[%c168, %c0_208] : memref<720x32xf32, #tpu.memory_space<vmem>>, vector<1x32xf32>
    %584 = vector.extract_strided_slice %583 {offsets = [0, 0], sizes = [1, 1], strides = [1, 1]} : vector<1x32xf32> to vector<1x1xf32>
    %585 = vector.extract_strided_slice %576 {offsets = [0, 0], sizes = [32, 32], strides = [1, 1]} : vector<64x32xf32> to vector<32x32xf32>
    %cst_209 = arith.constant dense<0.000000e+00> : vector<8x32xf32>
    %586 = tpu.matmul %577, %585, %cst_209 {dimension_numbers = #tpu.dot_dimension_numbers<[1], [1], [0], [0], [0, 0, 1, 0], [], []>} : vector<8x32xf32>, vector<32x32xf32>, vector<8x32xf32> -> vector<8x32xf32>
    %cst_210 = arith.constant dense<0.000000e+00> : vector<8xf32>
    %587 = vector.multi_reduction <add>, %586, %cst_210 [1] : vector<8x32xf32> to vector<8xf32>
    %588 = vector.shape_cast %587 : vector<8xf32> to vector<8x1xf32>
    %cst_211 = arith.constant 3.200000e+01 : f32
    %589 = vector.broadcast %cst_211 : f32 to vector<8x1xf32>
    %590 = arith.divf %588, %589 : vector<8x1xf32>
    %591 = vector.broadcast %590 : vector<8x1xf32> to vector<8x32xf32>
    %592 = arith.subf %586, %591 : vector<8x32xf32>
    %593 = arith.mulf %592, %592 : vector<8x32xf32>
    %cst_212 = arith.constant dense<0.000000e+00> : vector<8xf32>
    %594 = vector.multi_reduction <add>, %593, %cst_212 [1] : vector<8x32xf32> to vector<8xf32>
    %595 = vector.shape_cast %594 : vector<8xf32> to vector<8x1xf32>
    %cst_213 = arith.constant 3.200000e+01 : f32
    %596 = vector.broadcast %cst_213 : f32 to vector<8x1xf32>
    %597 = arith.divf %595, %596 : vector<8x1xf32>
    %cst_214 = arith.constant 9.99999974E-6 : f32
    %598 = vector.broadcast %cst_214 : f32 to vector<8x1xf32>
    %599 = arith.addf %597, %598 : vector<8x1xf32>
    %600 = math.rsqrt %599 : vector<8x1xf32>
    %601 = vector.broadcast %600 : vector<8x1xf32> to vector<8x32xf32>
    %602 = arith.mulf %592, %601 : vector<8x32xf32>
    %603 = vector.broadcast %578 : vector<1x32xf32> to vector<8x32xf32>
    %604 = arith.mulf %602, %603 : vector<8x32xf32>
    %605 = vector.broadcast %579 : vector<1x32xf32> to vector<8x32xf32>
    %606 = arith.addf %604, %605 : vector<8x32xf32>
    %cst_215 = arith.constant dense<0.000000e+00> : vector<32xf32>
    %607 = vector.multi_reduction <add>, %606, %cst_215 [0] : vector<8x32xf32> to vector<32xf32>
    %608 = vector.shape_cast %607 : vector<32xf32> to vector<1x32xf32>
    %cst_216 = arith.constant 8.000000e+00 : f32
    %609 = vector.broadcast %cst_216 : f32 to vector<1x32xf32>
    %610 = arith.divf %608, %609 : vector<1x32xf32>
    %cst_217 = arith.constant dense<0.000000e+00> : vector<1x32xf32>
    %611 = tpu.matmul %610, %580, %cst_217 {dimension_numbers = #tpu.dot_dimension_numbers<[1], [0], [0], [1], [0, 0, 1, 1], [], []>} : vector<1x32xf32>, vector<32x32xf32>, vector<1x32xf32> -> vector<1x32xf32>
    %612 = arith.addf %611, %581 : vector<1x32xf32>
    %cst_218 = arith.constant 5.000000e-01 : f32
    %613 = vector.broadcast %cst_218 : f32 to vector<1x32xf32>
    %614 = arith.mulf %613, %612 : vector<1x32xf32>
    %cst_219 = arith.constant 4.471500e-02 : f32
    %615 = vector.broadcast %cst_219 : f32 to vector<1x32xf32>
    %616 = arith.mulf %615, %612 : vector<1x32xf32>
    %617 = arith.mulf %616, %612 : vector<1x32xf32>
    %618 = arith.mulf %617, %612 : vector<1x32xf32>
    %619 = arith.addf %612, %618 : vector<1x32xf32>
    %cst_220 = arith.constant 0.797884583 : f32
    %620 = vector.broadcast %cst_220 : f32 to vector<1x32xf32>
    %621 = arith.mulf %620, %619 : vector<1x32xf32>
    %622 = math.tanh %621 : vector<1x32xf32>
    %cst_221 = arith.constant 1.000000e+00 : f32
    %623 = vector.broadcast %cst_221 : f32 to vector<1x32xf32>
    %624 = arith.addf %623, %622 : vector<1x32xf32>
    %625 = arith.mulf %614, %624 : vector<1x32xf32>
    %626 = arith.mulf %625, %582 : vector<1x32xf32>
    %cst_222 = arith.constant dense<0.000000e+00> : vector<1xf32>
    %627 = vector.multi_reduction <add>, %626, %cst_222 [1] : vector<1x32xf32> to vector<1xf32>
    %628 = vector.shape_cast %627 : vector<1xf32> to vector<1x1xf32>
    %629 = arith.addf %628, %584 : vector<1x1xf32>
    %c0_223 = arith.constant 0 : index
    %c0_224 = arith.constant 0 : index
    %630 = vector.load %arg8[%c0_223, %c0_224] : memref<2x1xf32, #tpu.memory_space<vmem>>, vector<1x1xf32>
    tpu.vector_store %arg8[%c0_223, %c0_224], %629 {strides = array<i32>} : memref<2x1xf32, #tpu.memory_space<vmem>>, vector<1x1xf32>,
    %631 = vector.extract_strided_slice %576 {offsets = [32, 0], sizes = [32, 32], strides = [1, 1]} : vector<64x32xf32> to vector<32x32xf32>
    %cst_225 = arith.constant dense<0.000000e+00> : vector<8x32xf32>
    %632 = tpu.matmul %577, %631, %cst_225 {dimension_numbers = #tpu.dot_dimension_numbers<[1], [1], [0], [0], [0, 0, 1, 0], [], []>} : vector<8x32xf32>, vector<32x32xf32>, vector<8x32xf32> -> vector<8x32xf32>
    %cst_226 = arith.constant dense<0.000000e+00> : vector<8xf32>
    %633 = vector.multi_reduction <add>, %632, %cst_226 [1] : vector<8x32xf32> to vector<8xf32>
    %634 = vector.shape_cast %633 : vector<8xf32> to vector<8x1xf32>
    %cst_227 = arith.constant 3.200000e+01 : f32
    %635 = vector.broadcast %cst_227 : f32 to vector<8x1xf32>
    %636 = arith.divf %634, %635 : vector<8x1xf32>
    %637 = vector.broadcast %636 : vector<8x1xf32> to vector<8x32xf32>
    %638 = arith.subf %632, %637 : vector<8x32xf32>
    %639 = arith.mulf %638, %638 : vector<8x32xf32>
    %cst_228 = arith.constant dense<0.000000e+00> : vector<8xf32>
    %640 = vector.multi_reduction <add>, %639, %cst_228 [1] : vector<8x32xf32> to vector<8xf32>
    %641 = vector.shape_cast %640 : vector<8xf32> to vector<8x1xf32>
    %cst_229 = arith.constant 3.200000e+01 : f32
    %642 = vector.broadcast %cst_229 : f32 to vector<8x1xf32>
    %643 = arith.divf %641, %642 : vector<8x1xf32>
    %cst_230 = arith.constant 9.99999974E-6 : f32
    %644 = vector.broadcast %cst_230 : f32 to vector<8x1xf32>
    %645 = arith.addf %643, %644 : vector<8x1xf32>
    %646 = math.rsqrt %645 : vector<8x1xf32>
    %647 = vector.broadcast %646 : vector<8x1xf32> to vector<8x32xf32>
    %648 = arith.mulf %638, %647 : vector<8x32xf32>
    %649 = vector.broadcast %578 : vector<1x32xf32> to vector<8x32xf32>
    %650 = arith.mulf %648, %649 : vector<8x32xf32>
    %651 = vector.broadcast %579 : vector<1x32xf32> to vector<8x32xf32>
    %652 = arith.addf %650, %651 : vector<8x32xf32>
    %cst_231 = arith.constant dense<0.000000e+00> : vector<32xf32>
    %653 = vector.multi_reduction <add>, %652, %cst_231 [0] : vector<8x32xf32> to vector<32xf32>
    %654 = vector.shape_cast %653 : vector<32xf32> to vector<1x32xf32>
    %cst_232 = arith.constant 8.000000e+00 : f32
    %655 = vector.broadcast %cst_232 : f32 to vector<1x32xf32>
    %656 = arith.divf %654, %655 : vector<1x32xf32>
    %cst_233 = arith.constant dense<0.000000e+00> : vector<1x32xf32>
    %657 = tpu.matmul %656, %580, %cst_233 {dimension_numbers = #tpu.dot_dimension_numbers<[1], [0], [0], [1], [0, 0, 1, 1], [], []>} : vector<1x32xf32>, vector<32x32xf32>, vector<1x32xf32> -> vector<1x32xf32>
    %658 = arith.addf %657, %581 : vector<1x32xf32>
    %cst_234 = arith.constant 5.000000e-01 : f32
    %659 = vector.broadcast %cst_234 : f32 to vector<1x32xf32>
    %660 = arith.mulf %659, %658 : vector<1x32xf32>
    %cst_235 = arith.constant 4.471500e-02 : f32
    %661 = vector.broadcast %cst_235 : f32 to vector<1x32xf32>
    %662 = arith.mulf %661, %658 : vector<1x32xf32>
    %663 = arith.mulf %662, %658 : vector<1x32xf32>
    %664 = arith.mulf %663, %658 : vector<1x32xf32>
    %665 = arith.addf %658, %664 : vector<1x32xf32>
    %cst_236 = arith.constant 0.797884583 : f32
    %666 = vector.broadcast %cst_236 : f32 to vector<1x32xf32>
    %667 = arith.mulf %666, %665 : vector<1x32xf32>
    %668 = math.tanh %667 : vector<1x32xf32>
    %cst_237 = arith.constant 1.000000e+00 : f32
    %669 = vector.broadcast %cst_237 : f32 to vector<1x32xf32>
    %670 = arith.addf %669, %668 : vector<1x32xf32>
    %671 = arith.mulf %660, %670 : vector<1x32xf32>
    %672 = arith.mulf %671, %582 : vector<1x32xf32>
    %cst_238 = arith.constant dense<0.000000e+00> : vector<1xf32>
    %673 = vector.multi_reduction <add>, %672, %cst_238 [1] : vector<1x32xf32> to vector<1xf32>
    %674 = vector.shape_cast %673 : vector<1xf32> to vector<1x1xf32>
    %675 = arith.addf %674, %584 : vector<1x1xf32>
    %c1 = arith.constant 1 : index
    %c0_239 = arith.constant 0 : index
    %676 = vector.load %arg8[%c1, %c0_239] : memref<2x1xf32, #tpu.memory_space<vmem>>, vector<1x1xf32>
    tpu.vector_store %arg8[%c1, %c0_239], %675 {strides = array<i32>} : memref<2x1xf32, #tpu.memory_space<vmem>>, vector<1x1xf32>,
    return
  }
  func.func @transform_0(%arg0: i32) -> (i32, i32) {
    %c0_i32 = arith.constant 0 : i32
    %c0_i32_0 = arith.constant 0 : i32
    %c0_i32_1 = arith.constant 0 : i32
    return %c0_i32, %c0_i32_0 : i32, i32
  }
  func.func @transform_1(%arg0: i32) -> (i32, i32) {
    %c0_i32 = arith.constant 0 : i32
    %c0_i32_0 = arith.constant 0 : i32
    %c0_i32_1 = arith.constant 0 : i32
    return %c0_i32, %c0_i32_0 : i32, i32
  }
  func.func @transform_2(%arg0: i32) -> (i32, i32) {
    %c0_i32 = arith.constant 0 : i32
    %c0_i32_0 = arith.constant 0 : i32
    %c0_i32_1 = arith.constant 0 : i32
    return %c0_i32, %c0_i32_0 : i32, i32
  }
  func.func @transform_3(%arg0: i32) -> (i32, i32) {
    %c0_i32 = arith.constant 0 : i32
    %c0_i32_0 = arith.constant 0 : i32
    %c0_i32_1 = arith.constant 0 : i32
    return %c0_i32, %c0_i32_0 : i32, i32
  }
  func.func @transform_4(%arg0: i32) -> (i32, i32) {
    %c0_i32 = arith.constant 0 : i32
    %c0_i32_0 = arith.constant 0 : i32
    %c0_i32_1 = arith.constant 0 : i32
    return %c0_i32, %c0_i32_0 : i32, i32
  }
  func.func @transform_5(%arg0: i32) -> (i32, i32) {
    %c0_i32 = arith.constant 0 : i32
    %c0_i32_0 = arith.constant 0 : i32
    %c0_i32_1 = arith.constant 0 : i32
    return %c0_i32, %c0_i32_0 : i32, i32
  }
  func.func @transform_6(%arg0: i32) -> (i32, i32) {
    %c0_i32 = arith.constant 0 : i32
    %c0_i32_0 = arith.constant 0 : i32
    %c0_i32_1 = arith.constant 0 : i32
    return %c0_i32, %c0_i32_0 : i32, i32
  }
  func.func @transform_7(%arg0: i32) -> (i32, i32) {
    %c0_i32 = arith.constant 0 : i32
    %c0_i32_0 = arith.constant 0 : i32
    %c0_i32_1 = arith.constant 0 : i32
    return %c0_i32, %c0_i32_0 : i32, i32
  }
}

</mosaic_0001>

<bundles_post_ra>
// kernel: criticadv_forward.1
= control target key start
LH: loop header
LB: loop body
LE: loop exit
PB: predicated region body
PF: predicated region fallthrough
CT: control target
= control target key end

     0   :  { %vm35_vm0 = vcmask 130048   ;;  %vm252_vm1 = vcmask 261120   ;;  %s10337_s9 = smov 96   ;;  %s10338_s19 = smov 64   ;;  %vm2027_vm13 = vcmask 523264   ;;  %vm2486_vm14 = vcmask 64512   ;;  %s12777_s2 = inlined_call_operand.vmem [shape: f32[720,32], index: 2, kind: input, shape index: {}]   ;;  %s12778_s1 = inlined_call_operand.vmem [shape: f32[32,16], index: 1, kind: input, shape index: {}]   ;;  %s12779_s0 = inlined_call_operand.vmem [shape: f32[16,16], index: 0, kind: input, shape index: {}]   ;;  %s12780_s3 = inlined_call_operand.vmem [shape: f32[288,64], index: 3, kind: input, shape index: {}]   ;;  %s12781_s5 = inlined_call_operand.vmem [shape: f32[16,32], index: 5, kind: input, shape index: {}]   ;;  %s12782_s4 = inlined_call_operand.vmem [shape: f32[128,96], index: 4, kind: input, shape index: {}]   ;;  %s12783_s6 = inlined_call_operand.vmem [shape: f32[64,64], index: 6, kind: input, shape index: {}]   ;;  %s12784_s7 = inlined_call_operand.vmem [shape: f32[2,1], index: 7, kind: output, shape index: {}]  }
   0x1   :  { %v26_v0 = vld [vmem:[%s12777_s2] sm:$0xff]  ;;  %v27_v1 = vld [vmem:[%s12777_s2 + $0x8] sm:$0xff]  ;;  %v123_v7 = vld [vmem:[%s12778_s1 + $0x10] sm:$0xff]  ;;  %vm10340_vm15 = vmmov 0  }
   0x2   :  { %v121_v2 = vld [vmem:[%s12778_s1] sm:$0xff]  ;;  %v9221_v3 = vpack.c.bf16 %v27_v1, %v26_v0  ;;  %v122_v5 = vld [vmem:[%s12778_s1 + $0x8] sm:$0xff]  ;;  %v124_v8 = vld [vmem:[%s12778_s1 + $0x18] sm:$0xff] }
   0x3   :  { %8463 = vmatprep.mubr.msk.f32.mxu1 %vm35_vm0, %v121_v2  ;;  %v29_v4 = vld [vmem:[%s12779_s0] sm:$0xff]  ;;  %v30_v6 = vld [vmem:[%s12779_s0 + $0x8] sm:$0xff]  ;;  %v225_v22 = vld [vmem:[%s12777_s2 + $0x38] sm:$0xff] }
   0x4   :  { %9226 = vmatprep.subr.bf16.mxu1 %v9221_v3  ;;  %9222 = vmatprep.subr.bf16.mxu0 %v9221_v3  ;;  %v7675_v9 = vld [vmem:[%s12777_s2 + $0x80] ss:$0 sm:$0xff]  ;;  %v223_v17 = vld [vmem:[%s12777_s2 + $0x28] sm:$0xff]  ;;  %v224_v24 = vld [vmem:[%s12777_s2 + $0x30] sm:$0xff] }
   0x5   :  { %9228 = vmatpush3.bf16.msra.mxu1 %v9221_v3  ;;  %9224 = vmatpush3.bf16.msra.mxu0 %v9221_v3  ;;  %v222_v13 = vld [vmem:[%s12777_s2 + $0x20] sm:$0xff]  ;;  %v117_v25 = vld [vmem:[%s12777_s2 + $0x10] sm:$0xff]  ;;  %v118_v33 = vld [vmem:[%s12777_s2 + $0x18] sm:$0xff] }
   0x6   :  { %8456 = vmatprep.mubr.msk.f32.mxu0 %vm35_vm0, %v29_v4  ;;  %vm10543_vm2 = vmpackc.low %vm252_vm1, %vm252_vm1 }
   0x8   :  { %8464 = vmatmul.mubr.msk.f32.vlgmr.msra.gmra.mrb[0].mxu1 %vm35_vm0, %v122_v5  ;;  %8457 = vmatmul.mubr.msk.f32.vlgmr.msra.gmra.mrb[0].mxu0 %vm35_vm0, %v30_v6  ;;  %v442_v6 = vld [vmem:[%s12780_s3] sm:$0xff] }
   0x9   :  { %8466 = vmatprep.mubr.msk.f32.mxu1 %vm35_vm0, %v123_v7  ;;  %v443_v7 = vld [vmem:[%s12780_s3 + $0x8] sm:$0xff] }
   0xc   :  { %8467 = vmatmul.mubr.msk.f32.gmra.mrb[2].mxu1 %vm35_vm0, %v124_v8  ;;  %v9237_v8 = vpack.c.bf16 %v443_v7, %v442_v6  ;;  %v7687_v6 = vld [vmem:[%s12780_s3 + $0x80] ss:$0 sm:$0xff] }
   0xe   :  { %9238 = vmatprep.subr.bf16.mxu1 %v9237_v8 }
   0xf   :  { %9240 = vmatpush3.bf16.msra.mxu1 %v9237_v8 }
  0xdb   :  { %v8465_v10 = vpop.f32.mrb[0].mxu1  ;;  %v8458_v11 = vpop.f32.mrb[0].mxu0 }
  0xdc   :  { %v203_v12 = vpop.f32.mrb[1].mxu1  ;;  %v108_v14 = vpop.f32.mrb[1].mxu0  ;;  %v209_v15 = vadd.f32 %v8465_v10, %v7675_v9  ;;  %v114_v31 = vadd.f32 %v8458_v11, %v7675_v9  ;;  %v445_v10 = vld [vmem:[%s12780_s3 + $0x18] sm:$0xff] }
  0xdd   :  { %v204_v16 = vadd.f32 %v7675_v9, %v203_v12  ;;  %v109_v20 = vadd.f32 %v7675_v9, %v108_v14  ;;  %v352_v12 = vld [vmem:[%s12777_s2 + $0xc0] sm:$0xff] }
  0xde   :  { %v10431_v26 = vadd.f32 %v223_v17, %v209_v15  ;;  %v10448_v36 = vadd.f32 %v118_v33, %v114_v31  ;;  %v354_v15 = vld [vmem:[%s12777_s2 + $0xd0] sm:$0xff] }
  0xdf   :  { %v10420_v18 = vadd.f32 %v222_v13, %v204_v16  ;;  %v8468_v19 = vpop.f32.mrb[2].mxu1  ;;  %v10439_v32 = vadd.f32 %v117_v25, %v109_v20  ;;  %v353_v13 = vld [vmem:[%s12777_s2 + $0xc8] sm:$0xff]  ;;  %v355_v16 = vld [vmem:[%s12777_s2 + $0xd8] sm:$0xff] }
  0xe0   :  { %v219_v21 = vadd.f32 %v8468_v19, %v7675_v9  ;;  %v213_v23 = vpop.f32.mrb[3].mxu1  ;;  %v295_v35 = vsel %vm252_vm1, %v10431_v26, 0.0  ;;  %v256_v39 = vsel %vm252_vm1, %v10448_v36, 0.0  ;;  %v9229_v14 = vpack.c.bf16 %v353_v13, %v352_v12 }
  0xe1   :  { %v214_v27 = vadd.f32 %v7675_v9, %v213_v23  ;;  %v292_v28 = vsel %vm252_vm1, %v10420_v18, 0.0  ;;  %v253_v38 = vsel %vm252_vm1, %v10439_v32, 0.0  ;;  %v444_v9 = vld [vmem:[%s12780_s3 + $0x10] sm:$0xff]  ;;  %v9233_v17 = vpack.c.bf16 %v355_v16, %v354_v15 }
  0xe2   :  { %293 = vadd.xlane.f32.xlu0 %v292_v28  ;;  %v10435_v29 = vadd.f32 %v225_v22, %v219_v21  ;;  %v9241_v11 = vpack.c.bf16 %v445_v10, %v444_v9  ;;  %9230 = vmatprep.subr.bf16.mxu0 %v9229_v14 }
  0xe3   :  { %v10437_v30 = vadd.f32 %v224_v24, %v214_v27  ;;  %9232 = vmatpush3.bf16.msra.mxu0 %v9229_v14 }
  0xe4   :  { %v301_v37 = vsel %vm252_vm1, %v10435_v29, 0.0  ;;  %9242 = vmatprep.subr.bf16.mxu1 %v9241_v11  ;;  %9234 = vmatprep.subr.bf16.mxu0 %v9233_v17 }
  0xe5   :  { %v298_v34 = vsel %vm252_vm1, %v10437_v30, 0.0  ;;  %9244 = vmatpush3.bf16.msra.mxu1 %v9241_v11  ;;  %v12795_v11 = vmov 0 }
  0xe6   :  { %299 = vadd.xlane.f32.xlu1 %v298_v34  ;;  %296 = vadd.xlane.f32.xlu0 %v295_v35  ;;  %v12796_v11 = vsel %vm10543_vm2, 4294967295, %v12795_v11 }
  0xe7   :  { %9236 = vmatpush3.bf16.msra.mxu0 %v9233_v17  ;;  %12797 = vst [vmem:[#allocation2_spill] sm:$0xff] %v12796_v11  ;;  %v7684_v17 = vld [vmem:[%s12777_s2 + $0x1a0] ss:$0 sm:$0xff] }
  0xea   :  { %302 = vadd.xlane.f32.xlu1 %v301_v37  ;;  %254 = vadd.xlane.f32.xlu0 %v253_v38 }
  0xee   :  { %257 = vadd.xlane.f32.xlu1 %v256_v39 }
 0x16f   :  { %v294_v40 = vpop.xlane.xlu0 %293 }
 0x170   :  { %v304_v41 = vmul.f32 0.03125, %v294_v40 }
 0x172   :  { %v10457_v42 = vsub.f32 %v10420_v18, %v304_v41 }
 0x173   :  { %v300_v43 = vpop.xlane.xlu1 %299  ;;  %v297_v44 = vpop.xlane.xlu0 %296 }
 0x174   :  { %v306_v45 = vmul.f32 0.03125, %v300_v43  ;;  %v305_v46 = vmul.f32 0.03125, %v297_v44  ;;  %v312_v47 = vmul.f32 %v10457_v42, %v10457_v42  ;;  %v7682_v43 = vld [vmem:[%s12777_s2 + $0x180] ss:$0 sm:$0xff] }
 0x176   :  { %v10462_v48 = vsub.f32 %v10437_v30, %v306_v45  ;;  %v10465_v49 = vsub.f32 %v10431_v26, %v305_v46  ;;  %v316_v50 = vsel %vm252_vm1, %v312_v47, 0.0  ;;  %v7683_v46 = vld [vmem:[%s12777_s2 + $0x188] ss:$0 sm:$0xff] }
 0x177   :  { %v303_v51 = vpop.xlane.xlu1 %302  ;;  %317 = vadd.xlane.f32.xlu0 %v316_v50  ;;  %v255_v52 = vpop.xlane.xlu0 %254 }
 0x178   :  { %v307_v53 = vmul.f32 0.03125, %v303_v51  ;;  %v260_v54 = vmul.f32 0.03125, %v255_v52  ;;  %v313_v55 = vmul.f32 %v10465_v49, %v10465_v49  ;;  %v314_v56 = vmul.f32 %v10462_v48, %v10462_v48 }
 0x17a   :  { %v10473_v57 = vsub.f32 %v10435_v29, %v307_v53  ;;  %v10476_v58 = vsub.f32 %v10439_v32, %v260_v54  ;;  %v319_v59 = vsel %vm252_vm1, %v313_v55, 0.0  ;;  %v322_v60 = vsel %vm252_vm1, %v314_v56, 0.0 }
 0x17b   :  { %320 = vadd.xlane.f32.xlu1 %v319_v59  ;;  %v258_v61 = vpop.xlane.xlu1 %257  ;;  %323 = vadd.xlane.f32.xlu0 %v322_v60 }
 0x17c   :  { %v261_v62 = vmul.f32 0.03125, %v258_v61  ;;  %v315_v63 = vmul.f32 %v10473_v57, %v10473_v57  ;;  %v264_v0 = vmul.f32 %v10476_v58, %v10476_v58 }
 0x17e   :  { %v10485_v1 = vsub.f32 %v10448_v36, %v261_v62  ;;  %v325_v2 = vsel %vm252_vm1, %v315_v63, 0.0  ;;  %v266_v3 = vsel %vm252_vm1, %v264_v0, 0.0 }
 0x17f   :  { %326 = vadd.xlane.f32.xlu1 %v325_v2  ;;  %267 = vadd.xlane.f32.xlu0 %v266_v3 }
 0x180   :  { %v265_v4 = vmul.f32 %v10485_v1, %v10485_v1 }
 0x182   :  { %v269_v5 = vsel %vm252_vm1, %v265_v4, 0.0 }
 0x183   :  { %270 = vadd.xlane.f32.xlu1 %v269_v5 }
 0x204   :  { %v318_v19 = vpop.xlane.xlu0 %317 }
 0x205   :  { %v328_v20 = vmul.f32 0.03125, %v318_v19 }
 0x207   :  { %v332_v21 = vadd.f32 1e-05, %v328_v20 }
 0x208   :  { %v321_v22 = vpop.xlane.xlu1 %320  ;;  %v324_v23 = vpop.xlane.xlu0 %323 }
 0x209   :  { %9883 = vrsqrt.f32 %v332_v21  ;;  %v329_v24 = vmul.f32 0.03125, %v321_v22  ;;  %v330_v25 = vmul.f32 0.03125, %v324_v23  ;;  %v12785_v21 = vmov 0.0  }
 0x20b   :  { %v333_v27 = vadd.f32 1e-05, %v329_v24  ;;  %v334_v28 = vadd.f32 1e-05, %v330_v25 }
 0x20c   :  { %v327_v31 = vpop.xlane.xlu1 %326  ;;  %v268_v33 = vpop.xlane.xlu0 %267 }
 0x20d   :  { %9885 = vrsqrt.f32 %v333_v27  ;;  %v331_v34 = vmul.f32 0.03125, %v327_v31  ;;  %v272_v35 = vmul.f32 0.03125, %v268_v33 }
 0x20e   :  { %9887 = vrsqrt.f32 %v334_v28 }
 0x20f   :  { %v335_v37 = vadd.f32 1e-05, %v331_v34  ;;  %v274_v38 = vadd.f32 1e-05, %v272_v35 }
 0x210   :  { %v271_v39 = vpop.xlane.xlu1 %270 }
 0x211   :  { %9889 = vrsqrt.f32 %v335_v37  ;;  %v273_v40 = vmul.f32 0.03125, %v271_v39 }
 0x212   :  { %9891 = vrsqrt.f32 %v274_v38 }
 0x213   :  { %v9884_v41 = vpop.eup %9883  ;;  %v275_v44 = vadd.f32 1e-05, %v273_v40 }
 0x214   :  { %v340_v45 = vmul.f32 %v9884_v41, %v10457_v42 }
 0x215   :  { %9893 = vrsqrt.f32 %v275_v44 }
 0x216   :  { %v344_v47 = vmul.f32 %v7682_v43, %v340_v45  ;;  %v249_v45 = vld [vmem:[%s12781_s5 + $0x8] sm:$0xff] }
 0x217   :  { %v9886_v50 = vpop.eup %9885 }
 0x218   :  { %v9888_v51 = vpop.eup %9887  ;;  %v341_v52 = vmul.f32 %v9886_v50, %v10465_v49  ;;  %v348_v53 = vadd.f32 %v7683_v46, %v344_v47 }
 0x219   :  { %v342_v54 = vmul.f32 %v9888_v51, %v10462_v48 }
 0x21a   :  { %v345_v55 = vmul.f32 %v7682_v43, %v341_v52  ;;  %8488 = vmatprep.mubr.msk.f32.mxu1 %vm252_vm1, %v348_v53 }
 0x21b   :  { %v9890_v56 = vpop.eup %9889  ;;  %v346_v59 = vmul.f32 %v7682_v43, %v342_v54 }
 0x21c   :  { %v9892_v60 = vpop.eup %9891  ;;  %v349_v42 = vadd.f32 %v7683_v46, %v345_v55  ;;  %v343_v61 = vmul.f32 %v9890_v56, %v10473_v57 }
 0x21d   :  { %v350_v62 = vadd.f32 %v7683_v46, %v346_v59  ;;  %v278_v63 = vmul.f32 %v9892_v60, %v10476_v58  ;;  %v230_v58 = vlaneseq }
 0x21e   :  { %8489 = vmatmul.mubr.msk.f32.vlgmr.msra.gmra.mrb[4].mxu1 %vm252_vm1, %v349_v42  ;;  %v347_v0 = vmul.f32 %v7682_v43, %v343_v61 }
 0x21f   :  { %v9894_v2 = vpop.eup %9893  ;;  %8491 = vmatprep.mubr.msk.f32.mxu1 %vm252_vm1, %v350_v62  ;;  %v284_v49 = vmul.f32 %v7682_v43, %v278_v63  ;;  %v231_v7 = vand.u32 127, %v230_v58 }
 0x220   :  { %v279_v48 = vmul.f32 %v9894_v2, %v10485_v1  ;;  %v351_v3 = vadd.f32 %v7683_v46, %v347_v0 }
 0x221   :  { %v290_v4 = vadd.f32 %v7683_v46, %v284_v49  ;;  %vm236_vm3 = vcmp.ge.s32.totalorder %v231_v7, 8  ;;  %vm237_vm4 = vcmp.lt.s32.totalorder %v231_v7, 16  ;;  %vm233_vm5 = vcmp.lt.s32.totalorder %v231_v7, 8 }
 0x222   :  { %8492 = vmatmul.mubr.msk.f32.gmra.mrb[6].mxu1 %vm252_vm1, %v351_v3  ;;  %v285_v5 = vmul.f32 %v7682_v43, %v279_v48  ;;  %vm238_vm6 = vmand %vm236_vm3, %vm237_vm4  ;;  %v10567_v22 = vsel %vm233_vm5, 1.0, %v12785_v21  ;;  %vm240_vm7 = vcmp.ge.s32.totalorder %v231_v7, 16  ;;  %vm241_vm8 = vcmp.lt.s32.totalorder %v231_v7, 24 }
 0x223   :  { %8477 = vmatprep.mubr.msk.f32.mxu0 %vm252_vm1, %v290_v4  ;;  %v10570_v23 = vsel %vm238_vm6, 1.0, %v12785_v21  ;;  %vm242_vm9 = vmand %vm240_vm7, %vm241_vm8  ;;  %vm244_vm10 = vcmp.ge.s32.totalorder %v231_v7, 24  ;;  %vm245_vm11 = vcmp.lt.s32.totalorder %v231_v7, 32 }
 0x224   :  { %v291_v57 = vadd.f32 %v7683_v46, %v285_v5  ;;  %v10587_v33 = vsel %vm242_vm9, 1.0, %v12785_v21  ;;  %vm246_vm12 = vmand %vm244_vm10, %vm245_vm11  ;;  %v248_v46 = vld [vmem:[%s12781_s5] sm:$0xff]  ;;  %s10336_s5 = smov 32  }
 0x225   :  { %v10604_v38 = vsel %vm246_vm12, 1.0, %v12785_v21 }
 0x226   :  { %8478 = vmatmul.mubr.msk.f32.vlgmr.msra.gmra.mrb[2].mxu0 %vm252_vm1, %v291_v57 }
 0x2f1   :  { %v8490_v8 = vpop.f32.mrb[4].mxu1 }
 0x2f2   :  { %v10537_v9 = vadd.f32 %v8490_v8, %v7687_v6  ;;  %v529_v1 = vpop.f32.mrb[5].mxu1 }
 0x2f3   :  { %v10539_v10 = vadd.f32 %v7687_v6, %v529_v1 }
 0x2f5   :  { %v9245_v12 = vpack.c.bf16 %v10537_v9, %v10539_v10  ;;  %v8493_v13 = vpop.f32.mrb[6].mxu1 }
 0x2f6   :  { %v10549_v14 = vadd.f32 %v8493_v13, %v7687_v6  ;;  %v539_v15 = vpop.f32.mrb[7].mxu1 }
 0x2f7   :  { %v10551_v16 = vadd.f32 %v7687_v6, %v539_v15  ;;  %9247 = vmatprep.subr.msk.bf16.mxu0 %vm10543_vm2, %v9245_v12  ;;  %9259 = vmatprep.subr.msk.bf16.mxu1 %vm10543_vm2, %v9245_v12 }
 0x2f8   :  { %9250 = vmatpush3.bf16.xpose.msk.msra.mxu0 %vm10543_vm2, %v9245_v12  ;;  %9262 = vmatpush3.bf16.xpose.msk.msra.mxu1 %vm10543_vm2, %v9245_v12 }
 0x2f9   :  { %v9251_v19 = vpack.c.bf16 %v10549_v14, %v10551_v16  ;;  %v8479_v20 = vpop.f32.mrb[2].mxu0 }
 0x2fa   :  { %v433_v24 = vpop.f32.mrb[3].mxu0  ;;  %v439_v31 = vadd.f32 %v8479_v20, %v7684_v17 }
 0x2fb   :  { %v434_v25 = vadd.f32 %v7684_v17, %v433_v24  ;;  %9253 = vmatprep.subr.msk.bf16.mxu0 %vm10543_vm2, %v9251_v19  ;;  %9265 = vmatprep.subr.msk.bf16.mxu1 %vm10543_vm2, %v9251_v19  ;;  %v9738_v17 = vpack.i.bf16 %v10604_v38, %v10587_v33 }
 0x2fc   :  { %v549_v34 = vmul.f32 %v439_v31, %v10567_v22  ;;  %v678_v35 = vmul.f32 %v439_v31, %v10570_v23  ;;  %v989_v39 = vmul.f32 %v439_v31, %v10587_v33  ;;  %v1205_v41 = vmul.f32 %v439_v31, %v10604_v38 }
 0x2fd   :  { %v548_v27 = vmul.f32 %v434_v25, %v10567_v22  ;;  %v677_v28 = vmul.f32 %v434_v25, %v10570_v23  ;;  %v988_v37 = vmul.f32 %v434_v25, %v10587_v33  ;;  %v1204_v40 = vmul.f32 %v434_v25, %v10604_v38 }
 0x2ff   :  { %8502 = vmatprep.mubr.msk.f32.mxu0 %vm252_vm1, %v548_v27  ;;  %8513 = vmatprep.mubr.msk.f32.mxu1 %vm252_vm1, %v677_v28 }
 0x300   :  { %9256 = vmatpush3.bf16.xpose.msk.msra.mxu0 %vm10543_vm2, %v9251_v19  ;;  %9268 = vmatpush3.bf16.xpose.msk.msra.mxu1 %vm10543_vm2, %v9251_v19 }
 0x301   :  { %9287 = vmatprep.subr.msk.bf16.mxu1 %vm10543_vm2, %v9245_v12 }
 0x307   :  { %8503 = vmatmul.mubr.msk.f32.vlgmr.msra.gmra.mrb[4].mxu0 %vm252_vm1, %v549_v34  ;;  %8514 = vmatmul.mubr.msk.f32.vlgmr.msra.gmra.mrb[8].mxu1 %vm252_vm1, %v678_v35 }
 0x308   :  { %9290 = vmatpush3.bf16.xpose.msk.msra.mxu1 %vm10543_vm2, %v9245_v12  ;;  %8546 = vmatprep.mubr.msk.f32.mxu1 %vm252_vm1, %v988_v37 }
 0x309   :  { %9293 = vmatprep.subr.msk.bf16.mxu1 %vm10543_vm2, %v9251_v19 }
 0x310   :  { %9296 = vmatpush3.bf16.xpose.msk.msra.mxu1 %vm10543_vm2, %v9251_v19 }
 0x311   :  { %9307 = vmatprep.subr.msk.bf16.mxu1 %vm10543_vm2, %v9245_v12 }
 0x317   :  { %8547 = vmatmul.mubr.msk.f32.vlgmr.msra.gmra.mrb[10].mxu1 %vm252_vm1, %v989_v39 }
 0x318   :  { %9310 = vmatpush3.bf16.xpose.msk.msra.mxu1 %vm10543_vm2, %v9245_v12  ;;  %8568 = vmatprep.mubr.msk.f32.mxu1 %vm252_vm1, %v1204_v40 }
 0x319   :  { %9313 = vmatprep.subr.msk.bf16.mxu1 %vm10543_vm2, %v9251_v19 }
 0x320   :  { %9316 = vmatpush3.bf16.xpose.msk.msra.mxu1 %vm10543_vm2, %v9251_v19  ;;  %v9733_v19 = vpack.i.bf16 %v10567_v22, %v10570_v23 }
 0x327   :  { %8569 = vmatmul.mubr.msk.f32.vlgmr.msra.gmra.mrb[12].mxu1 %vm252_vm1, %v1205_v41 }
 0x3da   :  { %v8504_v43 = vpop.f32.mrb[4].mxu0  ;;  %v8515_v44 = vpop.f32.mrb[8].mxu1 }
 0x3db   :  { %v644_v47 = vmul.f32 0.35355338, %v8504_v43  ;;  %v761_v50 = vmul.f32 0.35355338, %v8515_v44  ;;  %v634_v51 = vpop.f32.mrb[5].mxu0  ;;  %v751_v52 = vpop.f32.mrb[9].mxu1 }
 0x3dc   :  { %v643_v53 = vmul.f32 0.35355338, %v634_v51  ;;  %v760_v54 = vmul.f32 0.35355338, %v751_v52 }
 0x3dd   :  { %v10624_v55 = vadd.f32 %v761_v50, %v249_v45  ;;  %v10630_v60 = vadd.f32 %v644_v47, %v249_v45 }
 0x3de   :  { %v10626_v56 = vadd.f32 %v760_v54, %v248_v46  ;;  %v10634_v61 = vadd.f32 %v643_v53, %v248_v46 }
 0x3df   :  { %v767_v59 = vsel %vm252_vm1, %v10624_v55, -inf  ;;  %v650_v62 = vsel %vm252_vm1, %v10630_v60, -inf }
 0x3e0   :  { %768 = vmax.xlane.f32.xlu1 %v767_v59  ;;  %v764_v42 = vsel %vm252_vm1, %v10626_v56, -inf  ;;  %v647_v63 = vsel %vm252_vm1, %v10634_v61, -inf }
 0x3e1   :  { %765 = vmax.xlane.f32.xlu0 %v764_v42 }
 0x3e4   :  { %651 = vmax.xlane.f32.xlu1 %v650_v62 }
 0x3e5   :  { %648 = vmax.xlane.f32.xlu0 %v647_v63 }
 0x3ea   :  { %v8548_v0 = vpop.f32.mrb[10].mxu1 }
 0x3eb   :  { %v1072_v2 = vmul.f32 0.35355338, %v8548_v0  ;;  %v1062_v49 = vpop.f32.mrb[11].mxu1 }
 0x3ec   :  { %v1071_v48 = vmul.f32 0.35355338, %v1062_v49 }
 0x3ed   :  { %v10640_v3 = vadd.f32 %v1072_v2, %v249_v45 }
 0x3ee   :  { %v1073_v4 = vadd.f32 %v1071_v48, %v248_v46 }
 0x3ef   :  { %v1078_v5 = vsel %vm252_vm1, %v10640_v3, -inf }
 0x3f0   :  { %1079 = vmax.xlane.f32.xlu1 %v1078_v5  ;;  %v1075_v57 = vsel %vm252_vm1, %v1073_v4, -inf }
 0x3f1   :  { %1076 = vmax.xlane.f32.xlu0 %v1075_v57 }
 0x3fa   :  { %v8570_v58 = vpop.f32.mrb[12].mxu1 }
 0x3fb   :  { %v1288_v6 = vmul.f32 0.35355338, %v8570_v58  ;;  %v1278_v7 = vpop.f32.mrb[13].mxu1 }
 0x3fc   :  { %v1287_v8 = vmul.f32 0.35355338, %v1278_v7 }
 0x3fd   :  { %v1290_v1 = vadd.f32 %v1288_v6, %v249_v45 }
 0x3fe   :  { %v10645_v12 = vadd.f32 %v1287_v8, %v248_v46 }
 0x3ff   :  { %v1294_v13 = vsel %vm252_vm1, %v1290_v1, -inf }
 0x400   :  { %1295 = vmax.xlane.f32.xlu1 %v1294_v13  ;;  %v1291_v15 = vsel %vm252_vm1, %v10645_v12, -inf }
 0x401   :  { %1292 = vmax.xlane.f32.xlu0 %v1291_v15 }
 0x411   :  { %9739 = vrot.lane.b32.xlu1 %v9738_v17, %s10336_s5 }
 0x417   :  { %9734 = vrot.lane.b32.xlu0 %v9733_v19, %s10336_s5 }
 0x46d   :  { %v769_v20 = vpop.xlane.xlu1 %768 }
 0x46e   :  { %v766_v24 = vpop.xlane.xlu0 %765  ;;  %v771_v49 = vsub.f32 %v10624_v55, %v769_v20 }
 0x46f   :  { %v770_v13 = vsub.f32 %v10626_v56, %v766_v24 }
 0x470   :  { %v774_v48 = vmul.f32 1.442695, %v771_v49 }
 0x471   :  { %v652_v25 = vpop.xlane.xlu1 %651  ;;  %v772_v19 = vmul.f32 1.442695, %v770_v13 }
 0x472   :  { %v649_v27 = vpop.xlane.xlu0 %648  ;;  %9895 = vpow2.f32 %v774_v48  ;;  %v654_v6 = vsub.f32 %v10630_v60, %v652_v25 }
 0x473   :  { %v653_v5 = vsub.f32 %v10634_v61, %v649_v27 }
 0x474   :  { %v657_v15 = vmul.f32 1.442695, %v654_v6 }
 0x475   :  { %v655_v57 = vmul.f32 1.442695, %v653_v5 }
 0x477   :  { %9897 = vpow2.f32 %v655_v57 }
 0x47d   :  { %v10656_v28 = vpop.xlane.xlu1 %1079 }
 0x47e   :  { %v1077_v31 = vpop.xlane.xlu0 %1076 }
 0x47f   :  { %v1081_v58 = vsub.f32 %v1073_v4, %v1077_v31 }
 0x481   :  { %v1083_v7 = vmul.f32 1.442695, %v1081_v58 }
 0x483   :  { %9899 = vpow2.f32 %v1083_v7 }
 0x484   :  { %9901 = vpow2.f32 %v657_v15 }
 0x48d   :  { %v1296_v34 = vpop.xlane.xlu1 %1295 }
 0x48e   :  { %v10658_v35 = vpop.xlane.xlu0 %1292  ;;  %v1298_v8 = vsub.f32 %v1290_v1, %v1296_v34 }
 0x490   :  { %v1301_v17 = vmul.f32 1.442695, %v1298_v8 }
 0x491   :  { %v9740_v39 = vpop.permute.xlu1 %9739 }
 0x492   :  { %v9735_v37 = vpop.permute.xlu0 %9734  ;;  %v10672_v47 = vunpack.i.l.bf16 %v9740_v39  ;;  %9903 = vpow2.f32 %v1301_v17  ;;  %v10719_v34 = vunpack.i.h.bf16 %v9740_v39  ;;  %v1082_v39 = vsub.f32 %v10640_v3, %v10656_v28 }
 0x493   :  { %v10660_v40 = vunpack.i.h.bf16 %v9735_v37  ;;  %v10662_v41 = vunpack.i.l.bf16 %v9735_v37  ;;  %v10695_v37 = vpop.eup %9895  ;;  %9905 = vpow2.f32 %v772_v19 }
 0x494   :  { %v1101_v63 = vmul.f32 %v10672_v47, %v10539_v10  ;;  %v1102_v0 = vmul.f32 %v10672_v47, %v10537_v9  ;;  %v779_v55 = vsel %vm252_vm1, %v10695_v37, 0.0  ;;  %v10699_v61 = vpop.eup %9897 }
 0x495   :  { %v792_v43 = vmul.f32 %v10662_v41, %v10551_v16  ;;  %v793_v44 = vmul.f32 %v10662_v41, %v10549_v14  ;;  %v790_v45 = vmul.f32 %v10662_v41, %v10539_v10  ;;  %v791_v46 = vmul.f32 %v10662_v41, %v10537_v9  ;;  %v10703_v4 = vpop.eup %9899 }
 0x496   :  { %v675_v50 = vmul.f32 %v10660_v40, %v10551_v16  ;;  %v676_v51 = vmul.f32 %v10660_v40, %v10549_v14  ;;  %v673_v54 = vmul.f32 %v10660_v40, %v10539_v10  ;;  %v674_v59 = vmul.f32 %v10660_v40, %v10537_v9  ;;  %v10705_v56 = vpop.eup %9901 }
 0x497   :  { %v9748_v52 = vpack.i.bf16 %v793_v44, %v792_v43  ;;  %v9743_v53 = vpack.i.bf16 %v791_v46, %v790_v45  ;;  %v9763_v2 = vpack.i.bf16 %v1102_v0, %v1101_v63  ;;  %v659_v60 = vsel %vm252_vm1, %v10699_v61, 0.0 }
 0x498   :  { %v9758_v42 = vpack.i.bf16 %v676_v51, %v675_v50  ;;  %v9753_v62 = vpack.i.bf16 %v674_v59, %v673_v54  ;;  %v1087_v1 = vsel %vm252_vm1, %v10703_v4, 0.0  ;;  %v662_v24 = vsel %vm252_vm1, %v10705_v56, 0.0 }
 0x499   :  { %9749 = vrot.lane.b32.xlu1 %v9748_v52, %s10337_s9  ;;  %9744 = vrot.lane.b32.xlu0 %v9743_v53, %s10337_s9  ;;  %v1103_v43 = vmul.f32 %v10672_v47, %v10551_v16  ;;  %v1104_v44 = vmul.f32 %v10672_v47, %v10549_v14  ;;  %v1317_v46 = vmul.f32 %v10719_v34, %v10539_v10  ;;  %v1085_v52 = vmul.f32 1.442695, %v1082_v39 }
 0x49a   :  { %v1318_v50 = vmul.f32 %v10719_v34, %v10537_v9  ;;  %v1297_v53 = vsub.f32 %v10645_v12, %v10658_v35  ;;  %v1319_v0 = vmul.f32 %v10719_v34, %v10551_v16 }
 0x49b   :  { %v9768_v45 = vpack.i.bf16 %v1104_v44, %v1103_v43  ;;  %9907 = vpow2.f32 %v1085_v52 }
 0x49c   :  { %v10709_v20 = vpop.eup %9903  ;;  %v9773_v51 = vpack.i.bf16 %v1318_v50, %v1317_v46  ;;  %v1299_v54 = vmul.f32 1.442695, %v1297_v53 }
 0x49d   :  { %9759 = vrot.lane.b32.xlu1 %v9758_v42, %s10337_s9  ;;  %9754 = vrot.lane.b32.xlu0 %v9753_v62, %s10337_s9  ;;  %v10713_v25 = vpop.eup %9905  ;;  %v1306_v27 = vsel %vm252_vm1, %v10709_v20, 0.0 }
 0x49e   :  { %v776_v31 = vsel %vm252_vm1, %v10713_v25, 0.0  ;;  %9909 = vpow2.f32 %v1299_v54 }
 0x4a1   :  { %9764 = vrot.lane.b32.xlu1 %v9763_v2, %s10337_s9  ;;  %v1320_v2 = vmul.f32 %v10719_v34, %v10549_v14 }
 0x4a3   :  { %v9778_v6 = vpack.i.bf16 %v1320_v2, %v1319_v0 }
 0x4a5   :  { %v10735_v59 = vpop.eup %9907 }
 0x4a6   :  { %v1090_v9 = vsel %vm252_vm1, %v10735_v59, 0.0 }
 0x4a8   :  { %v10739_v10 = vpop.eup %9909 }
 0x4a9   :  { %v1303_v42 = vsel %vm252_vm1, %v10739_v10, 0.0 }
 0x4bc   :  { %780 = vadd.xlane.f32.xlu0 %v779_v55 }
 0x4c0   :  { %660 = vadd.xlane.f32.xlu0 %v659_v60 }
 0x4c4   :  { %1088 = vadd.xlane.f32.xlu0 %v1087_v1 }
 0x4c5   :  { %663 = vadd.xlane.f32.xlu1 %v662_v24 }
 0x4c8   :  { %1307 = vadd.xlane.f32.xlu0 %v1306_v27 }
 0x4c9   :  { %777 = vadd.xlane.f32.xlu1 %v776_v31 }
 0x4da   :  { %9769 = vrot.lane.b32.xlu1 %v9768_v45, %s10337_s9 }
 0x4de   :  { %9774 = vrot.lane.b32.xlu0 %v9773_v51, %s10337_s9 }
 0x4fe   :  { %1091 = vadd.xlane.f32.xlu1 %v1090_v9 }
 0x502   :  { %1304 = vadd.xlane.f32.xlu1 %v1303_v42 }
 0x50b   :  { %v9750_v3 = vpop.permute.xlu1 %9749  ;;  %v9745_v28 = vpop.permute.xlu0 %9744 }
 0x50c   :  { %v9752_v62 = vunpack.i.h.bf16 %v9750_v3  ;;  %v9751_v63 = vunpack.i.l.bf16 %v9750_v3  ;;  %v9747_v12 = vunpack.i.h.bf16 %v9745_v28  ;;  %v9746_v35 = vunpack.i.l.bf16 %v9745_v28 }
 0x50e   :  { %v9269_v49 = vpack.c.bf16 %v9747_v12, %v9746_v35  ;;  %v9273_v58 = vpack.c.bf16 %v9752_v62, %v9751_v63 }
 0x50f   :  { %v9755_v48 = vpop.permute.xlu0 %9754  ;;  %v9760_v8 = vpop.permute.xlu1 %9759 }
 0x510   :  { %v9757_v5 = vunpack.i.h.bf16 %v9755_v48  ;;  %v9756_v57 = vunpack.i.l.bf16 %v9755_v48  ;;  %9270 = vmatprep.subr.bf16.mxu0 %v9269_v49  ;;  %v9762_v24 = vunpack.i.h.bf16 %v9760_v8  ;;  %v9761_v27 = vunpack.i.l.bf16 %v9760_v8  ;;  %v1420_v48 = vld [vmem:[%s12777_s2 + $0xe0] sm:$0xff] }
 0x511   :  { %9272 = vmatpush3.bf16.msra.mxu0 %v9269_v49 }
 0x512   :  { %9274 = vmatprep.subr.bf16.mxu0 %v9273_v58  ;;  %v9277_v7 = vpack.c.bf16 %v9757_v5, %v9756_v57  ;;  %v9281_v51 = vpack.c.bf16 %v9762_v24, %v9761_v27  ;;  %v1421_v5 = vld [vmem:[%s12777_s2 + $0xe8] sm:$0xff] }
 0x513   :  { %9779 = vrot.lane.b32.xlu1 %v9778_v6, %s10337_s9  ;;  %v9765_v16 = vpop.permute.xlu1 %9764 }
 0x514   :  { %v9767_v46 = vunpack.i.h.bf16 %v9765_v16  ;;  %v9766_v50 = vunpack.i.l.bf16 %v9765_v16 }
 0x515   :  { %9276 = vmatpush3.bf16.msra.mxu0 %v9273_v58 }
 0x516   :  { %9278 = vmatprep.subr.bf16.mxu0 %v9277_v7 }
 0x549   :  { %v781_v13 = vpop.xlane.xlu0 %780 }
 0x54a   :  { %9911 = vrcp.f32 %v781_v13  ;;  %v1423_v13 = vld [vmem:[%s12777_s2 + $0xf8] sm:$0xff] }
 0x54d   :  { %v661_v17 = vpop.xlane.xlu0 %660 }
 0x54e   :  { %9913 = vrcp.f32 %v661_v17  ;;  %v1515_v17 = vld [vmem:[%s12780_s3 + $0x28] sm:$0xff] }
 0x551   :  { %v1089_v19 = vpop.xlane.xlu0 %1088 }
 0x552   :  { %v664_v15 = vpop.xlane.xlu1 %663 }
 0x554   :  { %v9912_v55 = vpop.eup %9911 }
 0x555   :  { %v785_v43 = vmul.f32 %v9912_v55, %v10695_v37  ;;  %v1308_v44 = vpop.xlane.xlu0 %1307  ;;  %v9297_v37 = vpack.c.bf16 %v9767_v46, %v9766_v50  ;;  %v7724_v46 = vld [vmem:[%s12777_s2 + $0x1a8] ss:$0 sm:$0xff] }
 0x556   :  { %v778_v14 = vpop.xlane.xlu1 %777 }
 0x557   :  { %9915 = vrcp.f32 %v778_v14 }
 0x558   :  { %9917 = vrcp.f32 %v664_v15  ;;  %v9914_v60 = vpop.eup %9913 }
 0x559   :  { %9919 = vrcp.f32 %v1089_v19  ;;  %v667_v45 = vmul.f32 %v9914_v60, %v10699_v61  ;;  %v9775_v9 = vpop.permute.xlu0 %9774  ;;  %v1511_v19 = vld [vmem:[%s12782_s4 + $0x8] sm:$0xff]  ;;  %v1516_v60 = vld [vmem:[%s12780_s3 + $0x30] sm:$0xff] }
 0x55a   :  { %v9770_v39 = vpop.permute.xlu1 %9769  ;;  %v9777_v3 = vunpack.i.h.bf16 %v9775_v9  ;;  %v9776_v28 = vunpack.i.l.bf16 %v9775_v9  ;;  %v1520_v9 = vld [vmem:[%s12777_s2 + $0x110] sm:$0xff] }
 0x55b   :  { %v9771_v54 = vunpack.i.l.bf16 %v9770_v39 }
 0x55c   :  { %v9317_v63 = vpack.c.bf16 %v9777_v3, %v9776_v28 }
 0x561   :  { %v9916_v1 = vpop.eup %9915 }
 0x562   :  { %v784_v31 = vmul.f32 %v9916_v1, %v10713_v25  ;;  %v9918_v52 = vpop.eup %9917  ;;  %v9772_v25 = vunpack.i.h.bf16 %v9770_v39  ;;  %v1517_v1 = vld [vmem:[%s12780_s3 + $0x38] sm:$0xff] }
 0x563   :  { %v9920_v53 = vpop.eup %9919  ;;  %v668_v61 = vmul.f32 %v9918_v52, %v10705_v56 }
 0x564   :  { %8524 = vmatprep.mubr.msk.f32.mxu0 %vm252_vm1, %v784_v31  ;;  %v1095_v42 = vmul.f32 %v9920_v53, %v10703_v4  ;;  %v9301_v62 = vpack.c.bf16 %v9772_v25, %v9771_v54  ;;  %v9345_v31 = vpack.c.bf16 %v1517_v1, %v1516_v60  ;;  %v1518_v54 = vld [vmem:[%s12777_s2 + $0x100] sm:$0xff] }
 0x565   :  { %8525 = vmatmul.mubr.msk.f32.vlgmr.msra.gmra.mrb[6].mxu0 %vm252_vm1, %v785_v43  ;;  %v1512_v43 = vld [vmem:[%s12782_s4 + $0x10] sm:$0xff] }
 0x566   :  { %9280 = vmatpush3.bf16.msra.mxu0 %v9277_v7  ;;  %8535 = vmatprep.mubr.msk.f32.mxu0 %vm252_vm1, %v667_v45  ;;  %v9325_v7 = vpack.c.bf16 %v1421_v5, %v1420_v48 }
 0x567   :  { %9282 = vmatprep.subr.bf16.mxu0 %v9281_v51 }
 0x56a   :  { %9284 = vmatpush3.bf16.msra.mxu0 %v9281_v51 }
 0x56b   :  { %9298 = vmatprep.subr.bf16.mxu0 %v9297_v37 }
 0x56d   :  { %8536 = vmatmul.mubr.msk.f32.vlgmr.msra.gmra.mrb[6].mxu0 %vm252_vm1, %v668_v61 }
 0x56e   :  { %9300 = vmatpush3.bf16.msra.mxu0 %v9297_v37  ;;  %8557 = vmatprep.mubr.msk.f32.mxu0 %vm252_vm1, %v1095_v42  ;;  %v1519_v37 = vld [vmem:[%s12777_s2 + $0x108] sm:$0xff]  ;;  %v1521_v42 = vld [vmem:[%s12777_s2 + $0x118] sm:$0xff] }
 0x56f   :  { %9302 = vmatprep.subr.bf16.mxu0 %v9301_v62  ;;  %v9349_v61 = vpack.c.bf16 %v1519_v37, %v1518_v54  ;;  %v9353_v3 = vpack.c.bf16 %v1521_v42, %v1520_v9 }
 0x572   :  { %9304 = vmatpush3.bf16.msra.mxu0 %v9301_v62 }
 0x573   :  { %9318 = vmatprep.subr.bf16.mxu0 %v9317_v63 }
 0x58b   :  { %v1092_v12 = vpop.xlane.xlu1 %1091 }
 0x58c   :  { %9921 = vrcp.f32 %v1092_v12 }
 0x58f   :  { %v1305_v35 = vpop.xlane.xlu1 %1304 }
 0x590   :  { %9923 = vrcp.f32 %v1305_v35 }
 0x591   :  { %9925 = vrcp.f32 %v1308_v44  ;;  %v1513_v44 = vld [vmem:[%s12782_s4 + $0x18] sm:$0xff] }
 0x592   :  { %v9337_v45 = vpack.c.bf16 %v1513_v44, %v1512_v43 }
 0x593   :  { %v9780_v56 = vpop.permute.xlu1 %9779 }
 0x594   :  { %v9782_v0 = vunpack.i.h.bf16 %v9780_v56  ;;  %v9781_v4 = vunpack.i.l.bf16 %v9780_v56 }
 0x596   :  { %v9922_v2 = vpop.eup %9921  ;;  %v9321_v57 = vpack.c.bf16 %v9782_v0, %v9781_v4 }
 0x597   :  { %v1096_v49 = vmul.f32 %v9922_v2, %v10735_v59  ;;  %v1422_v59 = vld [vmem:[%s12777_s2 + $0xf0] sm:$0xff] }
 0x598   :  { %v9329_v15 = vpack.c.bf16 %v1423_v13, %v1422_v59 }
 0x599   :  { %8558 = vmatmul.mubr.msk.f32.vlgmr.msra.gmra.mrb[6].mxu0 %vm252_vm1, %v1096_v49 }
 0x59a   :  { %v9924_v58 = vpop.eup %9923  ;;  %9320 = vmatpush3.bf16.msra.mxu0 %v9317_v63 }
 0x59b   :  { %9322 = vmatprep.subr.bf16.mxu0 %v9321_v57  ;;  %v1311_v6 = vmul.f32 %v9924_v58, %v10739_v10  ;;  %v9926_v8 = vpop.eup %9925  ;;  %v1514_v10 = vld [vmem:[%s12780_s3 + $0x20] sm:$0xff] }
 0x59c   :  { %v1312_v16 = vmul.f32 %v9926_v8, %v10709_v20  ;;  %v9341_v14 = vpack.c.bf16 %v1515_v17, %v1514_v10  ;;  %v1510_v20 = vld [vmem:[%s12782_s4] sm:$0xff]  ;;  %v7733_v8 = vld [vmem:[%s12777_s2 + $0x1b8] ss:$0 sm:$0xff] }
 0x59d   :  { %8579 = vmatprep.mubr.msk.f32.mxu0 %vm252_vm1, %v1311_v6  ;;  %v9333_v55 = vpack.c.bf16 %v1511_v19, %v1510_v20 }
 0x59e   :  { %9324 = vmatpush3.bf16.msra.mxu0 %v9321_v57 }
 0x59f   :  { %9326 = vmatprep.subr.bf16.mxu0 %v9325_v7  ;;  %9334 = vmatprep.subr.bf16.mxu1 %v9333_v55 }
 0x5a0   :  { %9336 = vmatpush3.bf16.msra.mxu1 %v9333_v55 }
 0x5a1   :  { %8580 = vmatmul.mubr.msk.f32.vlgmr.msra.gmra.mrb[6].mxu0 %vm252_vm1, %v1312_v16  ;;  %9338 = vmatprep.subr.bf16.mxu1 %v9337_v45 }
 0x5a2   :  { %9328 = vmatpush3.bf16.msra.mxu0 %v9325_v7 }
 0x5a3   :  { %9330 = vmatprep.subr.bf16.mxu0 %v9329_v15 }
 0x5a4   :  { %9340 = vmatpush3.bf16.msra.mxu1 %v9337_v45 }
 0x5a5   :  { %9350 = vmatprep.subr.bf16.mxu1 %v9349_v61 }
 0x5a6   :  { %9332 = vmatpush3.bf16.msra.mxu0 %v9329_v15 }
 0x5a7   :  { %9342 = vmatprep.subr.bf16.mxu0 %v9341_v14 }
 0x674   :  { %v8581_v24 = vpop.f32.mrb[6].mxu0 }
 0x675   :  { %v1409_v27 = vpop.f32.mrb[7].mxu0 }
 0x676   :  { %8590 = vmatprep.mubr.msk.f32.mxu0 %vm252_vm1, %v1409_v27 }
 0x677   :  { %8591 = vmatmul.mubr.msk.f32.vlgmr.msra.gmra.mrb[8].mxu0 %vm252_vm1, %v8581_v24 }
 0x678   :  { %9344 = vmatpush3.bf16.msra.mxu0 %v9341_v14  ;;  %8612 = vmatprep.mubr.msk.f32.mxu0 %vm252_vm1, %v10439_v32 }
 0x679   :  { %9346 = vmatprep.subr.bf16.mxu0 %v9345_v31 }
 0x67c   :  { %9348 = vmatpush3.bf16.msra.mxu0 %v9345_v31 }
 0x67f   :  { %8613 = vmatmul.mubr.msk.f32.vlgmr.msra.gmra.mrb[10].mxu0 %vm252_vm1, %v10448_v36 }
 0x74a   :  { %v8592_v50 = vpop.f32.mrb[8].mxu0 }
 0x74b   :  { %v1501_v51 = vpop.f32.mrb[9].mxu0  ;;  %v1507_v52 = vadd.f32 %v8592_v50, %v7724_v46 }
 0x74c   :  { %v1502_v39 = vadd.f32 %v7724_v46, %v1501_v51 }
 0x74e   :  { %8601 = vmatprep.mubr.msk.f32.mxu1 %vm252_vm1, %v1502_v39 }
 0x74f   :  { %8602 = vmatmul.mubr.msk.f32.vlgmr.msra.gmra.mrb[14].mxu1 %vm252_vm1, %v1507_v52 }
 0x750   :  { %9352 = vmatpush3.bf16.msra.mxu1 %v9349_v61 }
 0x751   :  { %9354 = vmatprep.subr.bf16.mxu1 %v9353_v3 }
 0x752   :  { %v8614_v53 = vpop.f32.mrb[10].mxu0 }
 0x753   :  { %v1676_v25 = vpop.f32.mrb[11].mxu0 }
 0x754   :  { %9356 = vmatpush3.bf16.msra.mxu1 %v9353_v3 }
 0x822   :  { %v8603_v28 = vpop.f32.mrb[14].mxu1 }
 0x823   :  { %v1686_v62 = vadd.f32 %v8614_v53, %v8603_v28  ;;  %v1595_v63 = vpop.f32.mrb[15].mxu1 }
 0x824   :  { %v1685_v12 = vadd.f32 %v1676_v25, %v1595_v63 }
 0x825   :  { %v7732_v35 = vmul.f32 -1.442695, %v1686_v62 }
 0x826   :  { %v7731_v56 = vmul.f32 -1.442695, %v1685_v12 }
 0x827   :  { %9927 = vpow2.f32 %v7732_v35 }
 0x828   :  { %9929 = vpow2.f32 %v7731_v56 }
 0x831   :  { %v9928_v0 = vpop.eup %9927 }
 0x832   :  { %v9930_v4 = vpop.eup %9929  ;;  %v1694_v2 = vadd.f32 1.0, %v9928_v0 }
 0x833   :  { %v1693_v49 = vadd.f32 1.0, %v9930_v4 }
 0x834   :  { %9931 = vrcp.f32 %v1694_v2 }
 0x835   :  { %9933 = vrcp.f32 %v1693_v49 }
 0x83e   :  { %v9932_v48 = vpop.eup %9931 }
 0x83f   :  { %v9934_v5 = vpop.eup %9933  ;;  %v1722_v58 = vmul.f32 %v9932_v48, %v10448_v36 }
 0x840   :  { %v1721_v57 = vmul.f32 %v9934_v5, %v10439_v32 }
 0x842   :  { %8623 = vmatprep.mubr.msk.f32.mxu1 %vm252_vm1, %v1721_v57  ;;  %v7739_v57 = vld [vmem:[%s12777_s2 + $0x198] ss:$0 sm:$0xff] }
 0x843   :  { %8624 = vmatmul.mubr.msk.f32.vlgmr.msra.gmra.mrb[16].mxu1 %vm252_vm1, %v1722_v58  ;;  %v7738_v58 = vld [vmem:[%s12777_s2 + $0x190] ss:$0 sm:$0xff] }
 0x916   :  { %v8625_v6 = vpop.f32.mrb[16].mxu1 }
 0x917   :  { %1808 = vrot.lane.b32.xlu1 %v8625_v6, %s10338_s19  ;;  %v1795_v7 = vpop.f32.mrb[17].mxu1  ;;  %v1902_v6 = vld [vmem:[%s12780_s3 + $0x60] sm:$0xff] }
 0x918   :  { %1806 = vrot.lane.b32.xlu0 %v1795_v7, %s10338_s19  ;;  %v1903_v7 = vld [vmem:[%s12780_s3 + $0x68] sm:$0xff] }
 0x91b   :  { %1818 = vrot.lane.b32.xlu1 %v10439_v32, %s10336_s5 }
 0x91c   :  { %1704 = vrot.lane.b32.xlu0 %v7733_v8, %s10336_s5  ;;  %v9357_v8 = vpack.c.bf16 %v1903_v7, %v1902_v6 }
 0x91e   :  { %9358 = vmatprep.subr.bf16.mxu0 %v9357_v8 }
 0x91f   :  { %1820 = vrot.lane.b32.xlu1 %v10448_v36, %s10336_s5  ;;  %9360 = vmatpush3.bf16.msra.mxu0 %v9357_v8 }
 0x989   :  { %v1809_v59 = vpop.permute.xlu1 %1808 }
 0x98a   :  { %v1807_v13 = vpop.permute.xlu0 %1806  ;;  %v1813_v15 = vadd.f32 %v8603_v28, %v1809_v59 }
 0x98b   :  { %v1812_v16 = vadd.f32 %v1807_v13, %v1595_v63 }
 0x98d   :  { %9935 = vtanh.f32 %v1812_v16  ;;  %v1819_v44 = vpop.permute.xlu1 %1818 }
 0x98e   :  { %9937 = vtanh.f32 %v1813_v15  ;;  %v1705_v14 = vpop.permute.xlu0 %1704 }
 0x98f   :  { %v1707_v20 = vsub.f32 %v1685_v12, %v1705_v14  ;;  %v1708_v32 = vsub.f32 %v1686_v62, %v1705_v14  ;;  %v1904_v14 = vld [vmem:[%s12780_s3 + $0x70] sm:$0xff] }
 0x991   :  { %v7734_v19 = vmul.f32 -1.442695, %v1707_v20  ;;  %v7735_v55 = vmul.f32 -1.442695, %v1708_v32  ;;  %v1821_v52 = vpop.permute.xlu1 %1820  ;;  %v1905_v20 = vld [vmem:[%s12780_s3 + $0x78] sm:$0xff] }
 0x992   :  { %v9361_v32 = vpack.c.bf16 %v1905_v20, %v1904_v14 }
 0x993   :  { %9939 = vpow2.f32 %v7734_v19 }
 0x994   :  { %9941 = vpow2.f32 %v7735_v55  ;;  %9362 = vmatprep.subr.bf16.mxu0 %v9361_v32 }
 0x995   :  { %9364 = vmatpush3.bf16.msra.mxu0 %v9361_v32 }
 0x997   :  { %v9936_v10 = vpop.eup %9935 }
 0x998   :  { %1828 = vrot.lane.b32.xlu0 %v9936_v10, %s10337_s9  ;;  %v9938_v17 = vpop.eup %9937 }
 0x99c   :  { %1830 = vrot.lane.b32.xlu0 %v9938_v17, %s10337_s9 }
 0x99d   :  { %v9940_v36 = vpop.eup %9939 }
 0x99e   :  { %v1715_v60 = vadd.f32 1.0, %v9940_v36  ;;  %v9942_v1 = vpop.eup %9941 }
 0x99f   :  { %v1716_v24 = vadd.f32 1.0, %v9942_v1 }
 0x9a0   :  { %9943 = vrcp.f32 %v1715_v60 }
 0x9a1   :  { %9945 = vrcp.f32 %v1716_v24 }
 0x9aa   :  { %v9944_v27 = vpop.eup %9943 }
 0x9ab   :  { %v1816_v31 = vsub.f32 1.0, %v9944_v27  ;;  %v9946_v43 = vpop.eup %9945 }
 0x9ac   :  { %v1817_v46 = vsub.f32 1.0, %v9946_v43 }
 0x9ad   :  { %v1824_v50 = vmul.f32 %v1819_v44, %v1816_v31 }
 0x9ae   :  { %v1825_v25 = vmul.f32 %v1821_v52, %v1817_v46  ;;  %v1909_v52 = vld [vmem:[%s12777_s2 + $0x150] sm:$0xff] }
 0xa0a   :  { %v1829_v45 = vpop.permute.xlu0 %1828 }
 0xa0b   :  { %v1834_v51 = vmul.f32 %v9944_v27, %v1829_v45 }
 0xa0d   :  { %v10839_v39 = vadd.f32 %v1834_v51, %v1824_v50  ;;  %v1907_v50 = vld [vmem:[%s12777_s2 + $0x140] sm:$0xff]  ;;  %v1908_v51 = vld [vmem:[%s12777_s2 + $0x148] sm:$0xff] }
 0xa0e   :  { %v1831_v53 = vpop.permute.xlu0 %1830 }
 0xa0f   :  { %v1835_v54 = vmul.f32 %v9946_v43, %v1831_v53  ;;  %1842 = vrot.lane.b32.xlu1 %v10839_v39, %s10337_s9  ;;  %v9365_v53 = vpack.c.bf16 %v1908_v51, %v1907_v50  ;;  %v2115_v50 = vld [vmem:[%s12780_s3 + $0x50] sm:$0xff]  ;;  %v2116_v51 = vld [vmem:[%s12780_s3 + $0x58] sm:$0xff] }
 0xa11   :  { %v10843_v37 = vadd.f32 %v1835_v54, %v1825_v25  ;;  %v1910_v25 = vld [vmem:[%s12777_s2 + $0x158] sm:$0xff]  ;;  %9366 = vmatprep.subr.bf16.mxu1 %v9365_v53 }
 0xa12   :  { %v9369_v54 = vpack.c.bf16 %v1910_v25, %v1909_v52  ;;  %9368 = vmatpush3.bf16.msra.mxu1 %v9365_v53 }
 0xa13   :  { %1844 = vrot.lane.b32.xlu0 %v10843_v37, %s10337_s9 }
 0xa14   :  { %9370 = vmatprep.subr.bf16.mxu1 %v9369_v54 }
 0xa16   :  { %9372 = vmatpush3.bf16.msra.mxu1 %v9369_v54  ;;  %v9393_v54 = vpack.c.bf16 %v2116_v51, %v2115_v50 }
 0xa81   :  { %v10847_v9 = vpop.permute.xlu1 %1842 }
 0xa82   :  { %v1848_v61 = vsel %vm252_vm1, %v10847_v9, 0.0 }
 0xa83   :  { %1849 = vadd.xlane.f32.xlu1 %v1848_v61  ;;  %v1911_v61 = vld [vmem:[%s12777_s2 + $0x160] sm:$0xff] }
 0xa85   :  { %v10851_v42 = vpop.permute.xlu0 %1844 }
 0xa86   :  { %v1851_v3 = vsel %vm252_vm1, %v10851_v42, 0.0 }
 0xa87   :  { %1852 = vadd.xlane.f32.xlu0 %v1851_v3  ;;  %v1912_v3 = vld [vmem:[%s12777_s2 + $0x168] sm:$0xff] }
 0xb10   :  { %v1850_v28 = vpop.xlane.xlu1 %1849 }
 0xb11   :  { %v1854_v62 = vmul.f32 0.03125, %v1850_v28  ;;  %v9373_v28 = vpack.c.bf16 %v1912_v3, %v1911_v61 }
 0xb13   :  { %v1856_v63 = vsub.f32 %v10839_v39, %v1854_v62  ;;  %v1913_v62 = vld [vmem:[%s12777_s2 + $0x170] sm:$0xff]  ;;  %9374 = vmatprep.subr.bf16.mxu1 %v9373_v28 }
 0xb14   :  { %v1853_v12 = vpop.xlane.xlu0 %1852  ;;  %9376 = vmatpush3.bf16.msra.mxu1 %v9373_v28 }
 0xb15   :  { %v1855_v35 = vmul.f32 0.03125, %v1853_v12  ;;  %v1858_v56 = vmul.f32 %v1856_v63, %v1856_v63 }
 0xb17   :  { %v1857_v0 = vsub.f32 %v10843_v37, %v1855_v35  ;;  %1862 = vrot.lane.b32.xlu0 %v1858_v56, %s10337_s9  ;;  %v2109_v35 = vld [vmem:[%s12782_s4 + $0x20] sm:$0xff]  ;;  %v2110_v56 = vld [vmem:[%s12782_s4 + $0x28] sm:$0xff] }
 0xb19   :  { %v1859_v4 = vmul.f32 %v1857_v0, %v1857_v0 }
 0xb1b   :  { %1864 = vrot.lane.b32.xlu1 %v1859_v4, %s10337_s9  ;;  %v7740_v4 = vld [vmem:[%s12780_s3 + $0x88] ss:$0 sm:$0xff] }
 0xb89   :  { %v1863_v2 = vpop.permute.xlu0 %1862 }
 0xb8a   :  { %v1868_v49 = vsel %vm252_vm1, %v1863_v2, 0.0 }
 0xb8b   :  { %1869 = vadd.xlane.f32.xlu1 %v1868_v49 }
 0xb8d   :  { %v1865_v48 = vpop.permute.xlu1 %1864 }
 0xb8e   :  { %v1871_v5 = vsel %vm252_vm1, %v1865_v48, 0.0 }
 0xb8f   :  { %1872 = vadd.xlane.f32.xlu0 %v1871_v5 }
 0xb9c   :  { %1897 = vrot.lane.b32.xlu1 %v7739_v57, %s10336_s5 }
 0xba5   :  { %1887 = vrot.lane.b32.xlu0 %v7738_v58, %s10336_s5 }
 0xc18   :  { %v1870_v59 = vpop.xlane.xlu1 %1869 }
 0xc19   :  { %v1874_v13 = vmul.f32 0.03125, %v1870_v59 }
 0xc1b   :  { %v1876_v16 = vadd.f32 1e-05, %v1874_v13 }
 0xc1c   :  { %v1873_v15 = vpop.xlane.xlu0 %1872  ;;  %v1898_v60 = vpop.permute.xlu1 %1897 }
 0xc1d   :  { %9947 = vrsqrt.f32 %v1876_v16  ;;  %v1875_v10 = vmul.f32 0.03125, %v1873_v15 }
 0xc1f   :  { %v1877_v17 = vadd.f32 1e-05, %v1875_v10 }
 0xc20   :  { %v1888_v55 = vpop.permute.xlu0 %1887 }
 0xc21   :  { %9949 = vrsqrt.f32 %v1877_v17 }
 0xc27   :  { %v9948_v19 = vpop.eup %9947 }
 0xc28   :  { %v1880_v36 = vmul.f32 %v9948_v19, %v1856_v63  ;;  %v1914_v63 = vld [vmem:[%s12777_s2 + $0x178] sm:$0xff] }
 0xc29   :  { %v9377_v12 = vpack.c.bf16 %v1914_v63, %v1913_v62 }
 0xc2a   :  { %v1890_v1 = vmul.f32 %v1888_v55, %v1880_v36 }
 0xc2b   :  { %v9950_v24 = vpop.eup %9949  ;;  %9378 = vmatprep.subr.bf16.mxu1 %v9377_v12 }
 0xc2c   :  { %v1881_v27 = vmul.f32 %v9950_v24, %v1857_v0  ;;  %v1900_v31 = vadd.f32 %v1898_v60, %v1890_v1  ;;  %9380 = vmatpush3.bf16.msra.mxu1 %v9377_v12  ;;  %v9381_v0 = vpack.c.bf16 %v2110_v56, %v2109_v35  ;;  %v2111_v1 = vld [vmem:[%s12782_s4 + $0x30] sm:$0xff]  ;;  %v2112_v24 = vld [vmem:[%s12782_s4 + $0x38] sm:$0xff] }
 0xc2e   :  { %v1891_v43 = vmul.f32 %v1888_v55, %v1881_v27  ;;  %1922 = vrot.lane.b32.xlu1 %v1900_v31, %s10337_s9  ;;  %9382 = vmatprep.subr.bf16.mxu0 %v9381_v0  ;;  %v9385_v27 = vpack.c.bf16 %v2112_v24, %v2111_v1  ;;  %v2113_v31 = vld [vmem:[%s12780_s3 + $0x40] sm:$0xff] }
 0xc30   :  { %v1901_v44 = vadd.f32 %v1898_v60, %v1891_v43  ;;  %v2114_v43 = vld [vmem:[%s12780_s3 + $0x48] sm:$0xff] }
 0xc32   :  { %1924 = vrot.lane.b32.xlu0 %v1901_v44, %s10337_s9  ;;  %v9389_v44 = vpack.c.bf16 %v2114_v43, %v2113_v31 }
 0xca0   :  { %v1923_v45 = vpop.permute.xlu1 %1922 }
 0xca1   :  { %8634 = vmatprep.mubr.msk.f32.mxu0 %vm252_vm1, %v1923_v45  ;;  %v7743_v45 = vld [vmem:[%s12777_s2 + $0x1b0] ss:$0 sm:$0xff] }
 0xca4   :  { %v1925_v46 = vpop.permute.xlu0 %1924 }
 0xca5   :  { %8635 = vmatmul.mubr.msk.f32.vlgmr.msra.gmra.mrb[12].mxu0 %vm252_vm1, %v1925_v46 }
 0xca6   :  { %9384 = vmatpush3.bf16.msra.mxu0 %v9381_v0 }
 0xca7   :  { %9386 = vmatprep.subr.bf16.mxu0 %v9385_v27 }
 0xcaa   :  { %9388 = vmatpush3.bf16.msra.mxu0 %v9385_v27 }
 0xcab   :  { %9390 = vmatprep.subr.bf16.mxu0 %v9389_v44 }
 0xd78   :  { %v8636_v2 = vpop.f32.mrb[12].mxu0 }
 0xd79   :  { %v2002_v49 = vadd.f32 %v8636_v2, %v7740_v4  ;;  %v1996_v48 = vpop.f32.mrb[13].mxu0 }
 0xd7a   :  { %v1997_v5 = vadd.f32 %v7740_v4, %v1996_v48  ;;  %v2119_v48 = vld [vmem:[%s12777_s2 + $0x130] sm:$0xff] }
 0xd7b   :  { %v2008_v57 = vmul.f32 0.044715, %v2002_v49  ;;  %v2006_v55 = vmul.f32 0.5, %v2002_v49 }
 0xd7c   :  { %v2007_v58 = vmul.f32 0.044715, %v1997_v5  ;;  %v2005_v32 = vmul.f32 0.5, %v1997_v5 }
 0xd7d   :  { %v2010_v6 = vmul.f32 %v2008_v57, %v2002_v49  ;;  %v2120_v57 = vld [vmem:[%s12777_s2 + $0x138] sm:$0xff] }
 0xd7e   :  { %v2009_v7 = vmul.f32 %v2007_v58, %v1997_v5  ;;  %v9401_v58 = vpack.c.bf16 %v2120_v57, %v2119_v48 }
 0xd7f   :  { %v2012_v8 = vmul.f32 %v2010_v6, %v2002_v49 }
 0xd80   :  { %v2011_v59 = vmul.f32 %v2009_v7, %v1997_v5 }
 0xd81   :  { %v2014_v13 = vadd.f32 %v2012_v8, %v2002_v49 }
 0xd82   :  { %v2013_v16 = vadd.f32 %v2011_v59, %v1997_v5 }
 0xd83   :  { %v2016_v15 = vmul.f32 0.7978846, %v2014_v13 }
 0xd84   :  { %v2015_v10 = vmul.f32 0.7978846, %v2013_v16 }
 0xd85   :  { %9951 = vtanh.f32 %v2016_v15 }
 0xd86   :  { %9953 = vtanh.f32 %v2015_v10 }
 0xd8f   :  { %v9952_v17 = vpop.eup %9951 }
 0xd90   :  { %v9954_v14 = vpop.eup %9953  ;;  %v2020_v20 = vadd.f32 1.0, %v9952_v17 }
 0xd91   :  { %v2019_v19 = vadd.f32 1.0, %v9954_v14 }
 0xd92   :  { %v2022_v60 = vmul.f32 %v2020_v20, %v2006_v55  ;;  %v7752_v20 = vld [vmem:[%s12777_s2 + $0x1c0] ss:$0 sm:$0xff] }
 0xd93   :  { %v2021_v36 = vmul.f32 %v2019_v19, %v2005_v32 }
 0xd95   :  { %8653 = vmatprep.mubr.msk.f32.mxu1 %vm2027_vm13, %v2021_v36 }
 0xd96   :  { %8654 = vmatmul.mubr.msk.f32.vlgmr.msra.gmra.mrb[18].mxu1 %vm2027_vm13, %v2022_v60 }
 0xe69   :  { %v8655_v46 = vpop.f32.mrb[18].mxu1 }
 0xe6a   :  { %v2100_v52 = vpop.f32.mrb[19].mxu1  ;;  %v2106_v25 = vadd.f32 %v8655_v46, %v7743_v45 }
 0xe6b   :  { %v2101_v53 = vadd.f32 %v7743_v45, %v2100_v52 }
 0xe6d   :  { %8664 = vmatprep.mubr.msk.f32.mxu0 %vm252_vm1, %v2101_v53 }
 0xe6e   :  { %8665 = vmatmul.mubr.msk.f32.vlgmr.msra.gmra.mrb[14].mxu0 %vm252_vm1, %v2106_v25 }
 0xe6f   :  { %9392 = vmatpush3.bf16.msra.mxu0 %v9389_v44  ;;  %8675 = vmatprep.mubr.msk.f32.mxu0 %vm252_vm1, %v10847_v9  ;;  %v2117_v9 = vld [vmem:[%s12777_s2 + $0x120] sm:$0xff] }
 0xe70   :  { %9394 = vmatprep.subr.bf16.mxu0 %v9393_v54 }
 0xe73   :  { %9396 = vmatpush3.bf16.msra.mxu0 %v9393_v54 }
 0xe76   :  { %8676 = vmatmul.mubr.msk.f32.vlgmr.msra.gmra.mrb[16].mxu0 %vm252_vm1, %v10851_v42  ;;  %v2118_v42 = vld [vmem:[%s12777_s2 + $0x128] sm:$0xff] }
 0xe77   :  { %v9397_v5 = vpack.c.bf16 %v2118_v42, %v2117_v9 }
 0xe79   :  { %9398 = vmatprep.subr.bf16.mxu1 %v9397_v5 }
 0xe7a   :  { %9400 = vmatpush3.bf16.msra.mxu1 %v9397_v5 }
 0xe7b   :  { %9402 = vmatprep.subr.bf16.mxu1 %v9401_v58 }
 0xe7e   :  { %9404 = vmatpush3.bf16.msra.mxu1 %v9401_v58 }
 0xf41   :  { %v8666_v61 = vpop.f32.mrb[14].mxu0 }
 0xf42   :  { %v2194_v3 = vpop.f32.mrb[15].mxu0 }
 0xf49   :  { %v8677_v28 = vpop.f32.mrb[16].mxu0 }
 0xf4a   :  { %v2283_v62 = vadd.f32 %v8677_v28, %v8666_v61  ;;  %v2273_v63 = vpop.f32.mrb[17].mxu0 }
 0xf4b   :  { %v2282_v12 = vadd.f32 %v2273_v63, %v2194_v3 }
 0xf4c   :  { %v7751_v35 = vmul.f32 -1.442695, %v2283_v62 }
 0xf4d   :  { %v7750_v56 = vmul.f32 -1.442695, %v2282_v12 }
 0xf4e   :  { %9955 = vpow2.f32 %v7751_v35 }
 0xf4f   :  { %9957 = vpow2.f32 %v7750_v56 }
 0xf58   :  { %v9956_v0 = vpop.eup %9955 }
 0xf59   :  { %v9958_v4 = vpop.eup %9957  ;;  %v2291_v2 = vadd.f32 1.0, %v9956_v0  ;;  %v2443_v0 = vld [vmem:[%s12777_s2 + $0x40] sm:$0xff] }
 0xf5a   :  { %v2290_v49 = vadd.f32 1.0, %v9958_v4 }
 0xf5b   :  { %9959 = vrcp.f32 %v2291_v2 }
 0xf5c   :  { %9961 = vrcp.f32 %v2290_v49 }
 0xf65   :  { %v9960_v6 = vpop.eup %9959 }
 0xf66   :  { %v9962_v7 = vpop.eup %9961  ;;  %2322 = vrot.lane.b32.xlu0 %v9960_v6, %s10336_s5 }
 0xf67   :  { %2320 = vrot.lane.b32.xlu1 %v9962_v7, %s10336_s5 }
 0xfd8   :  { %v2323_v8 = vpop.permute.xlu0 %2322 }
 0xfd9   :  { %v2327_v59 = vmul.f32 %v2323_v8, %v10843_v37  ;;  %v2321_v13 = vpop.permute.xlu1 %2320 }
 0xfda   :  { %v2326_v16 = vmul.f32 %v2321_v13, %v10839_v39 }
 0xfdb   :  { %2332 = vrot.lane.b32.xlu0 %v2327_v59, %s10337_s9 }
 0xfdc   :  { %2330 = vrot.lane.b32.xlu1 %v2326_v16, %s10337_s9 }
0x104d   :  { %v2333_v10 = vpop.permute.xlu0 %2332 }
0x104e   :  { %v2331_v15 = vpop.permute.xlu1 %2330 }
0x104f   :  { %8686 = vmatprep.mubr.msk.f32.mxu1 %vm252_vm1, %v2331_v15  ;;  %v7762_v15 = vld [vmem:[%s12777_s2 + $0xb0] ss:$0 sm:$0xff] }
0x1050   :  { %8687 = vmatmul.mubr.msk.f32.vlgmr.msra.gmra.mrb[20].mxu1 %vm252_vm1, %v2333_v10 }
0x1123   :  { %v8688_v17 = vpop.f32.mrb[20].mxu1 }
0x1124   :  { %2417 = vrot.lane.b32.xlu0 %v8688_v17, %s10338_s19  ;;  %v2404_v14 = vpop.f32.mrb[21].mxu1 }
0x1125   :  { %2415 = vrot.lane.b32.xlu1 %v2404_v14, %s10338_s19 }
0x1129   :  { %2301 = vrot.lane.b32.xlu1 %v7752_v20, %s10336_s5 }
0x1196   :  { %v2418_v32 = vpop.permute.xlu0 %2417 }
0x1197   :  { %v2422_v19 = vadd.f32 %v8666_v61, %v2418_v32  ;;  %v2416_v55 = vpop.permute.xlu1 %2415 }
0x1198   :  { %v2421_v36 = vadd.f32 %v2416_v55, %v2194_v3 }
0x1199   :  { %9963 = vtanh.f32 %v2422_v19 }
0x119a   :  { %9965 = vtanh.f32 %v2421_v36 }
0x119b   :  { %v2302_v24 = vpop.permute.xlu1 %2301 }
0x119c   :  { %v2305_v27 = vsub.f32 %v2283_v62, %v2302_v24  ;;  %v2304_v31 = vsub.f32 %v2282_v12, %v2302_v24 }
0x119e   :  { %v7754_v43 = vmul.f32 -1.442695, %v2305_v27  ;;  %v7753_v44 = vmul.f32 -1.442695, %v2304_v31 }
0x11a0   :  { %9967 = vpow2.f32 %v7754_v43 }
0x11a1   :  { %9969 = vpow2.f32 %v7753_v44 }
0x11a3   :  { %v9964_v60 = vpop.eup %9963 }
0x11a4   :  { %v9966_v1 = vpop.eup %9965  ;;  %2433 = vrot.lane.b32.xlu1 %v9964_v60, %s10337_s9 }
0x11a5   :  { %2431 = vrot.lane.b32.xlu0 %v9966_v1, %s10337_s9 }
0x11aa   :  { %v9968_v45 = vpop.eup %9967 }
0x11ab   :  { %v9970_v46 = vpop.eup %9969  ;;  %v2313_v50 = vadd.f32 1.0, %v9968_v45 }
0x11ac   :  { %v2312_v51 = vadd.f32 1.0, %v9970_v46 }
0x11ad   :  { %9971 = vrcp.f32 %v2313_v50 }
0x11ae   :  { %9973 = vrcp.f32 %v2312_v51 }
0x11b7   :  { %v9972_v52 = vpop.eup %9971 }
0x11b8   :  { %v9974_v53 = vpop.eup %9973  ;;  %v2426_v25 = vsub.f32 1.0, %v9972_v52 }
0x11b9   :  { %v2425_v54 = vsub.f32 1.0, %v9974_v53 }
0x11ba   :  { %v2428_v3 = vmul.f32 %v2426_v25, %v10843_v37  ;;  %v2444_v37 = vld [vmem:[%s12777_s2 + $0x48] sm:$0xff] }
0x11bb   :  { %v2427_v63 = vmul.f32 %v2425_v54, %v10839_v39  ;;  %v9405_v4 = vpack.c.bf16 %v2444_v37, %v2443_v0 }
0x11bd   :  { %9406 = vmatprep.subr.bf16.mxu1 %v9405_v4 }
0x11be   :  { %9408 = vmatpush3.bf16.msra.mxu1 %v9405_v4 }
0x11bf   :  { %9410 = vmatprep.subr.bf16.mxu1 %v9405_v4 }
0x1216   :  { %v2434_v61 = vpop.permute.xlu1 %2433 }
0x1217   :  { %v2438_v28 = vmul.f32 %v9972_v52, %v2434_v61  ;;  %v2432_v62 = vpop.permute.xlu0 %2431 }
0x1218   :  { %v2437_v12 = vmul.f32 %v9974_v53, %v2432_v62 }
0x1219   :  { %v2440_v35 = vadd.f32 %v2438_v28, %v2428_v3  ;;  %v7757_v3 = vld [vmem:[%s12777_s2 + $0xb8] ss:$0 sm:$0xff] }
0x121a   :  { %v2439_v56 = vadd.f32 %v2437_v12, %v2427_v63 }
0x121b   :  { %2718 = vrot.lane.b32.xlu1 %v2440_v35, %s10337_s9 }
0x121c   :  { %2451 = vrot.lane.b32.xlu0 %v2439_v56, %s10337_s9 }
0x123a   :  { %2588 = vxpose.xlu0.b32.start [1/2] (short) (narrow) %v10420_v18, 32  ;;  %v2441_v18 = vld [vmem:[%s12777_s2 + $0x50] sm:$0xff] }
0x123b   :  { %8689 = vmatprep.subr.mxu0 %v2441_v18 }
0x123c   :  { %8690 = vmatpush3.msra.mxu0 %v2441_v18 }
0x123d   :  { %8707 = vmatprep.subr.mxu0 %v2441_v18 }
0x123e   :  { %2589 = vxpose.xlu0.b32.end [2/2] (short) (narrow) %v10431_v26, 32 }
0x1244   :  { %2850 = vxpose.xlu1.b32.start [1/2] (short) (narrow) %v10437_v30, 32 }
0x1248   :  { %2851 = vxpose.xlu1.b32.end [2/2] (short) (narrow) %v10435_v29, 32 }
0x128d   :  { %v2719_v2 = vpop.permute.xlu1 %2718 }
0x128e   :  { %v2452_v39 = vpop.permute.xlu0 %2451 }
0x128f   :  { %2454 = vxpose.xlu0.b32.start.end [1/1] (short) (narrow) %v2452_v39, 32 }
0x129c   :  { %2721 = vxpose.xlu0.b32.start.end [1/1] (short) (narrow) %v2719_v2, 32 }
0x12ba   :  { %v2604_v49 = vpop.trf.xlu0 }
0x12bb   :  { %8701 = vmatprep.mubr.msk.f32.mxu1 %vm35_vm0, %v2604_v49 }
0x12be   :  { %v2605_v26 = vpop.trf.xlu0 }
0x12bf   :  { %8702 = vmatmul.mubr.msk.f32.vlgmr.msra.gmra.mrb[22].mxu1 %vm35_vm0, %v2605_v26 }
0x12c0   :  { %9412 = vmatpush3.bf16.msra.mxu1 %v9405_v4 }
0x12c2   :  { %v2606_v30 = vpop.trf.xlu0 }
0x12c3   :  { %8704 = vmatprep.mubr.msk.f32.mxu1 %vm35_vm0, %v2606_v30 }
0x12c4   :  { %v2866_v29 = vpop.trf.xlu1 }
0x12c6   :  { %v2607_v9 = vpop.trf.xlu0 }
0x12c7   :  { %8705 = vmatmul.mubr.msk.f32.gmra.mrb[24].mxu1 %vm35_vm0, %v2607_v9 }
0x12c8   :  { %v2867_v42 = vpop.trf.xlu1  ;;  %8719 = vmatprep.mubr.msk.f32.mxu1 %vm35_vm0, %v2866_v29 }
0x12cb   :  { %8720 = vmatmul.mubr.msk.f32.vlgmr.msra.gmra.mrb[26].mxu1 %vm35_vm0, %v2867_v42 }
0x12cc   :  { %v2868_v48 = vpop.trf.xlu1 }
0x12cd   :  { %8722 = vmatprep.mubr.msk.f32.mxu1 %vm35_vm0, %v2868_v48 }
0x12d0   :  { %v2869_v5 = vpop.trf.xlu1 }
0x12d1   :  { %8723 = vmatmul.mubr.msk.f32.gmra.mrb[28].mxu1 %vm35_vm0, %v2869_v5  ;;  %vm7463_vm0 = vcmask 253952  }
0x130f   :  { %v2470_v57 = vpop.trf.xlu0 }
0x1310   :  { %8691 = vmatprep.mubr.msk.f32.mxu0 %vm2486_vm14, %v2470_v57 }
0x1313   :  { %v2471_v58 = vpop.trf.xlu0 }
0x1314   :  { %8692 = vmatmul.mubr.msk.f32.vlgmr.msra.gmra.mrb[18].mxu0 %vm2486_vm14, %v2471_v58 }
0x1315   :  { %8708 = vmatpush3.msra.mxu0 %v2441_v18 }
0x1317   :  { %v2472_v6 = vpop.trf.xlu0 }
0x1318   :  { %8694 = vmatprep.mubr.msk.f32.mxu0 %vm2486_vm14, %v2472_v6 }
0x131b   :  { %v2473_v7 = vpop.trf.xlu0 }
0x131c   :  { %8695 = vmatmul.mubr.msk.f32.gmra.mrb[20].mxu0 %vm2486_vm14, %v2473_v7 }
0x131f   :  { %v2737_v8 = vpop.trf.xlu0 }
0x1320   :  { %8709 = vmatprep.mubr.msk.f32.mxu0 %vm2486_vm14, %v2737_v8 }
0x1323   :  { %v2738_v59 = vpop.trf.xlu0 }
0x1324   :  { %8710 = vmatmul.mubr.msk.f32.vlgmr.msra.gmra.mrb[22].mxu0 %vm2486_vm14, %v2738_v59 }
0x1327   :  { %v2739_v13 = vpop.trf.xlu0 }
0x1328   :  { %8712 = vmatprep.mubr.msk.f32.mxu0 %vm2486_vm14, %v2739_v13 }
0x132b   :  { %v2740_v16 = vpop.trf.xlu0 }
0x132c   :  { %8713 = vmatmul.mubr.msk.f32.gmra.mrb[24].mxu0 %vm2486_vm14, %v2740_v16 }
0x1392   :  { %v8703_v10 = vpop.f32.mrb[22].mxu1 }
0x1393   :  { %v11011_v17 = vadd.f32 %v8703_v10, %v7762_v15  ;;  %v2698_v14 = vpop.f32.mrb[23].mxu1 }
0x1394   :  { %v11013_v20 = vadd.f32 %v7762_v15, %v2698_v14 }
0x1395   :  { %v3120_v32 = vsel %vm252_vm1, %v11011_v17, 0.0 }
0x1396   :  { %3121 = vadd.xlane.f32.xlu0 %v3120_v32  ;;  %v3117_v19 = vsel %vm252_vm1, %v11013_v20, 0.0 }
0x1397   :  { %3118 = vadd.xlane.f32.xlu1 %v3117_v19 }
0x139a   :  { %v8706_v55 = vpop.f32.mrb[24].mxu1 }
0x139b   :  { %v2708_v36 = vpop.f32.mrb[25].mxu1  ;;  %v11019_v60 = vadd.f32 %v8706_v55, %v7762_v15 }
0x139c   :  { %v11021_v1 = vadd.f32 %v7762_v15, %v2708_v36 }
0x139d   :  { %v3126_v43 = vsel %vm252_vm1, %v11019_v60, 0.0 }
0x139e   :  { %v3123_v24 = vsel %vm252_vm1, %v11021_v1, 0.0  ;;  %v8721_v27 = vpop.f32.mrb[26].mxu1 }
0x139f   :  { %3124 = vadd.xlane.f32.xlu1 %v3123_v24  ;;  %v2960_v31 = vpop.f32.mrb[27].mxu1  ;;  %v11029_v45 = vadd.f32 %v8721_v27, %v7762_v15 }
0x13a0   :  { %v11027_v44 = vadd.f32 %v7762_v15, %v2960_v31 }
0x13a1   :  { %v3132_v25 = vsel %vm252_vm1, %v11029_v45, 0.0 }
0x13a2   :  { %v3129_v50 = vsel %vm252_vm1, %v11027_v44, 0.0 }
0x13a3   :  { %3127 = vadd.xlane.f32.xlu1 %v3126_v43 }
0x13a4   :  { %v8724_v46 = vpop.f32.mrb[28].mxu1 }
0x13a5   :  { %v11033_v51 = vadd.f32 %v8724_v46, %v7762_v15  ;;  %v2970_v52 = vpop.f32.mrb[29].mxu1 }
0x13a6   :  { %v11039_v54 = vadd.f32 %v7762_v15, %v2970_v52 }
0x13a7   :  { %3130 = vadd.xlane.f32.xlu1 %v3129_v50  ;;  %v3138_v53 = vsel %vm252_vm1, %v11033_v51, 0.0 }
0x13a8   :  { %3139 = vadd.xlane.f32.xlu0 %v3138_v53  ;;  %v3135_v61 = vsel %vm252_vm1, %v11039_v54, 0.0 }
0x13ab   :  { %3133 = vadd.xlane.f32.xlu1 %v3132_v25 }
0x13af   :  { %3136 = vadd.xlane.f32.xlu1 %v3135_v61 }
0x13e7   :  { %v8693_v28 = vpop.f32.mrb[18].mxu0 }
0x13e8   :  { %v11046_v62 = vadd.f32 %v8693_v28, %v7757_v3  ;;  %v2565_v63 = vpop.f32.mrb[19].mxu0 }
0x13e9   :  { %v11048_v12 = vadd.f32 %v7757_v3, %v2565_v63 }
0x13ea   :  { %v2992_v35 = vsel %vm252_vm1, %v11046_v62, 0.0 }
0x13eb   :  { %2993 = vadd.xlane.f32.xlu0 %v2992_v35  ;;  %v2989_v56 = vsel %vm252_vm1, %v11048_v12, 0.0 }
0x13ec   :  { %2990 = vadd.xlane.f32.xlu1 %v2989_v56 }
0x13ef   :  { %v8696_v0 = vpop.f32.mrb[20].mxu0 }
0x13f0   :  { %v11054_v37 = vadd.f32 %v8696_v0, %v7757_v3  ;;  %v2575_v4 = vpop.f32.mrb[21].mxu0 }
0x13f1   :  { %v11056_v39 = vadd.f32 %v7757_v3, %v2575_v4 }
0x13f2   :  { %v2998_v18 = vsel %vm252_vm1, %v11054_v37, 0.0 }
0x13f3   :  { %2999 = vadd.xlane.f32.xlu0 %v2998_v18  ;;  %v2995_v2 = vsel %vm252_vm1, %v11056_v39, 0.0 }
0x13f4   :  { %2996 = vadd.xlane.f32.xlu1 %v2995_v2 }
0x13f7   :  { %v8711_v49 = vpop.f32.mrb[22].mxu0 }
0x13f8   :  { %v11062_v26 = vadd.f32 %v8711_v49, %v7757_v3  ;;  %v2831_v30 = vpop.f32.mrb[23].mxu0 }
0x13f9   :  { %v11064_v29 = vadd.f32 %v7757_v3, %v2831_v30 }
0x13fa   :  { %12798 = vst [vmem:[#allocation3_spill] sm:$0xff] %v11062_v26  ;;  %v3004_v9 = vsel %vm252_vm1, %v11062_v26, 0.0 }
0x13fb   :  { %3005 = vadd.xlane.f32.xlu0 %v3004_v9  ;;  %v3001_v42 = vsel %vm252_vm1, %v11064_v29, 0.0 }
0x13fc   :  { %3002 = vadd.xlane.f32.xlu1 %v3001_v42  ;;  %v3376_v42 = vld [vmem:[%s12780_s3 + $0x98] sm:$0xff] }
0x13ff   :  { %v8714_v48 = vpop.f32.mrb[24].mxu0 }
0x1400   :  { %v11070_v5 = vadd.f32 %v8714_v48, %v7757_v3  ;;  %v2841_v57 = vpop.f32.mrb[25].mxu0 }
0x1401   :  { %v11072_v58 = vadd.f32 %v7757_v3, %v2841_v57  ;;  %v3377_v57 = vld [vmem:[%s12780_s3 + $0xa0] sm:$0xff] }
0x1402   :  { %12799 = vst [vmem:[#allocation4_spill] sm:$0xff] %v11070_v5  ;;  %v3010_v6 = vsel %vm252_vm1, %v11070_v5, 0.0 }
0x1403   :  { %12800 = vst [vmem:[#allocation5_spill] sm:$0xff] %v11072_v58  ;;  %3011 = vadd.xlane.f32.xlu0 %v3010_v6  ;;  %v3007_v7 = vsel %vm252_vm1, %v11072_v58, 0.0  ;;  %v3378_v6 = vld [vmem:[%s12780_s3 + $0xa8] sm:$0xff] }
0x1404   :  { %3008 = vadd.xlane.f32.xlu1 %v3007_v7  ;;  %v9425_v7 = vpack.c.bf16 %v3378_v6, %v3377_v57 }
0x1423   :  { %v3122_v8 = vpop.xlane.xlu0 %3121 }
0x1424   :  { %v3142_v59 = vmul.f32 0.03125, %v3122_v8  ;;  %v3119_v13 = vpop.xlane.xlu1 %3118 }
0x1425   :  { %v3141_v16 = vmul.f32 0.03125, %v3119_v13 }
0x1426   :  { %v11079_v15 = vsub.f32 %v11011_v17, %v3142_v59 }
0x1427   :  { %v11082_v10 = vsub.f32 %v11013_v20, %v3141_v16 }
0x1428   :  { %v3158_v14 = vmul.f32 %v11079_v15, %v11079_v15 }
0x1429   :  { %v3157_v32 = vmul.f32 %v11082_v10, %v11082_v10 }
0x142a   :  { %v3168_v19 = vsel %vm252_vm1, %v3158_v14, 0.0 }
0x142b   :  { %3169 = vadd.xlane.f32.xlu0 %v3168_v19  ;;  %v3165_v55 = vsel %vm252_vm1, %v3157_v32, 0.0 }
0x142c   :  { %3166 = vadd.xlane.f32.xlu1 %v3165_v55  ;;  %v3125_v36 = vpop.xlane.xlu1 %3124 }
0x142d   :  { %v3143_v24 = vmul.f32 0.03125, %v3125_v36 }
0x142f   :  { %v11091_v17 = vsub.f32 %v11021_v1, %v3143_v24 }
0x1430   :  { %v3128_v27 = vpop.xlane.xlu1 %3127 }
0x1431   :  { %v3144_v20 = vmul.f32 0.03125, %v3128_v27  ;;  %v3159_v31 = vmul.f32 %v11091_v17, %v11091_v17 }
0x1433   :  { %v11096_v43 = vsub.f32 %v11019_v60, %v3144_v20  ;;  %v3171_v46 = vsel %vm252_vm1, %v3159_v31, 0.0 }
0x1434   :  { %3172 = vadd.xlane.f32.xlu1 %v3171_v46  ;;  %v3131_v50 = vpop.xlane.xlu1 %3130 }
0x1435   :  { %v3145_v52 = vmul.f32 0.03125, %v3131_v50  ;;  %v3140_v53 = vpop.xlane.xlu0 %3139  ;;  %v3160_v25 = vmul.f32 %v11096_v43, %v11096_v43 }
0x1436   :  { %v3148_v61 = vmul.f32 0.03125, %v3140_v53 }
0x1437   :  { %v11102_v1 = vsub.f32 %v11027_v44, %v3145_v52  ;;  %v3174_v3 = vsel %vm252_vm1, %v3160_v25, 0.0 }
0x1438   :  { %3175 = vadd.xlane.f32.xlu0 %v3174_v3  ;;  %v3134_v28 = vpop.xlane.xlu1 %3133  ;;  %v11108_v35 = vsub.f32 %v11033_v51, %v3148_v61 }
0x1439   :  { %v3146_v63 = vmul.f32 0.03125, %v3134_v28  ;;  %v3161_v60 = vmul.f32 %v11102_v1, %v11102_v1 }
0x143a   :  { %v3164_v51 = vmul.f32 %v11108_v35, %v11108_v35 }
0x143b   :  { %v11111_v56 = vsub.f32 %v11029_v45, %v3146_v63  ;;  %v3177_v0 = vsel %vm252_vm1, %v3161_v60, 0.0 }
0x143c   :  { %3178 = vadd.xlane.f32.xlu1 %v3177_v0  ;;  %v3137_v44 = vpop.xlane.xlu1 %3136  ;;  %v3186_v30 = vsel %vm252_vm1, %v3164_v51, 0.0 }
0x143d   :  { %v3147_v4 = vmul.f32 0.03125, %v3137_v44  ;;  %v3162_v18 = vmul.f32 %v11111_v56, %v11111_v56 }
0x143f   :  { %v11117_v2 = vsub.f32 %v11039_v54, %v3147_v4  ;;  %v3180_v49 = vsel %vm252_vm1, %v3162_v18, 0.0  ;;  %v3375_v54 = vld [vmem:[%s12780_s3 + $0x90] sm:$0xff] }
0x1440   :  { %3181 = vadd.xlane.f32.xlu0 %v3180_v49  ;;  %v9421_v48 = vpack.c.bf16 %v3376_v42, %v3375_v54 }
0x1441   :  { %v3163_v45 = vmul.f32 %v11117_v2, %v11117_v2 }
0x1442   :  { %9422 = vmatprep.subr.bf16.mxu1 %v9421_v48 }
0x1443   :  { %v3183_v9 = vsel %vm252_vm1, %v3163_v45, 0.0  ;;  %9424 = vmatpush3.bf16.msra.mxu1 %v9421_v48 }
0x1444   :  { %3187 = vadd.xlane.f32.xlu0 %v3186_v30  ;;  %3184 = vadd.xlane.f32.xlu1 %v3183_v9 }
0x1445   :  { %9426 = vmatprep.subr.bf16.mxu1 %v9425_v7 }
0x1447   :  { %9428 = vmatpush3.bf16.msra.mxu1 %v9425_v7 }
0x1478   :  { %v2994_v8 = vpop.xlane.xlu0 %2993 }
0x1479   :  { %v3014_v59 = vmul.f32 0.03125, %v2994_v8  ;;  %v2991_v13 = vpop.xlane.xlu1 %2990 }
0x147a   :  { %v3013_v16 = vmul.f32 0.03125, %v2991_v13  ;;  %v3237_v13 = vld [vmem:[%s12777_s2 + $0x1c8] sm:$0xff] }
0x147b   :  { %v11139_v14 = vsub.f32 %v11046_v62, %v3014_v59 }
0x147c   :  { %v11142_v32 = vsub.f32 %v11048_v12, %v3013_v16  ;;  %v3238_v16 = vld [vmem:[%s12777_s2 + $0x1d0] sm:$0xff] }
0x147d   :  { %v3030_v19 = vmul.f32 %v11139_v14, %v11139_v14 }
0x147e   :  { %v3029_v55 = vmul.f32 %v11142_v32, %v11142_v32 }
0x147f   :  { %v3040_v36 = vsel %vm252_vm1, %v3030_v19, 0.0  ;;  %v9413_v19 = vpack.c.bf16 %v3238_v16, %v3237_v13 }
0x1480   :  { %v3000_v24 = vpop.xlane.xlu0 %2999  ;;  %3041 = vadd.xlane.f32.xlu0 %v3040_v36  ;;  %v3037_v27 = vsel %vm252_vm1, %v3029_v55, 0.0  ;;  %v3239_v55 = vld [vmem:[%s12777_s2 + $0x1d8] sm:$0xff]  ;;  %v3240_v36 = vld [vmem:[%s12777_s2 + $0x1e0] sm:$0xff] }
0x1481   :  { %v3016_v20 = vmul.f32 0.03125, %v3000_v24  ;;  %3038 = vadd.xlane.f32.xlu1 %v3037_v27  ;;  %v2997_v31 = vpop.xlane.xlu1 %2996  ;;  %9414 = vmatprep.subr.bf16.mxu0 %v9413_v19  ;;  %v9417_v24 = vpack.c.bf16 %v3240_v36, %v3239_v55 }
0x1482   :  { %v3015_v46 = vmul.f32 0.03125, %v2997_v31  ;;  %9416 = vmatpush3.bf16.msra.mxu0 %v9413_v19 }
0x1483   :  { %v11151_v50 = vsub.f32 %v11054_v37, %v3016_v20  ;;  %9418 = vmatprep.subr.bf16.mxu0 %v9417_v24 }
0x1484   :  { %v11154_v52 = vsub.f32 %v11056_v39, %v3015_v46 }
0x1485   :  { %v3032_v53 = vmul.f32 %v11151_v50, %v11151_v50 }
0x1486   :  { %v3031_v25 = vmul.f32 %v11154_v52, %v11154_v52  ;;  %9420 = vmatpush3.bf16.msra.mxu0 %v9417_v24 }
0x1487   :  { %v3046_v61 = vsel %vm252_vm1, %v3032_v53, 0.0 }
0x1488   :  { %v3006_v3 = vpop.xlane.xlu0 %3005  ;;  %3047 = vadd.xlane.f32.xlu0 %v3046_v61  ;;  %v3043_v28 = vsel %vm252_vm1, %v3031_v25, 0.0 }
0x1489   :  { %v3018_v63 = vmul.f32 0.03125, %v3006_v3  ;;  %3044 = vadd.xlane.f32.xlu1 %v3043_v28  ;;  %v3003_v60 = vpop.xlane.xlu1 %3002 }
0x148a   :  { %v3017_v0 = vmul.f32 0.03125, %v3003_v60 }
0x148b   :  { %v11163_v44 = vsub.f32 %v11062_v26, %v3018_v63 }
0x148c   :  { %v11166_v4 = vsub.f32 %v11064_v29, %v3017_v0 }
0x148d   :  { %v3034_v18 = vmul.f32 %v11163_v44, %v11163_v44 }
0x148e   :  { %v3033_v49 = vmul.f32 %v11166_v4, %v11166_v4 }
0x148f   :  { %v3052_v51 = vsel %vm252_vm1, %v3034_v18, 0.0  ;;  %v11201_v18 = vld [vmem:[%s12777_s2 + $0x288] ss:$0 sm:$0xff] }
0x1490   :  { %v3012_v45 = vpop.xlane.xlu0 %3011  ;;  %3053 = vadd.xlane.f32.xlu0 %v3052_v51  ;;  %v3049_v30 = vsel %vm252_vm1, %v3033_v49, 0.0 }
0x1491   :  { %v3020_v9 = vmul.f32 0.03125, %v3012_v45  ;;  %3050 = vadd.xlane.f32.xlu1 %v3049_v30  ;;  %v3009_v54 = vpop.xlane.xlu1 %3008 }
0x1492   :  { %v3019_v42 = vmul.f32 0.03125, %v3009_v54 }
0x1493   :  { %v11175_v48 = vsub.f32 %v11070_v5, %v3020_v9 }
0x1494   :  { %v11178_v57 = vsub.f32 %v11072_v58, %v3019_v42 }
0x1495   :  { %v3036_v6 = vmul.f32 %v11175_v48, %v11175_v48 }
0x1496   :  { %v3035_v7 = vmul.f32 %v11178_v57, %v11178_v57 }
0x1497   :  { %v3058_v8 = vsel %vm252_vm1, %v3036_v6, 0.0  ;;  %v11209_v6 = vld [vmem:[%s12777_s2 + $0x290] ss:$0 sm:$0xff] }
0x1498   :  { %3059 = vadd.xlane.f32.xlu0 %v3058_v8  ;;  %v3055_v59 = vsel %vm252_vm1, %v3035_v7, 0.0 }
0x1499   :  { %3056 = vadd.xlane.f32.xlu1 %v3055_v59 }
0x14b8   :  { %v3170_v27 = vpop.xlane.xlu0 %3169 }
0x14b9   :  { %v3190_v20 = vmul.f32 0.03125, %v3170_v27  ;;  %v3167_v31 = vpop.xlane.xlu1 %3166 }
0x14ba   :  { %v3189_v46 = vmul.f32 0.03125, %v3167_v31 }
0x14bb   :  { %v3198_v53 = vadd.f32 1e-05, %v3190_v20 }
0x14bc   :  { %v3197_v25 = vadd.f32 1e-05, %v3189_v46 }
0x14bd   :  { %9975 = vrsqrt.f32 %v3198_v53 }
0x14be   :  { %9977 = vrsqrt.f32 %v3197_v25 }
0x14c1   :  { %v3173_v61 = vpop.xlane.xlu1 %3172 }
0x14c2   :  { %v3191_v3 = vmul.f32 0.03125, %v3173_v61 }
0x14c4   :  { %v3199_v28 = vadd.f32 1e-05, %v3191_v3 }
0x14c5   :  { %v3176_v63 = vpop.xlane.xlu0 %3175 }
0x14c6   :  { %9979 = vrsqrt.f32 %v3199_v28  ;;  %v3192_v60 = vmul.f32 0.03125, %v3176_v63 }
0x14c7   :  { %v9976_v0 = vpop.eup %9975 }
0x14c8   :  { %v9978_v49 = vpop.eup %9977  ;;  %v3214_v51 = vmul.f32 %v9976_v0, %v11079_v15  ;;  %v3200_v45 = vadd.f32 1e-05, %v3192_v60 }
0x14c9   :  { %v3179_v30 = vpop.xlane.xlu1 %3178  ;;  %v3213_v9 = vmul.f32 %v9978_v49, %v11082_v10 }
0x14ca   :  { %v3222_v54 = vmul.f32 %v11201_v18, %v3214_v51  ;;  %9981 = vrsqrt.f32 %v3200_v45  ;;  %v3193_v42 = vmul.f32 0.03125, %v3179_v30 }
0x14cb   :  { %v3221_v7 = vmul.f32 %v11201_v18, %v3213_v9 }
0x14cc   :  { %v3201_v8 = vadd.f32 1e-05, %v3193_v42  ;;  %v3230_v16 = vadd.f32 %v11209_v6, %v3222_v54 }
0x14cd   :  { %v3182_v59 = vpop.xlane.xlu0 %3181  ;;  %v3229_v13 = vadd.f32 %v11209_v6, %v3221_v7 }
0x14ce   :  { %9983 = vrsqrt.f32 %v3201_v8  ;;  %v3194_v15 = vmul.f32 0.03125, %v3182_v59 }
0x14cf   :  { %8753 = vmatprep.mubr.msk.f32.mxu1 %vm252_vm1, %v3229_v13 }
0x14d0   :  { %v9980_v10 = vpop.eup %9979  ;;  %v3202_v19 = vadd.f32 1e-05, %v3194_v15  ;;  %8754 = vmatmul.mubr.msk.f32.vlgmr.msra.gmra.mrb[30].mxu1 %vm252_vm1, %v3230_v16 }
0x14d1   :  { %v3188_v55 = vpop.xlane.xlu0 %3187  ;;  %v3185_v36 = vpop.xlane.xlu1 %3184  ;;  %v3215_v24 = vmul.f32 %v9980_v10, %v11091_v17 }
0x14d2   :  { %9985 = vrsqrt.f32 %v3202_v19  ;;  %v3196_v27 = vmul.f32 0.03125, %v3188_v55  ;;  %v3195_v20 = vmul.f32 0.03125, %v3185_v36 }
0x14d3   :  { %v3223_v31 = vmul.f32 %v11201_v18, %v3215_v24 }
0x14d4   :  { %v9982_v46 = vpop.eup %9981  ;;  %v3204_v53 = vadd.f32 1e-05, %v3196_v27  ;;  %v3203_v25 = vadd.f32 1e-05, %v3195_v20 }
0x14d5   :  { %v3231_v61 = vadd.f32 %v11209_v6, %v3223_v31  ;;  %v3216_v3 = vmul.f32 %v9982_v46, %v11096_v43 }
0x14d6   :  { %9987 = vrsqrt.f32 %v3204_v53 }
0x14d7   :  { %9989 = vrsqrt.f32 %v3203_v25  ;;  %8756 = vmatprep.mubr.msk.f32.mxu1 %vm252_vm1, %v3231_v61  ;;  %v3224_v28 = vmul.f32 %v11201_v18, %v3216_v3 }
0x14d8   :  { %v9984_v63 = vpop.eup %9983 }
0x14d9   :  { %v3232_v17 = vadd.f32 %v11209_v6, %v3224_v28  ;;  %v3217_v60 = vmul.f32 %v9984_v63, %v11102_v1 }
0x14db   :  { %8757 = vmatmul.mubr.msk.f32.gmra.mrb[32].mxu1 %vm252_vm1, %v3232_v17  ;;  %v3225_v0 = vmul.f32 %v11201_v18, %v3217_v60 }
0x14dc   :  { %v9986_v49 = vpop.eup %9985 }
0x14dd   :  { %v3233_v51 = vadd.f32 %v11209_v6, %v3225_v0  ;;  %v3218_v43 = vmul.f32 %v9986_v49, %v11111_v56 }
0x14df   :  { %8759 = vmatprep.mubr.msk.f32.mxu1 %vm252_vm1, %v3233_v51  ;;  %v3226_v45 = vmul.f32 %v11201_v18, %v3218_v43 }
0x14e0   :  { %v9988_v30 = vpop.eup %9987 }
0x14e1   :  { %v9990_v9 = vpop.eup %9989  ;;  %v3234_v54 = vadd.f32 %v11209_v6, %v3226_v45  ;;  %v3220_v42 = vmul.f32 %v9988_v30, %v11108_v35 }
0x14e2   :  { %v3219_v1 = vmul.f32 %v9990_v9, %v11117_v2 }
0x14e3   :  { %8760 = vmatmul.mubr.msk.f32.gmra.mrb[34].mxu1 %vm252_vm1, %v3234_v54  ;;  %v3228_v7 = vmul.f32 %v11201_v18, %v3220_v42 }
0x14e4   :  { %v3227_v8 = vmul.f32 %v11201_v18, %v3219_v1 }
0x14e5   :  { %v3236_v56 = vadd.f32 %v11209_v6, %v3228_v7 }
0x14e6   :  { %v3235_v59 = vadd.f32 %v11209_v6, %v3227_v8 }
0x14e8   :  { %8762 = vmatprep.mubr.msk.f32.mxu1 %vm252_vm1, %v3235_v59 }
0x14e9   :  { %8763 = vmatmul.mubr.msk.f32.gmra.mrb[36].mxu1 %vm252_vm1, %v3236_v56 }
0x150d   :  { %v3042_v13 = vpop.xlane.xlu0 %3041 }
0x150e   :  { %v3062_v15 = vmul.f32 0.03125, %v3042_v13  ;;  %v3039_v16 = vpop.xlane.xlu1 %3038 }
0x150f   :  { %v3061_v35 = vmul.f32 0.03125, %v3039_v16 }
0x1510   :  { %v3070_v10 = vadd.f32 1e-05, %v3062_v15 }
0x1511   :  { %v3069_v2 = vadd.f32 1e-05, %v3061_v35 }
0x1512   :  { %9991 = vrsqrt.f32 %v3070_v10 }
0x1513   :  { %9993 = vrsqrt.f32 %v3069_v2 }
0x1515   :  { %v3048_v19 = vpop.xlane.xlu0 %3047 }
0x1516   :  { %v3064_v55 = vmul.f32 0.03125, %v3048_v19  ;;  %v3045_v36 = vpop.xlane.xlu1 %3044 }
0x1517   :  { %v3063_v24 = vmul.f32 0.03125, %v3045_v36 }
0x1518   :  { %v3072_v27 = vadd.f32 1e-05, %v3064_v55 }
0x1519   :  { %v3071_v20 = vadd.f32 1e-05, %v3063_v24 }
0x151a   :  { %9995 = vrsqrt.f32 %v3072_v27 }
0x151b   :  { %9997 = vrsqrt.f32 %v3071_v20 }
0x151c   :  { %v9992_v31 = vpop.eup %9991 }
0x151d   :  { %v9994_v46 = vpop.eup %9993  ;;  %v3086_v53 = vmul.f32 %v9992_v31, %v11139_v14  ;;  %v3054_v25 = vpop.xlane.xlu0 %3053 }
0x151e   :  { %v3066_v61 = vmul.f32 0.03125, %v3054_v25  ;;  %v3051_v3 = vpop.xlane.xlu1 %3050  ;;  %v3085_v28 = vmul.f32 %v9994_v46, %v11142_v32 }
0x151f   :  { %v3098_v63 = vmul.f32 %v11201_v18, %v3086_v53  ;;  %v3065_v17 = vmul.f32 0.03125, %v3051_v3  ;;  %v11275_v53 = vld [vmem:[%s12780_s3 + $0x110] ss:$0 sm:$0xff] }
0x1520   :  { %v3074_v60 = vadd.f32 1e-05, %v3066_v61  ;;  %v3097_v0 = vmul.f32 %v11201_v18, %v3085_v28 }
0x1521   :  { %v3073_v49 = vadd.f32 1e-05, %v3065_v17  ;;  %v3110_v43 = vadd.f32 %v11209_v6, %v3098_v63 }
0x1522   :  { %9999 = vrsqrt.f32 %v3074_v60  ;;  %v3109_v51 = vadd.f32 %v11209_v6, %v3097_v0 }
0x1523   :  { %10001 = vrsqrt.f32 %v3073_v49 }
0x1524   :  { %v9996_v45 = vpop.eup %9995  ;;  %8733 = vmatprep.mubr.msk.f32.mxu0 %vm252_vm1, %v3109_v51 }
0x1525   :  { %v9998_v14 = vpop.eup %9997  ;;  %v3060_v30 = vpop.xlane.xlu0 %3059  ;;  %8734 = vmatmul.mubr.msk.f32.vlgmr.msra.gmra.mrb[26].mxu0 %vm252_vm1, %v3110_v43  ;;  %v3088_v32 = vmul.f32 %v9996_v45, %v11151_v50 }
0x1526   :  { %v3068_v9 = vmul.f32 0.03125, %v3060_v30  ;;  %v3057_v54 = vpop.xlane.xlu1 %3056  ;;  %v3087_v42 = vmul.f32 %v9998_v14, %v11154_v52 }
0x1527   :  { %v3067_v1 = vmul.f32 0.03125, %v3057_v54  ;;  %v3100_v7 = vmul.f32 %v11201_v18, %v3088_v32 }
0x1528   :  { %v3076_v8 = vadd.f32 1e-05, %v3068_v9  ;;  %v3099_v56 = vmul.f32 %v11201_v18, %v3087_v42 }
0x1529   :  { %v3075_v59 = vadd.f32 1e-05, %v3067_v1  ;;  %v3112_v15 = vadd.f32 %v11209_v6, %v3100_v7 }
0x152a   :  { %10003 = vrsqrt.f32 %v3076_v8  ;;  %v3111_v13 = vadd.f32 %v11209_v6, %v3099_v56 }
0x152b   :  { %10005 = vrsqrt.f32 %v3075_v59 }
0x152c   :  { %v10000_v16 = vpop.eup %9999  ;;  %8736 = vmatprep.mubr.msk.f32.mxu0 %vm252_vm1, %v3111_v13 }
0x152d   :  { %v10002_v50 = vpop.eup %10001  ;;  %8737 = vmatmul.mubr.msk.f32.gmra.mrb[28].mxu0 %vm252_vm1, %v3112_v15  ;;  %v3090_v52 = vmul.f32 %v10000_v16, %v11163_v44 }
0x152e   :  { %v3089_v35 = vmul.f32 %v10002_v50, %v11166_v4 }
0x152f   :  { %v3102_v10 = vmul.f32 %v11201_v18, %v3090_v52 }
0x1530   :  { %v3101_v2 = vmul.f32 %v11201_v18, %v3089_v35 }
0x1531   :  { %v3114_v55 = vadd.f32 %v11209_v6, %v3102_v10 }
0x1532   :  { %v3113_v19 = vadd.f32 %v11209_v6, %v3101_v2 }
0x1534   :  { %v10004_v36 = vpop.eup %10003  ;;  %8739 = vmatprep.mubr.msk.f32.mxu0 %vm252_vm1, %v3113_v19 }
0x1535   :  { %v10006_v24 = vpop.eup %10005  ;;  %8740 = vmatmul.mubr.msk.f32.gmra.mrb[30].mxu0 %vm252_vm1, %v3114_v55  ;;  %v3092_v27 = vmul.f32 %v10004_v36, %v11175_v48 }
0x1536   :  { %v3091_v44 = vmul.f32 %v10006_v24, %v11178_v57 }
0x1537   :  { %v3104_v4 = vmul.f32 %v11201_v18, %v3092_v27 }
0x1538   :  { %v3103_v20 = vmul.f32 %v11201_v18, %v3091_v44 }
0x1539   :  { %v3116_v46 = vadd.f32 %v11209_v6, %v3104_v4 }
0x153a   :  { %v3115_v31 = vadd.f32 %v11209_v6, %v3103_v20 }
0x153c   :  { %8742 = vmatprep.mubr.msk.f32.mxu0 %vm252_vm1, %v3115_v31 }
0x153d   :  { %8743 = vmatmul.mubr.msk.f32.gmra.mrb[32].mxu0 %vm252_vm1, %v3116_v46 }
0x15a3   :  { %v8755_v48 = vpop.f32.mrb[30].mxu1 }
0x15a4   :  { %v3480_v57 = vadd.f32 %v8755_v48, %v11275_v53  ;;  %v3474_v25 = vpop.f32.mrb[31].mxu1 }
0x15a5   :  { %v3475_v61 = vadd.f32 %v11275_v53, %v3474_v25 }
0x15a6   :  { %v4028_v18 = vmul.f32 %v10662_v41, %v3480_v57  ;;  %v3779_v3 = vmul.f32 %v10660_v40, %v3480_v57  ;;  %v11282_v6 = vmul.f32 %v10672_v47, %v3480_v57  ;;  %v11285_v28 = vmul.f32 %v10719_v34, %v3480_v57 }
0x15a7   :  { %v11287_v63 = vpack.c.bf16 %v3480_v57, %v3475_v61  ;;  %v4027_v17 = vmul.f32 %v10662_v41, %v3475_v61  ;;  %v3778_v60 = vmul.f32 %v10660_v40, %v3475_v61  ;;  %v11292_v0 = vmul.f32 %v10672_v47, %v3475_v61 }
0x15a8   :  { %v11295_v49 = vmul.f32 %v10719_v34, %v3475_v61 }
0x15a9   :  { %9431 = vmatprep.subr.msk.bf16.mxu0 %vm10543_vm2, %v11287_v63  ;;  %9455 = vmatprep.subr.msk.bf16.mxu1 %vm10543_vm2, %v11287_v63  ;;  %v9783_v51 = vpack.i.bf16 %v4028_v18, %v4027_v17  ;;  %v9803_v43 = vpack.i.bf16 %v3779_v3, %v3778_v60  ;;  %v9823_v45 = vpack.i.bf16 %v11282_v6, %v11292_v0 }
0x15aa   :  { %9434 = vmatpush3.bf16.xpose.msk.msra.mxu0 %vm10543_vm2, %v11287_v63  ;;  %9458 = vmatpush3.bf16.xpose.msk.msra.mxu1 %vm10543_vm2, %v11287_v63 }
0x15ab   :  { %9784 = vrot.lane.b32.xlu1 %v9783_v51, %s10337_s9 }
0x15ae   :  { %v8758_v30 = vpop.f32.mrb[32].mxu1 }
0x15af   :  { %v3490_v32 = vadd.f32 %v8758_v30, %v11275_v53  ;;  %v3484_v9 = vpop.f32.mrb[33].mxu1 }
0x15b0   :  { %v3485_v54 = vadd.f32 %v11275_v53, %v3484_v9 }
0x15b1   :  { %v4030_v42 = vmul.f32 %v10662_v41, %v3490_v32  ;;  %v11318_v1 = vmul.f32 %v10660_v40, %v3490_v32  ;;  %v11321_v7 = vmul.f32 %v10672_v47, %v3490_v32  ;;  %v11324_v8 = vmul.f32 %v10719_v34, %v3490_v32 }
0x15b2   :  { %v11326_v56 = vpack.c.bf16 %v3490_v32, %v3485_v54  ;;  %v4029_v59 = vmul.f32 %v10662_v41, %v3485_v54  ;;  %v3780_v13 = vmul.f32 %v10660_v40, %v3485_v54  ;;  %v4600_v15 = vmul.f32 %v10672_v47, %v3485_v54 }
0x15b3   :  { %v11332_v16 = vmul.f32 %v10719_v34, %v3485_v54 }
0x15b4   :  { %9437 = vmatprep.subr.msk.bf16.mxu0 %vm10543_vm2, %v11326_v56  ;;  %9461 = vmatprep.subr.msk.bf16.mxu1 %vm10543_vm2, %v11326_v56  ;;  %v9788_v50 = vpack.i.bf16 %v4030_v42, %v4029_v59  ;;  %v9808_v52 = vpack.i.bf16 %v11318_v1, %v3780_v13  ;;  %v9828_v35 = vpack.i.bf16 %v11321_v7, %v4600_v15 }
0x15b5   :  { %9440 = vmatpush3.bf16.xpose.msk.msra.mxu0 %vm10543_vm2, %v11326_v56  ;;  %9464 = vmatpush3.bf16.xpose.msk.msra.mxu1 %vm10543_vm2, %v11326_v56 }
0x15b6   :  { %9789 = vrot.lane.b32.xlu0 %v9788_v50, %s10337_s9  ;;  %v8761_v2 = vpop.f32.mrb[34].mxu1 }
0x15b7   :  { %v3500_v19 = vadd.f32 %v8761_v2, %v11275_v53  ;;  %v3494_v55 = vpop.f32.mrb[35].mxu1 }
0x15b8   :  { %v3495_v36 = vadd.f32 %v11275_v53, %v3494_v55 }
0x15b9   :  { %v4032_v24 = vmul.f32 %v10662_v41, %v3500_v19  ;;  %v3783_v27 = vmul.f32 %v10660_v40, %v3500_v19  ;;  %v4603_v44 = vmul.f32 %v10672_v47, %v3500_v19  ;;  %v11357_v4 = vmul.f32 %v10719_v34, %v3500_v19 }
0x15ba   :  { %v11359_v20 = vpack.c.bf16 %v3500_v19, %v3495_v36  ;;  %9804 = vrot.lane.b32.xlu0 %v9803_v43, %s10337_s9  ;;  %v4031_v31 = vmul.f32 %v10662_v41, %v3495_v36  ;;  %v3782_v46 = vmul.f32 %v10660_v40, %v3495_v36  ;;  %v4602_v48 = vmul.f32 %v10672_v47, %v3495_v36 }
0x15bb   :  { %v11366_v57 = vmul.f32 %v10719_v34, %v3495_v36 }
0x15bc   :  { %v8764_v25 = vpop.f32.mrb[36].mxu1  ;;  %9443 = vmatprep.subr.msk.bf16.mxu0 %vm10543_vm2, %v11359_v20  ;;  %9467 = vmatprep.subr.msk.bf16.mxu1 %vm10543_vm2, %v11359_v20  ;;  %v9793_v61 = vpack.i.bf16 %v4032_v24, %v4031_v31  ;;  %v9813_v18 = vpack.i.bf16 %v3783_v27, %v3782_v46  ;;  %v9833_v3 = vpack.i.bf16 %v4603_v44, %v4602_v48 }
0x15bd   :  { %v3510_v17 = vadd.f32 %v8764_v25, %v11275_v53  ;;  %v3504_v60 = vpop.f32.mrb[37].mxu1  ;;  %9446 = vmatpush3.bf16.xpose.msk.msra.mxu0 %vm10543_vm2, %v11359_v20  ;;  %9470 = vmatpush3.bf16.xpose.msk.msra.mxu1 %vm10543_vm2, %v11359_v20 }
0x15be   :  { %v3505_v43 = vadd.f32 %v11275_v53, %v3504_v60  ;;  %9794 = vrot.lane.b32.xlu1 %v9793_v61, %s10337_s9  ;;  %9814 = vrot.lane.b32.xlu0 %v9813_v18, %s10337_s9 }
0x15bf   :  { %v4034_v30 = vmul.f32 %v10662_v41, %v3510_v17  ;;  %v3785_v32 = vmul.f32 %v10660_v40, %v3510_v17  ;;  %v11389_v9 = vmul.f32 %v10672_v47, %v3510_v17  ;;  %v11392_v54 = vmul.f32 %v10719_v34, %v3510_v17 }
0x15c0   :  { %v11394_v42 = vpack.c.bf16 %v3510_v17, %v3505_v43  ;;  %v4033_v1 = vmul.f32 %v10662_v41, %v3505_v43  ;;  %v3784_v53 = vmul.f32 %v10660_v40, %v3505_v43  ;;  %v11399_v7 = vmul.f32 %v10672_v47, %v3505_v43  ;;  %v7777_v47 = vld [vmem:[%s12777_s2 + $0x2a8] ss:$0 sm:$0xff] }
0x15c1   :  { %v11402_v59 = vmul.f32 %v10719_v34, %v3505_v43 }
0x15c2   :  { %9449 = vmatprep.subr.msk.bf16.mxu0 %vm10543_vm2, %v11394_v42  ;;  %9473 = vmatprep.subr.msk.bf16.mxu1 %vm10543_vm2, %v11394_v42  ;;  %v9798_v13 = vpack.i.bf16 %v4034_v30, %v4033_v1  ;;  %v9818_v15 = vpack.i.bf16 %v3785_v32, %v3784_v53 }
0x15c3   :  { %9824 = vrot.lane.b32.xlu0 %v9823_v45, %s10337_s9 }
0x15c4   :  { %9799 = vrot.lane.b32.xlu1 %v9798_v13, %s10337_s9 }
0x15c5   :  { %9452 = vmatpush3.bf16.xpose.msk.msra.mxu0 %vm10543_vm2, %v11394_v42  ;;  %9476 = vmatpush3.bf16.xpose.msk.msra.mxu1 %vm10543_vm2, %v11394_v42 }
0x15c6   :  { %9511 = vmatprep.subr.msk.bf16.mxu1 %vm10543_vm2, %v11287_v63 }
0x15c7   :  { %9834 = vrot.lane.b32.xlu0 %v9833_v3, %s10337_s9 }
0x15c8   :  { %9809 = vrot.lane.b32.xlu1 %v9808_v52, %s10337_s9 }
0x15cc   :  { %9819 = vrot.lane.b32.xlu1 %v9818_v15, %s10337_s9 }
0x15d0   :  { %9829 = vrot.lane.b32.xlu1 %v9828_v35, %s10337_s9 }
0x15f8   :  { %v8735_v34 = vpop.f32.mrb[26].mxu0 }
0x15f9   :  { %v11435_v6 = vadd.f32 %v8735_v34, %v7777_v47  ;;  %v3336_v0 = vpop.f32.mrb[27].mxu0 }
0x15fa   :  { %v11437_v45 = vadd.f32 %v7777_v47, %v3336_v0 }
0x15fb   :  { %v3514_v2 = vmul.f32 %v11435_v6, %v10567_v22  ;;  %v3787_v35 = vmul.f32 %v11435_v6, %v10570_v23 }
0x15fc   :  { %v3513_v50 = vmul.f32 %v11437_v45, %v10567_v22  ;;  %v3786_v52 = vmul.f32 %v11437_v45, %v10570_v23 }
0x15fe   :  { %8781 = vmatprep.mubr.msk.f32.mxu0 %vm252_vm1, %v3513_v50  ;;  %8809 = vmatprep.mubr.msk.f32.mxu1 %vm252_vm1, %v3786_v52 }
0x15ff   :  { %8782 = vmatmul.mubr.msk.f32.vlgmr.msra.gmra.mrb[34].mxu0 %vm252_vm1, %v3514_v2  ;;  %8810 = vmatmul.mubr.msk.f32.vlgmr.msra.gmra.mrb[38].mxu1 %vm252_vm1, %v3787_v35 }
0x1600   :  { %9514 = vmatpush3.bf16.xpose.msk.msra.mxu1 %vm10543_vm2, %v11287_v63  ;;  %v8738_v19 = vpop.f32.mrb[28].mxu0 }
0x1601   :  { %v11454_v55 = vadd.f32 %v8738_v19, %v7777_v47  ;;  %9517 = vmatprep.subr.msk.bf16.mxu1 %vm10543_vm2, %v11326_v56  ;;  %v3346_v36 = vpop.f32.mrb[29].mxu0 }
0x1602   :  { %v11459_v24 = vadd.f32 %v7777_v47, %v3346_v36 }
0x1603   :  { %v3516_v31 = vmul.f32 %v11454_v55, %v10567_v22  ;;  %v3789_v46 = vmul.f32 %v11454_v55, %v10570_v23  ;;  %v4360_v19 = vmul.f32 %v11454_v55, %v10587_v33 }
0x1604   :  { %v3515_v27 = vmul.f32 %v11459_v24, %v10567_v22  ;;  %v3788_v44 = vmul.f32 %v11459_v24, %v10570_v23  ;;  %v4359_v2 = vmul.f32 %v11459_v24, %v10587_v33 }
0x1606   :  { %8784 = vmatprep.mubr.msk.f32.mxu0 %vm252_vm1, %v3515_v27  ;;  %8812 = vmatprep.mubr.msk.f32.mxu1 %vm252_vm1, %v3788_v44 }
0x1607   :  { %8785 = vmatmul.mubr.msk.f32.gmra.mrb[36].mxu0 %vm252_vm1, %v3516_v31  ;;  %8813 = vmatmul.mubr.msk.f32.gmra.mrb[40].mxu1 %vm252_vm1, %v3789_v46 }
0x1608   :  { %9520 = vmatpush3.bf16.xpose.msk.msra.mxu1 %vm10543_vm2, %v11326_v56  ;;  %v8741_v48 = vpop.f32.mrb[30].mxu0 }
0x1609   :  { %v11476_v25 = vadd.f32 %v8741_v48, %v7777_v47  ;;  %9523 = vmatprep.subr.msk.bf16.mxu1 %vm10543_vm2, %v11359_v20  ;;  %v3356_v61 = vpop.f32.mrb[31].mxu0 }
0x160a   :  { %v11481_v18 = vadd.f32 %v7777_v47, %v3356_v61  ;;  %v4775_v61 = vmul.f32 %v11437_v45, %v10604_v38 }
0x160b   :  { %v3518_v60 = vmul.f32 %v11476_v25, %v10567_v22  ;;  %v3791_v43 = vmul.f32 %v11476_v25, %v10570_v23 }
0x160c   :  { %v3517_v3 = vmul.f32 %v11481_v18, %v10567_v22  ;;  %v3790_v17 = vmul.f32 %v11481_v18, %v10570_v23  ;;  %v4361_v36 = vmul.f32 %v11481_v18, %v10587_v33 }
0x160e   :  { %8787 = vmatprep.mubr.msk.f32.mxu0 %vm252_vm1, %v3517_v3  ;;  %8815 = vmatprep.mubr.msk.f32.mxu1 %vm252_vm1, %v3790_v17 }
0x160f   :  { %8788 = vmatmul.mubr.msk.f32.gmra.mrb[38].mxu0 %vm252_vm1, %v3518_v60  ;;  %8816 = vmatmul.mubr.msk.f32.gmra.mrb[42].mxu1 %vm252_vm1, %v3791_v43 }
0x1610   :  { %9526 = vmatpush3.bf16.xpose.msk.msra.mxu1 %vm10543_vm2, %v11359_v20  ;;  %v8744_v30 = vpop.f32.mrb[32].mxu0 }
0x1611   :  { %v11498_v32 = vadd.f32 %v8744_v30, %v7777_v47  ;;  %9529 = vmatprep.subr.msk.bf16.mxu1 %vm10543_vm2, %v11394_v42  ;;  %v3366_v1 = vpop.f32.mrb[33].mxu0 }
0x1612   :  { %v11503_v53 = vadd.f32 %v7777_v47, %v3366_v1  ;;  %v4357_v47 = vmul.f32 %v11437_v45, %v10587_v33 }
0x1613   :  { %v3520_v34 = vmul.f32 %v11498_v32, %v10567_v22  ;;  %v3793_v0 = vmul.f32 %v11498_v32, %v10570_v23  ;;  %v4364_v48 = vmul.f32 %v11498_v32, %v10587_v33 }
0x1614   :  { %v3519_v13 = vmul.f32 %v11503_v53, %v10567_v22  ;;  %v3792_v15 = vmul.f32 %v11503_v53, %v10570_v23  ;;  %v4358_v22 = vmul.f32 %v11435_v6, %v10587_v33  ;;  %v4363_v27 = vmul.f32 %v11503_v53, %v10587_v33 }
0x1616   :  { %8790 = vmatprep.mubr.msk.f32.mxu0 %vm252_vm1, %v3519_v13  ;;  %8818 = vmatprep.mubr.msk.f32.mxu1 %vm252_vm1, %v3792_v15 }
0x1617   :  { %8791 = vmatmul.mubr.msk.f32.gmra.mrb[40].mxu0 %vm252_vm1, %v3520_v34  ;;  %8819 = vmatmul.mubr.msk.f32.gmra.mrb[44].mxu1 %vm252_vm1, %v3793_v0  ;;  %v4776_v0 = vmul.f32 %v11435_v6, %v10604_v38  ;;  %v4780_v6 = vmul.f32 %v11476_v25, %v10604_v38 }
0x1618   :  { %9532 = vmatpush3.bf16.xpose.msk.msra.mxu1 %vm10543_vm2, %v11394_v42  ;;  %8893 = vmatprep.mubr.msk.f32.mxu1 %vm252_vm1, %v4357_v47  ;;  %v4777_v47 = vmul.f32 %v11459_v24, %v10604_v38  ;;  %v4781_v24 = vmul.f32 %v11503_v53, %v10604_v38 }
0x1619   :  { %9551 = vmatprep.subr.msk.bf16.mxu1 %vm10543_vm2, %v11287_v63 }
0x161d   :  { %v9785_v23 = vpop.permute.xlu1 %9784 }
0x161e   :  { %v9787_v50 = vunpack.i.h.bf16 %v9785_v23  ;;  %v9786_v52 = vunpack.i.l.bf16 %v9785_v23 }
0x161f   :  { %8894 = vmatmul.mubr.msk.f32.vlgmr.msra.gmra.mrb[46].mxu1 %vm252_vm1, %v4358_v22  ;;  %v4779_v22 = vmul.f32 %v11481_v18, %v10604_v38  ;;  %v11598_v18 = vld [vmem:[%s12783_s6 + $0x8] sm:$0xff] }
0x1620   :  { %8896 = vmatprep.mubr.msk.f32.mxu1 %vm252_vm1, %v4359_v2  ;;  %9554 = vmatpush3.bf16.xpose.msk.msra.mxu1 %vm10543_vm2, %v11287_v63  ;;  %v9477_v35 = vpack.c.bf16 %v9787_v50, %v9786_v52  ;;  %v4362_v63 = vmul.f32 %v11476_v25, %v10587_v33  ;;  %v11603_v25 = vld [vmem:[%s12783_s6] sm:$0xff] }
0x1621   :  { %9557 = vmatprep.subr.msk.bf16.mxu1 %vm10543_vm2, %v11326_v56 }
0x1622   :  { %9478 = vmatprep.subr.bf16.mxu0 %v9477_v35 }
0x1623   :  { %8897 = vmatmul.mubr.msk.f32.gmra.mrb[48].mxu1 %vm252_vm1, %v4360_v19  ;;  %9480 = vmatpush3.bf16.msra.mxu0 %v9477_v35 }
0x1624   :  { %8899 = vmatprep.mubr.msk.f32.mxu1 %vm252_vm1, %v4361_v36 }
0x1627   :  { %8900 = vmatmul.mubr.msk.f32.gmra.mrb[50].mxu1 %vm252_vm1, %v4362_v63 }
0x1628   :  { %8902 = vmatprep.mubr.msk.f32.mxu1 %vm252_vm1, %v4363_v27  ;;  %9560 = vmatpush3.bf16.xpose.msk.msra.mxu1 %vm10543_vm2, %v11326_v56  ;;  %v9790_v44 = vpop.permute.xlu0 %9789 }
0x1629   :  { %v9792_v31 = vunpack.i.h.bf16 %v9790_v44  ;;  %v9791_v46 = vunpack.i.l.bf16 %v9790_v44  ;;  %9563 = vmatprep.subr.msk.bf16.mxu1 %vm10543_vm2, %v11359_v20 }
0x162b   :  { %8903 = vmatmul.mubr.msk.f32.gmra.mrb[52].mxu1 %vm252_vm1, %v4364_v48  ;;  %v9481_v3 = vpack.c.bf16 %v9792_v31, %v9791_v46  ;;  %v11624_v46 = vld [vmem:[%s12783_s6 + $0x18] sm:$0xff] }
0x162c   :  { %8949 = vmatprep.mubr.msk.f32.mxu1 %vm252_vm1, %v4775_v61  ;;  %v9805_v45 = vpop.permute.xlu0 %9804 }
0x162d   :  { %9482 = vmatprep.subr.bf16.mxu0 %v9481_v3  ;;  %v9807_v30 = vunpack.i.h.bf16 %v9805_v45  ;;  %v9806_v1 = vunpack.i.l.bf16 %v9805_v45 }
0x162e   :  { %9484 = vmatpush3.bf16.msra.mxu0 %v9481_v3  ;;  %v11629_v3 = vld [vmem:[%s12783_s6 + $0x10] sm:$0xff] }
0x162f   :  { %v11571_v34 = vpack.c.bf16 %v9807_v30, %v9806_v1 }
0x1630   :  { %9566 = vmatpush3.bf16.xpose.msk.msra.mxu1 %vm10543_vm2, %v11359_v20  ;;  %v9795_v56 = vpop.permute.xlu1 %9794 }
0x1631   :  { %9569 = vmatprep.subr.msk.bf16.mxu1 %vm10543_vm2, %v11394_v42  ;;  %v9797_v33 = vunpack.i.h.bf16 %v9795_v56  ;;  %v9796_v17 = vunpack.i.l.bf16 %v9795_v56 }
0x1633   :  { %v9485_v60 = vpack.c.bf16 %v9797_v33, %v9796_v17 }
0x1635   :  { %9486 = vmatprep.subr.bf16.mxu0 %v9485_v60 }
0x1636   :  { %v9800_v43 = vpop.permute.xlu1 %9799  ;;  %9488 = vmatpush3.bf16.msra.mxu0 %v9485_v60 }
0x1637   :  { %v9802_v13 = vunpack.i.h.bf16 %v9800_v43  ;;  %v9801_v15 = vunpack.i.l.bf16 %v9800_v43 }
0x1638   :  { %9572 = vmatpush3.bf16.xpose.msk.msra.mxu1 %vm10543_vm2, %v11394_v42  ;;  %v4778_v42 = vmul.f32 %v11454_v55, %v10604_v38  ;;  %v4782_v55 = vmul.f32 %v11498_v32, %v10604_v38 }
0x1639   :  { %v9489_v20 = vpack.c.bf16 %v9802_v13, %v9801_v15 }
0x163b   :  { %9490 = vmatprep.subr.bf16.mxu0 %v9489_v20 }
0x163c   :  { %9492 = vmatpush3.bf16.msra.mxu0 %v9489_v20 }
0x163d   :  { %9494 = vmatprep.subr.bf16.mxu0 %v11571_v34 }
0x163f   :  { %8950 = vmatmul.mubr.msk.f32.vlgmr.msra.gmra.mrb[54].mxu1 %vm252_vm1, %v4776_v0 }
0x1640   :  { %8952 = vmatprep.mubr.msk.f32.mxu1 %vm252_vm1, %v4777_v47 }
0x1643   :  { %8953 = vmatmul.mubr.msk.f32.gmra.mrb[56].mxu1 %vm252_vm1, %v4778_v42 }
0x1644   :  { %8955 = vmatprep.mubr.msk.f32.mxu1 %vm252_vm1, %v4779_v22  ;;  %v11654_v22 = vld [vmem:[%s12783_s6 + $0x28] sm:$0xff] }
0x1647   :  { %8956 = vmatmul.mubr.msk.f32.gmra.mrb[58].mxu1 %vm252_vm1, %v4780_v6 }
0x1648   :  { %8958 = vmatprep.mubr.msk.f32.mxu1 %vm252_vm1, %v4781_v24 }
0x164b   :  { %8959 = vmatmul.mubr.msk.f32.gmra.mrb[60].mxu1 %vm252_vm1, %v4782_v55  ;;  %v11659_v55 = vld [vmem:[%s12783_s6 + $0x20] sm:$0xff] }
0x16d2   :  { %v8783_v23 = vpop.f32.mrb[34].mxu0  ;;  %v8811_v50 = vpop.f32.mrb[38].mxu1 }
0x16d3   :  { %v3675_v53 = vmul.f32 0.35355338, %v8783_v23  ;;  %v3924_v52 = vmul.f32 0.35355338, %v8811_v50  ;;  %v3635_v2 = vpop.f32.mrb[35].mxu0  ;;  %v3884_v35 = vpop.f32.mrb[39].mxu1 }
0x16d4   :  { %v3674_v19 = vmul.f32 0.35355338, %v3635_v2  ;;  %v3923_v38 = vmul.f32 0.35355338, %v3884_v35 }
0x16d5   :  { %v11606_v32 = vadd.f32 %v3924_v52, %v11598_v18  ;;  %v11609_v36 = vadd.f32 %v3675_v53, %v11598_v18 }
0x16d6   :  { %v11612_v63 = vadd.f32 %v3923_v38, %v11603_v25  ;;  %v11617_v44 = vadd.f32 %v3674_v19, %v11603_v25 }
0x16d7   :  { %v3942_v27 = vsel %vm2027_vm13, %v11606_v32, -inf  ;;  %v3693_v56 = vsel %vm2027_vm13, %v11609_v36, -inf }
0x16d8   :  { %3943 = vmax.xlane.f32.xlu0 %v3942_v27  ;;  %v3939_v31 = vsel %vm2027_vm13, %v11612_v63, -inf  ;;  %v3690_v1 = vsel %vm2027_vm13, %v11617_v44, -inf }
0x16d9   :  { %3940 = vmax.xlane.f32.xlu1 %v3939_v31 }
0x16da   :  { %v8786_v48 = vpop.f32.mrb[36].mxu0  ;;  %v8814_v61 = vpop.f32.mrb[40].mxu1 }
0x16db   :  { %v3677_v33 = vmul.f32 0.35355338, %v8786_v48  ;;  %v3926_v17 = vmul.f32 0.35355338, %v8814_v61  ;;  %v3645_v60 = vpop.f32.mrb[37].mxu0  ;;  %v3894_v45 = vpop.f32.mrb[41].mxu1 }
0x16dc   :  { %v3676_v43 = vmul.f32 0.35355338, %v3645_v60  ;;  %v3925_v30 = vmul.f32 0.35355338, %v3894_v45  ;;  %3694 = vmax.xlane.f32.xlu0 %v3693_v56 }
0x16dd   :  { %v11636_v13 = vadd.f32 %v3926_v17, %v11624_v46  ;;  %3691 = vmax.xlane.f32.xlu1 %v3690_v1  ;;  %v11639_v15 = vadd.f32 %v3677_v33, %v11624_v46  ;;  %v11684_v17 = vld [vmem:[%s12783_s6 + $0x38] sm:$0xff] }
0x16de   :  { %v11642_v20 = vadd.f32 %v3925_v30, %v11629_v3  ;;  %v11647_v47 = vadd.f32 %v3676_v43, %v11629_v3  ;;  %v11689_v43 = vld [vmem:[%s12783_s6 + $0x30] sm:$0xff] }
0x16df   :  { %v3948_v0 = vsel %vm2027_vm13, %v11636_v13, -inf  ;;  %v3699_v23 = vsel %vm2027_vm13, %v11639_v15, -inf }
0x16e0   :  { %3949 = vmax.xlane.f32.xlu0 %v3948_v0  ;;  %v3945_v42 = vsel %vm2027_vm13, %v11642_v20, -inf  ;;  %v3696_v38 = vsel %vm2027_vm13, %v11647_v47, -inf }
0x16e1   :  { %3946 = vmax.xlane.f32.xlu1 %v3945_v42 }
0x16e2   :  { %v8789_v6 = vpop.f32.mrb[38].mxu0  ;;  %v8817_v24 = vpop.f32.mrb[42].mxu1 }
0x16e3   :  { %v3679_v50 = vmul.f32 0.35355338, %v8789_v6  ;;  %v3928_v53 = vmul.f32 0.35355338, %v8817_v24  ;;  %v3655_v52 = vpop.f32.mrb[39].mxu0  ;;  %v3904_v2 = vpop.f32.mrb[43].mxu1 }
0x16e4   :  { %v3678_v35 = vmul.f32 0.35355338, %v3655_v52  ;;  %v3927_v19 = vmul.f32 0.35355338, %v3904_v2  ;;  %3700 = vmax.xlane.f32.xlu0 %v3699_v23 }
0x16e5   :  { %v11666_v27 = vadd.f32 %v3928_v53, %v11654_v22  ;;  %3697 = vmax.xlane.f32.xlu1 %v3696_v38  ;;  %v11669_v31 = vadd.f32 %v3679_v50, %v11654_v22 }
0x16e6   :  { %v11672_v48 = vadd.f32 %v3927_v19, %v11659_v55  ;;  %v11677_v56 = vadd.f32 %v3678_v35, %v11659_v55 }
0x16e7   :  { %v3954_v61 = vsel %vm2027_vm13, %v11666_v27, -inf  ;;  %v3705_v30 = vsel %vm2027_vm13, %v11669_v31, -inf }
0x16e8   :  { %3955 = vmax.xlane.f32.xlu0 %v3954_v61  ;;  %v3951_v33 = vsel %vm2027_vm13, %v11672_v48, -inf  ;;  %v3702_v50 = vsel %vm2027_vm13, %v11677_v56, -inf }
0x16e9   :  { %3952 = vmax.xlane.f32.xlu1 %v3951_v33 }
0x16ea   :  { %v8792_v60 = vpop.f32.mrb[40].mxu0  ;;  %v8820_v45 = vpop.f32.mrb[44].mxu1 }
0x16eb   :  { %v3681_v1 = vmul.f32 0.35355338, %v8792_v60  ;;  %v3930_v0 = vmul.f32 0.35355338, %v8820_v45  ;;  %v3665_v42 = vpop.f32.mrb[41].mxu0  ;;  %v3914_v6 = vpop.f32.mrb[45].mxu1 }
0x16ec   :  { %v3680_v24 = vmul.f32 0.35355338, %v3665_v42  ;;  %v3929_v23 = vmul.f32 0.35355338, %v3914_v6  ;;  %3706 = vmax.xlane.f32.xlu0 %v3705_v30 }
0x16ed   :  { %v11696_v53 = vadd.f32 %v3930_v0, %v11684_v17  ;;  %3703 = vmax.xlane.f32.xlu1 %v3702_v50  ;;  %v11702_v2 = vadd.f32 %v3681_v1, %v11684_v17 }
0x16ee   :  { %v11699_v52 = vadd.f32 %v3929_v23, %v11689_v43  ;;  %v11707_v19 = vadd.f32 %v3680_v24, %v11689_v43 }
0x16ef   :  { %v3960_v35 = vsel %vm2027_vm13, %v11696_v53, -inf  ;;  %v3711_v45 = vsel %vm2027_vm13, %v11702_v2, -inf }
0x16f0   :  { %3961 = vmax.xlane.f32.xlu0 %v3960_v35  ;;  %v3957_v38 = vsel %vm2027_vm13, %v11699_v52, -inf  ;;  %v3708_v1 = vsel %vm2027_vm13, %v11707_v19, -inf }
0x16f1   :  { %3958 = vmax.xlane.f32.xlu1 %v3957_v38 }
0x16f2   :  { %v8895_v61 = vpop.f32.mrb[46].mxu1 }
0x16f3   :  { %v4495_v33 = vmul.f32 0.35355338, %v8895_v61  ;;  %v4455_v60 = vpop.f32.mrb[47].mxu1 }
0x16f4   :  { %v4494_v30 = vmul.f32 0.35355338, %v4455_v60  ;;  %3712 = vmax.xlane.f32.xlu0 %v3711_v45 }
0x16f5   :  { %v11716_v0 = vadd.f32 %v4495_v33, %v11598_v18  ;;  %3709 = vmax.xlane.f32.xlu1 %v3708_v1 }
0x16f6   :  { %v11719_v42 = vadd.f32 %v4494_v30, %v11603_v25  ;;  %v8898_v6 = vpop.f32.mrb[48].mxu1 }
0x16f7   :  { %v4497_v24 = vmul.f32 0.35355338, %v8898_v6  ;;  %v4465_v23 = vpop.f32.mrb[49].mxu1  ;;  %v4513_v50 = vsel %vm2027_vm13, %v11716_v0, -inf }
0x16f8   :  { %v4496_v35 = vmul.f32 0.35355338, %v4465_v23  ;;  %4514 = vmax.xlane.f32.xlu0 %v4513_v50  ;;  %v4510_v38 = vsel %vm2027_vm13, %v11719_v42, -inf }
0x16f9   :  { %v11726_v61 = vadd.f32 %v4497_v24, %v11624_v46  ;;  %4511 = vmax.xlane.f32.xlu1 %v4510_v38 }
0x16fa   :  { %v11729_v33 = vadd.f32 %v4496_v35, %v11629_v3  ;;  %v8901_v60 = vpop.f32.mrb[50].mxu1 }
0x16fb   :  { %v4499_v45 = vmul.f32 0.35355338, %v8901_v60  ;;  %v4475_v30 = vpop.f32.mrb[51].mxu1  ;;  %v4519_v1 = vsel %vm2027_vm13, %v11726_v61, -inf }
0x16fc   :  { %v4498_v6 = vmul.f32 0.35355338, %v4475_v30  ;;  %4520 = vmax.xlane.f32.xlu0 %v4519_v1  ;;  %v4516_v23 = vsel %vm2027_vm13, %v11729_v33, -inf }
0x16fd   :  { %v11736_v50 = vadd.f32 %v4499_v45, %v11654_v22  ;;  %4517 = vmax.xlane.f32.xlu1 %v4516_v23 }
0x16fe   :  { %v11739_v24 = vadd.f32 %v4498_v6, %v11659_v55  ;;  %v8904_v35 = vpop.f32.mrb[52].mxu1 }
0x16ff   :  { %v4501_v38 = vmul.f32 0.35355338, %v8904_v35  ;;  %v4485_v21 = vpop.f32.mrb[53].mxu1  ;;  %v4525_v60 = vsel %vm2027_vm13, %v11736_v50, -inf }
0x1700   :  { %v4500_v40 = vmul.f32 0.35355338, %v4485_v21  ;;  %4526 = vmax.xlane.f32.xlu0 %v4525_v60  ;;  %v4522_v30 = vsel %vm2027_vm13, %v11739_v24, -inf }
0x1701   :  { %v11746_v1 = vadd.f32 %v4501_v38, %v11684_v17  ;;  %4523 = vmax.xlane.f32.xlu1 %v4522_v30 }
0x1702   :  { %v11749_v45 = vadd.f32 %v4500_v40, %v11689_v43 }
0x1703   :  { %v4531_v6 = vsel %vm2027_vm13, %v11746_v1, -inf }
0x1704   :  { %4532 = vmax.xlane.f32.xlu0 %v4531_v6  ;;  %v4528_v23 = vsel %vm2027_vm13, %v11749_v45, -inf }
0x1705   :  { %4529 = vmax.xlane.f32.xlu1 %v4528_v23 }
0x1712   :  { %v8951_v21 = vpop.f32.mrb[54].mxu1 }
0x1713   :  { %v4913_v35 = vmul.f32 0.35355338, %v8951_v21  ;;  %v4873_v60 = vpop.f32.mrb[55].mxu1 }
0x1714   :  { %v4912_v51 = vmul.f32 0.35355338, %v4873_v60 }
0x1715   :  { %v11756_v10 = vadd.f32 %v4913_v35, %v11598_v18 }
0x1716   :  { %v11759_v38 = vadd.f32 %v4912_v51, %v11603_v25  ;;  %v8954_v40 = vpop.f32.mrb[56].mxu1 }
0x1717   :  { %v4915_v30 = vmul.f32 0.35355338, %v8954_v40  ;;  %v4883_v14 = vpop.f32.mrb[57].mxu1  ;;  %v4931_v6 = vsel %vm2027_vm13, %v11756_v10, -inf }
0x1718   :  { %v4914_v41 = vmul.f32 0.35355338, %v4883_v14  ;;  %4932 = vmax.xlane.f32.xlu0 %v4931_v6  ;;  %v4928_v23 = vsel %vm2027_vm13, %v11759_v38, -inf }
0x1719   :  { %v11766_v21 = vadd.f32 %v4915_v30, %v11624_v46  ;;  %4929 = vmax.xlane.f32.xlu1 %v4928_v23 }
0x171a   :  { %v11769_v18 = vadd.f32 %v4914_v41, %v11629_v3  ;;  %v8957_v51 = vpop.f32.mrb[58].mxu1 }
0x171b   :  { %v4917_v25 = vmul.f32 0.35355338, %v8957_v51  ;;  %v4893_v35 = vpop.f32.mrb[59].mxu1  ;;  %v4937_v60 = vsel %vm2027_vm13, %v11766_v21, -inf }
0x171c   :  { %v4916_v40 = vmul.f32 0.35355338, %v4893_v35  ;;  %4938 = vmax.xlane.f32.xlu0 %v4937_v60  ;;  %v4934_v14 = vsel %vm2027_vm13, %v11769_v18, -inf }
0x171d   :  { %v11776_v6 = vadd.f32 %v4917_v25, %v11654_v22  ;;  %4935 = vmax.xlane.f32.xlu1 %v4934_v14  ;;  %v12802_v25 = vpack.i.bf16 %v11285_v28, %v11295_v49  ;;  %v11801_v14 = vpop.permute.xlu0 %9814 }
0x171e   :  { %v11779_v46 = vadd.f32 %v4916_v40, %v11659_v55  ;;  %v8960_v41 = vpop.f32.mrb[60].mxu1  ;;  %v12801_v55 = vpack.i.bf16 %v11389_v9, %v11399_v7 }
0x171f   :  { %v4919_v3 = vmul.f32 0.35355338, %v8960_v41  ;;  %v4903_v30 = vpop.f32.mrb[61].mxu1  ;;  %v4943_v23 = vsel %vm2027_vm13, %v11776_v6, -inf }
0x1720   :  { %v4918_v51 = vmul.f32 0.35355338, %v4903_v30  ;;  %4944 = vmax.xlane.f32.xlu0 %v4943_v23  ;;  %v4940_v35 = vsel %vm2027_vm13, %v11779_v46, -inf }
0x1721   :  { %v11786_v60 = vadd.f32 %v4919_v3, %v11684_v17  ;;  %4941 = vmax.xlane.f32.xlu1 %v4940_v35  ;;  %v11807_v41 = vpop.permute.xlu0 %9824 }
0x1722   :  { %v11789_v22 = vadd.f32 %v4918_v51, %v11689_v43  ;;  %v11805_v43 = vpop.permute.xlu1 %9809 }
0x1723   :  { %v4949_v40 = vsel %vm2027_vm13, %v11786_v60, -inf }
0x1724   :  { %v4946_v17 = vsel %vm2027_vm13, %v11789_v22, -inf }
0x1725   :  { %v11811_v7 = vpop.permute.xlu0 %9834 }
0x1726   :  { %v11809_v9 = vpop.permute.xlu1 %9819 }
0x172a   :  { %v11813_v28 = vpop.permute.xlu1 %9829 }
0x1732   :  { %9839 = vrot.lane.b32.xlu1 %v12801_v55, %s10337_s9 }
0x1736   :  { %9844 = vrot.lane.b32.xlu0 %v12802_v25, %s10337_s9 }
0x1755   :  { %4950 = vmax.xlane.f32.xlu0 %v4949_v40 }
0x1756   :  { %4947 = vmax.xlane.f32.xlu1 %v4946_v17 }
0x1765   :  { %v3944_v49 = vpop.xlane.xlu0 %3943 }
0x1766   :  { %v3964_v3 = vsub.f32 %v11606_v32, %v3944_v49  ;;  %v3941_v30 = vpop.xlane.xlu1 %3940 }
0x1767   :  { %v3963_v23 = vsub.f32 %v11612_v63, %v3941_v30 }
0x1768   :  { %v3973_v51 = vmul.f32 1.442695, %v3964_v3 }
0x1769   :  { %v3971_v35 = vmul.f32 1.442695, %v3963_v23  ;;  %v3695_v55 = vpop.xlane.xlu0 %3694 }
0x176a   :  { %10007 = vpow2.f32 %v3973_v51  ;;  %v3715_v25 = vsub.f32 %v11609_v36, %v3695_v55  ;;  %v3692_v40 = vpop.xlane.xlu1 %3691 }
0x176b   :  { %10009 = vpow2.f32 %v3971_v35  ;;  %v3714_v17 = vsub.f32 %v11617_v44, %v3692_v40 }
0x176c   :  { %v3724_v11 = vmul.f32 1.442695, %v3715_v25 }
0x176d   :  { %v3722_v5 = vmul.f32 1.442695, %v3714_v17  ;;  %v3950_v58 = vpop.xlane.xlu0 %3949 }
0x176e   :  { %10011 = vpow2.f32 %v3724_v11  ;;  %v3966_v26 = vsub.f32 %v11636_v13, %v3950_v58  ;;  %v3947_v32 = vpop.xlane.xlu1 %3946 }
0x176f   :  { %10013 = vpow2.f32 %v3722_v5  ;;  %v3965_v63 = vsub.f32 %v11642_v20, %v3947_v32 }
0x1770   :  { %v3977_v49 = vmul.f32 1.442695, %v3966_v26 }
0x1771   :  { %v3975_v3 = vmul.f32 1.442695, %v3965_v63  ;;  %v3701_v30 = vpop.xlane.xlu0 %3700 }
0x1772   :  { %10015 = vpow2.f32 %v3977_v49  ;;  %v3717_v36 = vsub.f32 %v11639_v15, %v3701_v30  ;;  %v3698_v23 = vpop.xlane.xlu1 %3697 }
0x1773   :  { %10017 = vpow2.f32 %v3975_v3  ;;  %v3716_v44 = vsub.f32 %v11647_v47, %v3698_v23 }
0x1774   :  { %v11823_v51 = vpop.eup %10007  ;;  %v3728_v35 = vmul.f32 1.442695, %v3717_v36 }
0x1775   :  { %v11825_v11 = vpop.eup %10009  ;;  %v3726_v58 = vmul.f32 1.442695, %v3716_v44  ;;  %v3956_v13 = vpop.xlane.xlu0 %3955  ;;  %v3990_v5 = vsel %vm2027_vm13, %v11823_v51, 0.0 }
0x1776   :  { %10019 = vpow2.f32 %v3728_v35  ;;  %v3968_v26 = vsub.f32 %v11666_v27, %v3956_v13  ;;  %3991 = vadd.xlane.f32.xlu0 %v3990_v5  ;;  %v3953_v20 = vpop.xlane.xlu1 %3952  ;;  %v3987_v15 = vsel %vm2027_vm13, %v11825_v11, 0.0 }
0x1777   :  { %v3967_v47 = vsub.f32 %v11672_v48, %v3953_v20  ;;  %3988 = vadd.xlane.f32.xlu1 %v3987_v15  ;;  %10021 = vpow2.f32 %v3726_v58 }
0x1778   :  { %v11833_v55 = vpop.eup %10011  ;;  %v3981_v25 = vmul.f32 1.442695, %v3968_v26 }
0x1779   :  { %v11835_v40 = vpop.eup %10013  ;;  %v3707_v17 = vpop.xlane.xlu0 %3706  ;;  %v3741_v32 = vsel %vm2027_vm13, %v11833_v55, 0.0  ;;  %v3979_v3 = vmul.f32 1.442695, %v3967_v47 }
0x177a   :  { %v3719_v27 = vsub.f32 %v11669_v31, %v3707_v17  ;;  %3742 = vadd.xlane.f32.xlu0 %v3741_v32  ;;  %v3704_v63 = vpop.xlane.xlu1 %3703  ;;  %v3738_v49 = vsel %vm2027_vm13, %v11835_v40, 0.0  ;;  %10023 = vpow2.f32 %v3981_v25 }
0x177b   :  { %v3718_v48 = vsub.f32 %v11677_v56, %v3704_v63  ;;  %3739 = vadd.xlane.f32.xlu1 %v3738_v49 }
0x177c   :  { %v11843_v30 = vpop.eup %10015  ;;  %v3732_v36 = vmul.f32 1.442695, %v3719_v27 }
0x177d   :  { %v11845_v23 = vpop.eup %10017  ;;  %v3730_v44 = vmul.f32 1.442695, %v3718_v48  ;;  %v3962_v35 = vpop.xlane.xlu0 %3961  ;;  %v3996_v31 = vsel %vm2027_vm13, %v11843_v30, 0.0 }
0x177e   :  { %10025 = vpow2.f32 %v3732_v36  ;;  %v3970_v58 = vsub.f32 %v11696_v53, %v3962_v35  ;;  %3997 = vadd.xlane.f32.xlu0 %v3996_v31  ;;  %v3959_v13 = vpop.xlane.xlu1 %3958  ;;  %v3993_v56 = vsel %vm2027_vm13, %v11845_v23, 0.0 }
0x177f   :  { %10027 = vpow2.f32 %v3979_v3  ;;  %3994 = vadd.xlane.f32.xlu1 %v3993_v56  ;;  %v3969_v20 = vsub.f32 %v11699_v52, %v3959_v13 }
0x1780   :  { %v11852_v5 = vpop.eup %10019  ;;  %10029 = vpow2.f32 %v3730_v44  ;;  %v3985_v26 = vmul.f32 1.442695, %v3970_v58 }
0x1781   :  { %v3713_v15 = vpop.xlane.xlu0 %3712  ;;  %v3747_v47 = vsel %vm2027_vm13, %v11852_v5, 0.0  ;;  %v11857_v25 = vpop.eup %10021  ;;  %v3983_v32 = vmul.f32 1.442695, %v3969_v20 }
0x1782   :  { %v3721_v53 = vsub.f32 %v11702_v2, %v3713_v15  ;;  %3748 = vadd.xlane.f32.xlu0 %v3747_v47  ;;  %v3710_v17 = vpop.xlane.xlu1 %3709  ;;  %10031 = vpow2.f32 %v3985_v26  ;;  %v3744_v3 = vsel %vm2027_vm13, %v11857_v25, 0.0 }
0x1783   :  { %v3720_v63 = vsub.f32 %v11707_v19, %v3710_v17 }
0x1784   :  { %v3736_v27 = vmul.f32 1.442695, %v3721_v53  ;;  %v11863_v52 = vpop.eup %10023 }
0x1785   :  { %v4515_v49 = vpop.xlane.xlu0 %4514  ;;  %v3734_v2 = vmul.f32 1.442695, %v3720_v63  ;;  %v4002_v56 = vsel %vm2027_vm13, %v11863_v52, 0.0 }
0x1786   :  { %10033 = vpow2.f32 %v3736_v27  ;;  %v4535_v48 = vsub.f32 %v11716_v0, %v4515_v49  ;;  %3745 = vadd.xlane.f32.xlu0 %v3744_v3  ;;  %v4512_v36 = vpop.xlane.xlu1 %4511 }
0x1787   :  { %10035 = vpow2.f32 %v3983_v32  ;;  %v4534_v31 = vsub.f32 %v11719_v42, %v4512_v36 }
0x1788   :  { %v11866_v44 = vpop.eup %10025  ;;  %v4544_v35 = vmul.f32 1.442695, %v4535_v48 }
0x1789   :  { %v11869_v58 = vpop.eup %10027  ;;  %v4521_v19 = vpop.xlane.xlu0 %4520  ;;  %v3753_v13 = vsel %vm2027_vm13, %v11866_v44, 0.0  ;;  %v4542_v15 = vmul.f32 1.442695, %v4534_v31 }
0x178a   :  { %v11875_v26 = vpop.eup %10029  ;;  %10037 = vpow2.f32 %v4544_v35  ;;  %v4537_v0 = vsub.f32 %v11726_v61, %v4521_v19  ;;  %3754 = vadd.xlane.f32.xlu1 %v3753_v13  ;;  %4003 = vadd.xlane.f32.xlu0 %v4002_v56  ;;  %v4518_v20 = vpop.xlane.xlu1 %4517  ;;  %v3999_v17 = vsel %vm2027_vm13, %v11869_v58, 0.0 }
0x178b   :  { %10039 = vpow2.f32 %v3734_v2  ;;  %v4536_v47 = vsub.f32 %v11729_v33, %v4518_v20  ;;  %v3750_v32 = vsel %vm2027_vm13, %v11875_v26, 0.0 }
0x178c   :  { %v4548_v42 = vmul.f32 1.442695, %v4537_v0  ;;  %v11883_v27 = vpop.eup %10031 }
0x178d   :  { %v4527_v53 = vpop.xlane.xlu0 %4526  ;;  %v4546_v3 = vmul.f32 1.442695, %v4536_v47  ;;  %v4008_v35 = vsel %vm2027_vm13, %v11883_v27, 0.0 }
0x178e   :  { %10041 = vpow2.f32 %v4548_v42  ;;  %v4539_v61 = vsub.f32 %v11736_v50, %v4527_v53  ;;  %4000 = vadd.xlane.f32.xlu1 %v3999_v17  ;;  %3751 = vadd.xlane.f32.xlu0 %v3750_v32  ;;  %v4524_v63 = vpop.xlane.xlu1 %4523 }
0x178f   :  { %10043 = vpow2.f32 %v4542_v15  ;;  %v4538_v48 = vsub.f32 %v11739_v24, %v4524_v63 }
0x1790   :  { %v11886_v49 = vpop.eup %10033  ;;  %v4552_v33 = vmul.f32 1.442695, %v4539_v61 }
0x1791   :  { %v4533_v36 = vpop.xlane.xlu0 %4532  ;;  %v3759_v2 = vsel %vm2027_vm13, %v11886_v49, 0.0  ;;  %v11893_v31 = vpop.eup %10035  ;;  %v4550_v56 = vmul.f32 1.442695, %v4538_v48 }
0x1792   :  { %10045 = vpow2.f32 %v4552_v33  ;;  %v4541_v50 = vsub.f32 %v11746_v1, %v4533_v36  ;;  %3760 = vadd.xlane.f32.xlu1 %v3759_v2  ;;  %4009 = vadd.xlane.f32.xlu0 %v4008_v35  ;;  %v4530_v19 = vpop.xlane.xlu1 %4529  ;;  %v4005_v15 = vsel %vm2027_vm13, %v11893_v31, 0.0 }
0x1793   :  { %10047 = vpow2.f32 %v4546_v3  ;;  %v4540_v0 = vsub.f32 %v11749_v45, %v4530_v19 }
0x1794   :  { %v11896_v13 = vpop.eup %10037  ;;  %v4556_v24 = vmul.f32 1.442695, %v4541_v50 }
0x1795   :  { %v4561_v20 = vsel %vm2027_vm13, %v11896_v13, 0.0  ;;  %v11903_v42 = vpop.eup %10039  ;;  %v4554_v47 = vmul.f32 1.442695, %v4540_v0 }
0x1796   :  { %10049 = vpow2.f32 %v4556_v24  ;;  %4562 = vadd.xlane.f32.xlu1 %v4561_v20  ;;  %4006 = vadd.xlane.f32.xlu0 %v4005_v15  ;;  %v3756_v45 = vsel %vm2027_vm13, %v11903_v42, 0.0 }
0x1797   :  { %10051 = vpow2.f32 %v4550_v56 }
0x1798   :  { %v11905_v1 = vpop.eup %10041  ;;  %10053 = vpow2.f32 %v4554_v47 }
0x1799   :  { %v4567_v53 = vsel %vm2027_vm13, %v11905_v1, 0.0  ;;  %v11911_v17 = vpop.eup %10043 }
0x179a   :  { %4568 = vadd.xlane.f32.xlu1 %v4567_v53  ;;  %3757 = vadd.xlane.f32.xlu0 %v3756_v45  ;;  %v4558_v63 = vsel %vm2027_vm13, %v11911_v17, 0.0 }
0x179c   :  { %v11913_v32 = vpop.eup %10045 }
0x179d   :  { %v4573_v61 = vsel %vm2027_vm13, %v11913_v32, 0.0  ;;  %v11919_v3 = vpop.eup %10047 }
0x179e   :  { %4574 = vadd.xlane.f32.xlu1 %v4573_v61  ;;  %4559 = vadd.xlane.f32.xlu0 %v4558_v63  ;;  %v4564_v36 = vsel %vm2027_vm13, %v11919_v3, 0.0 }
0x17a0   :  { %v11921_v33 = vpop.eup %10049 }
0x17a1   :  { %v4579_v48 = vsel %vm2027_vm13, %v11921_v33, 0.0  ;;  %v11927_v2 = vpop.eup %10051 }
0x17a2   :  { %4580 = vadd.xlane.f32.xlu1 %v4579_v48  ;;  %4565 = vadd.xlane.f32.xlu0 %v4564_v36  ;;  %v4570_v50 = vsel %vm2027_vm13, %v11927_v2, 0.0  ;;  %v11931_v19 = vpop.eup %10053 }
0x17a3   :  { %v4576_v53 = vsel %vm2027_vm13, %v11931_v19, 0.0 }
0x17a5   :  { %v4933_v35 = vpop.xlane.xlu0 %4932 }
0x17a6   :  { %v4953_v56 = vsub.f32 %v11756_v10, %v4933_v35  ;;  %v4930_v24 = vpop.xlane.xlu1 %4929  ;;  %4571 = vadd.xlane.f32.xlu0 %v4570_v50 }
0x17a7   :  { %v4952_v0 = vsub.f32 %v11759_v38, %v4930_v24 }
0x17a8   :  { %v4962_v20 = vmul.f32 1.442695, %v4953_v56 }
0x17a9   :  { %v4960_v15 = vmul.f32 1.442695, %v4952_v0  ;;  %v4939_v47 = vpop.xlane.xlu0 %4938 }
0x17aa   :  { %10055 = vpow2.f32 %v4962_v20  ;;  %v4955_v45 = vsub.f32 %v11766_v21, %v4939_v47  ;;  %v4936_v61 = vpop.xlane.xlu1 %4935  ;;  %4577 = vadd.xlane.f32.xlu0 %v4576_v53 }
0x17ab   :  { %10057 = vpow2.f32 %v4960_v15  ;;  %v4954_v63 = vsub.f32 %v11769_v18, %v4936_v61 }
0x17ac   :  { %v4966_v48 = vmul.f32 1.442695, %v4955_v45 }
0x17ad   :  { %v4964_v10 = vmul.f32 1.442695, %v4954_v63  ;;  %v4945_v36 = vpop.xlane.xlu0 %4944 }
0x17ae   :  { %10059 = vpow2.f32 %v4966_v48  ;;  %v4957_v38 = vsub.f32 %v11776_v6, %v4945_v36  ;;  %v4942_v35 = vpop.xlane.xlu1 %4941  ;;  %v12803_v48 = vpack.i.bf16 %v11324_v8, %v11332_v16 }
0x17af   :  { %10061 = vpow2.f32 %v4964_v10  ;;  %v4956_v50 = vsub.f32 %v11779_v46, %v4942_v35 }
0x17b0   :  { %v4970_v56 = vmul.f32 1.442695, %v4957_v38 }
0x17b1   :  { %v4968_v24 = vmul.f32 1.442695, %v4956_v50  ;;  %v11969_v10 = vpop.permute.xlu0 %9844 }
0x17b2   :  { %10063 = vpow2.f32 %v4970_v56  ;;  %v11971_v36 = vpop.permute.xlu1 %9839 }
0x17b3   :  { %10065 = vpow2.f32 %v4968_v24 }
0x17b4   :  { %v11941_v21 = vpop.eup %10055 }
0x17b5   :  { %v11943_v0 = vpop.eup %10057  ;;  %v4979_v18 = vsel %vm2027_vm13, %v11941_v21, 0.0 }
0x17b6   :  { %4980 = vadd.xlane.f32.xlu1 %v4979_v18  ;;  %v4976_v20 = vsel %vm2027_vm13, %v11943_v0, 0.0 }
0x17b7   :  { %4977 = vadd.xlane.f32.xlu0 %v4976_v20 }
0x17b8   :  { %v11949_v6 = vpop.eup %10059 }
0x17b9   :  { %v11951_v15 = vpop.eup %10061  ;;  %v4985_v46 = vsel %vm2027_vm13, %v11949_v6, 0.0 }
0x17ba   :  { %4986 = vadd.xlane.f32.xlu1 %v4985_v46  ;;  %v4982_v47 = vsel %vm2027_vm13, %v11951_v15, 0.0 }
0x17bb   :  { %4983 = vadd.xlane.f32.xlu0 %v4982_v47 }
0x17bc   :  { %v11957_v53 = vpop.eup %10063 }
0x17bd   :  { %v11959_v45 = vpop.eup %10065  ;;  %v4991_v61 = vsel %vm2027_vm13, %v11957_v53, 0.0 }
0x17be   :  { %4992 = vadd.xlane.f32.xlu1 %v4991_v61  ;;  %v4988_v63 = vsel %vm2027_vm13, %v11959_v45, 0.0 }
0x17bf   :  { %4989 = vadd.xlane.f32.xlu0 %v4988_v63  ;;  %v12805_v63 = vpack.i.bf16 %v11392_v54, %v11402_v59  ;;  %v9817_v54 = vunpack.i.h.bf16 %v11801_v14  ;;  %v9816_v59 = vunpack.i.l.bf16 %v11801_v14 }
0x17d5   :  { %9849 = vrot.lane.b32.xlu0 %v12803_v48, %s10337_s9 }
0x17e2   :  { %v4951_v38 = vpop.xlane.xlu0 %4950 }
0x17e3   :  { %v4959_v35 = vsub.f32 %v11786_v60, %v4951_v38  ;;  %v4948_v50 = vpop.xlane.xlu1 %4947 }
0x17e4   :  { %v4958_v56 = vsub.f32 %v11789_v22, %v4948_v50  ;;  %v12804_v22 = vpack.i.bf16 %v11357_v4, %v11366_v57  ;;  %v9811_v4 = vunpack.i.l.bf16 %v11805_v43 }
0x17e5   :  { %v4974_v24 = vmul.f32 1.442695, %v4959_v35 }
0x17e6   :  { %v4972_v18 = vmul.f32 1.442695, %v4958_v56 }
0x17e7   :  { %10067 = vpow2.f32 %v4974_v24  ;;  %v9812_v24 = vunpack.i.h.bf16 %v11805_v43 }
0x17e8   :  { %10069 = vpow2.f32 %v4972_v18 }
0x17f1   :  { %v11975_v20 = vpop.eup %10067 }
0x17f2   :  { %v11977_v46 = vpop.eup %10069  ;;  %v4997_v8 = vsel %vm2027_vm13, %v11975_v20, 0.0 }
0x17f3   :  { %4998 = vadd.xlane.f32.xlu1 %v4997_v8  ;;  %v4994_v16 = vsel %vm2027_vm13, %v11977_v46, 0.0 }
0x17f4   :  { %4995 = vadd.xlane.f32.xlu0 %v4994_v16 }
0x1803   :  { %v3992_v60 = vpop.xlane.xlu0 %3991 }
0x1804   :  { %10071 = vrcp.f32 %v3992_v60  ;;  %9854 = vrot.lane.b32.xlu1 %v12804_v22, %s10337_s9  ;;  %v3989_v47 = vpop.xlane.xlu1 %3988  ;;  %v9497_v60 = vpack.c.bf16 %v9812_v24, %v9811_v4 }
0x1805   :  { %10073 = vrcp.f32 %v3989_v47  ;;  %v9822_v47 = vunpack.i.h.bf16 %v11809_v9 }
0x1807   :  { %v3743_v61 = vpop.xlane.xlu0 %3742 }
0x1808   :  { %9859 = vrot.lane.b32.xlu1 %v12805_v63, %s10337_s9  ;;  %v3740_v48 = vpop.xlane.xlu1 %3739 }
0x180b   :  { %v3998_v38 = vpop.xlane.xlu0 %3997 }
0x180c   :  { %10075 = vrcp.f32 %v3998_v38  ;;  %v3995_v35 = vpop.xlane.xlu1 %3994  ;;  %v9501_v38 = vpack.c.bf16 %v9817_v54, %v9816_v59 }
0x180d   :  { %10077 = vrcp.f32 %v3995_v35 }
0x180e   :  { %v10072_v50 = vpop.eup %10071 }
0x180f   :  { %v10074_v56 = vpop.eup %10073  ;;  %v3749_v57 = vpop.xlane.xlu0 %3748  ;;  %v4020_v8 = vmul.f32 %v10072_v50, %v11823_v51  ;;  %v9826_v50 = vunpack.i.l.bf16 %v11807_v41 }
0x1810   :  { %v4019_v18 = vmul.f32 %v10074_v56, %v11825_v11  ;;  %v9821_v11 = vunpack.i.l.bf16 %v11809_v9 }
0x1812   :  { %8837 = vmatprep.mubr.msk.f32.mxu0 %vm2027_vm13, %v4019_v18  ;;  %v9505_v9 = vpack.c.bf16 %v9822_v47, %v9821_v11 }
0x1813   :  { %v3746_v16 = vpop.xlane.xlu0 %3745  ;;  %8838 = vmatmul.mubr.msk.f32.vlgmr.msra.gmra.mrb[42].mxu0 %vm2027_vm13, %v4020_v8 }
0x1814   :  { %9496 = vmatpush3.bf16.msra.mxu0 %v11571_v34  ;;  %v9827_v34 = vunpack.i.h.bf16 %v11807_v41 }
0x1815   :  { %9498 = vmatprep.subr.bf16.mxu0 %v9497_v60 }
0x1816   :  { %v10076_v22 = vpop.eup %10075 }
0x1817   :  { %v10078_v43 = vpop.eup %10077  ;;  %v4004_v51 = vpop.xlane.xlu0 %4003  ;;  %v4022_v14 = vmul.f32 %v10076_v22, %v11843_v30 }
0x1818   :  { %v3755_v63 = vpop.xlane.xlu1 %3754  ;;  %9500 = vmatpush3.bf16.msra.mxu0 %v9497_v60  ;;  %v4021_v35 = vmul.f32 %v10078_v43, %v11845_v23  ;;  %10079 = vrcp.f32 %v4004_v51  ;;  %v9533_v23 = vpack.c.bf16 %v9827_v34, %v9826_v50  ;;  %v9836_v50 = vunpack.i.l.bf16 %v11811_v7 }
0x1819   :  { %9502 = vmatprep.subr.bf16.mxu0 %v9501_v38 }
0x181a   :  { %8840 = vmatprep.mubr.msk.f32.mxu0 %vm2027_vm13, %v4021_v35  ;;  %v9831_v35 = vunpack.i.l.bf16 %v11813_v28 }
0x181b   :  { %v3752_v56 = vpop.xlane.xlu0 %3751  ;;  %8841 = vmatmul.mubr.msk.f32.gmra.mrb[44].mxu0 %vm2027_vm13, %v4022_v14 }
0x181c   :  { %v4001_v24 = vpop.xlane.xlu1 %4000  ;;  %9504 = vmatpush3.bf16.msra.mxu0 %v9501_v38  ;;  %v9832_v38 = vunpack.i.h.bf16 %v11813_v28 }
0x181d   :  { %10081 = vrcp.f32 %v4001_v24  ;;  %9506 = vmatprep.subr.bf16.mxu0 %v9505_v9 }
0x181e   :  { %10083 = vrcp.f32 %v3740_v48  ;;  %v9537_v28 = vpack.c.bf16 %v9832_v38, %v9831_v35 }
0x181f   :  { %v4010_v4 = vpop.xlane.xlu0 %4009 }
0x1820   :  { %9508 = vmatpush3.bf16.msra.mxu0 %v9505_v9  ;;  %10085 = vrcp.f32 %v4010_v4  ;;  %v3761_v54 = vpop.xlane.xlu1 %3760  ;;  %v9842_v4 = vunpack.i.h.bf16 %v11971_v36 }
0x1821   :  { %9534 = vmatprep.subr.bf16.mxu0 %v9533_v23 }
0x1822   :  { %v10080_v18 = vpop.eup %10079 }
0x1823   :  { %v4007_v30 = vpop.xlane.xlu0 %4006  ;;  %v4024_v60 = vmul.f32 %v10080_v18, %v11863_v52 }
0x1824   :  { %10087 = vrcp.f32 %v4007_v30  ;;  %v4563_v11 = vpop.xlane.xlu1 %4562 }
0x1825   :  { %10089 = vrcp.f32 %v3743_v61 }
0x1826   :  { %10091 = vrcp.f32 %v3746_v16 }
0x1827   :  { %v10082_v8 = vpop.eup %10081  ;;  %v3758_v41 = vpop.xlane.xlu0 %3757  ;;  %10093 = vrcp.f32 %v3749_v57 }
0x1828   :  { %v4023_v59 = vmul.f32 %v10082_v8, %v11869_v58  ;;  %v10084_v48 = vpop.eup %10083  ;;  %10095 = vrcp.f32 %v3752_v56 }
0x1829   :  { %10097 = vrcp.f32 %v3755_v63  ;;  %v3770_v52 = vmul.f32 %v10084_v48, %v11835_v40  ;;  %v4569_v63 = vpop.xlane.xlu1 %4568  ;;  %v9837_v40 = vunpack.i.h.bf16 %v11811_v7  ;;  %v9841_v7 = vunpack.i.l.bf16 %v11971_v36 }
0x182a   :  { %8843 = vmatprep.mubr.msk.f32.mxu0 %vm2027_vm13, %v4023_v59  ;;  %v10086_v43 = vpop.eup %10085  ;;  %10099 = vrcp.f32 %v3758_v41  ;;  %v9846_v36 = vunpack.i.l.bf16 %v11969_v10 }
0x182b   :  { %8844 = vmatmul.mubr.msk.f32.gmra.mrb[46].mxu0 %vm2027_vm13, %v4024_v60  ;;  %v4560_v22 = vpop.xlane.xlu0 %4559  ;;  %v4026_v16 = vmul.f32 %v10086_v43, %v11883_v27  ;;  %10101 = vrcp.f32 %v3761_v54  ;;  %v9541_v18 = vpack.c.bf16 %v9837_v40, %v9836_v50  ;;  %v9847_v54 = vunpack.i.h.bf16 %v11969_v10 }
0x182c   :  { %10103 = vrcp.f32 %v4560_v22  ;;  %v9545_v59 = vpack.c.bf16 %v9842_v4, %v9841_v7 }
0x182d   :  { %10105 = vrcp.f32 %v4563_v11  ;;  %v4575_v30 = vpop.xlane.xlu1 %4574  ;;  %v9573_v43 = vpack.c.bf16 %v9847_v54, %v9846_v36 }
0x182e   :  { %v10088_v47 = vpop.eup %10087 }
0x182f   :  { %v4025_v61 = vmul.f32 %v10088_v47, %v11893_v31  ;;  %v10090_v58 = vpop.eup %10089  ;;  %v4566_v51 = vpop.xlane.xlu0 %4565 }
0x1830   :  { %v10092_v57 = vpop.eup %10091  ;;  %v3771_v31 = vmul.f32 %v10090_v58, %v11833_v55  ;;  %10107 = vrcp.f32 %v4566_v51 }
0x1831   :  { %8846 = vmatprep.mubr.msk.f32.mxu0 %vm2027_vm13, %v4025_v61  ;;  %v10094_v27 = vpop.eup %10093  ;;  %v3772_v14 = vmul.f32 %v10092_v57, %v11857_v25  ;;  %10109 = vrcp.f32 %v4569_v63  ;;  %v4581_v60 = vpop.xlane.xlu1 %4580 }
0x1832   :  { %8847 = vmatmul.mubr.msk.f32.gmra.mrb[48].mxu0 %vm2027_vm13, %v4026_v16  ;;  %v10096_v34 = vpop.eup %10095  ;;  %v3773_v55 = vmul.f32 %v10094_v27, %v11852_v5 }
0x1833   :  { %8865 = vmatprep.mubr.msk.f32.mxu0 %vm2027_vm13, %v3770_v52  ;;  %v4572_v56 = vpop.xlane.xlu0 %4571  ;;  %v10098_v24 = vpop.eup %10097  ;;  %v3774_v25 = vmul.f32 %v10096_v34, %v11875_v26 }
0x1834   :  { %v10100_v9 = vpop.eup %10099  ;;  %10111 = vrcp.f32 %v4572_v56  ;;  %v3775_v5 = vmul.f32 %v10098_v24, %v11866_v44  ;;  %v5193_v24 = vld [vmem:[%s12777_s2 + $0x1e8] sm:$0xff] }
0x1835   :  { %v3776_v26 = vmul.f32 %v10100_v9, %v11903_v42  ;;  %10113 = vrcp.f32 %v4575_v30 }
0x1836   :  { %8866 = vmatmul.mubr.msk.f32.vlgmr.msra.gmra.mrb[42].mxu0 %vm2027_vm13, %v3771_v31 }
0x1837   :  { %9536 = vmatpush3.bf16.msra.mxu0 %v9533_v23  ;;  %8868 = vmatprep.mubr.msk.f32.mxu0 %vm2027_vm13, %v3772_v14  ;;  %v10102_v23 = vpop.eup %10101  ;;  %v4578_v8 = vpop.xlane.xlu0 %4577 }
0x1838   :  { %9538 = vmatprep.subr.bf16.mxu0 %v9537_v28  ;;  %v10104_v41 = vpop.eup %10103  ;;  %10115 = vrcp.f32 %v4578_v8  ;;  %v3777_v44 = vmul.f32 %v10102_v23, %v11886_v49  ;;  %v5196_v23 = vld [vmem:[%s12777_s2 + $0x200] sm:$0xff] }
0x1839   :  { %v10106_v22 = vpop.eup %10105  ;;  %v4590_v42 = vmul.f32 %v10104_v41, %v11911_v17  ;;  %10117 = vrcp.f32 %v4581_v60 }
0x183a   :  { %8869 = vmatmul.mubr.msk.f32.gmra.mrb[44].mxu0 %vm2027_vm13, %v3773_v55  ;;  %v10108_v48 = vpop.eup %10107  ;;  %v4591_v10 = vmul.f32 %v10106_v22, %v11896_v13 }
0x183b   :  { %9540 = vmatpush3.bf16.msra.mxu0 %v9537_v28  ;;  %8871 = vmatprep.mubr.msk.f32.mxu0 %vm2027_vm13, %v3774_v25  ;;  %v10110_v11 = vpop.eup %10109  ;;  %v4592_v61 = vmul.f32 %v10108_v48, %v11919_v3  ;;  %v5194_v25 = vld [vmem:[%s12777_s2 + $0x1f0] sm:$0xff] }
0x183c   :  { %9542 = vmatprep.subr.bf16.mxu0 %v9541_v18  ;;  %v4593_v16 = vmul.f32 %v10110_v11, %v11905_v1  ;;  %v9589_v30 = vpack.c.bf16 %v5194_v25, %v5193_v24  ;;  %v5334_v11 = vld [vmem:[%s12782_s4 + $0x58] sm:$0xff] }
0x183e   :  { %8872 = vmatmul.mubr.msk.f32.gmra.mrb[46].mxu0 %vm2027_vm13, %v3775_v5  ;;  %v10112_v49 = vpop.eup %10111  ;;  %v5195_v5 = vld [vmem:[%s12777_s2 + $0x1f8] sm:$0xff] }
0x183f   :  { %9544 = vmatpush3.bf16.msra.mxu0 %v9541_v18  ;;  %8874 = vmatprep.mubr.msk.f32.mxu0 %vm2027_vm13, %v3776_v26  ;;  %v10114_v58 = vpop.eup %10113  ;;  %v4594_v51 = vmul.f32 %v10112_v49, %v11927_v2  ;;  %v9593_v41 = vpack.c.bf16 %v5196_v23, %v5195_v5  ;;  %v5337_v49 = vld [vmem:[%s12780_s3 + $0xc0] sm:$0xff] }
0x1840   :  { %9546 = vmatprep.subr.bf16.mxu0 %v9545_v59  ;;  %v4595_v3 = vmul.f32 %v10114_v58, %v11913_v32 }
0x1842   :  { %8875 = vmatmul.mubr.msk.f32.gmra.mrb[48].mxu0 %vm2027_vm13, %v3777_v44  ;;  %v10116_v52 = vpop.eup %10115 }
0x1843   :  { %9548 = vmatpush3.bf16.msra.mxu0 %v9545_v59  ;;  %8921 = vmatprep.mubr.msk.f32.mxu0 %vm2027_vm13, %v4590_v42  ;;  %v10118_v57 = vpop.eup %10117  ;;  %v4596_v38 = vmul.f32 %v10116_v52, %v11931_v19  ;;  %v4981_v19 = vpop.xlane.xlu1 %4980 }
0x1844   :  { %v4978_v47 = vpop.xlane.xlu0 %4977  ;;  %9574 = vmatprep.subr.bf16.mxu0 %v9573_v43  ;;  %v4597_v31 = vmul.f32 %v10118_v57, %v11921_v33 }
0x1845   :  { %10119 = vrcp.f32 %v4978_v47 }
0x1846   :  { %8922 = vmatmul.mubr.msk.f32.vlgmr.msra.gmra.mrb[42].mxu0 %vm2027_vm13, %v4591_v10  ;;  %10121 = vrcp.f32 %v4981_v19  ;;  %v5333_v10 = vld [vmem:[%s12782_s4 + $0x50] sm:$0xff] }
0x1847   :  { %9576 = vmatpush3.bf16.msra.mxu0 %v9573_v43  ;;  %8924 = vmatprep.mubr.msk.f32.mxu0 %vm2027_vm13, %v4592_v61  ;;  %v4987_v14 = vpop.xlane.xlu1 %4986  ;;  %v5336_v43 = vld [vmem:[%s12780_s3 + $0xb8] sm:$0xff]  ;;  %v9601_v61 = vpack.c.bf16 %v5334_v11, %v5333_v10 }
0x1848   :  { %v4984_v17 = vpop.xlane.xlu0 %4983 }
0x1849   :  { %10123 = vrcp.f32 %v4984_v17  ;;  %v5338_v17 = vld [vmem:[%s12780_s3 + $0xc8] sm:$0xff] }
0x184a   :  { %8925 = vmatmul.mubr.msk.f32.gmra.mrb[44].mxu0 %vm2027_vm13, %v4593_v16  ;;  %10125 = vrcp.f32 %v4987_v14 }
0x184b   :  { %8927 = vmatprep.mubr.msk.f32.mxu0 %vm2027_vm13, %v4594_v51  ;;  %v4993_v34 = vpop.xlane.xlu1 %4992  ;;  %v9609_v51 = vpack.c.bf16 %v5338_v17, %v5337_v49 }
0x184c   :  { %v4990_v13 = vpop.xlane.xlu0 %4989 }
0x184d   :  { %10127 = vrcp.f32 %v4990_v13 }
0x184e   :  { %8928 = vmatmul.mubr.msk.f32.gmra.mrb[46].mxu0 %vm2027_vm13, %v4595_v3  ;;  %10129 = vrcp.f32 %v4993_v34 }
0x184f   :  { %v10120_v35 = vpop.eup %10119  ;;  %8930 = vmatprep.mubr.msk.f32.mxu0 %vm2027_vm13, %v4596_v38 }
0x1850   :  { %v9850_v1 = vpop.permute.xlu0 %9849  ;;  %v5008_v27 = vmul.f32 %v10120_v35, %v11943_v0  ;;  %v10122_v18 = vpop.eup %10121 }
0x1851   :  { %v9852_v2 = vunpack.i.h.bf16 %v9850_v1  ;;  %v9851_v63 = vunpack.i.l.bf16 %v9850_v1  ;;  %v5009_v26 = vmul.f32 %v10122_v18, %v11941_v21  ;;  %v12806_v1 = vld [vmem:[#allocation3_spill] sm:$0xff] }
0x1852   :  { %8931 = vmatmul.mubr.msk.f32.gmra.mrb[48].mxu0 %vm2027_vm13, %v4597_v31  ;;  %v12807_v31 = vld [vmem:[#allocation5_spill] sm:$0xff] }
0x1853   :  { %8977 = vmatprep.mubr.msk.f32.mxu0 %vm2027_vm13, %v5008_v27  ;;  %v9577_v32 = vpack.c.bf16 %v9852_v2, %v9851_v63  ;;  %v10124_v8 = vpop.eup %10123  ;;  %v12808_v2 = vld [vmem:[#allocation4_spill] sm:$0xff] }
0x1854   :  { %v10126_v54 = vpop.eup %10125  ;;  %v5010_v36 = vmul.f32 %v10124_v8, %v11951_v15  ;;  %v7891_v63 = vld [vmem:[%s12777_s2 + $0x2b0] ss:$0 sm:$0xff] }
0x1855   :  { %9578 = vmatprep.subr.bf16.mxu0 %v9577_v32  ;;  %v5011_v60 = vmul.f32 %v10126_v54, %v11949_v6  ;;  %v5339_v54 = vld [vmem:[%s12777_s2 + $0x208] sm:$0xff] }
0x1856   :  { %9580 = vmatpush3.bf16.msra.mxu0 %v9577_v32 }
0x1857   :  { %v10128_v59 = vpop.eup %10127 }
0x1858   :  { %v10130_v44 = vpop.eup %10129  ;;  %v5012_v22 = vmul.f32 %v10128_v59, %v11959_v45  ;;  %v5335_v45 = vld [vmem:[%s12780_s3 + $0xb0] sm:$0xff] }
0x1859   :  { %v5013_v21 = vmul.f32 %v10130_v44, %v11957_v53  ;;  %v9605_v53 = vpack.c.bf16 %v5336_v43, %v5335_v45  ;;  %v5342_v44 = vld [vmem:[%s12777_s2 + $0x220] sm:$0xff] }
0x1880   :  { %v4999_v40 = vpop.xlane.xlu1 %4998 }
0x1881   :  { %v4996_v0 = vpop.xlane.xlu0 %4995 }
0x1882   :  { %10131 = vrcp.f32 %v4996_v0 }
0x1883   :  { %10133 = vrcp.f32 %v4999_v40 }
0x1884   :  { %v9855_v50 = vpop.permute.xlu1 %9854 }
0x1885   :  { %v9857_v28 = vunpack.i.h.bf16 %v9855_v50  ;;  %v9856_v33 = vunpack.i.l.bf16 %v9855_v50 }
0x1887   :  { %v9581_v56 = vpack.c.bf16 %v9857_v28, %v9856_v33 }
0x1888   :  { %v9860_v55 = vpop.permute.xlu1 %9859 }
0x1889   :  { %v9862_v9 = vunpack.i.h.bf16 %v9860_v55  ;;  %v9861_v4 = vunpack.i.l.bf16 %v9860_v55  ;;  %9582 = vmatprep.subr.bf16.mxu0 %v9581_v56 }
0x188a   :  { %9584 = vmatpush3.bf16.msra.mxu0 %v9581_v56 }
0x188b   :  { %v9585_v7 = vpack.c.bf16 %v9862_v9, %v9861_v4 }
0x188c   :  { %v10132_v42 = vpop.eup %10131 }
0x188d   :  { %9586 = vmatprep.subr.bf16.mxu0 %v9585_v7  ;;  %v10134_v15 = vpop.eup %10133  ;;  %v5014_v48 = vmul.f32 %v10132_v42, %v11977_v46  ;;  %v5331_v46 = vld [vmem:[%s12782_s4 + $0x40] sm:$0xff] }
0x188e   :  { %9588 = vmatpush3.bf16.msra.mxu0 %v9585_v7  ;;  %v5015_v6 = vmul.f32 %v10134_v15, %v11975_v20  ;;  %v5332_v20 = vld [vmem:[%s12782_s4 + $0x48] sm:$0xff] }
0x188f   :  { %9590 = vmatprep.subr.bf16.mxu0 %v9589_v30  ;;  %v9597_v47 = vpack.c.bf16 %v5332_v20, %v5331_v46 }
0x1891   :  { %8978 = vmatmul.mubr.msk.f32.vlgmr.msra.gmra.mrb[42].mxu0 %vm2027_vm13, %v5009_v26  ;;  %9598 = vmatprep.subr.bf16.mxu1 %v9597_v47 }
0x1892   :  { %8980 = vmatprep.mubr.msk.f32.mxu0 %vm2027_vm13, %v5010_v36  ;;  %9592 = vmatpush3.bf16.msra.mxu0 %v9589_v30  ;;  %v5340_v36 = vld [vmem:[%s12777_s2 + $0x210] sm:$0xff] }
0x1893   :  { %9594 = vmatprep.subr.bf16.mxu0 %v9593_v41  ;;  %9600 = vmatpush3.bf16.msra.mxu1 %v9597_v47  ;;  %v9613_v59 = vpack.c.bf16 %v5340_v36, %v5339_v54 }
0x1894   :  { %9602 = vmatprep.subr.bf16.mxu1 %v9601_v61 }
0x1895   :  { %8981 = vmatmul.mubr.msk.f32.gmra.mrb[44].mxu0 %vm2027_vm13, %v5011_v60  ;;  %v5341_v60 = vld [vmem:[%s12777_s2 + $0x218] sm:$0xff] }
0x1896   :  { %8983 = vmatprep.mubr.msk.f32.mxu0 %vm2027_vm13, %v5012_v22  ;;  %9596 = vmatpush3.bf16.msra.mxu0 %v9593_v41  ;;  %v9617_v22 = vpack.c.bf16 %v5342_v44, %v5341_v60 }
0x1897   :  { %9606 = vmatprep.subr.bf16.mxu0 %v9605_v53  ;;  %9604 = vmatpush3.bf16.msra.mxu1 %v9601_v61 }
0x1898   :  { %9614 = vmatprep.subr.bf16.mxu1 %v9613_v59 }
0x1899   :  { %8984 = vmatmul.mubr.msk.f32.gmra.mrb[46].mxu0 %vm2027_vm13, %v5013_v21 }
0x189a   :  { %8986 = vmatprep.mubr.msk.f32.mxu0 %vm2027_vm13, %v5014_v48 }
0x189d   :  { %8987 = vmatmul.mubr.msk.f32.gmra.mrb[48].mxu0 %vm2027_vm13, %v5015_v6 }
0x1964   :  { %v8979_v16 = vpop.f32.mrb[42].mxu0 }
0x1965   :  { %v5146_v58 = vpop.f32.mrb[43].mxu0 }
0x1966   :  { %8997 = vmatprep.mubr.msk.f32.mxu0 %vm252_vm1, %v5146_v58 }
0x1967   :  { %8998 = vmatmul.mubr.msk.f32.vlgmr.msra.gmra.mrb[50].mxu0 %vm252_vm1, %v8979_v16 }
0x1968   :  { %v8982_v52 = vpop.f32.mrb[44].mxu0  ;;  %9608 = vmatpush3.bf16.msra.mxu0 %v9605_v53 }
0x1969   :  { %v5156_v13 = vpop.f32.mrb[45].mxu0  ;;  %9610 = vmatprep.subr.bf16.mxu0 %v9609_v51 }
0x196a   :  { %9000 = vmatprep.mubr.msk.f32.mxu0 %vm252_vm1, %v5156_v13 }
0x196b   :  { %9001 = vmatmul.mubr.msk.f32.gmra.mrb[52].mxu0 %vm252_vm1, %v8982_v52 }
0x196c   :  { %v8985_v3 = vpop.f32.mrb[46].mxu0  ;;  %9612 = vmatpush3.bf16.msra.mxu0 %v9609_v51 }
0x196d   :  { %v5166_v57 = vpop.f32.mrb[47].mxu0 }
0x196e   :  { %9003 = vmatprep.mubr.msk.f32.mxu0 %vm252_vm1, %v5166_v57 }
0x196f   :  { %9004 = vmatmul.mubr.msk.f32.gmra.mrb[54].mxu0 %vm252_vm1, %v8985_v3 }
0x1970   :  { %v8988_v38 = vpop.f32.mrb[48].mxu0 }
0x1971   :  { %v5176_v35 = vpop.f32.mrb[49].mxu0 }
0x1972   :  { %9006 = vmatprep.mubr.msk.f32.mxu0 %vm252_vm1, %v5176_v35 }
0x1973   :  { %9007 = vmatmul.mubr.msk.f32.gmra.mrb[56].mxu0 %vm252_vm1, %v8988_v38 }
0x1974   :  { %9037 = vmatprep.mubr.msk.f32.mxu0 %vm252_vm1, %v11048_v12 }
0x1977   :  { %9038 = vmatmul.mubr.msk.f32.vlgmr.msra.gmra.mrb[58].mxu0 %vm252_vm1, %v11046_v62 }
0x1978   :  { %9040 = vmatprep.mubr.msk.f32.mxu0 %vm252_vm1, %v11056_v39 }
0x197b   :  { %9041 = vmatmul.mubr.msk.f32.gmra.mrb[60].mxu0 %vm252_vm1, %v11054_v37 }
0x197c   :  { %9043 = vmatprep.mubr.msk.f32.mxu0 %vm252_vm1, %v11064_v29 }
0x197f   :  { %9044 = vmatmul.mubr.msk.f32.gmra.mrb[62].mxu0 %vm252_vm1, %v12806_v1 }
0x1980   :  { %9046 = vmatprep.mubr.msk.f32.mxu0 %vm252_vm1, %v12807_v31 }
0x1983   :  { %9047 = vmatmul.mubr.msk.f32.gmra.mrb[64].mxu0 %vm252_vm1, %v12808_v2 }
0x1a3a   :  { %v8999_v27 = vpop.f32.mrb[50].mxu0 }
0x1a3b   :  { %v5292_v32 = vpop.f32.mrb[51].mxu0  ;;  %v5298_v14 = vadd.f32 %v8999_v27, %v7891_v63 }
0x1a3c   :  { %v5293_v19 = vadd.f32 %v7891_v63, %v5292_v32 }
0x1a3e   :  { %v9002_v34 = vpop.f32.mrb[52].mxu0  ;;  %9017 = vmatprep.mubr.msk.f32.mxu1 %vm252_vm1, %v5293_v19 }
0x1a3f   :  { %v5302_v40 = vpop.f32.mrb[53].mxu0  ;;  %9018 = vmatmul.mubr.msk.f32.vlgmr.msra.gmra.mrb[62].mxu1 %vm252_vm1, %v5298_v14  ;;  %v5308_v28 = vadd.f32 %v9002_v34, %v7891_v63 }
0x1a40   :  { %v5303_v50 = vadd.f32 %v7891_v63, %v5302_v40  ;;  %9616 = vmatpush3.bf16.msra.mxu1 %v9613_v59 }
0x1a41   :  { %9618 = vmatprep.subr.bf16.mxu1 %v9617_v22 }
0x1a42   :  { %v9005_v33 = vpop.f32.mrb[54].mxu0  ;;  %9020 = vmatprep.mubr.msk.f32.mxu1 %vm252_vm1, %v5303_v50 }
0x1a43   :  { %v5312_v56 = vpop.f32.mrb[55].mxu0  ;;  %9021 = vmatmul.mubr.msk.f32.gmra.mrb[64].mxu1 %vm252_vm1, %v5308_v28  ;;  %v5318_v55 = vadd.f32 %v9005_v33, %v7891_v63 }
0x1a44   :  { %v5313_v0 = vadd.f32 %v7891_v63, %v5312_v56  ;;  %9620 = vmatpush3.bf16.msra.mxu1 %v9617_v22 }
0x1a46   :  { %v9008_v24 = vpop.f32.mrb[56].mxu0  ;;  %9023 = vmatprep.mubr.msk.f32.mxu1 %vm252_vm1, %v5313_v0 }
0x1a47   :  { %v5322_v25 = vpop.f32.mrb[57].mxu0  ;;  %9024 = vmatmul.mubr.msk.f32.gmra.mrb[66].mxu1 %vm252_vm1, %v5318_v55  ;;  %v5328_v4 = vadd.f32 %v9008_v24, %v7891_v63 }
0x1a48   :  { %v5323_v9 = vadd.f32 %v7891_v63, %v5322_v25 }
0x1a4a   :  { %9026 = vmatprep.mubr.msk.f32.mxu1 %vm252_vm1, %v5323_v9  ;;  %v9039_v7 = vpop.f32.mrb[58].mxu0 }
0x1a4b   :  { %9027 = vmatmul.mubr.msk.f32.gmra.mrb[68].mxu1 %vm252_vm1, %v5328_v4  ;;  %v5563_v30 = vpop.f32.mrb[59].mxu0 }
0x1a4e   :  { %v9042_v18 = vpop.f32.mrb[60].mxu0 }
0x1a4f   :  { %v5573_v5 = vpop.f32.mrb[61].mxu0 }
0x1a52   :  { %v9045_v23 = vpop.f32.mrb[62].mxu0 }
0x1a53   :  { %v5583_v8 = vpop.f32.mrb[63].mxu0 }
0x1a56   :  { %v9048_v26 = vpop.f32.mrb[64].mxu0 }
0x1a57   :  { %v5593_v41 = vpop.f32.mrb[65].mxu0 }
0x1b12   :  { %v12155_v42 = vpop.f32.mrb[62].mxu1 }
0x1b13   :  { %v12158_v21 = vadd.f32 %v9039_v7, %v12155_v42  ;;  %v12160_v15 = vpop.f32.mrb[63].mxu1 }
0x1b14   :  { %v12163_v48 = vadd.f32 %v5563_v30, %v12160_v15 }
0x1b15   :  { %v7917_v6 = vmul.f32 -1.442695, %v12158_v21 }
0x1b16   :  { %v7916_v45 = vmul.f32 -1.442695, %v12163_v48  ;;  %v12167_v43 = vpop.f32.mrb[64].mxu1 }
0x1b17   :  { %10135 = vpow2.f32 %v7917_v6  ;;  %v12170_v53 = vadd.f32 %v9042_v18, %v12167_v43  ;;  %v12172_v46 = vpop.f32.mrb[65].mxu1 }
0x1b18   :  { %10137 = vpow2.f32 %v7916_v45  ;;  %v12175_v20 = vadd.f32 %v5573_v5, %v12172_v46 }
0x1b19   :  { %v7919_v10 = vmul.f32 -1.442695, %v12170_v53 }
0x1b1a   :  { %v7918_v47 = vmul.f32 -1.442695, %v12175_v20  ;;  %v12179_v11 = vpop.f32.mrb[66].mxu1 }
0x1b1b   :  { %10139 = vpow2.f32 %v7919_v10  ;;  %v12182_v61 = vadd.f32 %v9045_v23, %v12179_v11  ;;  %v12184_v49 = vpop.f32.mrb[67].mxu1 }
0x1b1c   :  { %10141 = vpow2.f32 %v7918_v47  ;;  %v12187_v17 = vadd.f32 %v5583_v8, %v12184_v49 }
0x1b1d   :  { %v7921_v16 = vmul.f32 -1.442695, %v12182_v61 }
0x1b1e   :  { %v7920_v58 = vmul.f32 -1.442695, %v12187_v17  ;;  %v12191_v51 = vpop.f32.mrb[68].mxu1 }
0x1b1f   :  { %10143 = vpow2.f32 %v7921_v16  ;;  %v12194_v52 = vadd.f32 %v9048_v26, %v12191_v51  ;;  %v12196_v13 = vpop.f32.mrb[69].mxu1 }
0x1b20   :  { %10145 = vpow2.f32 %v7920_v58  ;;  %v12199_v3 = vadd.f32 %v5593_v41, %v12196_v13 }
0x1b21   :  { %v10136_v57 = vpop.eup %10135  ;;  %v7923_v38 = vmul.f32 -1.442695, %v12194_v52 }
0x1b22   :  { %v10138_v35 = vpop.eup %10137  ;;  %v5635_v63 = vadd.f32 1.0, %v10136_v57  ;;  %v7922_v27 = vmul.f32 -1.442695, %v12199_v3 }
0x1b23   :  { %v5634_v32 = vadd.f32 1.0, %v10138_v35  ;;  %10147 = vpow2.f32 %v7923_v38  ;;  %v7924_v35 = vld [vmem:[%s12777_s2 + $0x2c0] ss:$0 sm:$0xff] }
0x1b24   :  { %10149 = vrcp.f32 %v5635_v63 }
0x1b25   :  { %v10140_v19 = vpop.eup %10139  ;;  %10151 = vrcp.f32 %v5634_v32 }
0x1b26   :  { %v10142_v14 = vpop.eup %10141  ;;  %v5637_v34 = vadd.f32 1.0, %v10140_v19  ;;  %10153 = vpow2.f32 %v7922_v27 }
0x1b27   :  { %v5636_v40 = vadd.f32 1.0, %v10142_v14 }
0x1b28   :  { %10155 = vrcp.f32 %v5637_v34 }
0x1b29   :  { %v10144_v50 = vpop.eup %10143  ;;  %10157 = vrcp.f32 %v5636_v40 }
0x1b2a   :  { %v10146_v28 = vpop.eup %10145  ;;  %v5639_v33 = vadd.f32 1.0, %v10144_v50 }
0x1b2b   :  { %v5638_v56 = vadd.f32 1.0, %v10146_v28 }
0x1b2c   :  { %10159 = vrcp.f32 %v5639_v33 }
0x1b2d   :  { %v10148_v0 = vpop.eup %10147  ;;  %10161 = vrcp.f32 %v5638_v56 }
0x1b2e   :  { %v10150_v55 = vpop.eup %10149  ;;  %v5641_v24 = vadd.f32 1.0, %v10148_v0 }
0x1b2f   :  { %v10152_v25 = vpop.eup %10151  ;;  %v5723_v30 = vmul.f32 %v10150_v55, %v11046_v62 }
0x1b30   :  { %v10154_v9 = vpop.eup %10153  ;;  %v5722_v4 = vmul.f32 %v10152_v25, %v11048_v12  ;;  %10163 = vrcp.f32 %v5641_v24 }
0x1b31   :  { %v5640_v7 = vadd.f32 1.0, %v10154_v9 }
0x1b32   :  { %v10156_v18 = vpop.eup %10155  ;;  %9057 = vmatprep.mubr.msk.f32.mxu1 %vm252_vm1, %v5722_v4 }
0x1b33   :  { %v10158_v5 = vpop.eup %10157  ;;  %10165 = vrcp.f32 %v5640_v7  ;;  %9058 = vmatmul.mubr.msk.f32.vlgmr.msra.gmra.mrb[70].mxu1 %vm252_vm1, %v5723_v30  ;;  %v5725_v8 = vmul.f32 %v10156_v18, %v11054_v37 }
0x1b34   :  { %v5724_v23 = vmul.f32 %v10158_v5, %v11056_v39 }
0x1b36   :  { %v10160_v26 = vpop.eup %10159  ;;  %9060 = vmatprep.mubr.msk.f32.mxu1 %vm252_vm1, %v5724_v23 }
0x1b37   :  { %v10162_v41 = vpop.eup %10161  ;;  %9061 = vmatmul.mubr.msk.f32.gmra.mrb[72].mxu1 %vm252_vm1, %v5725_v8  ;;  %v5727_v36 = vmul.f32 %v10160_v26, %v12806_v1 }
0x1b38   :  { %v5726_v54 = vmul.f32 %v10162_v41, %v11064_v29 }
0x1b3a   :  { %9063 = vmatprep.mubr.msk.f32.mxu1 %vm252_vm1, %v5726_v54  ;;  %v10164_v59 = vpop.eup %10163 }
0x1b3b   :  { %9064 = vmatmul.mubr.msk.f32.gmra.mrb[74].mxu1 %vm252_vm1, %v5727_v36  ;;  %v5729_v22 = vmul.f32 %v10164_v59, %v12808_v2 }
0x1b3d   :  { %v10166_v60 = vpop.eup %10165 }
0x1b3e   :  { %v5728_v44 = vmul.f32 %v10166_v60, %v12807_v31 }
0x1b40   :  { %9066 = vmatprep.mubr.msk.f32.mxu1 %vm252_vm1, %v5728_v44 }
0x1b41   :  { %9067 = vmatmul.mubr.msk.f32.gmra.mrb[76].mxu1 %vm252_vm1, %v5729_v22 }
0x1c06   :  { %v9059_v6 = vpop.f32.mrb[70].mxu1 }
0x1c07   :  { %5869 = vrot.lane.b32.xlu1 %v9059_v6, %s10338_s19  ;;  %v5820_v45 = vpop.f32.mrb[71].mxu1 }
0x1c08   :  { %5867 = vrot.lane.b32.xlu0 %v5820_v45, %s10338_s19 }
0x1c0a   :  { %v9062_v10 = vpop.f32.mrb[72].mxu1 }
0x1c0b   :  { %5873 = vrot.lane.b32.xlu1 %v9062_v10, %s10338_s19  ;;  %v5830_v47 = vpop.f32.mrb[73].mxu1 }
0x1c0e   :  { %v9065_v16 = vpop.f32.mrb[74].mxu1 }
0x1c0f   :  { %5871 = vrot.lane.b32.xlu1 %v5830_v47, %s10338_s19  ;;  %v5840_v58 = vpop.f32.mrb[75].mxu1 }
0x1c13   :  { %5875 = vrot.lane.b32.xlu1 %v5840_v58, %s10338_s19 }
0x1c14   :  { %v9068_v57 = vpop.f32.mrb[76].mxu1 }
0x1c15   :  { %v5850_v38 = vpop.f32.mrb[77].mxu1 }
0x1c16   :  { %5879 = vrot.lane.b32.xlu0 %v5850_v38, %s10338_s19 }
0x1c17   :  { %5877 = vrot.lane.b32.xlu1 %v9065_v16, %s10338_s19 }
0x1c1a   :  { %5663 = vrot.lane.b32.xlu0 %v7924_v35, %s10336_s5 }
0x1c1b   :  { %5881 = vrot.lane.b32.xlu1 %v9068_v57, %s10338_s19 }
0x1c1f   :  { %5915 = vrot.lane.b32.xlu1 %v11048_v12, %s10336_s5 }
0x1c23   :  { %5917 = vrot.lane.b32.xlu1 %v11046_v62, %s10336_s5 }
0x1c27   :  { %5919 = vrot.lane.b32.xlu1 %v11056_v39, %s10336_s5 }
0x1c2b   :  { %5921 = vrot.lane.b32.xlu1 %v11054_v37, %s10336_s5 }
0x1c2f   :  { %5923 = vrot.lane.b32.xlu1 %v11064_v29, %s10336_s5 }
0x1c33   :  { %5925 = vrot.lane.b32.xlu1 %v12806_v1, %s10336_s5 }
0x1c37   :  { %5927 = vrot.lane.b32.xlu1 %v12807_v31, %s10336_s5 }
0x1c3b   :  { %5929 = vrot.lane.b32.xlu1 %v12808_v2, %s10336_s5 }
0x1c79   :  { %v5870_v12 = vpop.permute.xlu1 %5869 }
0x1c7a   :  { %v5892_v62 = vadd.f32 %v12155_v42, %v5870_v12  ;;  %v5868_v63 = vpop.permute.xlu0 %5867 }
0x1c7b   :  { %v5891_v39 = vadd.f32 %v5868_v63, %v12160_v15 }
0x1c7c   :  { %10167 = vtanh.f32 %v5892_v62 }
0x1c7d   :  { %v5874_v37 = vpop.permute.xlu1 %5873  ;;  %10169 = vtanh.f32 %v5891_v39 }
0x1c7e   :  { %v5894_v29 = vadd.f32 %v12167_v43, %v5874_v37 }
0x1c80   :  { %10171 = vtanh.f32 %v5894_v29 }
0x1c81   :  { %v5872_v27 = vpop.permute.xlu1 %5871 }
0x1c82   :  { %v5893_v1 = vadd.f32 %v5872_v27, %v12172_v46 }
0x1c84   :  { %10173 = vtanh.f32 %v5893_v1 }
0x1c85   :  { %v5876_v32 = vpop.permute.xlu1 %5875 }
0x1c86   :  { %v10168_v31 = vpop.eup %10167  ;;  %v5895_v2 = vadd.f32 %v5876_v32, %v12184_v49 }
0x1c87   :  { %5957 = vrot.lane.b32.xlu0 %v10168_v31, %s10337_s9  ;;  %v10170_v19 = vpop.eup %10169 }
0x1c88   :  { %10175 = vtanh.f32 %v5895_v2  ;;  %v5880_v14 = vpop.permute.xlu0 %5879 }
0x1c89   :  { %v5878_v42 = vpop.permute.xlu1 %5877  ;;  %v5897_v46 = vadd.f32 %v5880_v14, %v12196_v13 }
0x1c8a   :  { %v5896_v15 = vadd.f32 %v12179_v11, %v5878_v42  ;;  %v10172_v43 = vpop.eup %10171 }
0x1c8b   :  { %5955 = vrot.lane.b32.xlu0 %v10170_v19, %s10337_s9 }
0x1c8c   :  { %10177 = vtanh.f32 %v5896_v15  ;;  %v5664_v13 = vpop.permute.xlu0 %5663 }
0x1c8d   :  { %v5882_v34 = vpop.permute.xlu1 %5881  ;;  %10179 = vtanh.f32 %v5897_v46  ;;  %v5667_v56 = vsub.f32 %v12158_v21, %v5664_v13  ;;  %v5666_v0 = vsub.f32 %v12163_v48, %v5664_v13  ;;  %v5669_v24 = vsub.f32 %v12170_v53, %v5664_v13 }
0x1c8e   :  { %v10174_v40 = vpop.eup %10173  ;;  %v5898_v49 = vadd.f32 %v12191_v51, %v5882_v34  ;;  %v5668_v25 = vsub.f32 %v12175_v20, %v5664_v13  ;;  %v5670_v7 = vsub.f32 %v12187_v17, %v5664_v13  ;;  %v5671_v21 = vsub.f32 %v12182_v61, %v5664_v13 }
0x1c8f   :  { %5961 = vrot.lane.b32.xlu0 %v10172_v43, %s10337_s9  ;;  %v7926_v55 = vmul.f32 -1.442695, %v5667_v56  ;;  %v7925_v51 = vmul.f32 -1.442695, %v5666_v0  ;;  %v7928_v9 = vmul.f32 -1.442695, %v5669_v24  ;;  %v5672_v8 = vsub.f32 %v12199_v3, %v5664_v13 }
0x1c90   :  { %10181 = vtanh.f32 %v5898_v49  ;;  %v7927_v4 = vmul.f32 -1.442695, %v5668_v25  ;;  %v7929_v18 = vmul.f32 -1.442695, %v5670_v7  ;;  %v7930_v23 = vmul.f32 -1.442695, %v5671_v21 }
0x1c91   :  { %10183 = vpow2.f32 %v7926_v55  ;;  %v5916_v53 = vpop.permute.xlu1 %5915  ;;  %v7931_v41 = vmul.f32 -1.442695, %v5672_v8  ;;  %v5673_v36 = vsub.f32 %v12194_v52, %v5664_v13 }
0x1c92   :  { %v10176_v50 = vpop.eup %10175  ;;  %10185 = vpow2.f32 %v7925_v51 }
0x1c93   :  { %5959 = vrot.lane.b32.xlu0 %v10174_v40, %s10337_s9  ;;  %10187 = vpow2.f32 %v7928_v9  ;;  %v7932_v44 = vmul.f32 -1.442695, %v5673_v36 }
0x1c94   :  { %10189 = vpow2.f32 %v7927_v4 }
0x1c95   :  { %10191 = vpow2.f32 %v7929_v18  ;;  %v5918_v59 = vpop.permute.xlu1 %5917 }
0x1c96   :  { %v10178_v28 = vpop.eup %10177 }
0x1c97   :  { %5963 = vrot.lane.b32.xlu0 %v10176_v50, %s10337_s9  ;;  %v10180_v11 = vpop.eup %10179 }
0x1c99   :  { %v5920_v6 = vpop.permute.xlu1 %5919 }
0x1c9a   :  { %v10182_v33 = vpop.eup %10181 }
0x1c9b   :  { %5965 = vrot.lane.b32.xlu0 %v10178_v28, %s10337_s9  ;;  %v10184_v30 = vpop.eup %10183 }
0x1c9c   :  { %v5699_v5 = vadd.f32 1.0, %v10184_v30  ;;  %v10186_v48 = vpop.eup %10185 }
0x1c9d   :  { %v5698_v26 = vadd.f32 1.0, %v10186_v48  ;;  %v10188_v20 = vpop.eup %10187  ;;  %v5922_v62 = vpop.permute.xlu1 %5921 }
0x1c9e   :  { %10193 = vrcp.f32 %v5699_v5  ;;  %v5701_v54 = vadd.f32 1.0, %v10188_v20  ;;  %v10190_v17 = vpop.eup %10189 }
0x1c9f   :  { %5967 = vrot.lane.b32.xlu0 %v10180_v11, %s10337_s9  ;;  %10195 = vpow2.f32 %v7930_v23  ;;  %v5700_v61 = vadd.f32 1.0, %v10190_v17  ;;  %v10192_v60 = vpop.eup %10191 }
0x1ca0   :  { %10197 = vrcp.f32 %v5698_v26  ;;  %v5702_v3 = vadd.f32 1.0, %v10192_v60 }
0x1ca1   :  { %10199 = vpow2.f32 %v7931_v41  ;;  %v5924_v42 = vpop.permute.xlu1 %5923 }
0x1ca2   :  { %10201 = vrcp.f32 %v5701_v54 }
0x1ca3   :  { %5969 = vrot.lane.b32.xlu0 %v10182_v33, %s10337_s9  ;;  %10203 = vrcp.f32 %v5700_v61 }
0x1ca4   :  { %10205 = vpow2.f32 %v7932_v44 }
0x1ca5   :  { %10207 = vrcp.f32 %v5702_v3  ;;  %v5926_v13 = vpop.permute.xlu1 %5925 }
0x1ca8   :  { %v10194_v22 = vpop.eup %10193 }
0x1ca9   :  { %v10196_v45 = vpop.eup %10195  ;;  %v5908_v10 = vsub.f32 1.0, %v10194_v22  ;;  %v5928_v4 = vpop.permute.xlu1 %5927 }
0x1caa   :  { %v10198_v47 = vpop.eup %10197  ;;  %v5703_v16 = vadd.f32 1.0, %v10196_v45 }
0x1cab   :  { %v10200_v57 = vpop.eup %10199  ;;  %v5907_v38 = vsub.f32 1.0, %v10198_v47  ;;  %v5940_v52 = vmul.f32 %v5918_v59, %v5908_v10 }
0x1cac   :  { %v10202_v12 = vpop.eup %10201  ;;  %10209 = vrcp.f32 %v5703_v16  ;;  %v5704_v39 = vadd.f32 1.0, %v10200_v57 }
0x1cad   :  { %v5939_v29 = vmul.f32 %v5916_v53, %v5907_v38  ;;  %v5910_v27 = vsub.f32 1.0, %v10202_v12  ;;  %v10204_v32 = vpop.eup %10203  ;;  %v5930_v26 = vpop.permute.xlu1 %5929 }
0x1cae   :  { %v10206_v31 = vpop.eup %10205  ;;  %10211 = vrcp.f32 %v5704_v39  ;;  %v5909_v15 = vsub.f32 1.0, %v10204_v32 }
0x1caf   :  { %v5942_v14 = vmul.f32 %v5922_v62, %v5910_v27  ;;  %v10208_v46 = vpop.eup %10207  ;;  %v5705_v34 = vadd.f32 1.0, %v10206_v31 }
0x1cb0   :  { %v5941_v50 = vmul.f32 %v5920_v6, %v5909_v15  ;;  %v5911_v28 = vsub.f32 1.0, %v10208_v46 }
0x1cb1   :  { %10213 = vrcp.f32 %v5705_v34 }
0x1cb2   :  { %v5943_v55 = vmul.f32 %v5924_v42, %v5911_v28 }
0x1cb6   :  { %v10210_v33 = vpop.eup %10209 }
0x1cb7   :  { %v5912_v51 = vsub.f32 1.0, %v10210_v33 }
0x1cb8   :  { %v10212_v25 = vpop.eup %10211 }
0x1cb9   :  { %v5944_v30 = vmul.f32 %v5926_v13, %v5912_v51  ;;  %v5913_v18 = vsub.f32 1.0, %v10212_v25 }
0x1cbb   :  { %v10214_v48 = vpop.eup %10213  ;;  %v5945_v8 = vmul.f32 %v5928_v4, %v5913_v18 }
0x1cbc   :  { %v5914_v20 = vsub.f32 1.0, %v10214_v48 }
0x1cbe   :  { %v5946_v17 = vmul.f32 %v5930_v26, %v5914_v20 }
0x1cf9   :  { %v5958_v58 = vpop.permute.xlu0 %5957 }
0x1cfa   :  { %v5980_v35 = vmul.f32 %v10194_v22, %v5958_v58 }
0x1cfc   :  { %v12271_v63 = vadd.f32 %v5980_v35, %v5940_v52 }
0x1cfd   :  { %v5956_v37 = vpop.permute.xlu0 %5955 }
0x1cfe   :  { %v5979_v1 = vmul.f32 %v10198_v47, %v5956_v37  ;;  %6007 = vrot.lane.b32.xlu0 %v12271_v63, %s10337_s9 }
0x1d00   :  { %v12275_v2 = vadd.f32 %v5979_v1, %v5939_v29 }
0x1d01   :  { %v5962_v19 = vpop.permute.xlu0 %5961 }
0x1d02   :  { %v5982_v43 = vmul.f32 %v10202_v12, %v5962_v19  ;;  %6005 = vrot.lane.b32.xlu1 %v12275_v2, %s10337_s9 }
0x1d04   :  { %v12279_v40 = vadd.f32 %v5982_v43, %v5942_v14 }
0x1d05   :  { %v5960_v49 = vpop.permute.xlu0 %5959 }
0x1d06   :  { %v5981_v11 = vmul.f32 %v10204_v32, %v5960_v49  ;;  %6011 = vrot.lane.b32.xlu0 %v12279_v40, %s10337_s9 }
0x1d08   :  { %v12283_v56 = vadd.f32 %v5981_v11, %v5941_v50 }
0x1d09   :  { %v5964_v0 = vpop.permute.xlu0 %5963 }
0x1d0a   :  { %v5983_v24 = vmul.f32 %v10208_v46, %v5964_v0  ;;  %6009 = vrot.lane.b32.xlu1 %v12283_v56, %s10337_s9 }
0x1d0c   :  { %v12287_v9 = vadd.f32 %v5983_v24, %v5943_v55 }
0x1d0d   :  { %v5966_v7 = vpop.permute.xlu0 %5965 }
0x1d0e   :  { %v5984_v21 = vmul.f32 %v10210_v33, %v5966_v7  ;;  %6013 = vrot.lane.b32.xlu1 %v12287_v9, %s10337_s9 }
0x1d10   :  { %v12291_v5 = vadd.f32 %v5984_v21, %v5944_v30 }
0x1d11   :  { %v5968_v23 = vpop.permute.xlu0 %5967 }
0x1d12   :  { %v5985_v53 = vmul.f32 %v10212_v25, %v5968_v23  ;;  %6015 = vrot.lane.b32.xlu0 %v12291_v5, %s10337_s9 }
0x1d14   :  { %v12295_v41 = vadd.f32 %v5985_v53, %v5945_v8 }
0x1d15   :  { %v5970_v54 = vpop.permute.xlu0 %5969 }
0x1d16   :  { %v5986_v36 = vmul.f32 %v10214_v48, %v5970_v54  ;;  %6017 = vrot.lane.b32.xlu1 %v12295_v41, %s10337_s9 }
0x1d18   :  { %v12299_v59 = vadd.f32 %v5986_v36, %v5946_v17 }
0x1d1a   :  { %6019 = vrot.lane.b32.xlu0 %v12299_v59, %s10337_s9 }
0x1d70   :  { %v12303_v61 = vpop.permute.xlu0 %6007 }
0x1d71   :  { %v6032_v60 = vsel %vm252_vm1, %v12303_v61, 0.0 }
0x1d72   :  { %6033 = vadd.xlane.f32.xlu0 %v6032_v60 }
0x1d74   :  { %v12307_v44 = vpop.permute.xlu1 %6005 }
0x1d75   :  { %v6029_v22 = vsel %vm252_vm1, %v12307_v44, 0.0 }
0x1d76   :  { %6030 = vadd.xlane.f32.xlu1 %v6029_v22 }
0x1d78   :  { %v12311_v6 = vpop.permute.xlu0 %6011 }
0x1d79   :  { %v6038_v3 = vsel %vm252_vm1, %v12311_v6, 0.0 }
0x1d7a   :  { %6039 = vadd.xlane.f32.xlu1 %v6038_v3 }
0x1d7c   :  { %v12315_v45 = vpop.permute.xlu1 %6009 }
0x1d7d   :  { %v6035_v10 = vsel %vm252_vm1, %v12315_v45, 0.0 }
0x1d7e   :  { %6036 = vadd.xlane.f32.xlu0 %v6035_v10 }
0x1d80   :  { %v12319_v47 = vpop.permute.xlu1 %6013 }
0x1d81   :  { %v6041_v16 = vsel %vm252_vm1, %v12319_v47, 0.0 }
0x1d82   :  { %6042 = vadd.xlane.f32.xlu0 %v6041_v16 }
0x1d84   :  { %v12323_v58 = vpop.permute.xlu0 %6015 }
0x1d85   :  { %v6044_v57 = vsel %vm252_vm1, %v12323_v58, 0.0 }
0x1d86   :  { %6045 = vadd.xlane.f32.xlu1 %v6044_v57 }
0x1d88   :  { %v12327_v38 = vpop.permute.xlu1 %6017 }
0x1d89   :  { %v6047_v52 = vsel %vm252_vm1, %v12327_v38, 0.0 }
0x1d8a   :  { %6048 = vadd.xlane.f32.xlu0 %v6047_v52 }
0x1d8c   :  { %v12331_v35 = vpop.permute.xlu0 %6019 }
0x1d8d   :  { %v6050_v12 = vsel %vm252_vm1, %v12331_v35, 0.0 }
0x1d8e   :  { %6051 = vadd.xlane.f32.xlu1 %v6050_v12 }
0x1dff   :  { %v6034_v62 = vpop.xlane.xlu0 %6033 }
0x1e00   :  { %v6054_v39 = vmul.f32 0.03125, %v6034_v62  ;;  %v7942_v62 = vld [vmem:[%s12777_s2 + $0x2a0] ss:$0 sm:$0xff] }
0x1e02   :  { %v12336_v37 = vsub.f32 %v12271_v63, %v6054_v39  ;;  %v7941_v39 = vld [vmem:[%s12777_s2 + $0x298] ss:$0 sm:$0xff] }
0x1e03   :  { %v6031_v29 = vpop.xlane.xlu1 %6030 }
0x1e04   :  { %v6070_v27 = vmul.f32 %v12336_v37, %v12336_v37  ;;  %v6053_v1 = vmul.f32 0.03125, %v6031_v29  ;;  %v6197_v29 = vld [vmem:[%s12780_s3 + $0xf0] sm:$0xff] }
0x1e06   :  { %v12341_v32 = vsub.f32 %v12275_v2, %v6053_v1  ;;  %6087 = vrot.lane.b32.xlu1 %v6070_v27, %s10337_s9  ;;  %v6198_v27 = vld [vmem:[%s12780_s3 + $0xf8] sm:$0xff]  ;;  %v6199_v1 = vld [vmem:[%s12780_s3 + $0x100] sm:$0xff] }
0x1e07   :  { %v6040_v31 = vpop.xlane.xlu1 %6039 }
0x1e08   :  { %v6069_v42 = vmul.f32 %v12341_v32, %v12341_v32  ;;  %v6056_v19 = vmul.f32 0.03125, %v6040_v31  ;;  %v9621_v31 = vpack.c.bf16 %v6198_v27, %v6197_v29 }
0x1e0a   :  { %v12347_v15 = vsub.f32 %v12279_v40, %v6056_v19  ;;  %6085 = vrot.lane.b32.xlu0 %v6069_v42, %s10337_s9  ;;  %v6200_v42 = vld [vmem:[%s12780_s3 + $0x108] sm:$0xff]  ;;  %9622 = vmatprep.subr.bf16.mxu0 %v9621_v31 }
0x1e0b   :  { %v6037_v14 = vpop.xlane.xlu0 %6036  ;;  %v9625_v19 = vpack.c.bf16 %v6200_v42, %v6199_v1  ;;  %9624 = vmatpush3.bf16.msra.mxu0 %v9621_v31 }
0x1e0c   :  { %v6072_v43 = vmul.f32 %v12347_v15, %v12347_v15  ;;  %v6055_v46 = vmul.f32 0.03125, %v6037_v14 }
0x1e0d   :  { %9626 = vmatprep.subr.bf16.mxu0 %v9625_v19 }
0x1e0e   :  { %v12353_v34 = vsub.f32 %v12283_v56, %v6055_v46  ;;  %6091 = vrot.lane.b32.xlu0 %v6072_v43, %s10337_s9 }
0x1e0f   :  { %v6043_v49 = vpop.xlane.xlu0 %6042  ;;  %9628 = vmatpush3.bf16.msra.mxu0 %v9625_v19 }
0x1e10   :  { %v6071_v50 = vmul.f32 %v12353_v34, %v12353_v34  ;;  %v6057_v28 = vmul.f32 0.03125, %v6043_v49 }
0x1e12   :  { %v12359_v11 = vsub.f32 %v12287_v9, %v6057_v28  ;;  %6089 = vrot.lane.b32.xlu1 %v6071_v50, %s10337_s9 }
0x1e13   :  { %v6046_v33 = vpop.xlane.xlu1 %6045 }
0x1e14   :  { %v6073_v13 = vmul.f32 %v12359_v11, %v12359_v11  ;;  %v6058_v0 = vmul.f32 0.03125, %v6046_v33 }
0x1e16   :  { %v12365_v55 = vsub.f32 %v12291_v5, %v6058_v0  ;;  %6093 = vrot.lane.b32.xlu1 %v6073_v13, %s10337_s9 }
0x1e17   :  { %v6049_v51 = vpop.xlane.xlu0 %6048 }
0x1e18   :  { %v6074_v24 = vmul.f32 %v12365_v55, %v12365_v55  ;;  %v6059_v25 = vmul.f32 0.03125, %v6049_v51 }
0x1e1a   :  { %v12371_v4 = vsub.f32 %v12295_v41, %v6059_v25  ;;  %6095 = vrot.lane.b32.xlu0 %v6074_v24, %s10337_s9 }
0x1e1b   :  { %v6052_v7 = vpop.xlane.xlu1 %6051 }
0x1e1c   :  { %v6075_v30 = vmul.f32 %v12371_v4, %v12371_v4  ;;  %v6060_v18 = vmul.f32 0.03125, %v6052_v7 }
0x1e1e   :  { %v12377_v21 = vsub.f32 %v12299_v59, %v6060_v18  ;;  %6097 = vrot.lane.b32.xlu1 %v6075_v30, %s10337_s9 }
0x1e20   :  { %v6076_v48 = vmul.f32 %v12377_v21, %v12377_v21 }
0x1e22   :  { %6099 = vrot.lane.b32.xlu0 %v6076_v48, %s10337_s9 }
0x1e78   :  { %v6088_v23 = vpop.permute.xlu1 %6087 }
0x1e79   :  { %v6112_v8 = vsel %vm252_vm1, %v6088_v23, 0.0 }
0x1e7a   :  { %6113 = vadd.xlane.f32.xlu0 %v6112_v8 }
0x1e7c   :  { %v6086_v53 = vpop.permute.xlu0 %6085 }
0x1e7d   :  { %v6109_v26 = vsel %vm252_vm1, %v6086_v53, 0.0 }
0x1e7e   :  { %6110 = vadd.xlane.f32.xlu1 %v6109_v26 }
0x1e80   :  { %v6092_v20 = vpop.permute.xlu0 %6091 }
0x1e81   :  { %v6118_v54 = vsel %vm252_vm1, %v6092_v20, 0.0 }
0x1e82   :  { %6119 = vadd.xlane.f32.xlu1 %v6118_v54 }
0x1e84   :  { %v6090_v17 = vpop.permute.xlu1 %6089 }
0x1e85   :  { %v6115_v36 = vsel %vm252_vm1, %v6090_v17, 0.0 }
0x1e86   :  { %6116 = vadd.xlane.f32.xlu0 %v6115_v36 }
0x1e88   :  { %v6094_v60 = vpop.permute.xlu1 %6093 }
0x1e89   :  { %v6121_v22 = vsel %vm252_vm1, %v6094_v60, 0.0 }
0x1e8a   :  { %6122 = vadd.xlane.f32.xlu0 %v6121_v22 }
0x1e8c   :  { %v6096_v3 = vpop.permute.xlu0 %6095 }
0x1e8d   :  { %v6124_v10 = vsel %vm252_vm1, %v6096_v3, 0.0 }
0x1e8e   :  { %6125 = vadd.xlane.f32.xlu1 %v6124_v10 }
0x1e90   :  { %v6098_v16 = vpop.permute.xlu1 %6097 }
0x1e91   :  { %v6127_v57 = vsel %vm252_vm1, %v6098_v16, 0.0 }
0x1e92   :  { %6128 = vadd.xlane.f32.xlu0 %v6127_v57 }
0x1e94   :  { %v6100_v52 = vpop.permute.xlu0 %6099 }
0x1e95   :  { %v6130_v12 = vsel %vm252_vm1, %v6100_v52, 0.0 }
0x1e96   :  { %6131 = vadd.xlane.f32.xlu1 %v6130_v12 }
0x1ea7   :  { %6186 = vrot.lane.b32.xlu1 %v7942_v62, %s10336_s5 }
0x1ea8   :  { %6170 = vrot.lane.b32.xlu0 %v7941_v39, %s10336_s5 }
0x1f07   :  { %v6114_v14 = vpop.xlane.xlu0 %6113 }
0x1f08   :  { %v6134_v46 = vmul.f32 0.03125, %v6114_v14 }
0x1f0a   :  { %v6142_v28 = vadd.f32 1e-05, %v6134_v46 }
0x1f0b   :  { %v6111_v43 = vpop.xlane.xlu1 %6110 }
0x1f0c   :  { %v6133_v49 = vmul.f32 0.03125, %v6111_v43  ;;  %10215 = vrsqrt.f32 %v6142_v28 }
0x1f0e   :  { %v6141_v13 = vadd.f32 1e-05, %v6133_v49 }
0x1f0f   :  { %v6120_v50 = vpop.xlane.xlu1 %6119 }
0x1f10   :  { %v6136_v33 = vmul.f32 0.03125, %v6120_v50  ;;  %10217 = vrsqrt.f32 %v6141_v13 }
0x1f12   :  { %v6144_v24 = vadd.f32 1e-05, %v6136_v33 }
0x1f13   :  { %v6117_v0 = vpop.xlane.xlu0 %6116 }
0x1f14   :  { %v6135_v51 = vmul.f32 0.03125, %v6117_v0 }
0x1f16   :  { %v6143_v25 = vadd.f32 1e-05, %v6135_v51  ;;  %v10216_v26 = vpop.eup %10215 }
0x1f17   :  { %v6123_v7 = vpop.xlane.xlu0 %6122  ;;  %v6158_v57 = vmul.f32 %v10216_v26, %v12336_v37  ;;  %v6203_v26 = vld [vmem:[%s12777_s2 + $0x250] sm:$0xff] }
0x1f18   :  { %10219 = vrsqrt.f32 %v6143_v25  ;;  %v6137_v30 = vmul.f32 0.03125, %v6123_v7 }
0x1f19   :  { %10221 = vrsqrt.f32 %v6144_v24 }
0x1f1a   :  { %v6145_v18 = vadd.f32 1e-05, %v6137_v30  ;;  %v10218_v54 = vpop.eup %10217 }
0x1f1b   :  { %v6126_v48 = vpop.xlane.xlu1 %6125  ;;  %v6157_v52 = vmul.f32 %v10218_v54, %v12341_v32  ;;  %v6204_v54 = vld [vmem:[%s12777_s2 + $0x258] sm:$0xff] }
0x1f1c   :  { %10223 = vrsqrt.f32 %v6145_v18  ;;  %v6138_v23 = vmul.f32 0.03125, %v6126_v48 }
0x1f1e   :  { %v6146_v8 = vadd.f32 1e-05, %v6138_v23 }
0x1f1f   :  { %v6129_v53 = vpop.xlane.xlu0 %6128 }
0x1f20   :  { %10225 = vrsqrt.f32 %v6146_v8  ;;  %v6139_v20 = vmul.f32 0.03125, %v6129_v53  ;;  %v6202_v53 = vld [vmem:[%s12777_s2 + $0x248] sm:$0xff] }
0x1f22   :  { %v10220_v17 = vpop.eup %10219  ;;  %v6147_v36 = vadd.f32 1e-05, %v6139_v20  ;;  %v9629_v20 = vpack.c.bf16 %v6203_v26, %v6202_v53 }
0x1f23   :  { %v6132_v60 = vpop.xlane.xlu1 %6131  ;;  %v6171_v22 = vpop.permute.xlu0 %6170  ;;  %v6159_v3 = vmul.f32 %v10220_v17, %v12353_v34  ;;  %v6205_v17 = vld [vmem:[%s12777_s2 + $0x260] sm:$0xff] }
0x1f24   :  { %v10222_v10 = vpop.eup %10221  ;;  %10227 = vrsqrt.f32 %v6147_v36  ;;  %v6140_v16 = vmul.f32 0.03125, %v6132_v60  ;;  %v6174_v39 = vmul.f32 %v6171_v22, %v6158_v57  ;;  %v6173_v29 = vmul.f32 %v6171_v22, %v6157_v52  ;;  %9630 = vmatprep.subr.bf16.mxu1 %v9629_v20  ;;  %v6206_v60 = vld [vmem:[%s12777_s2 + $0x268] sm:$0xff]  ;;  %v6569_v52 = vld [vmem:[%s12780_s3 + $0xd0] sm:$0xff] }
0x1f25   :  { %v6160_v1 = vmul.f32 %v10222_v10, %v12347_v15  ;;  %v6175_v31 = vmul.f32 %v6171_v22, %v6159_v3  ;;  %9632 = vmatpush3.bf16.msra.mxu1 %v9629_v20  ;;  %v9633_v36 = vpack.c.bf16 %v6205_v17, %v6204_v54  ;;  %v6208_v3 = vld [vmem:[%s12777_s2 + $0x278] sm:$0xff] }
0x1f26   :  { %v10224_v12 = vpop.eup %10223  ;;  %v6148_v62 = vadd.f32 1e-05, %v6140_v16  ;;  %v6209_v16 = vld [vmem:[%s12777_s2 + $0x280] sm:$0xff] }
0x1f27   :  { %v6187_v27 = vpop.permute.xlu1 %6186  ;;  %v6161_v34 = vmul.f32 %v10224_v12, %v12359_v11  ;;  %v6176_v37 = vmul.f32 %v6171_v22, %v6160_v1  ;;  %9634 = vmatprep.subr.bf16.mxu1 %v9633_v36  ;;  %v9641_v57 = vpack.c.bf16 %v6209_v16, %v6208_v3  ;;  %v6570_v12 = vld [vmem:[%s12780_s3 + $0xd8] sm:$0xff] }
0x1f28   :  { %10229 = vrsqrt.f32 %v6148_v62  ;;  %v6190_v42 = vadd.f32 %v6187_v27, %v6174_v39  ;;  %v6189_v19 = vadd.f32 %v6187_v27, %v6173_v29  ;;  %v6191_v46 = vadd.f32 %v6187_v27, %v6175_v31  ;;  %v6565_v39 = vld [vmem:[%s12782_s4 + $0x60] sm:$0xff]  ;;  %v6566_v29 = vld [vmem:[%s12782_s4 + $0x68] sm:$0xff]  ;;  %v6568_v31 = vld [vmem:[%s12782_s4 + $0x78] sm:$0xff] }
0x1f29   :  { %v6192_v43 = vadd.f32 %v6187_v27, %v6176_v37  ;;  %v6177_v49 = vmul.f32 %v6171_v22, %v6161_v34  ;;  %9636 = vmatpush3.bf16.msra.mxu1 %v9633_v36  ;;  %v12465_v62 = vpack.c.bf16 %v6570_v12, %v6569_v52  ;;  %v9645_v1 = vpack.c.bf16 %v6566_v29, %v6565_v39 }
0x1f2a   :  { %v10226_v14 = vpop.eup %10225  ;;  %6225 = vrot.lane.b32.xlu0 %v6190_v42, %s10337_s9  ;;  %6223 = vrot.lane.b32.xlu1 %v6189_v19, %s10337_s9  ;;  %v7943_v19 = vld [vmem:[%s12780_s3 + $0x118] ss:$0 sm:$0xff] }
0x1f2b   :  { %v6162_v32 = vmul.f32 %v10226_v14, %v12365_v55  ;;  %v6193_v33 = vadd.f32 %v6187_v27, %v6177_v49  ;;  %9646 = vmatprep.subr.bf16.mxu0 %v9645_v1 }
0x1f2d   :  { %v6178_v50 = vmul.f32 %v6171_v22, %v6162_v32 }
0x1f2e   :  { %v10228_v28 = vpop.eup %10227  ;;  %6229 = vrot.lane.b32.xlu0 %v6192_v43, %s10337_s9  ;;  %6227 = vrot.lane.b32.xlu1 %v6191_v46, %s10337_s9 }
0x1f2f   :  { %v6194_v15 = vadd.f32 %v6187_v27, %v6178_v50  ;;  %v6163_v11 = vmul.f32 %v10228_v28, %v12371_v4 }
0x1f31   :  { %v6179_v13 = vmul.f32 %v6171_v22, %v6163_v11 }
0x1f32   :  { %v10230_v0 = vpop.eup %10229  ;;  %6233 = vrot.lane.b32.xlu0 %v6194_v15, %s10337_s9  ;;  %6231 = vrot.lane.b32.xlu1 %v6193_v33, %s10337_s9 }
0x1f33   :  { %v6195_v55 = vadd.f32 %v6187_v27, %v6179_v13  ;;  %v6164_v51 = vmul.f32 %v10230_v0, %v12377_v21 }
0x1f35   :  { %v6180_v24 = vmul.f32 %v6171_v22, %v6164_v51  ;;  %v6207_v22 = vld [vmem:[%s12777_s2 + $0x270] sm:$0xff] }
0x1f36   :  { %6235 = vrot.lane.b32.xlu1 %v6195_v55, %s10337_s9  ;;  %v9637_v10 = vpack.c.bf16 %v6207_v22, %v6206_v60 }
0x1f37   :  { %v6196_v25 = vadd.f32 %v6187_v27, %v6180_v24  ;;  %v6567_v27 = vld [vmem:[%s12782_s4 + $0x70] sm:$0xff] }
0x1f38   :  { %9638 = vmatprep.subr.bf16.mxu1 %v9637_v10  ;;  %v9649_v42 = vpack.c.bf16 %v6568_v31, %v6567_v27 }
0x1f39   :  { %6237 = vrot.lane.b32.xlu0 %v6196_v25, %s10337_s9  ;;  %9640 = vmatpush3.bf16.msra.mxu1 %v9637_v10 }
0x1f3a   :  { %9642 = vmatprep.subr.bf16.mxu1 %v9641_v57 }
0x1f3d   :  { %9644 = vmatpush3.bf16.msra.mxu1 %v9641_v57 }
0x1f3e   :  { %9654 = vmatprep.subr.bf16.mxu1 %v12465_v62 }
0x1f9c   :  { %v6226_v7 = vpop.permute.xlu0 %6225  ;;  %v6224_v30 = vpop.permute.xlu1 %6223 }
0x1f9d   :  { %9077 = vmatprep.mubr.msk.f32.mxu0 %vm252_vm1, %v6224_v30 }
0x1f9e   :  { %9078 = vmatmul.mubr.msk.f32.vlgmr.msra.gmra.mrb[66].mxu0 %vm252_vm1, %v6226_v7 }
0x1f9f   :  { %9648 = vmatpush3.bf16.msra.mxu0 %v9645_v1 }
0x1fa0   :  { %v6230_v4 = vpop.permute.xlu0 %6229  ;;  %v6228_v18 = vpop.permute.xlu1 %6227  ;;  %9650 = vmatprep.subr.bf16.mxu0 %v9649_v42 }
0x1fa1   :  { %9080 = vmatprep.mubr.msk.f32.mxu0 %vm252_vm1, %v6228_v18 }
0x1fa2   :  { %9081 = vmatmul.mubr.msk.f32.gmra.mrb[68].mxu0 %vm252_vm1, %v6230_v4 }
0x1fa3   :  { %9652 = vmatpush3.bf16.msra.mxu0 %v9649_v42 }
0x1fa4   :  { %v6234_v48 = vpop.permute.xlu0 %6233  ;;  %v6232_v21 = vpop.permute.xlu1 %6231 }
0x1fa5   :  { %9083 = vmatprep.mubr.msk.f32.mxu0 %vm252_vm1, %v6232_v21 }
0x1fa6   :  { %9084 = vmatmul.mubr.msk.f32.gmra.mrb[70].mxu0 %vm252_vm1, %v6234_v48 }
0x1fa8   :  { %v6236_v23 = vpop.permute.xlu1 %6235 }
0x1fa9   :  { %9086 = vmatprep.mubr.msk.f32.mxu0 %vm252_vm1, %v6236_v23 }
0x1fab   :  { %v6238_v8 = vpop.permute.xlu0 %6237 }
0x1fac   :  { %9087 = vmatmul.mubr.msk.f32.gmra.mrb[72].mxu0 %vm252_vm1, %v6238_v8 }
0x2071   :  { %v9079_v34 = vpop.f32.mrb[66].mxu0 }
0x2072   :  { %v12483_v14 = vadd.f32 %v9079_v34, %v7943_v19  ;;  %v6321_v37 = vpop.f32.mrb[67].mxu0 }
0x2073   :  { %v6322_v32 = vadd.f32 %v7943_v19, %v6321_v37 }
0x2074   :  { %v6369_v43 = vmul.f32 0.044715, %v12483_v14 }
0x2075   :  { %v6368_v46 = vmul.f32 0.044715, %v6322_v32  ;;  %v9082_v49 = vpop.f32.mrb[68].mxu0 }
0x2076   :  { %v6377_v50 = vmul.f32 %v6369_v43, %v12483_v14  ;;  %v12487_v28 = vadd.f32 %v9082_v49, %v7943_v19  ;;  %v6331_v15 = vpop.f32.mrb[69].mxu0 }
0x2077   :  { %v6376_v11 = vmul.f32 %v6368_v46, %v6322_v32  ;;  %v12489_v33 = vadd.f32 %v7943_v19, %v6331_v15 }
0x2078   :  { %v6385_v13 = vmul.f32 %v6377_v50, %v12483_v14  ;;  %v6371_v0 = vmul.f32 0.044715, %v12487_v28 }
0x2079   :  { %v6384_v55 = vmul.f32 %v6376_v11, %v6322_v32  ;;  %v6370_v51 = vmul.f32 0.044715, %v12489_v33  ;;  %v9085_v24 = vpop.f32.mrb[70].mxu0 }
0x207a   :  { %v6393_v25 = vadd.f32 %v6385_v13, %v12483_v14  ;;  %v6379_v7 = vmul.f32 %v6371_v0, %v12487_v28  ;;  %v12496_v30 = vadd.f32 %v9085_v24, %v7943_v19  ;;  %v6341_v4 = vpop.f32.mrb[71].mxu0 }
0x207b   :  { %v6392_v18 = vadd.f32 %v6384_v55, %v6322_v32  ;;  %v6378_v48 = vmul.f32 %v6370_v51, %v12489_v33  ;;  %v12499_v21 = vadd.f32 %v7943_v19, %v6341_v4  ;;  %v6360_v55 = vmul.f32 0.5, %v6322_v32 }
0x207c   :  { %v6401_v23 = vmul.f32 0.7978846, %v6393_v25  ;;  %v6387_v8 = vmul.f32 %v6379_v7, %v12487_v28  ;;  %v6373_v53 = vmul.f32 0.044715, %v12496_v30  ;;  %v6571_v25 = vld [vmem:[%s12780_s3 + $0xe0] sm:$0xff]  ;;  %v6572_v7 = vld [vmem:[%s12780_s3 + $0xe8] sm:$0xff] }
0x207d   :  { %v6386_v26 = vmul.f32 %v6378_v48, %v12489_v33  ;;  %v6372_v20 = vmul.f32 0.044715, %v12499_v21  ;;  %v6400_v54 = vmul.f32 0.7978846, %v6392_v18  ;;  %v6361_v4 = vmul.f32 0.5, %v12483_v14 }
0x207e   :  { %10231 = vtanh.f32 %v6401_v23  ;;  %v6395_v17 = vadd.f32 %v6387_v8, %v12487_v28  ;;  %v6381_v36 = vmul.f32 %v6373_v53, %v12496_v30  ;;  %v9657_v32 = vpack.c.bf16 %v6572_v7, %v6571_v25 }
0x207f   :  { %v6394_v60 = vadd.f32 %v6386_v26, %v12489_v33  ;;  %v6380_v22 = vmul.f32 %v6372_v20, %v12499_v21  ;;  %v9088_v3 = vpop.f32.mrb[72].mxu0  ;;  %10233 = vtanh.f32 %v6400_v54  ;;  %v6362_v20 = vmul.f32 0.5, %v12489_v33 }
0x2080   :  { %v6389_v10 = vmul.f32 %v6381_v36, %v12496_v30  ;;  %v12510_v16 = vadd.f32 %v9088_v3, %v7943_v19  ;;  %v6351_v57 = vpop.f32.mrb[73].mxu0  ;;  %v6403_v52 = vmul.f32 0.7978846, %v6395_v17  ;;  %v6363_v17 = vmul.f32 0.5, %v12487_v28 }
0x2081   :  { %v6388_v12 = vmul.f32 %v6380_v22, %v12499_v21  ;;  %v6352_v39 = vadd.f32 %v7943_v19, %v6351_v57  ;;  %v6402_v29 = vmul.f32 0.7978846, %v6394_v60  ;;  %v6365_v33 = vmul.f32 0.5, %v12496_v30 }
0x2082   :  { %v6397_v27 = vadd.f32 %v6389_v10, %v12496_v30  ;;  %v6375_v1 = vmul.f32 0.044715, %v12510_v16  ;;  %10235 = vtanh.f32 %v6403_v52  ;;  %v6364_v10 = vmul.f32 0.5, %v12499_v21 }
0x2083   :  { %v6396_v31 = vadd.f32 %v6388_v12, %v12499_v21  ;;  %v6374_v42 = vmul.f32 0.044715, %v6352_v39  ;;  %10237 = vtanh.f32 %v6402_v29 }
0x2084   :  { %v6383_v34 = vmul.f32 %v6375_v1, %v12510_v16  ;;  %v6405_v37 = vmul.f32 0.7978846, %v6397_v27  ;;  %v6366_v27 = vmul.f32 0.5, %v6352_v39 }
0x2085   :  { %v6382_v43 = vmul.f32 %v6374_v42, %v6352_v39  ;;  %v6404_v46 = vmul.f32 0.7978846, %v6396_v31  ;;  %v6367_v31 = vmul.f32 0.5, %v12510_v16 }
0x2086   :  { %v6391_v49 = vmul.f32 %v6383_v34, %v12510_v16  ;;  %10239 = vtanh.f32 %v6405_v37 }
0x2087   :  { %v6390_v50 = vmul.f32 %v6382_v43, %v6352_v39  ;;  %10241 = vtanh.f32 %v6404_v46 }
0x2088   :  { %v10232_v19 = vpop.eup %10231  ;;  %v6399_v15 = vadd.f32 %v6391_v49, %v12510_v16 }
0x2089   :  { %v10234_v11 = vpop.eup %10233  ;;  %v6417_v13 = vadd.f32 1.0, %v10232_v19  ;;  %v6398_v0 = vadd.f32 %v6390_v50, %v6352_v39 }
0x208a   :  { %v6416_v51 = vadd.f32 1.0, %v10234_v11  ;;  %v6407_v24 = vmul.f32 0.7978846, %v6399_v15 }
0x208b   :  { %v6406_v18 = vmul.f32 0.7978846, %v6398_v0  ;;  %v6425_v53 = vmul.f32 %v6417_v13, %v6361_v4 }
0x208c   :  { %v10236_v48 = vpop.eup %10235  ;;  %v6424_v23 = vmul.f32 %v6416_v51, %v6360_v55  ;;  %10243 = vtanh.f32 %v6407_v24 }
0x208d   :  { %v10238_v8 = vpop.eup %10237  ;;  %v6419_v26 = vadd.f32 1.0, %v10236_v48  ;;  %10245 = vtanh.f32 %v6406_v18 }
0x208e   :  { %9105 = vmatprep.mubr.msk.f32.mxu1 %vm2027_vm13, %v6424_v23  ;;  %v6418_v54 = vadd.f32 1.0, %v10238_v8 }
0x208f   :  { %9106 = vmatmul.mubr.msk.f32.vlgmr.msra.gmra.mrb[78].mxu1 %vm2027_vm13, %v6425_v53  ;;  %v6427_v22 = vmul.f32 %v6419_v26, %v6363_v17 }
0x2090   :  { %v10240_v36 = vpop.eup %10239  ;;  %v6426_v14 = vmul.f32 %v6418_v54, %v6362_v20  ;;  %9656 = vmatpush3.bf16.msra.mxu1 %v12465_v62 }
0x2091   :  { %v10242_v60 = vpop.eup %10241  ;;  %v6421_v3 = vadd.f32 1.0, %v10240_v36  ;;  %9658 = vmatprep.subr.bf16.mxu1 %v9657_v32 }
0x2092   :  { %9108 = vmatprep.mubr.msk.f32.mxu1 %vm2027_vm13, %v6426_v14  ;;  %v6420_v57 = vadd.f32 1.0, %v10242_v60 }
0x2093   :  { %9109 = vmatmul.mubr.msk.f32.gmra.mrb[80].mxu1 %vm2027_vm13, %v6427_v22  ;;  %v6429_v28 = vmul.f32 %v6421_v3, %v6365_v33 }
0x2094   :  { %v6428_v52 = vmul.f32 %v6420_v57, %v6364_v10  ;;  %9660 = vmatpush3.bf16.msra.mxu1 %v9657_v32 }
0x2096   :  { %v10244_v12 = vpop.eup %10243  ;;  %9111 = vmatprep.mubr.msk.f32.mxu1 %vm2027_vm13, %v6428_v52 }
0x2097   :  { %v10246_v62 = vpop.eup %10245  ;;  %9112 = vmatmul.mubr.msk.f32.gmra.mrb[82].mxu1 %vm2027_vm13, %v6429_v28  ;;  %v6423_v29 = vadd.f32 1.0, %v10244_v12 }
0x2098   :  { %v6422_v1 = vadd.f32 1.0, %v10246_v62 }
0x2099   :  { %v6431_v42 = vmul.f32 %v6423_v29, %v6367_v31 }
0x209a   :  { %v6430_v21 = vmul.f32 %v6422_v1, %v6366_v27 }
0x209c   :  { %9114 = vmatprep.mubr.msk.f32.mxu1 %vm2027_vm13, %v6430_v21 }
0x209d   :  { %9115 = vmatmul.mubr.msk.f32.gmra.mrb[84].mxu1 %vm2027_vm13, %v6431_v42 }
0x209e   :  { %9145 = vmatprep.mubr.msk.f32.mxu1 %vm252_vm1, %v12307_v44 }
0x20a1   :  { %9146 = vmatmul.mubr.msk.f32.vlgmr.msra.gmra.mrb[86].mxu1 %vm252_vm1, %v12303_v61  ;;  %v7952_v61 = vld [vmem:[%s12777_s2 + $0x2b8] ss:$0 sm:$0xff] }
0x20a2   :  { %9148 = vmatprep.mubr.msk.f32.mxu1 %vm252_vm1, %v12315_v45 }
0x20a5   :  { %9149 = vmatmul.mubr.msk.f32.gmra.mrb[88].mxu1 %vm252_vm1, %v12311_v6 }
0x20a6   :  { %9151 = vmatprep.mubr.msk.f32.mxu1 %vm252_vm1, %v12319_v47 }
0x20a9   :  { %9152 = vmatmul.mubr.msk.f32.gmra.mrb[90].mxu1 %vm252_vm1, %v12323_v58 }
0x20aa   :  { %9154 = vmatprep.mubr.msk.f32.mxu1 %vm252_vm1, %v12327_v38 }
0x20ad   :  { %9155 = vmatmul.mubr.msk.f32.gmra.mrb[92].mxu1 %vm252_vm1, %v12331_v35 }
0x2162   :  { %v9107_v44 = vpop.f32.mrb[78].mxu1 }
0x2163   :  { %v6526_v45 = vpop.f32.mrb[79].mxu1  ;;  %v6532_v6 = vadd.f32 %v9107_v44, %v7952_v61 }
0x2164   :  { %v6527_v30 = vadd.f32 %v7952_v61, %v6526_v45 }
0x2166   :  { %v9110_v16 = vpop.f32.mrb[80].mxu1  ;;  %9125 = vmatprep.mubr.msk.f32.mxu0 %vm252_vm1, %v6527_v30 }
0x2167   :  { %v6536_v47 = vpop.f32.mrb[81].mxu1  ;;  %9126 = vmatmul.mubr.msk.f32.vlgmr.msra.gmra.mrb[74].mxu0 %vm252_vm1, %v6532_v6  ;;  %v6542_v39 = vadd.f32 %v9110_v16, %v7952_v61 }
0x2168   :  { %v6537_v58 = vadd.f32 %v7952_v61, %v6536_v47 }
0x216a   :  { %v9113_v38 = vpop.f32.mrb[82].mxu1  ;;  %9128 = vmatprep.mubr.msk.f32.mxu0 %vm252_vm1, %v6537_v58 }
0x216b   :  { %v6546_v35 = vpop.f32.mrb[83].mxu1  ;;  %9129 = vmatmul.mubr.msk.f32.gmra.mrb[76].mxu0 %vm252_vm1, %v6542_v39  ;;  %v6552_v37 = vadd.f32 %v9113_v38, %v7952_v61 }
0x216c   :  { %v6547_v34 = vadd.f32 %v7952_v61, %v6546_v35 }
0x216e   :  { %9131 = vmatprep.mubr.msk.f32.mxu0 %vm252_vm1, %v6547_v34 }
0x216f   :  { %9132 = vmatmul.mubr.msk.f32.gmra.mrb[78].mxu0 %vm252_vm1, %v6552_v37 }
0x2170   :  { %v9116_v43 = vpop.f32.mrb[84].mxu1 }
0x2171   :  { %v6556_v46 = vpop.f32.mrb[85].mxu1  ;;  %v6562_v50 = vadd.f32 %v9116_v43, %v7952_v61  ;;  %v6573_v43 = vld [vmem:[%s12777_s2 + $0x228] sm:$0xff] }
0x2172   :  { %v6557_v49 = vadd.f32 %v7952_v61, %v6556_v46  ;;  %v6574_v46 = vld [vmem:[%s12777_s2 + $0x230] sm:$0xff] }
0x2174   :  { %9134 = vmatprep.mubr.msk.f32.mxu0 %vm252_vm1, %v6557_v49  ;;  %v9147_v19 = vpop.f32.mrb[86].mxu1  ;;  %v6575_v49 = vld [vmem:[%s12777_s2 + $0x238] sm:$0xff] }
0x2175   :  { %9135 = vmatmul.mubr.msk.f32.gmra.mrb[80].mxu0 %vm252_vm1, %v6562_v50  ;;  %v6789_v15 = vpop.f32.mrb[87].mxu1  ;;  %v9661_v50 = vpack.c.bf16 %v6574_v46, %v6573_v43 }
0x2177   :  { %9662 = vmatprep.subr.bf16.mxu0 %v9661_v50 }
0x2178   :  { %v9150_v11 = vpop.f32.mrb[88].mxu1  ;;  %9664 = vmatpush3.bf16.msra.mxu0 %v9661_v50 }
0x2179   :  { %v6799_v13 = vpop.f32.mrb[89].mxu1 }
0x217c   :  { %v9153_v0 = vpop.f32.mrb[90].mxu1 }
0x217d   :  { %v6809_v55 = vpop.f32.mrb[91].mxu1 }
0x2180   :  { %v9156_v51 = vpop.f32.mrb[92].mxu1 }
0x2181   :  { %v6819_v24 = vpop.f32.mrb[93].mxu1 }
0x223a   :  { %v12567_v25 = vpop.f32.mrb[74].mxu0 }
0x223b   :  { %v12570_v7 = vadd.f32 %v9147_v19, %v12567_v25  ;;  %v12572_v4 = vpop.f32.mrb[75].mxu0  ;;  %v6576_v19 = vld [vmem:[%s12777_s2 + $0x240] sm:$0xff] }
0x223c   :  { %v12575_v18 = vadd.f32 %v6789_v15, %v12572_v4 }
0x223d   :  { %v7978_v48 = vmul.f32 -1.442695, %v12570_v7 }
0x223e   :  { %v7977_v23 = vmul.f32 -1.442695, %v12575_v18  ;;  %v12579_v8 = vpop.f32.mrb[76].mxu0 }
0x223f   :  { %10247 = vpow2.f32 %v7978_v48  ;;  %v12582_v53 = vadd.f32 %v9150_v11, %v12579_v8  ;;  %v12584_v26 = vpop.f32.mrb[77].mxu0  ;;  %v9665_v11 = vpack.c.bf16 %v6576_v19, %v6575_v49  ;;  %v7985_v49 = vld [vmem:[%s12777_s2 + $0x2c8] ss:$0 sm:$0xff] }
0x2240   :  { %10249 = vpow2.f32 %v7977_v23  ;;  %v12587_v32 = vadd.f32 %v6799_v13, %v12584_v26 }
0x2241   :  { %v7980_v20 = vmul.f32 -1.442695, %v12582_v53  ;;  %9666 = vmatprep.subr.bf16.mxu0 %v9665_v11 }
0x2242   :  { %v7979_v54 = vmul.f32 -1.442695, %v12587_v32  ;;  %v12591_v17 = vpop.f32.mrb[78].mxu0  ;;  %9668 = vmatpush3.bf16.msra.mxu0 %v9665_v11 }
0x2243   :  { %10251 = vpow2.f32 %v7980_v20  ;;  %v12594_v36 = vadd.f32 %v9153_v0, %v12591_v17  ;;  %v12596_v14 = vpop.f32.mrb[79].mxu0 }
0x2244   :  { %10253 = vpow2.f32 %v7979_v54  ;;  %v12599_v60 = vadd.f32 %v6809_v55, %v12596_v14 }
0x2245   :  { %v7982_v22 = vmul.f32 -1.442695, %v12594_v36 }
0x2246   :  { %v7981_v3 = vmul.f32 -1.442695, %v12599_v60 }
0x2247   :  { %10255 = vpow2.f32 %v7982_v22 }
0x2248   :  { %10257 = vpow2.f32 %v7981_v3  ;;  %v12603_v10 = vpop.f32.mrb[80].mxu0 }
0x2249   :  { %v10248_v57 = vpop.eup %10247  ;;  %v12606_v33 = vadd.f32 %v9156_v51, %v12603_v10  ;;  %v12608_v52 = vpop.f32.mrb[81].mxu0 }
0x224a   :  { %v10250_v28 = vpop.eup %10249  ;;  %v6861_v12 = vadd.f32 1.0, %v10248_v57  ;;  %v12611_v62 = vadd.f32 %v6819_v24, %v12608_v52 }
0x224b   :  { %v6860_v29 = vadd.f32 1.0, %v10250_v28  ;;  %v7984_v27 = vmul.f32 -1.442695, %v12606_v33 }
0x224c   :  { %10259 = vrcp.f32 %v6861_v12  ;;  %v7983_v1 = vmul.f32 -1.442695, %v12611_v62 }
0x224d   :  { %v10252_v31 = vpop.eup %10251  ;;  %10261 = vrcp.f32 %v6860_v29 }
0x224e   :  { %v10254_v21 = vpop.eup %10253  ;;  %v6863_v42 = vadd.f32 1.0, %v10252_v31  ;;  %10263 = vpow2.f32 %v7984_v27 }
0x224f   :  { %v6862_v61 = vadd.f32 1.0, %v10254_v21  ;;  %10265 = vpow2.f32 %v7983_v1 }
0x2250   :  { %10267 = vrcp.f32 %v6863_v42 }
0x2251   :  { %v10256_v44 = vpop.eup %10255  ;;  %10269 = vrcp.f32 %v6862_v61 }
0x2252   :  { %v10258_v45 = vpop.eup %10257  ;;  %v6865_v30 = vadd.f32 1.0, %v10256_v44 }
0x2253   :  { %v6864_v6 = vadd.f32 1.0, %v10258_v45 }
0x2254   :  { %10271 = vrcp.f32 %v6865_v30 }
0x2255   :  { %10273 = vrcp.f32 %v6864_v6 }
0x2256   :  { %v10260_v16 = vpop.eup %10259 }
0x2257   :  { %v10262_v47 = vpop.eup %10261  ;;  %6958 = vrot.lane.b32.xlu0 %v10260_v16, %s10336_s5 }
0x2258   :  { %v10264_v58 = vpop.eup %10263  ;;  %6956 = vrot.lane.b32.xlu1 %v10262_v47, %s10336_s5 }
0x2259   :  { %v10266_v39 = vpop.eup %10265  ;;  %v6867_v38 = vadd.f32 1.0, %v10264_v58 }
0x225a   :  { %v10268_v35 = vpop.eup %10267  ;;  %v6866_v34 = vadd.f32 1.0, %v10266_v39 }
0x225b   :  { %v10270_v37 = vpop.eup %10269  ;;  %10275 = vrcp.f32 %v6867_v38  ;;  %6962 = vrot.lane.b32.xlu0 %v10268_v35, %s10336_s5 }
0x225c   :  { %10277 = vrcp.f32 %v6866_v34  ;;  %6960 = vrot.lane.b32.xlu1 %v10270_v37, %s10336_s5 }
0x225e   :  { %v10272_v15 = vpop.eup %10271 }
0x225f   :  { %v10274_v13 = vpop.eup %10273  ;;  %6966 = vrot.lane.b32.xlu0 %v10272_v15, %s10336_s5 }
0x2260   :  { %6964 = vrot.lane.b32.xlu1 %v10274_v13, %s10336_s5 }
0x2265   :  { %v10276_v0 = vpop.eup %10275 }
0x2266   :  { %v10278_v55 = vpop.eup %10277  ;;  %6970 = vrot.lane.b32.xlu0 %v10276_v0, %s10336_s5 }
0x2267   :  { %6968 = vrot.lane.b32.xlu1 %v10278_v55, %s10336_s5 }
0x22c9   :  { %v6959_v51 = vpop.permute.xlu0 %6958 }
0x22ca   :  { %v6981_v24 = vmul.f32 %v6959_v51, %v12271_v63  ;;  %v6957_v48 = vpop.permute.xlu1 %6956 }
0x22cb   :  { %v6980_v23 = vmul.f32 %v6957_v48, %v12275_v2 }
0x22cc   :  { %6998 = vrot.lane.b32.xlu0 %v6981_v24, %s10337_s9 }
0x22cd   :  { %v6963_v20 = vpop.permute.xlu0 %6962  ;;  %6996 = vrot.lane.b32.xlu1 %v6980_v23, %s10337_s9 }
0x22ce   :  { %v6983_v54 = vmul.f32 %v6963_v20, %v12279_v40  ;;  %v6961_v22 = vpop.permute.xlu1 %6960 }
0x22cf   :  { %v6982_v3 = vmul.f32 %v6961_v22, %v12283_v56 }
0x22d0   :  { %7002 = vrot.lane.b32.xlu0 %v6983_v54, %s10337_s9 }
0x22d1   :  { %v6967_v57 = vpop.permute.xlu0 %6966  ;;  %7000 = vrot.lane.b32.xlu1 %v6982_v3, %s10337_s9 }
0x22d2   :  { %v6985_v28 = vmul.f32 %v6967_v57, %v12291_v5  ;;  %v6965_v12 = vpop.permute.xlu1 %6964 }
0x22d3   :  { %v6984_v29 = vmul.f32 %v6965_v12, %v12287_v9 }
0x22d4   :  { %7006 = vrot.lane.b32.xlu0 %v6985_v28, %s10337_s9 }
0x22d5   :  { %7004 = vrot.lane.b32.xlu1 %v6984_v29, %s10337_s9 }
0x22d8   :  { %v6971_v27 = vpop.permute.xlu0 %6970 }
0x22d9   :  { %v6987_v1 = vmul.f32 %v6971_v27, %v12299_v59  ;;  %v6969_v31 = vpop.permute.xlu1 %6968 }
0x22da   :  { %v6986_v21 = vmul.f32 %v6969_v31, %v12295_v41 }
0x22db   :  { %7010 = vrot.lane.b32.xlu0 %v6987_v1, %s10337_s9 }
0x22dc   :  { %7008 = vrot.lane.b32.xlu1 %v6986_v21, %s10337_s9 }
0x233e   :  { %v6999_v42 = vpop.permute.xlu0 %6998 }
0x233f   :  { %v6997_v61 = vpop.permute.xlu1 %6996 }
0x2340   :  { %9165 = vmatprep.mubr.msk.f32.mxu0 %vm252_vm1, %v6997_v61 }
0x2341   :  { %9166 = vmatmul.mubr.msk.f32.vlgmr.msra.gmra.mrb[82].mxu0 %vm252_vm1, %v6999_v42 }
0x2342   :  { %v7003_v44 = vpop.permute.xlu0 %7002 }
0x2343   :  { %v7001_v45 = vpop.permute.xlu1 %7000 }
0x2344   :  { %9168 = vmatprep.mubr.msk.f32.mxu0 %vm252_vm1, %v7001_v45 }
0x2345   :  { %9169 = vmatmul.mubr.msk.f32.gmra.mrb[84].mxu0 %vm252_vm1, %v7003_v44 }
0x2346   :  { %v7007_v6 = vpop.permute.xlu0 %7006 }
0x2347   :  { %v7005_v30 = vpop.permute.xlu1 %7004 }
0x2348   :  { %9171 = vmatprep.mubr.msk.f32.mxu0 %vm252_vm1, %v7005_v30 }
0x2349   :  { %9172 = vmatmul.mubr.msk.f32.gmra.mrb[86].mxu0 %vm252_vm1, %v7007_v6 }
0x234d   :  { %v7011_v47 = vpop.permute.xlu0 %7010 }
0x234e   :  { %v7009_v16 = vpop.permute.xlu1 %7008 }
0x234f   :  { %9174 = vmatprep.mubr.msk.f32.mxu0 %vm252_vm1, %v7009_v16 }
0x2350   :  { %9175 = vmatmul.mubr.msk.f32.gmra.mrb[88].mxu0 %vm252_vm1, %v7011_v47 }
0x2414   :  { %v9167_v58 = vpop.f32.mrb[82].mxu0 }
0x2415   :  { %7143 = vrot.lane.b32.xlu0 %v9167_v58, %s10338_s19  ;;  %v7094_v39 = vpop.f32.mrb[83].mxu0 }
0x2416   :  { %7141 = vrot.lane.b32.xlu1 %v7094_v39, %s10338_s19 }
0x2418   :  { %v9170_v38 = vpop.f32.mrb[84].mxu0 }
0x2419   :  { %v7104_v35 = vpop.f32.mrb[85].mxu0 }
0x241c   :  { %v9173_v34 = vpop.f32.mrb[86].mxu0 }
0x241d   :  { %7151 = vrot.lane.b32.xlu0 %v9173_v34, %s10338_s19  ;;  %v7114_v37 = vpop.f32.mrb[87].mxu0 }
0x241e   :  { %7149 = vrot.lane.b32.xlu1 %v7114_v37, %s10338_s19 }
0x2421   :  { %7147 = vrot.lane.b32.xlu0 %v9170_v38, %s10338_s19 }
0x2422   :  { %7145 = vrot.lane.b32.xlu1 %v7104_v35, %s10338_s19 }
0x2423   :  { %v9176_v43 = vpop.f32.mrb[88].mxu0 }
0x2424   :  { %v7124_v46 = vpop.f32.mrb[89].mxu0 }
0x2425   :  { %7155 = vrot.lane.b32.xlu0 %v9176_v43, %s10338_s19 }
0x2426   :  { %7153 = vrot.lane.b32.xlu1 %v7124_v46, %s10338_s19 }
0x242a   :  { %6889 = vrot.lane.b32.xlu1 %v7985_v49, %s10336_s5 }
0x2487   :  { %v7144_v50 = vpop.permute.xlu0 %7143 }
0x2488   :  { %v7166_v19 = vadd.f32 %v12567_v25, %v7144_v50  ;;  %v7142_v15 = vpop.permute.xlu1 %7141 }
0x2489   :  { %v7165_v11 = vadd.f32 %v7142_v15, %v12572_v4 }
0x248a   :  { %10279 = vtanh.f32 %v7166_v19 }
0x248b   :  { %10281 = vtanh.f32 %v7165_v11 }
0x248f   :  { %v7152_v13 = vpop.permute.xlu0 %7151 }
0x2490   :  { %v7170_v0 = vadd.f32 %v12591_v17, %v7152_v13  ;;  %v7150_v55 = vpop.permute.xlu1 %7149 }
0x2491   :  { %v7169_v51 = vadd.f32 %v7150_v55, %v12596_v14 }
0x2492   :  { %10283 = vtanh.f32 %v7170_v0  ;;  %v10339_v0 = vmov 0.0|0.0  }
0x2493   :  { %10285 = vtanh.f32 %v7169_v51  ;;  %v7148_v24 = vpop.permute.xlu0 %7147  ;;  %9669 = vmatprep.subr.bf16.mxu1 %v10339_v0  ;;  %9683 = vmatprep.subr.bf16.mxu0 %v10339_v0 }
0x2494   :  { %v10280_v48 = vpop.eup %10279  ;;  %v7168_v23 = vadd.f32 %v12579_v8, %v7148_v24  ;;  %v7146_v20 = vpop.permute.xlu1 %7145 }
0x2495   :  { %v10282_v54 = vpop.eup %10281  ;;  %v7167_v25 = vadd.f32 %v7146_v20, %v12584_v26  ;;  %7207 = vrot.lane.b32.xlu1 %v10280_v48, %s10337_s9 }
0x2496   :  { %10287 = vtanh.f32 %v7168_v23  ;;  %7205 = vrot.lane.b32.xlu0 %v10282_v54, %s10337_s9 }
0x2497   :  { %10289 = vtanh.f32 %v7167_v25  ;;  %v7156_v4 = vpop.permute.xlu0 %7155 }
0x2498   :  { %v7172_v17 = vadd.f32 %v12603_v10, %v7156_v4  ;;  %v7154_v14 = vpop.permute.xlu1 %7153 }
0x2499   :  { %v7171_v22 = vadd.f32 %v7154_v14, %v12608_v52 }
0x249a   :  { %10291 = vtanh.f32 %v7172_v17 }
0x249b   :  { %10293 = vtanh.f32 %v7171_v22 }
0x249c   :  { %v10284_v3 = vpop.eup %10283  ;;  %v6890_v10 = vpop.permute.xlu1 %6889 }
0x249d   :  { %v10286_v8 = vpop.eup %10285  ;;  %7215 = vrot.lane.b32.xlu1 %v10284_v3, %s10337_s9  ;;  %v6893_v52 = vsub.f32 %v12570_v7, %v6890_v10  ;;  %v6892_v29 = vsub.f32 %v12575_v18, %v6890_v10  ;;  %v6897_v31 = vsub.f32 %v12594_v36, %v6890_v10  ;;  %v6896_v21 = vsub.f32 %v12599_v60, %v6890_v10 }
0x249e   :  { %7213 = vrot.lane.b32.xlu0 %v10286_v8, %s10337_s9  ;;  %v6895_v61 = vsub.f32 %v12582_v53, %v6890_v10  ;;  %v6894_v45 = vsub.f32 %v12587_v32, %v6890_v10  ;;  %v6899_v30 = vsub.f32 %v12606_v33, %v6890_v10  ;;  %v6898_v18 = vsub.f32 %v12611_v62, %v6890_v10 }
0x249f   :  { %v7987_v27 = vmul.f32 -1.442695, %v6893_v52  ;;  %v7986_v1 = vmul.f32 -1.442695, %v6892_v29  ;;  %v7991_v42 = vmul.f32 -1.442695, %v6897_v31 }
0x24a0   :  { %v10288_v26 = vpop.eup %10287  ;;  %v7990_v44 = vmul.f32 -1.442695, %v6896_v21  ;;  %v7989_v7 = vmul.f32 -1.442695, %v6895_v61  ;;  %v7988_v6 = vmul.f32 -1.442695, %v6894_v45 }
0x24a1   :  { %v10290_v57 = vpop.eup %10289  ;;  %7211 = vrot.lane.b32.xlu1 %v10288_v26, %s10337_s9  ;;  %10295 = vpow2.f32 %v7987_v27  ;;  %v7993_v36 = vmul.f32 -1.442695, %v6899_v30  ;;  %v7992_v58 = vmul.f32 -1.442695, %v6898_v18 }
0x24a2   :  { %7209 = vrot.lane.b32.xlu0 %v10290_v57, %s10337_s9  ;;  %10297 = vpow2.f32 %v7986_v1 }
0x24a3   :  { %10299 = vpow2.f32 %v7991_v42 }
0x24a4   :  { %v10292_v28 = vpop.eup %10291  ;;  %10301 = vpow2.f32 %v7990_v44 }
0x24a5   :  { %v10294_v12 = vpop.eup %10293  ;;  %7219 = vrot.lane.b32.xlu1 %v10292_v28, %s10337_s9  ;;  %10303 = vpow2.f32 %v7989_v7 }
0x24a6   :  { %7217 = vrot.lane.b32.xlu0 %v10294_v12, %s10337_s9  ;;  %10305 = vpow2.f32 %v7988_v6 }
0x24a7   :  { %10307 = vpow2.f32 %v7993_v36  ;;  %v12809_v36 = vmov 0.0  }
0x24a8   :  { %10309 = vpow2.f32 %v7992_v58  ;;  %9185 = vmatprep.mubr.msk.f32.mxu1 %vm10340_vm15, %v12809_v36  ;;  %9207 = vmatprep.mubr.msk.f32.mxu0 %vm10340_vm15, %v12809_v36 }
0x24ab   :  { %v10296_v16 = vpop.eup %10295 }
0x24ac   :  { %v10298_v47 = vpop.eup %10297  ;;  %v6925_v60 = vadd.f32 1.0, %v10296_v16 }
0x24ad   :  { %v6924_v39 = vadd.f32 1.0, %v10298_v47  ;;  %v10300_v53 = vpop.eup %10299 }
0x24ae   :  { %10311 = vrcp.f32 %v6925_v60  ;;  %v10302_v32 = vpop.eup %10301  ;;  %v6929_v33 = vadd.f32 1.0, %v10300_v53 }
0x24af   :  { %10313 = vrcp.f32 %v6924_v39  ;;  %v10304_v38 = vpop.eup %10303  ;;  %v6928_v35 = vadd.f32 1.0, %v10302_v32 }
0x24b0   :  { %v10306_v62 = vpop.eup %10305  ;;  %10315 = vrcp.f32 %v6929_v33  ;;  %v6927_v37 = vadd.f32 1.0, %v10304_v38 }
0x24b1   :  { %v10308_v34 = vpop.eup %10307  ;;  %10317 = vrcp.f32 %v6928_v35  ;;  %v6926_v46 = vadd.f32 1.0, %v10306_v62 }
0x24b2   :  { %v10310_v43 = vpop.eup %10309  ;;  %10319 = vrcp.f32 %v6927_v37  ;;  %v6931_v19 = vadd.f32 1.0, %v10308_v34 }
0x24b3   :  { %10321 = vrcp.f32 %v6926_v46  ;;  %v6930_v11 = vadd.f32 1.0, %v10310_v43 }
0x24b4   :  { %10323 = vrcp.f32 %v6931_v19 }
0x24b5   :  { %10325 = vrcp.f32 %v6930_v11 }
0x24b8   :  { %v10312_v49 = vpop.eup %10311 }
0x24b9   :  { %v10314_v50 = vpop.eup %10313  ;;  %v7182_v15 = vsub.f32 1.0, %v10312_v49 }
0x24ba   :  { %v7181_v13 = vsub.f32 1.0, %v10314_v50  ;;  %v10316_v23 = vpop.eup %10315 }
0x24bb   :  { %v7190_v51 = vmul.f32 %v7182_v15, %v12271_v63  ;;  %v10318_v25 = vpop.eup %10317  ;;  %v7186_v14 = vsub.f32 1.0, %v10316_v23 }
0x24bc   :  { %v7189_v20 = vmul.f32 %v7181_v13, %v12275_v2  ;;  %v10320_v22 = vpop.eup %10319  ;;  %v7185_v8 = vsub.f32 1.0, %v10318_v25 }
0x24bd   :  { %v10322_v26 = vpop.eup %10321  ;;  %v7194_v63 = vmul.f32 %v7186_v14, %v12291_v5  ;;  %v7184_v10 = vsub.f32 1.0, %v10320_v22 }
0x24be   :  { %v10324_v52 = vpop.eup %10323  ;;  %v7193_v2 = vmul.f32 %v7185_v8, %v12287_v9  ;;  %v7183_v27 = vsub.f32 1.0, %v10322_v26 }
0x24bf   :  { %v10326_v1 = vpop.eup %10325  ;;  %v7192_v61 = vmul.f32 %v7184_v10, %v12279_v40  ;;  %v7188_v30 = vsub.f32 1.0, %v10324_v52 }
0x24c0   :  { %v7191_v5 = vmul.f32 %v7183_v27, %v12283_v56  ;;  %v7187_v6 = vsub.f32 1.0, %v10326_v1 }
0x24c1   :  { %v7196_v58 = vmul.f32 %v7188_v30, %v12299_v59 }
0x24c2   :  { %v7195_v56 = vmul.f32 %v7187_v6, %v12295_v41  ;;  %v8008_v6 = vld [vmem:[%s12777_s2 + $0x90] ss:$0 sm:$0xff] }
0x2507   :  { %v7208_v55 = vpop.permute.xlu1 %7207 }
0x2508   :  { %v7230_v24 = vmul.f32 %v10312_v49, %v7208_v55  ;;  %v7206_v48 = vpop.permute.xlu0 %7205 }
0x2509   :  { %v7229_v54 = vmul.f32 %v10314_v50, %v7206_v48  ;;  %v7245_v48 = vld [vmem:[%s12777_s2 + $0x58] sm:$0xff] }
0x250a   :  { %v7238_v4 = vadd.f32 %v7230_v24, %v7190_v51 }
0x250b   :  { %v7237_v17 = vadd.f32 %v7229_v54, %v7189_v20 }
0x250d   :  { %v9863_v3 = vpack.i.bf16 %v7238_v4, %v7237_v17 }
0x250f   :  { %9864 = vrot.lane.b32.xlu0 %v9863_v3, %s10337_s9  ;;  %v7216_v57 = vpop.permute.xlu1 %7215 }
0x2510   :  { %v7234_v28 = vmul.f32 %v10316_v23, %v7216_v57  ;;  %v7214_v12 = vpop.permute.xlu0 %7213 }
0x2511   :  { %v7233_v29 = vmul.f32 %v10318_v25, %v7214_v12 }
0x2512   :  { %v7242_v31 = vadd.f32 %v7234_v28, %v7194_v63 }
0x2513   :  { %v7241_v21 = vadd.f32 %v7233_v29, %v7193_v2  ;;  %v7212_v42 = vpop.permute.xlu1 %7211  ;;  %v7249_v2 = vld [vmem:[%s12777_s2 + $0x68] sm:$0xff]  ;;  %v7250_v29 = vld [vmem:[%s12777_s2 + $0x70] sm:$0xff] }
0x2514   :  { %v7232_v44 = vmul.f32 %v10320_v22, %v7212_v42  ;;  %v7210_v45 = vpop.permute.xlu0 %7209 }
0x2515   :  { %v9868_v7 = vpack.i.bf16 %v7242_v31, %v7241_v21  ;;  %v7231_v18 = vmul.f32 %v10322_v26, %v7210_v45 }
0x2516   :  { %v7240_v16 = vadd.f32 %v7232_v44, %v7192_v61 }
0x2517   :  { %v7239_v47 = vadd.f32 %v7231_v18, %v7191_v5  ;;  %9869 = vrot.lane.b32.xlu1 %v9868_v7, %s10337_s9  ;;  %v7220_v9 = vpop.permute.xlu1 %7219  ;;  %v8007_v5 = vld [vmem:[%s12777_s2 + $0x88] ss:$0 sm:$0xff] }
0x2518   :  { %v7236_v40 = vmul.f32 %v10324_v52, %v7220_v9  ;;  %v7218_v60 = vpop.permute.xlu0 %7217  ;;  %v7248_v52 = vld [vmem:[%s12777_s2 + $0x60] sm:$0xff] }
0x2519   :  { %v9873_v39 = vpack.i.bf16 %v7240_v16, %v7239_v47  ;;  %v7235_v53 = vmul.f32 %v10326_v1, %v7218_v60  ;;  %v9678_v27 = vpack.c.bf16 %v7249_v2, %v7248_v52  ;;  %v7251_v1 = vld [vmem:[%s12777_s2 + $0x78] sm:$0xff] }
0x251a   :  { %v7244_v32 = vadd.f32 %v7236_v40, %v7196_v58  ;;  %v9681_v31 = vpack.c.bf16 %v7251_v1, %v7250_v29  ;;  %v7254_v1 = vld [vmem:[%s12777_s2 + $0xa8] sm:$0x1] }
0x251b   :  { %v7243_v33 = vadd.f32 %v7235_v53, %v7195_v56  ;;  %9874 = vrot.lane.b32.xlu0 %v9873_v39, %s10337_s9 }
0x251d   :  { %v9878_v38 = vpack.i.bf16 %v7244_v32, %v7243_v33 }
0x251f   :  { %9879 = vrot.lane.b32.xlu1 %v9878_v38, %s10337_s9 }
0x2581   :  { %v9865_v35 = vpop.permute.xlu0 %9864 }
0x2582   :  { %v9867_v62 = vunpack.i.h.bf16 %v9865_v35  ;;  %v9866_v34 = vunpack.i.l.bf16 %v9865_v35 }
0x2584   :  { %v9670_v59 = vpack.c.bf16 %v9867_v62, %v9866_v34 }
0x2586   :  { %9672 = vmatpush3.bf16.xpose.msk.msra.mxu1 %vm10543_vm2, %v9670_v59 }
0x2587   :  { %9673 = vmatprep.subr.bf16.mxu1 %v10339_v0 }
0x2589   :  { %v9870_v43 = vpop.permute.xlu1 %9869 }
0x258a   :  { %v9872_v46 = vunpack.i.h.bf16 %v9870_v43  ;;  %v9871_v41 = vunpack.i.l.bf16 %v9870_v43 }
0x258c   :  { %v9684_v49 = vpack.c.bf16 %v9872_v46, %v9871_v41 }
0x258d   :  { %v9875_v50 = vpop.permute.xlu0 %9874 }
0x258e   :  { %v9877_v19 = vunpack.i.h.bf16 %v9875_v50  ;;  %v9876_v15 = vunpack.i.l.bf16 %v9875_v50  ;;  %9686 = vmatpush3.bf16.xpose.msk.msra.mxu0 %vm10543_vm2, %v9684_v49 }
0x258f   :  { %9687 = vmatprep.subr.bf16.mxu0 %v10339_v0 }
0x2590   :  { %v9674_v11 = vpack.c.bf16 %v9877_v19, %v9876_v15  ;;  %v7252_v19 = vld [vmem:[%s12777_s2 + $0x98] sm:$0x1] }
0x2591   :  { %v9880_v13 = vpop.permute.xlu1 %9879 }
0x2592   :  { %v9882_v55 = vunpack.i.h.bf16 %v9880_v13  ;;  %v9881_v51 = vunpack.i.l.bf16 %v9880_v13  ;;  %9676 = vmatpush3.bf16.xpose.msk.msra.mxu1 %vm10543_vm2, %v9674_v11 }
0x2593   :  { %9677 = vmatprep.subr.bf16.mxu1 %v10339_v0 }
0x2594   :  { %v9688_v24 = vpack.c.bf16 %v9882_v55, %v9881_v51 }
0x2596   :  { %9690 = vmatpush3.bf16.xpose.msk.msra.mxu0 %vm10543_vm2, %v9688_v24 }
0x2599   :  { %9186 = vmatmul.mubr.msk.f32.vlgmr.msra.gmra.mrb[94].mxu1 %vm252_vm1, %v7245_v48 }
0x259a   :  { %9196 = vmatprep.mubr.msk.f32.mxu1 %vm10340_vm15, %v12809_v36  ;;  %9679 = vmatpush3.bf16.msra.mxu1 %v9678_v27 }
0x259b   :  { %9680 = vmatprep.subr.bf16.mxu1 %v10339_v0 }
0x259d   :  { %9208 = vmatmul.mubr.msk.f32.vlgmr.msra.gmra.mrb[90].mxu0 %vm252_vm1, %v7245_v48 }
0x259e   :  { %9682 = vmatpush3.bf16.msra.mxu1 %v9681_v31 }
0x259f   :  { %9691 = vmatprep.subr.bf16.mxu1 %v10339_v0 }
0x266c   :  { %v7344_v23 = vpop.f32.mrb[94].mxu1 }
0x266d   :  { %v9187_v20 = vpop.f32.mrb[95].mxu1  ;;  %v7348_v54 = vsel %vm252_vm1, %v7344_v23, 0.0 }
0x266e   :  { %7349 = vadd.xlane.f32.xlu0 %v7348_v54 }
0x2670   :  { %v7556_v25 = vpop.f32.mrb[90].mxu0 }
0x2671   :  { %v7560_v4 = vsel %vm252_vm1, %v7556_v25, 0.0  ;;  %v9209_v17 = vpop.f32.mrb[91].mxu0 }
0x2672   :  { %7561 = vadd.xlane.f32.xlu1 %v7560_v4 }
0x26fb   :  { %v7350_v14 = vpop.xlane.xlu0 %7349 }
0x26fc   :  { %v7351_v22 = vmul.f32 0.03125, %v7350_v14 }
0x26fe   :  { %v7352_v3 = vsub.f32 %v7344_v23, %v7351_v22 }
0x26ff   :  { %v7562_v8 = vpop.xlane.xlu1 %7561 }
0x2700   :  { %v7563_v26 = vmul.f32 0.03125, %v7562_v8  ;;  %v7353_v57 = vmul.f32 %v7352_v3, %v7352_v3 }
0x2702   :  { %v7564_v63 = vsub.f32 %v7556_v25, %v7563_v26  ;;  %v7354_v28 = vsel %vm252_vm1, %v7353_v57, 0.0  ;;  %v7253_v26 = vld [vmem:[%s12777_s2 + $0xa0] sm:$0x1] }
0x2703   :  { %7355 = vadd.xlane.f32.xlu0 %v7354_v28 }
0x2704   :  { %v7565_v12 = vmul.f32 %v7564_v63, %v7564_v63 }
0x2706   :  { %v7566_v10 = vsel %vm252_vm1, %v7565_v12, 0.0 }
0x2707   :  { %7567 = vadd.xlane.f32.xlu0 %v7566_v10 }
0x2790   :  { %v7356_v21 = vpop.xlane.xlu0 %7355 }
0x2791   :  { %v7357_v42 = vmul.f32 0.03125, %v7356_v21 }
0x2793   :  { %v7358_v61 = vadd.f32 1e-05, %v7357_v42 }
0x2794   :  { %v7568_v44 = vpop.xlane.xlu0 %7567 }
0x2795   :  { %10327 = vrsqrt.f32 %v7358_v61  ;;  %v7569_v45 = vmul.f32 0.03125, %v7568_v44 }
0x2797   :  { %v7570_v30 = vadd.f32 1e-05, %v7569_v45 }
0x2799   :  { %10329 = vrsqrt.f32 %v7570_v30 }
0x279f   :  { %v10328_v7 = vpop.eup %10327 }
0x27a0   :  { %v7360_v18 = vmul.f32 %v10328_v7, %v7352_v3 }
0x27a2   :  { %v7365_v16 = vmul.f32 %v8007_v5, %v7360_v18 }
0x27a3   :  { %v10330_v47 = vpop.eup %10329 }
0x27a4   :  { %v7370_v9 = vadd.f32 %v8008_v6, %v7365_v16  ;;  %v7572_v58 = vmul.f32 %v10330_v47, %v7564_v63 }
0x27a6   :  { %v7573_v40 = vmul.f32 %v8007_v5, %v7572_v58  ;;  %v7371_v60 = vsel %vm252_vm1, %v7370_v9, 0.0 }
0x27a7   :  { %v7372_v39 = vrot.slane %v7371_v60, 4 }
0x27a8   :  { %v7574_v56 = vadd.f32 %v8008_v6, %v7573_v40 }
0x27a9   :  { %v7373_v53 = vadd.f32 %v7372_v39, %v7371_v60 }
0x27aa   :  { %v7575_v32 = vsel %vm252_vm1, %v7574_v56, 0.0 }
0x27ab   :  { %v7374_v33 = vrot.slane %v7373_v53, 2  ;;  %v7576_v38 = vrot.slane %v7575_v32, 4 }
0x27ad   :  { %v7375_v35 = vadd.f32 %v7374_v33, %v7373_v53  ;;  %v7577_v62 = vadd.f32 %v7576_v38, %v7575_v32 }
0x27af   :  { %v7376_v34 = vrot.slane %v7375_v35, 1  ;;  %v7578_v59 = vrot.slane %v7577_v62, 2 }
0x27b1   :  { %v7377_v37 = vadd.f32 %v7376_v34, %v7375_v35  ;;  %v7579_v43 = vadd.f32 %v7578_v59, %v7577_v62 }
0x27b3   :  { %v7379_v46 = vmul.f32 0.125, %v7377_v37  ;;  %v7580_v41 = vrot.slane %v7579_v43, 1 }
0x27b5   :  { %9197 = vmatmul.mubr.msk.f32.vlgmr.msra.gmra.mrb[96].mxu1 %vm252_vm1, %v7379_v46  ;;  %v7581_v49 = vadd.f32 %v7580_v41, %v7579_v43 }
0x27b6   :  { %9693 = vmatpush3.bf16.msra.mxu1 %v9678_v27  ;;  %9218 = vmatprep.mubr.msk.f32.mxu1 %vm10340_vm15, %v12809_v36 }
0x27b7   :  { %9694 = vmatprep.subr.bf16.mxu1 %v10339_v0  ;;  %v7582_v50 = vmul.f32 0.125, %v7581_v49 }
0x27ba   :  { %9696 = vmatpush3.bf16.msra.mxu1 %v9681_v31 }
0x27bd   :  { %9219 = vmatmul.mubr.msk.f32.vlgmr.msra.gmra.mrb[98].mxu1 %vm252_vm1, %v7582_v50  ;;  %vm7468_vm1 = vcmask 0  }
0x2888   :  { %v7449_v15 = vpop.f32.mrb[96].mxu1 }
0x2889   :  { %v7450_v11 = vadd.f32 %v7449_v15, %v7252_v19  ;;  %v9198_v13 = vpop.f32.mrb[97].mxu1 }
0x288b   :  { %v7454_v55 = vmul.f32 0.044715, %v7450_v11  ;;  %v7453_v3 = vmul.f32 0.5, %v7450_v11 }
0x288d   :  { %v7455_v51 = vmul.f32 %v7454_v55, %v7450_v11 }
0x288f   :  { %v7456_v24 = vmul.f32 %v7455_v51, %v7450_v11 }
0x2890   :  { %v7652_v48 = vpop.f32.mrb[98].mxu1 }
0x2891   :  { %v7653_v23 = vadd.f32 %v7652_v48, %v7252_v19  ;;  %v9220_v36 = vpop.f32.mrb[99].mxu1  ;;  %v7457_v20 = vadd.f32 %v7456_v24, %v7450_v11 }
0x2893   :  { %v7657_v0 = vmul.f32 0.044715, %v7653_v23  ;;  %v7458_v54 = vmul.f32 0.7978846, %v7457_v20  ;;  %v7656_v10 = vmul.f32 0.5, %v7653_v23 }
0x2895   :  { %v7658_v25 = vmul.f32 %v7657_v0, %v7653_v23  ;;  %10331 = vtanh.f32 %v7458_v54 }
0x2897   :  { %v7659_v4 = vmul.f32 %v7658_v25, %v7653_v23 }
0x2899   :  { %v7660_v17 = vadd.f32 %v7659_v4, %v7653_v23 }
0x289b   :  { %v7661_v14 = vmul.f32 0.7978846, %v7660_v17 }
0x289d   :  { %10333 = vtanh.f32 %v7661_v14 }
0x289f   :  { %v10332_v22 = vpop.eup %10331 }
0x28a0   :  { %v7460_v8 = vadd.f32 1.0, %v10332_v22 }
0x28a2   :  { %v7461_v57 = vmul.f32 %v7460_v8, %v7453_v3 }
0x28a4   :  { %v7462_v63 = vmul.f32 %v7461_v57, %v7253_v26 }
0x28a6   :  { %v7464_v28 = vsel %vm7463_vm0, %v7462_v63, 0.0 }
0x28a7   :  { %v10334_v12 = vpop.eup %10333  ;;  %7465 = vadd.xlane.f32.xlu1 %v7464_v28 }
0x28a8   :  { %v7663_v52 = vadd.f32 1.0, %v10334_v12 }
0x28aa   :  { %v7664_v2 = vmul.f32 %v7663_v52, %v7656_v10 }
0x28ac   :  { %v7665_v29 = vmul.f32 %v7664_v2, %v7253_v26 }
0x28ae   :  { %v7666_v27 = vsel %vm7463_vm0, %v7665_v29, 0.0 }
0x28af   :  { %7667 = vadd.xlane.f32.xlu0 %v7666_v27 }
0x2934   :  { %v7466_v31 = vpop.xlane.xlu1 %7465 }
0x2935   :  { %v7467_v21 = vadd.f32 %v7466_v31, %v7254_v1 }
0x2937   :  { %7469 = vst.msk [vmem:[%s12784_s7] sm:$0x1] %vm7468_vm1, %v7467_v21 }
0x293c   :  { %v7668_v42 = vpop.xlane.xlu0 %7667 }
0x293d   :  { %v7669_v61 = vadd.f32 %v7668_v42, %v7254_v1 }
0x293f   :  { %7670 = vst.msk [vmem:[%s12784_s7 + $0x1] sm:$0x1] %vm7468_vm1, %v7669_v61 }

</bundles_post_ra>
